<compile_context>
chip_gen: v7x
topology: tpu7x:2x2x1
jax: 0.10.0
libtpu: 0.0.40
codegen_flags: <defaults>
</compile_context>

<pallas_src>
import jax
import jax.numpy as jnp
from jax.experimental import pallas as pl
from jax.experimental.pallas import tpu as pltpu


def _vmem():
    return pl.BlockSpec(memory_space=pltpu.MemorySpace.VMEM)


# ---------------- fused Pallas kernel ----------------

def _make_lenet5_kernel(N, C, H, W):
    """Builds the fused LeNet5 forward kernel for an (N, C, H, W) input."""
    assert (C, H, W) == (3, 32, 32), "LeNet5 fc1 (16*5*5) implies a 3x32x32 input"
    K = 5                        # conv kernel size (both convs)
    HW = H * W                   # per-image lane stride
    L = N * HW                   # flat lane count of the input

    # Lane offsets of the 25 conv taps.  Stage-1 activations live on the original
    # (h, w) lane grid; stage-2 (pooled) activations live on the even-(h, w) sub-grid,
    # hence the factor 2 on the conv2 tap / pool2 window offsets.
    taps1 = [kh * W + kw for kh in range(K) for kw in range(K)]
    taps2 = [2 * (kh * W + kw) for kh in range(K) for kw in range(K)]
    pool1 = [0, 1, W, W + 1]
    pool2 = [0, 2, 2 * W, 2 * W + 2]

    M1 = L - max(taps1)          # conv1 output lanes (only valid anchors are read)
    M2 = M1 - max(pool1)         # pool1 output lanes
    M3 = M2 - max(taps2)         # conv2 output lanes
    M4 = M3 - max(pool2)         # pool2 output lanes

    # fc1 gather: pooled feature (pp, pq, o2) of image n sits at lane
    # n*HW + 4*W*pp + 4*pq of the stage-2 pooled activation.
    fc_taps = [4 * W * pp + 4 * pq for pp in range(5) for pq in range(5)]
    assert (N - 1) * HW + max(fc_taps) < M4

    def kernel(x_ref, w1_ref, b1_ref, w2_ref, b2_ref,
               fw1_ref, fb1_ref, fw2_ref, fb2_ref, fw3_ref, fb3_ref, o_ref):
        f32 = jnp.float32

        def conv(act, w, n_in, taps, m):
            # z = sum_t  W_t(O, n_in) @ act[:, s_t : s_t + m]  — unit-stride lane slices.
            z = jnp.zeros((w.shape[0], m), f32)
            for i, s in enumerate(taps):
                z = z + jnp.dot(w[:, n_in * i:n_in * (i + 1)], act[:, s:s + m],
                                preferred_element_type=f32)
            return z

        def pool_bias_relu(z, b, offs, m):
            # relu(max_q z + b) == maxpool(relu(conv + b))
            h = z[:, 0:m]
            for s in offs[1:]:
                h = jnp.maximum(h, z[:, s:s + m])
            return jnp.maximum(h + b, 0.0)

        x = x_ref[...]                                                   # (C, L)
        z1 = conv(x, w1_ref[...], C, taps1, M1)                          # (6, M1)
        h1 = pool_bias_relu(z1, b1_ref[...], pool1, M2)                  # (6, M2)
        z2 = conv(h1, w2_ref[...], 6, taps2, M3)                         # (16, M3)
        h2 = pool_bias_relu(z2, b2_ref[...], pool2, M4)                  # (16, M4)

        # Gather the N pooled 16x5x5 maps into a (400, N) matrix (features on sublanes,
        # batch on lanes).  Per-image columns use sublane-aligned concats (16-row
        # pieces); columns are merged with an iota select (no unaligned lane concat).
        n_feat = 16 * len(fc_taps)
        col = jax.lax.broadcasted_iota(jnp.int32, (n_feat, N), 1)
        feats = jnp.zeros((n_feat, N), f32)
        for n in range(N):
            base = n * HW
            f_n = jnp.concatenate(
                [h2[:, base + a:base + a + 1] for a in fc_taps], axis=0)  # (400, 1)
            feats = jnp.where(col == n, f_n, feats)

        # fc1 -> ReLU -> fc2 -> ReLU -> fc3 -> log-softmax (classes on sublanes).
        h = jnp.maximum(jnp.dot(fw1_ref[...], feats, preferred_element_type=f32)
                        + fb1_ref[...], 0.0)                              # (120, N)
        h = jnp.maximum(jnp.dot(fw2_ref[...], h, preferred_element_type=f32)
                        + fb2_ref[...], 0.0)                              # (84, N)
        z = jnp.dot(fw3_ref[...], h, preferred_element_type=f32) + fb3_ref[...]  # (10, N)

        m = jnp.max(z, axis=0, keepdims=True)
        lse = m + jnp.log(jnp.sum(jnp.exp(z - m), axis=0, keepdims=True))
        o_ref[...] = z - lse                                              # (10, N)

    return kernel


# ---------------- model ----------------

def init_params(key):
    ks = jax.random.split(key, 10)

    def w(k, shape, fan_in):
        return jax.random.normal(k, shape, jnp.float32) / jnp.sqrt(float(fan_in))

    return {
        "conv1_w": w(ks[0], (6, 3, 5, 5), 3 * 25),
        "conv1_b": w(ks[1], (6,), 3 * 25),
        "conv2_w": w(ks[2], (16, 6, 5, 5), 6 * 25),
        "conv2_b": w(ks[3], (16,), 6 * 25),
        "fc1_w": w(ks[4], (120, 16 * 5 * 5), 16 * 5 * 5),
        "fc1_b": w(ks[5], (120,), 16 * 5 * 5),
        "fc2_w": w(ks[6], (84, 120), 120),
        "fc2_b": w(ks[7], (84,), 120),
        "fc3_w": w(ks[8], (10, 84), 84),
        "fc3_b": w(ks[9], (10,), 84),
    }


def prepare_params(p):
    # One-time host-side re-layouts (outside jit):
    #   * conv weights -> (O, 25*Cin) with column order (kh, kw, c) (tap-major blocks)
    #   * fc1 columns permuted from torch.flatten order (o2, pp, pq) to the kernel's
    #     gather order (pp, pq, o2)
    #   * FC stack runs as W(out,in) @ h(in,N): fc weights stay in PyTorch (out,in) form
    #   * biases -> (out, 1) columns (broadcast along lanes inside the kernel)
    def conv_mat(w):
        return w.transpose(0, 2, 3, 1).reshape(w.shape[0], -1)

    return {
        "conv1_wm": conv_mat(p["conv1_w"]), "conv1_b": p["conv1_b"].reshape(6, 1),
        "conv2_wm": conv_mat(p["conv2_w"]), "conv2_b": p["conv2_b"].reshape(16, 1),
        "fc1_wm": p["fc1_w"].reshape(120, 16, 5, 5).transpose(0, 2, 3, 1).reshape(120, 400),
        "fc1_b": p["fc1_b"].reshape(120, 1),
        "fc2_wm": p["fc2_w"], "fc2_b": p["fc2_b"].reshape(84, 1),
        "fc3_wm": p["fc3_w"], "fc3_b": p["fc3_b"].reshape(10, 1),
    }


def lenet5_forward(kp, x):
    # x: (N, 3, 32, 32) float32 NCHW (same as the PyTorch module)
    N, C, H, W = x.shape
    xf = x.transpose(1, 0, 2, 3).reshape(C, N * H * W)   # channel-major flat-lane copy
    out = pl.pallas_call(
        _make_lenet5_kernel(N, C, H, W),
        out_shape=jax.ShapeDtypeStruct((10, N), jnp.float32),
        in_specs=[_vmem()] * 11,
        out_specs=_vmem(),
    )(xf, kp["conv1_wm"], kp["conv1_b"], kp["conv2_wm"], kp["conv2_b"],
      kp["fc1_wm"], kp["fc1_b"], kp["fc2_wm"], kp["fc2_b"], kp["fc3_wm"], kp["fc3_b"])
    return out.T                                          # (N, 10) log-probs


# ---------------- plain-JAX reference (correctness check only) ----------------

def _reference_forward(params, x):
    def conv(x, w, b):
        O, C, k, _ = w.shape
        N, _, H, W = x.shape
        OH, OW = H - k + 1, W - k + 1
        y = jnp.zeros((N, O, OH, OW), jnp.float32) + b[None, :, None, None]
        for kh in range(k):
            for kw in range(k):
                y = y + jnp.einsum("oc,nchw->nohw", w[:, :, kh, kw],
                                   x[:, :, kh:kh + OH, kw:kw + OW])
        return y

    def pool(x):
        return jnp.maximum(jnp.maximum(x[:, :, 0::2, 0::2], x[:, :, 0::2, 1::2]),
                           jnp.maximum(x[:, :, 1::2, 0::2], x[:, :, 1::2, 1::2]))

    h = pool(jax.nn.relu(conv(x, params["conv1_w"], params["conv1_b"])))
    h = pool(jax.nn.relu(conv(h, params["conv2_w"], params["conv2_b"])))
    h = h.reshape(h.shape[0], -1)
    h = jax.nn.relu(h @ params["fc1_w"].T + params["fc1_b"])
    h = jax.nn.relu(h @ params["fc2_w"].T + params["fc2_b"])
    z = h @ params["fc3_w"].T + params["fc3_b"]
    return jax.nn.log_softmax(z, axis=1)


if __name__ == "__main__":
    key = jax.random.PRNGKey(0)
    kparams, kx = jax.random.split(key)
    params = init_params(kparams)
    kp = prepare_params(params)

    # LeNet5's fc1 (16*5*5 features) implies 3x32x32 spatial input; batch = 2.
    x = jax.random.normal(kx, (2, 3, 32, 32), jnp.float32)

    out = jax.block_until_ready(jax.jit(lenet5_forward)(kp, x))
    assert out.shape == (2, 10)

    ref = jax.block_until_ready(_reference_forward(params, x))
    assert jnp.allclose(out, ref, atol=1e-4, rtol=1e-4)

    print("KERNEL_OK")
</pallas_src>

<mosaic_0001>
module attributes {stable_mosaic.version = 11 : i64} {
  func.func @kernel(%arg0: memref<3x2048xf32, #tpu.memory_space<vmem>>, %arg1: memref<6x75xf32, #tpu.memory_space<vmem>>, %arg2: memref<6x1xf32, #tpu.memory_space<vmem>>, %arg3: memref<16x150xf32, #tpu.memory_space<vmem>>, %arg4: memref<16x1xf32, #tpu.memory_space<vmem>>, %arg5: memref<120x400xf32, #tpu.memory_space<vmem>>, %arg6: memref<120x1xf32, #tpu.memory_space<vmem>>, %arg7: memref<84x120xf32, #tpu.memory_space<vmem>>, %arg8: memref<84x1xf32, #tpu.memory_space<vmem>>, %arg9: memref<10x84xf32, #tpu.memory_space<vmem>>, %arg10: memref<10x1xf32, #tpu.memory_space<vmem>>, %arg11: memref<10x2xf32, #tpu.memory_space<vmem>>) attributes {dimension_semantics = [], scalar_prefetch = 0 : i64, scratch_operands = 0 : i64, tpu.core_type = #tpu.core_type<tc>} {
    %c0 = arith.constant 0 : index
    %c0_0 = arith.constant 0 : index
    %0 = vector.load %arg0[%c0, %c0_0] : memref<3x2048xf32, #tpu.memory_space<vmem>>, vector<3x2048xf32>
    %c0_1 = arith.constant 0 : index
    %c0_2 = arith.constant 0 : index
    %1 = vector.load %arg1[%c0_1, %c0_2] : memref<6x75xf32, #tpu.memory_space<vmem>>, vector<6x75xf32>
    %cst = arith.constant 0.000000e+00 : f32
    %2 = vector.broadcast %cst : f32 to vector<6x1916xf32>
    %3 = vector.extract_strided_slice %1 {offsets = [0, 0], sizes = [6, 3], strides = [1, 1]} : vector<6x75xf32> to vector<6x3xf32>
    %4 = vector.extract_strided_slice %0 {offsets = [0, 0], sizes = [3, 1916], strides = [1, 1]} : vector<3x2048xf32> to vector<3x1916xf32>
    %cst_3 = arith.constant dense<0.000000e+00> : vector<6x1916xf32>
    %5 = tpu.matmul %3, %4, %cst_3 {dimension_numbers = #tpu.dot_dimension_numbers<[1], [0], [0], [1], [0, 0, 1, 1], [], []>} : vector<6x3xf32>, vector<3x1916xf32>, vector<6x1916xf32> -> vector<6x1916xf32>
    %6 = arith.addf %2, %5 : vector<6x1916xf32>
    %7 = vector.extract_strided_slice %1 {offsets = [0, 3], sizes = [6, 3], strides = [1, 1]} : vector<6x75xf32> to vector<6x3xf32>
    %8 = vector.extract_strided_slice %0 {offsets = [0, 1], sizes = [3, 1916], strides = [1, 1]} : vector<3x2048xf32> to vector<3x1916xf32>
    %cst_4 = arith.constant dense<0.000000e+00> : vector<6x1916xf32>
    %9 = tpu.matmul %7, %8, %cst_4 {dimension_numbers = #tpu.dot_dimension_numbers<[1], [0], [0], [1], [0, 0, 1, 1], [], []>} : vector<6x3xf32>, vector<3x1916xf32>, vector<6x1916xf32> -> vector<6x1916xf32>
    %10 = arith.addf %6, %9 : vector<6x1916xf32>
    %11 = vector.extract_strided_slice %1 {offsets = [0, 6], sizes = [6, 3], strides = [1, 1]} : vector<6x75xf32> to vector<6x3xf32>
    %12 = vector.extract_strided_slice %0 {offsets = [0, 2], sizes = [3, 1916], strides = [1, 1]} : vector<3x2048xf32> to vector<3x1916xf32>
    %cst_5 = arith.constant dense<0.000000e+00> : vector<6x1916xf32>
    %13 = tpu.matmul %11, %12, %cst_5 {dimension_numbers = #tpu.dot_dimension_numbers<[1], [0], [0], [1], [0, 0, 1, 1], [], []>} : vector<6x3xf32>, vector<3x1916xf32>, vector<6x1916xf32> -> vector<6x1916xf32>
    %14 = arith.addf %10, %13 : vector<6x1916xf32>
    %15 = vector.extract_strided_slice %1 {offsets = [0, 9], sizes = [6, 3], strides = [1, 1]} : vector<6x75xf32> to vector<6x3xf32>
    %16 = vector.extract_strided_slice %0 {offsets = [0, 3], sizes = [3, 1916], strides = [1, 1]} : vector<3x2048xf32> to vector<3x1916xf32>
    %cst_6 = arith.constant dense<0.000000e+00> : vector<6x1916xf32>
    %17 = tpu.matmul %15, %16, %cst_6 {dimension_numbers = #tpu.dot_dimension_numbers<[1], [0], [0], [1], [0, 0, 1, 1], [], []>} : vector<6x3xf32>, vector<3x1916xf32>, vector<6x1916xf32> -> vector<6x1916xf32>
    %18 = arith.addf %14, %17 : vector<6x1916xf32>
    %19 = vector.extract_strided_slice %1 {offsets = [0, 12], sizes = [6, 3], strides = [1, 1]} : vector<6x75xf32> to vector<6x3xf32>
    %20 = vector.extract_strided_slice %0 {offsets = [0, 4], sizes = [3, 1916], strides = [1, 1]} : vector<3x2048xf32> to vector<3x1916xf32>
    %cst_7 = arith.constant dense<0.000000e+00> : vector<6x1916xf32>
    %21 = tpu.matmul %19, %20, %cst_7 {dimension_numbers = #tpu.dot_dimension_numbers<[1], [0], [0], [1], [0, 0, 1, 1], [], []>} : vector<6x3xf32>, vector<3x1916xf32>, vector<6x1916xf32> -> vector<6x1916xf32>
    %22 = arith.addf %18, %21 : vector<6x1916xf32>
    %23 = vector.extract_strided_slice %1 {offsets = [0, 15], sizes = [6, 3], strides = [1, 1]} : vector<6x75xf32> to vector<6x3xf32>
    %24 = vector.extract_strided_slice %0 {offsets = [0, 32], sizes = [3, 1916], strides = [1, 1]} : vector<3x2048xf32> to vector<3x1916xf32>
    %cst_8 = arith.constant dense<0.000000e+00> : vector<6x1916xf32>
    %25 = tpu.matmul %23, %24, %cst_8 {dimension_numbers = #tpu.dot_dimension_numbers<[1], [0], [0], [1], [0, 0, 1, 1], [], []>} : vector<6x3xf32>, vector<3x1916xf32>, vector<6x1916xf32> -> vector<6x1916xf32>
    %26 = arith.addf %22, %25 : vector<6x1916xf32>
    %27 = vector.extract_strided_slice %1 {offsets = [0, 18], sizes = [6, 3], strides = [1, 1]} : vector<6x75xf32> to vector<6x3xf32>
    %28 = vector.extract_strided_slice %0 {offsets = [0, 33], sizes = [3, 1916], strides = [1, 1]} : vector<3x2048xf32> to vector<3x1916xf32>
    %cst_9 = arith.constant dense<0.000000e+00> : vector<6x1916xf32>
    %29 = tpu.matmul %27, %28, %cst_9 {dimension_numbers = #tpu.dot_dimension_numbers<[1], [0], [0], [1], [0, 0, 1, 1], [], []>} : vector<6x3xf32>, vector<3x1916xf32>, vector<6x1916xf32> -> vector<6x1916xf32>
    %30 = arith.addf %26, %29 : vector<6x1916xf32>
    %31 = vector.extract_strided_slice %1 {offsets = [0, 21], sizes = [6, 3], strides = [1, 1]} : vector<6x75xf32> to vector<6x3xf32>
    %32 = vector.extract_strided_slice %0 {offsets = [0, 34], sizes = [3, 1916], strides = [1, 1]} : vector<3x2048xf32> to vector<3x1916xf32>
    %cst_10 = arith.constant dense<0.000000e+00> : vector<6x1916xf32>
    %33 = tpu.matmul %31, %32, %cst_10 {dimension_numbers = #tpu.dot_dimension_numbers<[1], [0], [0], [1], [0, 0, 1, 1], [], []>} : vector<6x3xf32>, vector<3x1916xf32>, vector<6x1916xf32> -> vector<6x1916xf32>
    %34 = arith.addf %30, %33 : vector<6x1916xf32>
    %35 = vector.extract_strided_slice %1 {offsets = [0, 24], sizes = [6, 3], strides = [1, 1]} : vector<6x75xf32> to vector<6x3xf32>
    %36 = vector.extract_strided_slice %0 {offsets = [0, 35], sizes = [3, 1916], strides = [1, 1]} : vector<3x2048xf32> to vector<3x1916xf32>
    %cst_11 = arith.constant dense<0.000000e+00> : vector<6x1916xf32>
    %37 = tpu.matmul %35, %36, %cst_11 {dimension_numbers = #tpu.dot_dimension_numbers<[1], [0], [0], [1], [0, 0, 1, 1], [], []>} : vector<6x3xf32>, vector<3x1916xf32>, vector<6x1916xf32> -> vector<6x1916xf32>
    %38 = arith.addf %34, %37 : vector<6x1916xf32>
    %39 = vector.extract_strided_slice %1 {offsets = [0, 27], sizes = [6, 3], strides = [1, 1]} : vector<6x75xf32> to vector<6x3xf32>
    %40 = vector.extract_strided_slice %0 {offsets = [0, 36], sizes = [3, 1916], strides = [1, 1]} : vector<3x2048xf32> to vector<3x1916xf32>
    %cst_12 = arith.constant dense<0.000000e+00> : vector<6x1916xf32>
    %41 = tpu.matmul %39, %40, %cst_12 {dimension_numbers = #tpu.dot_dimension_numbers<[1], [0], [0], [1], [0, 0, 1, 1], [], []>} : vector<6x3xf32>, vector<3x1916xf32>, vector<6x1916xf32> -> vector<6x1916xf32>
    %42 = arith.addf %38, %41 : vector<6x1916xf32>
    %43 = vector.extract_strided_slice %1 {offsets = [0, 30], sizes = [6, 3], strides = [1, 1]} : vector<6x75xf32> to vector<6x3xf32>
    %44 = vector.extract_strided_slice %0 {offsets = [0, 64], sizes = [3, 1916], strides = [1, 1]} : vector<3x2048xf32> to vector<3x1916xf32>
    %cst_13 = arith.constant dense<0.000000e+00> : vector<6x1916xf32>
    %45 = tpu.matmul %43, %44, %cst_13 {dimension_numbers = #tpu.dot_dimension_numbers<[1], [0], [0], [1], [0, 0, 1, 1], [], []>} : vector<6x3xf32>, vector<3x1916xf32>, vector<6x1916xf32> -> vector<6x1916xf32>
    %46 = arith.addf %42, %45 : vector<6x1916xf32>
    %47 = vector.extract_strided_slice %1 {offsets = [0, 33], sizes = [6, 3], strides = [1, 1]} : vector<6x75xf32> to vector<6x3xf32>
    %48 = vector.extract_strided_slice %0 {offsets = [0, 65], sizes = [3, 1916], strides = [1, 1]} : vector<3x2048xf32> to vector<3x1916xf32>
    %cst_14 = arith.constant dense<0.000000e+00> : vector<6x1916xf32>
    %49 = tpu.matmul %47, %48, %cst_14 {dimension_numbers = #tpu.dot_dimension_numbers<[1], [0], [0], [1], [0, 0, 1, 1], [], []>} : vector<6x3xf32>, vector<3x1916xf32>, vector<6x1916xf32> -> vector<6x1916xf32>
    %50 = arith.addf %46, %49 : vector<6x1916xf32>
    %51 = vector.extract_strided_slice %1 {offsets = [0, 36], sizes = [6, 3], strides = [1, 1]} : vector<6x75xf32> to vector<6x3xf32>
    %52 = vector.extract_strided_slice %0 {offsets = [0, 66], sizes = [3, 1916], strides = [1, 1]} : vector<3x2048xf32> to vector<3x1916xf32>
    %cst_15 = arith.constant dense<0.000000e+00> : vector<6x1916xf32>
    %53 = tpu.matmul %51, %52, %cst_15 {dimension_numbers = #tpu.dot_dimension_numbers<[1], [0], [0], [1], [0, 0, 1, 1], [], []>} : vector<6x3xf32>, vector<3x1916xf32>, vector<6x1916xf32> -> vector<6x1916xf32>
    %54 = arith.addf %50, %53 : vector<6x1916xf32>
    %55 = vector.extract_strided_slice %1 {offsets = [0, 39], sizes = [6, 3], strides = [1, 1]} : vector<6x75xf32> to vector<6x3xf32>
    %56 = vector.extract_strided_slice %0 {offsets = [0, 67], sizes = [3, 1916], strides = [1, 1]} : vector<3x2048xf32> to vector<3x1916xf32>
    %cst_16 = arith.constant dense<0.000000e+00> : vector<6x1916xf32>
    %57 = tpu.matmul %55, %56, %cst_16 {dimension_numbers = #tpu.dot_dimension_numbers<[1], [0], [0], [1], [0, 0, 1, 1], [], []>} : vector<6x3xf32>, vector<3x1916xf32>, vector<6x1916xf32> -> vector<6x1916xf32>
    %58 = arith.addf %54, %57 : vector<6x1916xf32>
    %59 = vector.extract_strided_slice %1 {offsets = [0, 42], sizes = [6, 3], strides = [1, 1]} : vector<6x75xf32> to vector<6x3xf32>
    %60 = vector.extract_strided_slice %0 {offsets = [0, 68], sizes = [3, 1916], strides = [1, 1]} : vector<3x2048xf32> to vector<3x1916xf32>
    %cst_17 = arith.constant dense<0.000000e+00> : vector<6x1916xf32>
    %61 = tpu.matmul %59, %60, %cst_17 {dimension_numbers = #tpu.dot_dimension_numbers<[1], [0], [0], [1], [0, 0, 1, 1], [], []>} : vector<6x3xf32>, vector<3x1916xf32>, vector<6x1916xf32> -> vector<6x1916xf32>
    %62 = arith.addf %58, %61 : vector<6x1916xf32>
    %63 = vector.extract_strided_slice %1 {offsets = [0, 45], sizes = [6, 3], strides = [1, 1]} : vector<6x75xf32> to vector<6x3xf32>
    %64 = vector.extract_strided_slice %0 {offsets = [0, 96], sizes = [3, 1916], strides = [1, 1]} : vector<3x2048xf32> to vector<3x1916xf32>
    %cst_18 = arith.constant dense<0.000000e+00> : vector<6x1916xf32>
    %65 = tpu.matmul %63, %64, %cst_18 {dimension_numbers = #tpu.dot_dimension_numbers<[1], [0], [0], [1], [0, 0, 1, 1], [], []>} : vector<6x3xf32>, vector<3x1916xf32>, vector<6x1916xf32> -> vector<6x1916xf32>
    %66 = arith.addf %62, %65 : vector<6x1916xf32>
    %67 = vector.extract_strided_slice %1 {offsets = [0, 48], sizes = [6, 3], strides = [1, 1]} : vector<6x75xf32> to vector<6x3xf32>
    %68 = vector.extract_strided_slice %0 {offsets = [0, 97], sizes = [3, 1916], strides = [1, 1]} : vector<3x2048xf32> to vector<3x1916xf32>
    %cst_19 = arith.constant dense<0.000000e+00> : vector<6x1916xf32>
    %69 = tpu.matmul %67, %68, %cst_19 {dimension_numbers = #tpu.dot_dimension_numbers<[1], [0], [0], [1], [0, 0, 1, 1], [], []>} : vector<6x3xf32>, vector<3x1916xf32>, vector<6x1916xf32> -> vector<6x1916xf32>
    %70 = arith.addf %66, %69 : vector<6x1916xf32>
    %71 = vector.extract_strided_slice %1 {offsets = [0, 51], sizes = [6, 3], strides = [1, 1]} : vector<6x75xf32> to vector<6x3xf32>
    %72 = vector.extract_strided_slice %0 {offsets = [0, 98], sizes = [3, 1916], strides = [1, 1]} : vector<3x2048xf32> to vector<3x1916xf32>
    %cst_20 = arith.constant dense<0.000000e+00> : vector<6x1916xf32>
    %73 = tpu.matmul %71, %72, %cst_20 {dimension_numbers = #tpu.dot_dimension_numbers<[1], [0], [0], [1], [0, 0, 1, 1], [], []>} : vector<6x3xf32>, vector<3x1916xf32>, vector<6x1916xf32> -> vector<6x1916xf32>
    %74 = arith.addf %70, %73 : vector<6x1916xf32>
    %75 = vector.extract_strided_slice %1 {offsets = [0, 54], sizes = [6, 3], strides = [1, 1]} : vector<6x75xf32> to vector<6x3xf32>
    %76 = vector.extract_strided_slice %0 {offsets = [0, 99], sizes = [3, 1916], strides = [1, 1]} : vector<3x2048xf32> to vector<3x1916xf32>
    %cst_21 = arith.constant dense<0.000000e+00> : vector<6x1916xf32>
    %77 = tpu.matmul %75, %76, %cst_21 {dimension_numbers = #tpu.dot_dimension_numbers<[1], [0], [0], [1], [0, 0, 1, 1], [], []>} : vector<6x3xf32>, vector<3x1916xf32>, vector<6x1916xf32> -> vector<6x1916xf32>
    %78 = arith.addf %74, %77 : vector<6x1916xf32>
    %79 = vector.extract_strided_slice %1 {offsets = [0, 57], sizes = [6, 3], strides = [1, 1]} : vector<6x75xf32> to vector<6x3xf32>
    %80 = vector.extract_strided_slice %0 {offsets = [0, 100], sizes = [3, 1916], strides = [1, 1]} : vector<3x2048xf32> to vector<3x1916xf32>
    %cst_22 = arith.constant dense<0.000000e+00> : vector<6x1916xf32>
    %81 = tpu.matmul %79, %80, %cst_22 {dimension_numbers = #tpu.dot_dimension_numbers<[1], [0], [0], [1], [0, 0, 1, 1], [], []>} : vector<6x3xf32>, vector<3x1916xf32>, vector<6x1916xf32> -> vector<6x1916xf32>
    %82 = arith.addf %78, %81 : vector<6x1916xf32>
    %83 = vector.extract_strided_slice %1 {offsets = [0, 60], sizes = [6, 3], strides = [1, 1]} : vector<6x75xf32> to vector<6x3xf32>
    %84 = vector.extract_strided_slice %0 {offsets = [0, 128], sizes = [3, 1916], strides = [1, 1]} : vector<3x2048xf32> to vector<3x1916xf32>
    %cst_23 = arith.constant dense<0.000000e+00> : vector<6x1916xf32>
    %85 = tpu.matmul %83, %84, %cst_23 {dimension_numbers = #tpu.dot_dimension_numbers<[1], [0], [0], [1], [0, 0, 1, 1], [], []>} : vector<6x3xf32>, vector<3x1916xf32>, vector<6x1916xf32> -> vector<6x1916xf32>
    %86 = arith.addf %82, %85 : vector<6x1916xf32>
    %87 = vector.extract_strided_slice %1 {offsets = [0, 63], sizes = [6, 3], strides = [1, 1]} : vector<6x75xf32> to vector<6x3xf32>
    %88 = vector.extract_strided_slice %0 {offsets = [0, 129], sizes = [3, 1916], strides = [1, 1]} : vector<3x2048xf32> to vector<3x1916xf32>
    %cst_24 = arith.constant dense<0.000000e+00> : vector<6x1916xf32>
    %89 = tpu.matmul %87, %88, %cst_24 {dimension_numbers = #tpu.dot_dimension_numbers<[1], [0], [0], [1], [0, 0, 1, 1], [], []>} : vector<6x3xf32>, vector<3x1916xf32>, vector<6x1916xf32> -> vector<6x1916xf32>
    %90 = arith.addf %86, %89 : vector<6x1916xf32>
    %91 = vector.extract_strided_slice %1 {offsets = [0, 66], sizes = [6, 3], strides = [1, 1]} : vector<6x75xf32> to vector<6x3xf32>
    %92 = vector.extract_strided_slice %0 {offsets = [0, 130], sizes = [3, 1916], strides = [1, 1]} : vector<3x2048xf32> to vector<3x1916xf32>
    %cst_25 = arith.constant dense<0.000000e+00> : vector<6x1916xf32>
    %93 = tpu.matmul %91, %92, %cst_25 {dimension_numbers = #tpu.dot_dimension_numbers<[1], [0], [0], [1], [0, 0, 1, 1], [], []>} : vector<6x3xf32>, vector<3x1916xf32>, vector<6x1916xf32> -> vector<6x1916xf32>
    %94 = arith.addf %90, %93 : vector<6x1916xf32>
    %95 = vector.extract_strided_slice %1 {offsets = [0, 69], sizes = [6, 3], strides = [1, 1]} : vector<6x75xf32> to vector<6x3xf32>
    %96 = vector.extract_strided_slice %0 {offsets = [0, 131], sizes = [3, 1916], strides = [1, 1]} : vector<3x2048xf32> to vector<3x1916xf32>
    %cst_26 = arith.constant dense<0.000000e+00> : vector<6x1916xf32>
    %97 = tpu.matmul %95, %96, %cst_26 {dimension_numbers = #tpu.dot_dimension_numbers<[1], [0], [0], [1], [0, 0, 1, 1], [], []>} : vector<6x3xf32>, vector<3x1916xf32>, vector<6x1916xf32> -> vector<6x1916xf32>
    %98 = arith.addf %94, %97 : vector<6x1916xf32>
    %99 = vector.extract_strided_slice %1 {offsets = [0, 72], sizes = [6, 3], strides = [1, 1]} : vector<6x75xf32> to vector<6x3xf32>
    %100 = vector.extract_strided_slice %0 {offsets = [0, 132], sizes = [3, 1916], strides = [1, 1]} : vector<3x2048xf32> to vector<3x1916xf32>
    %cst_27 = arith.constant dense<0.000000e+00> : vector<6x1916xf32>
    %101 = tpu.matmul %99, %100, %cst_27 {dimension_numbers = #tpu.dot_dimension_numbers<[1], [0], [0], [1], [0, 0, 1, 1], [], []>} : vector<6x3xf32>, vector<3x1916xf32>, vector<6x1916xf32> -> vector<6x1916xf32>
    %102 = arith.addf %98, %101 : vector<6x1916xf32>
    %c0_28 = arith.constant 0 : index
    %c0_29 = arith.constant 0 : index
    %103 = vector.load %arg2[%c0_28, %c0_29] : memref<6x1xf32, #tpu.memory_space<vmem>>, vector<6x1xf32>
    %104 = vector.extract_strided_slice %102 {offsets = [0, 0], sizes = [6, 1883], strides = [1, 1]} : vector<6x1916xf32> to vector<6x1883xf32>
    %105 = vector.extract_strided_slice %102 {offsets = [0, 1], sizes = [6, 1883], strides = [1, 1]} : vector<6x1916xf32> to vector<6x1883xf32>
    %106 = arith.maximumf %104, %105 : vector<6x1883xf32>
    %107 = vector.extract_strided_slice %102 {offsets = [0, 32], sizes = [6, 1883], strides = [1, 1]} : vector<6x1916xf32> to vector<6x1883xf32>
    %108 = arith.maximumf %106, %107 : vector<6x1883xf32>
    %109 = vector.extract_strided_slice %102 {offsets = [0, 33], sizes = [6, 1883], strides = [1, 1]} : vector<6x1916xf32> to vector<6x1883xf32>
    %110 = arith.maximumf %108, %109 : vector<6x1883xf32>
    %111 = vector.broadcast %103 : vector<6x1xf32> to vector<6x1883xf32>
    %112 = arith.addf %110, %111 : vector<6x1883xf32>
    %cst_30 = arith.constant 0.000000e+00 : f32
    %113 = vector.broadcast %cst_30 : f32 to vector<6x1883xf32>
    %114 = arith.maximumf %112, %113 : vector<6x1883xf32>
    %c0_31 = arith.constant 0 : index
    %c0_32 = arith.constant 0 : index
    %115 = vector.load %arg3[%c0_31, %c0_32] : memref<16x150xf32, #tpu.memory_space<vmem>>, vector<16x150xf32>
    %cst_33 = arith.constant 0.000000e+00 : f32
    %116 = vector.broadcast %cst_33 : f32 to vector<16x1619xf32>
    %117 = vector.extract_strided_slice %115 {offsets = [0, 0], sizes = [16, 6], strides = [1, 1]} : vector<16x150xf32> to vector<16x6xf32>
    %118 = vector.extract_strided_slice %114 {offsets = [0, 0], sizes = [6, 1619], strides = [1, 1]} : vector<6x1883xf32> to vector<6x1619xf32>
    %cst_34 = arith.constant dense<0.000000e+00> : vector<16x1619xf32>
    %119 = tpu.matmul %117, %118, %cst_34 {dimension_numbers = #tpu.dot_dimension_numbers<[1], [0], [0], [1], [0, 0, 1, 1], [], []>} : vector<16x6xf32>, vector<6x1619xf32>, vector<16x1619xf32> -> vector<16x1619xf32>
    %120 = arith.addf %116, %119 : vector<16x1619xf32>
    %121 = vector.extract_strided_slice %115 {offsets = [0, 6], sizes = [16, 6], strides = [1, 1]} : vector<16x150xf32> to vector<16x6xf32>
    %122 = vector.extract_strided_slice %114 {offsets = [0, 2], sizes = [6, 1619], strides = [1, 1]} : vector<6x1883xf32> to vector<6x1619xf32>
    %cst_35 = arith.constant dense<0.000000e+00> : vector<16x1619xf32>
    %123 = tpu.matmul %121, %122, %cst_35 {dimension_numbers = #tpu.dot_dimension_numbers<[1], [0], [0], [1], [0, 0, 1, 1], [], []>} : vector<16x6xf32>, vector<6x1619xf32>, vector<16x1619xf32> -> vector<16x1619xf32>
    %124 = arith.addf %120, %123 : vector<16x1619xf32>
    %125 = vector.extract_strided_slice %115 {offsets = [0, 12], sizes = [16, 6], strides = [1, 1]} : vector<16x150xf32> to vector<16x6xf32>
    %126 = vector.extract_strided_slice %114 {offsets = [0, 4], sizes = [6, 1619], strides = [1, 1]} : vector<6x1883xf32> to vector<6x1619xf32>
    %cst_36 = arith.constant dense<0.000000e+00> : vector<16x1619xf32>
    %127 = tpu.matmul %125, %126, %cst_36 {dimension_numbers = #tpu.dot_dimension_numbers<[1], [0], [0], [1], [0, 0, 1, 1], [], []>} : vector<16x6xf32>, vector<6x1619xf32>, vector<16x1619xf32> -> vector<16x1619xf32>
    %128 = arith.addf %124, %127 : vector<16x1619xf32>
    %129 = vector.extract_strided_slice %115 {offsets = [0, 18], sizes = [16, 6], strides = [1, 1]} : vector<16x150xf32> to vector<16x6xf32>
    %130 = vector.extract_strided_slice %114 {offsets = [0, 6], sizes = [6, 1619], strides = [1, 1]} : vector<6x1883xf32> to vector<6x1619xf32>
    %cst_37 = arith.constant dense<0.000000e+00> : vector<16x1619xf32>
    %131 = tpu.matmul %129, %130, %cst_37 {dimension_numbers = #tpu.dot_dimension_numbers<[1], [0], [0], [1], [0, 0, 1, 1], [], []>} : vector<16x6xf32>, vector<6x1619xf32>, vector<16x1619xf32> -> vector<16x1619xf32>
    %132 = arith.addf %128, %131 : vector<16x1619xf32>
    %133 = vector.extract_strided_slice %115 {offsets = [0, 24], sizes = [16, 6], strides = [1, 1]} : vector<16x150xf32> to vector<16x6xf32>
    %134 = vector.extract_strided_slice %114 {offsets = [0, 8], sizes = [6, 1619], strides = [1, 1]} : vector<6x1883xf32> to vector<6x1619xf32>
    %cst_38 = arith.constant dense<0.000000e+00> : vector<16x1619xf32>
    %135 = tpu.matmul %133, %134, %cst_38 {dimension_numbers = #tpu.dot_dimension_numbers<[1], [0], [0], [1], [0, 0, 1, 1], [], []>} : vector<16x6xf32>, vector<6x1619xf32>, vector<16x1619xf32> -> vector<16x1619xf32>
    %136 = arith.addf %132, %135 : vector<16x1619xf32>
    %137 = vector.extract_strided_slice %115 {offsets = [0, 30], sizes = [16, 6], strides = [1, 1]} : vector<16x150xf32> to vector<16x6xf32>
    %138 = vector.extract_strided_slice %114 {offsets = [0, 64], sizes = [6, 1619], strides = [1, 1]} : vector<6x1883xf32> to vector<6x1619xf32>
    %cst_39 = arith.constant dense<0.000000e+00> : vector<16x1619xf32>
    %139 = tpu.matmul %137, %138, %cst_39 {dimension_numbers = #tpu.dot_dimension_numbers<[1], [0], [0], [1], [0, 0, 1, 1], [], []>} : vector<16x6xf32>, vector<6x1619xf32>, vector<16x1619xf32> -> vector<16x1619xf32>
    %140 = arith.addf %136, %139 : vector<16x1619xf32>
    %141 = vector.extract_strided_slice %115 {offsets = [0, 36], sizes = [16, 6], strides = [1, 1]} : vector<16x150xf32> to vector<16x6xf32>
    %142 = vector.extract_strided_slice %114 {offsets = [0, 66], sizes = [6, 1619], strides = [1, 1]} : vector<6x1883xf32> to vector<6x1619xf32>
    %cst_40 = arith.constant dense<0.000000e+00> : vector<16x1619xf32>
    %143 = tpu.matmul %141, %142, %cst_40 {dimension_numbers = #tpu.dot_dimension_numbers<[1], [0], [0], [1], [0, 0, 1, 1], [], []>} : vector<16x6xf32>, vector<6x1619xf32>, vector<16x1619xf32> -> vector<16x1619xf32>
    %144 = arith.addf %140, %143 : vector<16x1619xf32>
    %145 = vector.extract_strided_slice %115 {offsets = [0, 42], sizes = [16, 6], strides = [1, 1]} : vector<16x150xf32> to vector<16x6xf32>
    %146 = vector.extract_strided_slice %114 {offsets = [0, 68], sizes = [6, 1619], strides = [1, 1]} : vector<6x1883xf32> to vector<6x1619xf32>
    %cst_41 = arith.constant dense<0.000000e+00> : vector<16x1619xf32>
    %147 = tpu.matmul %145, %146, %cst_41 {dimension_numbers = #tpu.dot_dimension_numbers<[1], [0], [0], [1], [0, 0, 1, 1], [], []>} : vector<16x6xf32>, vector<6x1619xf32>, vector<16x1619xf32> -> vector<16x1619xf32>
    %148 = arith.addf %144, %147 : vector<16x1619xf32>
    %149 = vector.extract_strided_slice %115 {offsets = [0, 48], sizes = [16, 6], strides = [1, 1]} : vector<16x150xf32> to vector<16x6xf32>
    %150 = vector.extract_strided_slice %114 {offsets = [0, 70], sizes = [6, 1619], strides = [1, 1]} : vector<6x1883xf32> to vector<6x1619xf32>
    %cst_42 = arith.constant dense<0.000000e+00> : vector<16x1619xf32>
    %151 = tpu.matmul %149, %150, %cst_42 {dimension_numbers = #tpu.dot_dimension_numbers<[1], [0], [0], [1], [0, 0, 1, 1], [], []>} : vector<16x6xf32>, vector<6x1619xf32>, vector<16x1619xf32> -> vector<16x1619xf32>
    %152 = arith.addf %148, %151 : vector<16x1619xf32>
    %153 = vector.extract_strided_slice %115 {offsets = [0, 54], sizes = [16, 6], strides = [1, 1]} : vector<16x150xf32> to vector<16x6xf32>
    %154 = vector.extract_strided_slice %114 {offsets = [0, 72], sizes = [6, 1619], strides = [1, 1]} : vector<6x1883xf32> to vector<6x1619xf32>
    %cst_43 = arith.constant dense<0.000000e+00> : vector<16x1619xf32>
    %155 = tpu.matmul %153, %154, %cst_43 {dimension_numbers = #tpu.dot_dimension_numbers<[1], [0], [0], [1], [0, 0, 1, 1], [], []>} : vector<16x6xf32>, vector<6x1619xf32>, vector<16x1619xf32> -> vector<16x1619xf32>
    %156 = arith.addf %152, %155 : vector<16x1619xf32>
    %157 = vector.extract_strided_slice %115 {offsets = [0, 60], sizes = [16, 6], strides = [1, 1]} : vector<16x150xf32> to vector<16x6xf32>
    %158 = vector.extract_strided_slice %114 {offsets = [0, 128], sizes = [6, 1619], strides = [1, 1]} : vector<6x1883xf32> to vector<6x1619xf32>
    %cst_44 = arith.constant dense<0.000000e+00> : vector<16x1619xf32>
    %159 = tpu.matmul %157, %158, %cst_44 {dimension_numbers = #tpu.dot_dimension_numbers<[1], [0], [0], [1], [0, 0, 1, 1], [], []>} : vector<16x6xf32>, vector<6x1619xf32>, vector<16x1619xf32> -> vector<16x1619xf32>
    %160 = arith.addf %156, %159 : vector<16x1619xf32>
    %161 = vector.extract_strided_slice %115 {offsets = [0, 66], sizes = [16, 6], strides = [1, 1]} : vector<16x150xf32> to vector<16x6xf32>
    %162 = vector.extract_strided_slice %114 {offsets = [0, 130], sizes = [6, 1619], strides = [1, 1]} : vector<6x1883xf32> to vector<6x1619xf32>
    %cst_45 = arith.constant dense<0.000000e+00> : vector<16x1619xf32>
    %163 = tpu.matmul %161, %162, %cst_45 {dimension_numbers = #tpu.dot_dimension_numbers<[1], [0], [0], [1], [0, 0, 1, 1], [], []>} : vector<16x6xf32>, vector<6x1619xf32>, vector<16x1619xf32> -> vector<16x1619xf32>
    %164 = arith.addf %160, %163 : vector<16x1619xf32>
    %165 = vector.extract_strided_slice %115 {offsets = [0, 72], sizes = [16, 6], strides = [1, 1]} : vector<16x150xf32> to vector<16x6xf32>
    %166 = vector.extract_strided_slice %114 {offsets = [0, 132], sizes = [6, 1619], strides = [1, 1]} : vector<6x1883xf32> to vector<6x1619xf32>
    %cst_46 = arith.constant dense<0.000000e+00> : vector<16x1619xf32>
    %167 = tpu.matmul %165, %166, %cst_46 {dimension_numbers = #tpu.dot_dimension_numbers<[1], [0], [0], [1], [0, 0, 1, 1], [], []>} : vector<16x6xf32>, vector<6x1619xf32>, vector<16x1619xf32> -> vector<16x1619xf32>
    %168 = arith.addf %164, %167 : vector<16x1619xf32>
    %169 = vector.extract_strided_slice %115 {offsets = [0, 78], sizes = [16, 6], strides = [1, 1]} : vector<16x150xf32> to vector<16x6xf32>
    %170 = vector.extract_strided_slice %114 {offsets = [0, 134], sizes = [6, 1619], strides = [1, 1]} : vector<6x1883xf32> to vector<6x1619xf32>
    %cst_47 = arith.constant dense<0.000000e+00> : vector<16x1619xf32>
    %171 = tpu.matmul %169, %170, %cst_47 {dimension_numbers = #tpu.dot_dimension_numbers<[1], [0], [0], [1], [0, 0, 1, 1], [], []>} : vector<16x6xf32>, vector<6x1619xf32>, vector<16x1619xf32> -> vector<16x1619xf32>
    %172 = arith.addf %168, %171 : vector<16x1619xf32>
    %173 = vector.extract_strided_slice %115 {offsets = [0, 84], sizes = [16, 6], strides = [1, 1]} : vector<16x150xf32> to vector<16x6xf32>
    %174 = vector.extract_strided_slice %114 {offsets = [0, 136], sizes = [6, 1619], strides = [1, 1]} : vector<6x1883xf32> to vector<6x1619xf32>
    %cst_48 = arith.constant dense<0.000000e+00> : vector<16x1619xf32>
    %175 = tpu.matmul %173, %174, %cst_48 {dimension_numbers = #tpu.dot_dimension_numbers<[1], [0], [0], [1], [0, 0, 1, 1], [], []>} : vector<16x6xf32>, vector<6x1619xf32>, vector<16x1619xf32> -> vector<16x1619xf32>
    %176 = arith.addf %172, %175 : vector<16x1619xf32>
    %177 = vector.extract_strided_slice %115 {offsets = [0, 90], sizes = [16, 6], strides = [1, 1]} : vector<16x150xf32> to vector<16x6xf32>
    %178 = vector.extract_strided_slice %114 {offsets = [0, 192], sizes = [6, 1619], strides = [1, 1]} : vector<6x1883xf32> to vector<6x1619xf32>
    %cst_49 = arith.constant dense<0.000000e+00> : vector<16x1619xf32>
    %179 = tpu.matmul %177, %178, %cst_49 {dimension_numbers = #tpu.dot_dimension_numbers<[1], [0], [0], [1], [0, 0, 1, 1], [], []>} : vector<16x6xf32>, vector<6x1619xf32>, vector<16x1619xf32> -> vector<16x1619xf32>
    %180 = arith.addf %176, %179 : vector<16x1619xf32>
    %181 = vector.extract_strided_slice %115 {offsets = [0, 96], sizes = [16, 6], strides = [1, 1]} : vector<16x150xf32> to vector<16x6xf32>
    %182 = vector.extract_strided_slice %114 {offsets = [0, 194], sizes = [6, 1619], strides = [1, 1]} : vector<6x1883xf32> to vector<6x1619xf32>
    %cst_50 = arith.constant dense<0.000000e+00> : vector<16x1619xf32>
    %183 = tpu.matmul %181, %182, %cst_50 {dimension_numbers = #tpu.dot_dimension_numbers<[1], [0], [0], [1], [0, 0, 1, 1], [], []>} : vector<16x6xf32>, vector<6x1619xf32>, vector<16x1619xf32> -> vector<16x1619xf32>
    %184 = arith.addf %180, %183 : vector<16x1619xf32>
    %185 = vector.extract_strided_slice %115 {offsets = [0, 102], sizes = [16, 6], strides = [1, 1]} : vector<16x150xf32> to vector<16x6xf32>
    %186 = vector.extract_strided_slice %114 {offsets = [0, 196], sizes = [6, 1619], strides = [1, 1]} : vector<6x1883xf32> to vector<6x1619xf32>
    %cst_51 = arith.constant dense<0.000000e+00> : vector<16x1619xf32>
    %187 = tpu.matmul %185, %186, %cst_51 {dimension_numbers = #tpu.dot_dimension_numbers<[1], [0], [0], [1], [0, 0, 1, 1], [], []>} : vector<16x6xf32>, vector<6x1619xf32>, vector<16x1619xf32> -> vector<16x1619xf32>
    %188 = arith.addf %184, %187 : vector<16x1619xf32>
    %189 = vector.extract_strided_slice %115 {offsets = [0, 108], sizes = [16, 6], strides = [1, 1]} : vector<16x150xf32> to vector<16x6xf32>
    %190 = vector.extract_strided_slice %114 {offsets = [0, 198], sizes = [6, 1619], strides = [1, 1]} : vector<6x1883xf32> to vector<6x1619xf32>
    %cst_52 = arith.constant dense<0.000000e+00> : vector<16x1619xf32>
    %191 = tpu.matmul %189, %190, %cst_52 {dimension_numbers = #tpu.dot_dimension_numbers<[1], [0], [0], [1], [0, 0, 1, 1], [], []>} : vector<16x6xf32>, vector<6x1619xf32>, vector<16x1619xf32> -> vector<16x1619xf32>
    %192 = arith.addf %188, %191 : vector<16x1619xf32>
    %193 = vector.extract_strided_slice %115 {offsets = [0, 114], sizes = [16, 6], strides = [1, 1]} : vector<16x150xf32> to vector<16x6xf32>
    %194 = vector.extract_strided_slice %114 {offsets = [0, 200], sizes = [6, 1619], strides = [1, 1]} : vector<6x1883xf32> to vector<6x1619xf32>
    %cst_53 = arith.constant dense<0.000000e+00> : vector<16x1619xf32>
    %195 = tpu.matmul %193, %194, %cst_53 {dimension_numbers = #tpu.dot_dimension_numbers<[1], [0], [0], [1], [0, 0, 1, 1], [], []>} : vector<16x6xf32>, vector<6x1619xf32>, vector<16x1619xf32> -> vector<16x1619xf32>
    %196 = arith.addf %192, %195 : vector<16x1619xf32>
    %197 = vector.extract_strided_slice %115 {offsets = [0, 120], sizes = [16, 6], strides = [1, 1]} : vector<16x150xf32> to vector<16x6xf32>
    %198 = vector.extract_strided_slice %114 {offsets = [0, 256], sizes = [6, 1619], strides = [1, 1]} : vector<6x1883xf32> to vector<6x1619xf32>
    %cst_54 = arith.constant dense<0.000000e+00> : vector<16x1619xf32>
    %199 = tpu.matmul %197, %198, %cst_54 {dimension_numbers = #tpu.dot_dimension_numbers<[1], [0], [0], [1], [0, 0, 1, 1], [], []>} : vector<16x6xf32>, vector<6x1619xf32>, vector<16x1619xf32> -> vector<16x1619xf32>
    %200 = arith.addf %196, %199 : vector<16x1619xf32>
    %201 = vector.extract_strided_slice %115 {offsets = [0, 126], sizes = [16, 6], strides = [1, 1]} : vector<16x150xf32> to vector<16x6xf32>
    %202 = vector.extract_strided_slice %114 {offsets = [0, 258], sizes = [6, 1619], strides = [1, 1]} : vector<6x1883xf32> to vector<6x1619xf32>
    %cst_55 = arith.constant dense<0.000000e+00> : vector<16x1619xf32>
    %203 = tpu.matmul %201, %202, %cst_55 {dimension_numbers = #tpu.dot_dimension_numbers<[1], [0], [0], [1], [0, 0, 1, 1], [], []>} : vector<16x6xf32>, vector<6x1619xf32>, vector<16x1619xf32> -> vector<16x1619xf32>
    %204 = arith.addf %200, %203 : vector<16x1619xf32>
    %205 = vector.extract_strided_slice %115 {offsets = [0, 132], sizes = [16, 6], strides = [1, 1]} : vector<16x150xf32> to vector<16x6xf32>
    %206 = vector.extract_strided_slice %114 {offsets = [0, 260], sizes = [6, 1619], strides = [1, 1]} : vector<6x1883xf32> to vector<6x1619xf32>
    %cst_56 = arith.constant dense<0.000000e+00> : vector<16x1619xf32>
    %207 = tpu.matmul %205, %206, %cst_56 {dimension_numbers = #tpu.dot_dimension_numbers<[1], [0], [0], [1], [0, 0, 1, 1], [], []>} : vector<16x6xf32>, vector<6x1619xf32>, vector<16x1619xf32> -> vector<16x1619xf32>
    %208 = arith.addf %204, %207 : vector<16x1619xf32>
    %209 = vector.extract_strided_slice %115 {offsets = [0, 138], sizes = [16, 6], strides = [1, 1]} : vector<16x150xf32> to vector<16x6xf32>
    %210 = vector.extract_strided_slice %114 {offsets = [0, 262], sizes = [6, 1619], strides = [1, 1]} : vector<6x1883xf32> to vector<6x1619xf32>
    %cst_57 = arith.constant dense<0.000000e+00> : vector<16x1619xf32>
    %211 = tpu.matmul %209, %210, %cst_57 {dimension_numbers = #tpu.dot_dimension_numbers<[1], [0], [0], [1], [0, 0, 1, 1], [], []>} : vector<16x6xf32>, vector<6x1619xf32>, vector<16x1619xf32> -> vector<16x1619xf32>
    %212 = arith.addf %208, %211 : vector<16x1619xf32>
    %213 = vector.extract_strided_slice %115 {offsets = [0, 144], sizes = [16, 6], strides = [1, 1]} : vector<16x150xf32> to vector<16x6xf32>
    %214 = vector.extract_strided_slice %114 {offsets = [0, 264], sizes = [6, 1619], strides = [1, 1]} : vector<6x1883xf32> to vector<6x1619xf32>
    %cst_58 = arith.constant dense<0.000000e+00> : vector<16x1619xf32>
    %215 = tpu.matmul %213, %214, %cst_58 {dimension_numbers = #tpu.dot_dimension_numbers<[1], [0], [0], [1], [0, 0, 1, 1], [], []>} : vector<16x6xf32>, vector<6x1619xf32>, vector<16x1619xf32> -> vector<16x1619xf32>
    %216 = arith.addf %212, %215 : vector<16x1619xf32>
    %c0_59 = arith.constant 0 : index
    %c0_60 = arith.constant 0 : index
    %217 = vector.load %arg4[%c0_59, %c0_60] : memref<16x1xf32, #tpu.memory_space<vmem>>, vector<16x1xf32>
    %218 = vector.extract_strided_slice %216 {offsets = [0, 0], sizes = [16, 1553], strides = [1, 1]} : vector<16x1619xf32> to vector<16x1553xf32>
    %219 = vector.extract_strided_slice %216 {offsets = [0, 2], sizes = [16, 1553], strides = [1, 1]} : vector<16x1619xf32> to vector<16x1553xf32>
    %220 = arith.maximumf %218, %219 : vector<16x1553xf32>
    %221 = vector.extract_strided_slice %216 {offsets = [0, 64], sizes = [16, 1553], strides = [1, 1]} : vector<16x1619xf32> to vector<16x1553xf32>
    %222 = arith.maximumf %220, %221 : vector<16x1553xf32>
    %223 = vector.extract_strided_slice %216 {offsets = [0, 66], sizes = [16, 1553], strides = [1, 1]} : vector<16x1619xf32> to vector<16x1553xf32>
    %224 = arith.maximumf %222, %223 : vector<16x1553xf32>
    %225 = vector.broadcast %217 : vector<16x1xf32> to vector<16x1553xf32>
    %226 = arith.addf %224, %225 : vector<16x1553xf32>
    %cst_61 = arith.constant 0.000000e+00 : f32
    %227 = vector.broadcast %cst_61 : f32 to vector<16x1553xf32>
    %228 = arith.maximumf %226, %227 : vector<16x1553xf32>
    %229 = tpu.iota {dimensions = array<i32: 1>} : vector<400x2xi32>
    %cst_62 = arith.constant 0.000000e+00 : f32
    %230 = vector.broadcast %cst_62 : f32 to vector<400x2xf32>
    %231 = vector.extract_strided_slice %228 {offsets = [0, 0], sizes = [16, 1], strides = [1, 1]} : vector<16x1553xf32> to vector<16x1xf32>
    %232 = vector.extract_strided_slice %228 {offsets = [0, 4], sizes = [16, 1], strides = [1, 1]} : vector<16x1553xf32> to vector<16x1xf32>
    %233 = vector.extract_strided_slice %228 {offsets = [0, 8], sizes = [16, 1], strides = [1, 1]} : vector<16x1553xf32> to vector<16x1xf32>
    %234 = vector.extract_strided_slice %228 {offsets = [0, 12], sizes = [16, 1], strides = [1, 1]} : vector<16x1553xf32> to vector<16x1xf32>
    %235 = vector.extract_strided_slice %228 {offsets = [0, 16], sizes = [16, 1], strides = [1, 1]} : vector<16x1553xf32> to vector<16x1xf32>
    %236 = vector.extract_strided_slice %228 {offsets = [0, 128], sizes = [16, 1], strides = [1, 1]} : vector<16x1553xf32> to vector<16x1xf32>
    %237 = vector.extract_strided_slice %228 {offsets = [0, 132], sizes = [16, 1], strides = [1, 1]} : vector<16x1553xf32> to vector<16x1xf32>
    %238 = vector.extract_strided_slice %228 {offsets = [0, 136], sizes = [16, 1], strides = [1, 1]} : vector<16x1553xf32> to vector<16x1xf32>
    %239 = vector.extract_strided_slice %228 {offsets = [0, 140], sizes = [16, 1], strides = [1, 1]} : vector<16x1553xf32> to vector<16x1xf32>
    %240 = vector.extract_strided_slice %228 {offsets = [0, 144], sizes = [16, 1], strides = [1, 1]} : vector<16x1553xf32> to vector<16x1xf32>
    %241 = vector.extract_strided_slice %228 {offsets = [0, 256], sizes = [16, 1], strides = [1, 1]} : vector<16x1553xf32> to vector<16x1xf32>
    %242 = vector.extract_strided_slice %228 {offsets = [0, 260], sizes = [16, 1], strides = [1, 1]} : vector<16x1553xf32> to vector<16x1xf32>
    %243 = vector.extract_strided_slice %228 {offsets = [0, 264], sizes = [16, 1], strides = [1, 1]} : vector<16x1553xf32> to vector<16x1xf32>
    %244 = vector.extract_strided_slice %228 {offsets = [0, 268], sizes = [16, 1], strides = [1, 1]} : vector<16x1553xf32> to vector<16x1xf32>
    %245 = vector.extract_strided_slice %228 {offsets = [0, 272], sizes = [16, 1], strides = [1, 1]} : vector<16x1553xf32> to vector<16x1xf32>
    %246 = vector.extract_strided_slice %228 {offsets = [0, 384], sizes = [16, 1], strides = [1, 1]} : vector<16x1553xf32> to vector<16x1xf32>
    %247 = vector.extract_strided_slice %228 {offsets = [0, 388], sizes = [16, 1], strides = [1, 1]} : vector<16x1553xf32> to vector<16x1xf32>
    %248 = vector.extract_strided_slice %228 {offsets = [0, 392], sizes = [16, 1], strides = [1, 1]} : vector<16x1553xf32> to vector<16x1xf32>
    %249 = vector.extract_strided_slice %228 {offsets = [0, 396], sizes = [16, 1], strides = [1, 1]} : vector<16x1553xf32> to vector<16x1xf32>
    %250 = vector.extract_strided_slice %228 {offsets = [0, 400], sizes = [16, 1], strides = [1, 1]} : vector<16x1553xf32> to vector<16x1xf32>
    %251 = vector.extract_strided_slice %228 {offsets = [0, 512], sizes = [16, 1], strides = [1, 1]} : vector<16x1553xf32> to vector<16x1xf32>
    %252 = vector.extract_strided_slice %228 {offsets = [0, 516], sizes = [16, 1], strides = [1, 1]} : vector<16x1553xf32> to vector<16x1xf32>
    %253 = vector.extract_strided_slice %228 {offsets = [0, 520], sizes = [16, 1], strides = [1, 1]} : vector<16x1553xf32> to vector<16x1xf32>
    %254 = vector.extract_strided_slice %228 {offsets = [0, 524], sizes = [16, 1], strides = [1, 1]} : vector<16x1553xf32> to vector<16x1xf32>
    %255 = vector.extract_strided_slice %228 {offsets = [0, 528], sizes = [16, 1], strides = [1, 1]} : vector<16x1553xf32> to vector<16x1xf32>
    %256 = tpu.concatenate %231, %232, %233, %234, %235, %236, %237, %238, %239, %240, %241, %242, %243, %244, %245, %246 in 0 : vector<16x1xf32>, vector<16x1xf32>, vector<16x1xf32>, vector<16x1xf32>, vector<16x1xf32>, vector<16x1xf32>, vector<16x1xf32>, vector<16x1xf32>, vector<16x1xf32>, vector<16x1xf32>, vector<16x1xf32>, vector<16x1xf32>, vector<16x1xf32>, vector<16x1xf32>, vector<16x1xf32>, vector<16x1xf32> -> vector<256x1xf32>
    %257 = tpu.concatenate %247, %248, %249, %250, %251, %252, %253, %254, %255 in 0 : vector<16x1xf32>, vector<16x1xf32>, vector<16x1xf32>, vector<16x1xf32>, vector<16x1xf32>, vector<16x1xf32>, vector<16x1xf32>, vector<16x1xf32>, vector<16x1xf32> -> vector<144x1xf32>
    %258 = tpu.concatenate %256, %257 in 0 : vector<256x1xf32>, vector<144x1xf32> -> vector<400x1xf32>
    %c0_i32 = arith.constant 0 : i32
    %259 = vector.broadcast %c0_i32 : i32 to vector<400x2xi32>
    %260 = arith.cmpi eq, %229, %259 : vector<400x2xi32>
    %261 = vector.shape_cast %258 : vector<400x1xf32> to vector<400x1xf32>
    %262 = vector.broadcast %261 : vector<400x1xf32> to vector<400x2xf32>
    %263 = arith.select %260, %262, %230 : vector<400x2xi1>, vector<400x2xf32>
    %264 = vector.extract_strided_slice %228 {offsets = [0, 1024], sizes = [16, 1], strides = [1, 1]} : vector<16x1553xf32> to vector<16x1xf32>
    %265 = vector.extract_strided_slice %228 {offsets = [0, 1028], sizes = [16, 1], strides = [1, 1]} : vector<16x1553xf32> to vector<16x1xf32>
    %266 = vector.extract_strided_slice %228 {offsets = [0, 1032], sizes = [16, 1], strides = [1, 1]} : vector<16x1553xf32> to vector<16x1xf32>
    %267 = vector.extract_strided_slice %228 {offsets = [0, 1036], sizes = [16, 1], strides = [1, 1]} : vector<16x1553xf32> to vector<16x1xf32>
    %268 = vector.extract_strided_slice %228 {offsets = [0, 1040], sizes = [16, 1], strides = [1, 1]} : vector<16x1553xf32> to vector<16x1xf32>
    %269 = vector.extract_strided_slice %228 {offsets = [0, 1152], sizes = [16, 1], strides = [1, 1]} : vector<16x1553xf32> to vector<16x1xf32>
    %270 = vector.extract_strided_slice %228 {offsets = [0, 1156], sizes = [16, 1], strides = [1, 1]} : vector<16x1553xf32> to vector<16x1xf32>
    %271 = vector.extract_strided_slice %228 {offsets = [0, 1160], sizes = [16, 1], strides = [1, 1]} : vector<16x1553xf32> to vector<16x1xf32>
    %272 = vector.extract_strided_slice %228 {offsets = [0, 1164], sizes = [16, 1], strides = [1, 1]} : vector<16x1553xf32> to vector<16x1xf32>
    %273 = vector.extract_strided_slice %228 {offsets = [0, 1168], sizes = [16, 1], strides = [1, 1]} : vector<16x1553xf32> to vector<16x1xf32>
    %274 = vector.extract_strided_slice %228 {offsets = [0, 1280], sizes = [16, 1], strides = [1, 1]} : vector<16x1553xf32> to vector<16x1xf32>
    %275 = vector.extract_strided_slice %228 {offsets = [0, 1284], sizes = [16, 1], strides = [1, 1]} : vector<16x1553xf32> to vector<16x1xf32>
    %276 = vector.extract_strided_slice %228 {offsets = [0, 1288], sizes = [16, 1], strides = [1, 1]} : vector<16x1553xf32> to vector<16x1xf32>
    %277 = vector.extract_strided_slice %228 {offsets = [0, 1292], sizes = [16, 1], strides = [1, 1]} : vector<16x1553xf32> to vector<16x1xf32>
    %278 = vector.extract_strided_slice %228 {offsets = [0, 1296], sizes = [16, 1], strides = [1, 1]} : vector<16x1553xf32> to vector<16x1xf32>
    %279 = vector.extract_strided_slice %228 {offsets = [0, 1408], sizes = [16, 1], strides = [1, 1]} : vector<16x1553xf32> to vector<16x1xf32>
    %280 = vector.extract_strided_slice %228 {offsets = [0, 1412], sizes = [16, 1], strides = [1, 1]} : vector<16x1553xf32> to vector<16x1xf32>
    %281 = vector.extract_strided_slice %228 {offsets = [0, 1416], sizes = [16, 1], strides = [1, 1]} : vector<16x1553xf32> to vector<16x1xf32>
    %282 = vector.extract_strided_slice %228 {offsets = [0, 1420], sizes = [16, 1], strides = [1, 1]} : vector<16x1553xf32> to vector<16x1xf32>
    %283 = vector.extract_strided_slice %228 {offsets = [0, 1424], sizes = [16, 1], strides = [1, 1]} : vector<16x1553xf32> to vector<16x1xf32>
    %284 = vector.extract_strided_slice %228 {offsets = [0, 1536], sizes = [16, 1], strides = [1, 1]} : vector<16x1553xf32> to vector<16x1xf32>
    %285 = vector.extract_strided_slice %228 {offsets = [0, 1540], sizes = [16, 1], strides = [1, 1]} : vector<16x1553xf32> to vector<16x1xf32>
    %286 = vector.extract_strided_slice %228 {offsets = [0, 1544], sizes = [16, 1], strides = [1, 1]} : vector<16x1553xf32> to vector<16x1xf32>
    %287 = vector.extract_strided_slice %228 {offsets = [0, 1548], sizes = [16, 1], strides = [1, 1]} : vector<16x1553xf32> to vector<16x1xf32>
    %288 = vector.extract_strided_slice %228 {offsets = [0, 1552], sizes = [16, 1], strides = [1, 1]} : vector<16x1553xf32> to vector<16x1xf32>
    %289 = tpu.concatenate %264, %265, %266, %267, %268, %269, %270, %271, %272, %273, %274, %275, %276, %277, %278, %279 in 0 : vector<16x1xf32>, vector<16x1xf32>, vector<16x1xf32>, vector<16x1xf32>, vector<16x1xf32>, vector<16x1xf32>, vector<16x1xf32>, vector<16x1xf32>, vector<16x1xf32>, vector<16x1xf32>, vector<16x1xf32>, vector<16x1xf32>, vector<16x1xf32>, vector<16x1xf32>, vector<16x1xf32>, vector<16x1xf32> -> vector<256x1xf32>
    %290 = tpu.concatenate %280, %281, %282, %283, %284, %285, %286, %287, %288 in 0 : vector<16x1xf32>, vector<16x1xf32>, vector<16x1xf32>, vector<16x1xf32>, vector<16x1xf32>, vector<16x1xf32>, vector<16x1xf32>, vector<16x1xf32>, vector<16x1xf32> -> vector<144x1xf32>
    %291 = tpu.concatenate %289, %290 in 0 : vector<256x1xf32>, vector<144x1xf32> -> vector<400x1xf32>
    %c1_i32 = arith.constant 1 : i32
    %292 = vector.broadcast %c1_i32 : i32 to vector<400x2xi32>
    %293 = arith.cmpi eq, %229, %292 : vector<400x2xi32>
    %294 = vector.shape_cast %291 : vector<400x1xf32> to vector<400x1xf32>
    %295 = vector.broadcast %294 : vector<400x1xf32> to vector<400x2xf32>
    %296 = arith.select %293, %295, %263 : vector<400x2xi1>, vector<400x2xf32>
    %c0_63 = arith.constant 0 : index
    %c0_64 = arith.constant 0 : index
    %297 = vector.load %arg5[%c0_63, %c0_64] : memref<120x400xf32, #tpu.memory_space<vmem>>, vector<120x400xf32>
    %cst_65 = arith.constant dense<0.000000e+00> : vector<120x2xf32>
    %298 = tpu.matmul %297, %296, %cst_65 {dimension_numbers = #tpu.dot_dimension_numbers<[1], [0], [0], [1], [0, 0, 1, 1], [], []>} : vector<120x400xf32>, vector<400x2xf32>, vector<120x2xf32> -> vector<120x2xf32>
    %c0_66 = arith.constant 0 : index
    %c0_67 = arith.constant 0 : index
    %299 = vector.load %arg6[%c0_66, %c0_67] : memref<120x1xf32, #tpu.memory_space<vmem>>, vector<120x1xf32>
    %300 = vector.broadcast %299 : vector<120x1xf32> to vector<120x2xf32>
    %301 = arith.addf %298, %300 : vector<120x2xf32>
    %cst_68 = arith.constant 0.000000e+00 : f32
    %302 = vector.broadcast %cst_68 : f32 to vector<120x2xf32>
    %303 = arith.maximumf %301, %302 : vector<120x2xf32>
    %c0_69 = arith.constant 0 : index
    %c0_70 = arith.constant 0 : index
    %304 = vector.load %arg7[%c0_69, %c0_70] : memref<84x120xf32, #tpu.memory_space<vmem>>, vector<84x120xf32>
    %cst_71 = arith.constant dense<0.000000e+00> : vector<84x2xf32>
    %305 = tpu.matmul %304, %303, %cst_71 {dimension_numbers = #tpu.dot_dimension_numbers<[1], [0], [0], [1], [0, 0, 1, 1], [], []>} : vector<84x120xf32>, vector<120x2xf32>, vector<84x2xf32> -> vector<84x2xf32>
    %c0_72 = arith.constant 0 : index
    %c0_73 = arith.constant 0 : index
    %306 = vector.load %arg8[%c0_72, %c0_73] : memref<84x1xf32, #tpu.memory_space<vmem>>, vector<84x1xf32>
    %307 = vector.broadcast %306 : vector<84x1xf32> to vector<84x2xf32>
    %308 = arith.addf %305, %307 : vector<84x2xf32>
    %cst_74 = arith.constant 0.000000e+00 : f32
    %309 = vector.broadcast %cst_74 : f32 to vector<84x2xf32>
    %310 = arith.maximumf %308, %309 : vector<84x2xf32>
    %c0_75 = arith.constant 0 : index
    %c0_76 = arith.constant 0 : index
    %311 = vector.load %arg9[%c0_75, %c0_76] : memref<10x84xf32, #tpu.memory_space<vmem>>, vector<10x84xf32>
    %cst_77 = arith.constant dense<0.000000e+00> : vector<10x2xf32>
    %312 = tpu.matmul %311, %310, %cst_77 {dimension_numbers = #tpu.dot_dimension_numbers<[1], [0], [0], [1], [0, 0, 1, 1], [], []>} : vector<10x84xf32>, vector<84x2xf32>, vector<10x2xf32> -> vector<10x2xf32>
    %c0_78 = arith.constant 0 : index
    %c0_79 = arith.constant 0 : index
    %313 = vector.load %arg10[%c0_78, %c0_79] : memref<10x1xf32, #tpu.memory_space<vmem>>, vector<10x1xf32>
    %314 = vector.broadcast %313 : vector<10x1xf32> to vector<10x2xf32>
    %315 = arith.addf %312, %314 : vector<10x2xf32>
    %cst_80 = arith.constant dense<0xFF800000> : vector<2xf32>
    %316 = vector.multi_reduction <maximumf>, %315, %cst_80 [0] : vector<10x2xf32> to vector<2xf32>
    %317 = vector.shape_cast %316 : vector<2xf32> to vector<1x2xf32>
    %318 = vector.broadcast %317 : vector<1x2xf32> to vector<10x2xf32>
    %319 = arith.subf %315, %318 : vector<10x2xf32>
    %320 = math.exp %319 : vector<10x2xf32>
    %cst_81 = arith.constant dense<0.000000e+00> : vector<2xf32>
    %321 = vector.multi_reduction <add>, %320, %cst_81 [0] : vector<10x2xf32> to vector<2xf32>
    %322 = vector.shape_cast %321 : vector<2xf32> to vector<1x2xf32>
    %323 = math.log %322 : vector<1x2xf32>
    %324 = arith.addf %317, %323 : vector<1x2xf32>
    %325 = vector.broadcast %324 : vector<1x2xf32> to vector<10x2xf32>
    %326 = arith.subf %315, %325 : vector<10x2xf32>
    %c0_82 = arith.constant 0 : index
    %c0_83 = arith.constant 0 : index
    %327 = vector.load %arg11[%c0_82, %c0_83] : memref<10x2xf32, #tpu.memory_space<vmem>>, vector<10x2xf32>
    tpu.vector_store %arg11[%c0_82, %c0_83], %326 {strides = array<i32>} : memref<10x2xf32, #tpu.memory_space<vmem>>, vector<10x2xf32>,
    return
  }
}

</mosaic_0001>

<bundles_post_ra>
// kernel: lenet5_forward.1
= control target key start
LH: loop header
LB: loop body
LE: loop exit
PB: predicated region body
PF: predicated region fallthrough
CT: control target
= control target key end

     0   :  { %v41212_v3 = vmov 0.0   ;;  %s34770_s23 = smov 127   ;;  %s34771_s26 = smov 125   ;;  %vm95_vm0 = vcmask 1039360   ;;  %vm113_vm1 = vcmask 1042432   ;;  %vm110_vm2 = vcmask 23552   ;;  %s41197_s0 = inlined_call_operand.vmem [shape: f32[3,2048], index: 0, kind: input, shape index: {}]   ;;  %s41198_s1 = inlined_call_operand.vmem [shape: f32[6,75], index: 1, kind: input, shape index: {}]   ;;  %s41199_s2 = inlined_call_operand.vmem [shape: f32[6,1], index: 2, kind: input, shape index: {}]   ;;  %s41200_s3 = inlined_call_operand.vmem [shape: f32[16,150], index: 3, kind: input, shape index: {}]   ;;  %s41201_s4 = inlined_call_operand.vmem [shape: f32[16,1], index: 4, kind: input, shape index: {}]   ;;  %s41202_s5 = inlined_call_operand.vmem [shape: f32[120,400], index: 5, kind: input, shape index: {}]   ;;  %s41203_s6 = inlined_call_operand.vmem [shape: f32[120,1], index: 6, kind: input, shape index: {}]   ;;  %s41204_s8 = inlined_call_operand.vmem [shape: f32[84,1], index: 8, kind: input, shape index: {}]   ;;  %s41205_s10 = inlined_call_operand.vmem [shape: f32[10,1], index: 10, kind: input, shape index: {}]   ;;  %s41206_s7 = inlined_call_operand.vmem [shape: f32[84,120], index: 7, kind: input, shape index: {}]   ;;  %s41207_s9 = inlined_call_operand.vmem [shape: f32[10,84], index: 9, kind: input, shape index: {}]   ;;  %s41208_s11 = inlined_call_operand.vmem [shape: f32[10,2], index: 11, kind: output, shape index: {}]  }
   0x1   :  { %v34888_v0 = vld [vmem:[%s41197_s0 + $0x10] sm:$0x77]  ;;  %v34893_v1 = vld [vmem:[%s41197_s0] sm:$0x77]  ;;  %v34898_v2 = vld [vmem:[%s41197_s0 + $0x8] sm:$0x77]  ;;  %279 = vmatprep.mubr.f32.mxu1 %v41212_v3  ;;  %208 = vmatprep.mubr.f32.mxu0 %v41212_v3 }
   0x2   :  { %73 = vrot.lane.b32.xlu1 %v34888_v0, %s34770_s23  ;;  %69 = vrot.lane.b32.xlu0 %v34898_v2, %s34770_s23  ;;  %v34908_v4 = vcombine.high %v34898_v2, %v34898_v2  ;;  %v34912_v5 = vcombine.high %v34893_v1, %v34893_v1  ;;  %v34921_v6 = vld [vmem:[%s41198_s1] sm:$0x3f]  ;;  %v34929_v7 = vcombine.high %v34888_v0, %v34888_v0  ;;  %v34934_v8 = vld [vmem:[%s41197_s0 + $0x18] sm:$0x77]  ;;  %s34772_s18 = smov 126   ;;  %s34773_s19 = smov 122  }
   0x3   :  { %v34942_v9 = vcombine.high %v34934_v8, %v34934_v8  ;;  %v34947_v10 = vld [vmem:[%s41197_s0 + $0x20] sm:$0x77]  ;;  %v34960_v12 = vld [vmem:[%s41197_s0 + $0x28] sm:$0x77]  ;;  %v34973_v14 = vld [vmem:[%s41197_s0 + $0x30] sm:$0x77] }
   0x4   :  { %v34955_v11 = vcombine.high %v34947_v10, %v34947_v10  ;;  %v34968_v13 = vcombine.high %v34960_v12, %v34960_v12  ;;  %v34981_v15 = vcombine.high %v34973_v14, %v34973_v14  ;;  %v34986_v16 = vld [vmem:[%s41197_s0 + $0x38] sm:$0x77]  ;;  %s34774_s20 = smov 119   ;;  %s34775_s21 = smov 124   ;;  %vm34779_vm3 = vmmov 0  }
   0x5   :  { %s34776_s22 = smov 116   ;;  %s34777_s24 = smov 96   ;;  %vm1342_vm4 = vcmask 1031168   ;;  %v35263_v55 = vcombine.high %v34986_v16, %v34986_v16  ;;  %vm2003_vm5 = vcmask 1022976   ;;  %vm2664_vm6 = vcmask 1014784  }
   0x6   :  { %71 = vrot.lane.b32.xlu1 %v34908_v4, %s34770_s23  ;;  %67 = vrot.lane.b32.xlu0 %v34912_v5, %s34770_s23  ;;  %s34778_s25 = smov 113   ;;  %s34780_s27 = smov 95   ;;  %vm3328_vm7 = vcmask 785408   ;;  %vm3992_vm8 = vcmask 777216   ;;  %vm4656_vm9 = vcmask 769024   ;;  %vm5320_vm10 = vcmask 760832  }
   0x7   :  { %s34781_s28 = smov 110   ;;  %s34782_s29 = smov 94   ;;  %vm5984_vm11 = vcmask 752640   ;;  %vm6648_vm12 = vcmask 523264   ;;  %vm7312_vm13 = vcmask 515072   ;;  %vm7976_vm14 = vcmask 506880  }
   0x8   :  { %s34783_s30 = smov 107   ;;  %s34784_s12 = smov 93   ;;  %vm8640_vm15 = vcmask 498688  }
   0x9   :  { %s34785_s13 = smov 104   ;;  %s34786_s14 = smov 92  }
   0xa   :  { %48 = vrot.lane.b32.xlu1 %v34921_v6, %s34771_s26  ;;  %65 = vrot.lane.b32.xlu0 %v34893_v1, %s34770_s23  ;;  %s34787_s17 = smov 101   ;;  %s34792_s15 = smov 61  }
   0xb   :  { %s34793_s16 = smov 89  }
   0xe   :  { %77 = vrot.lane.b32.xlu1 %v34934_v8, %s34770_s23  ;;  %75 = vrot.lane.b32.xlu0 %v34929_v7, %s34770_s23 }
  0x12   :  { %81 = vrot.lane.b32.xlu1 %v34947_v10, %s34770_s23  ;;  %79 = vrot.lane.b32.xlu0 %v34942_v9, %s34770_s23 }
  0x16   :  { %85 = vrot.lane.b32.xlu1 %v34960_v12, %s34770_s23  ;;  %83 = vrot.lane.b32.xlu0 %v34955_v11, %s34770_s23 }
  0x1a   :  { %89 = vrot.lane.b32.xlu1 %v34973_v14, %s34770_s23  ;;  %87 = vrot.lane.b32.xlu0 %v34968_v13, %s34770_s23 }
  0x1e   :  { %93 = vrot.lane.b32.xlu1 %v34986_v16, %s34770_s23  ;;  %91 = vrot.lane.b32.xlu0 %v34981_v15, %s34770_s23 }
  0x22   :  { %1316 = vrot.lane.b32.xlu1 %v34898_v2, %s34772_s18  ;;  %1314 = vrot.lane.b32.xlu0 %v34912_v5, %s34772_s18 }
  0x26   :  { %1320 = vrot.lane.b32.xlu1 %v34888_v0, %s34772_s18  ;;  %1318 = vrot.lane.b32.xlu0 %v34908_v4, %s34772_s18 }
  0x2a   :  { %1310 = vrot.lane.b32.xlu1 %v34921_v6, %s34773_s19  ;;  %1312 = vrot.lane.b32.xlu0 %v34893_v1, %s34772_s18 }
  0x2e   :  { %1324 = vrot.lane.b32.xlu1 %v34934_v8, %s34772_s18  ;;  %1322 = vrot.lane.b32.xlu0 %v34929_v7, %s34772_s18 }
  0x32   :  { %1328 = vrot.lane.b32.xlu1 %v34947_v10, %s34772_s18  ;;  %1326 = vrot.lane.b32.xlu0 %v34942_v9, %s34772_s18 }
  0x36   :  { %1332 = vrot.lane.b32.xlu1 %v34960_v12, %s34772_s18  ;;  %1330 = vrot.lane.b32.xlu0 %v34955_v11, %s34772_s18 }
  0x3a   :  { %1336 = vrot.lane.b32.xlu1 %v34973_v14, %s34772_s18  ;;  %1334 = vrot.lane.b32.xlu0 %v34968_v13, %s34772_s18 }
  0x3e   :  { %1340 = vrot.lane.b32.xlu1 %v34986_v16, %s34772_s18  ;;  %1338 = vrot.lane.b32.xlu0 %v34981_v15, %s34772_s18 }
  0x42   :  { %1977 = vrot.lane.b32.xlu1 %v34898_v2, %s34771_s26  ;;  %1975 = vrot.lane.b32.xlu0 %v34912_v5, %s34771_s26 }
  0x46   :  { %1981 = vrot.lane.b32.xlu1 %v34888_v0, %s34771_s26  ;;  %1979 = vrot.lane.b32.xlu0 %v34908_v4, %s34771_s26 }
  0x4a   :  { %1971 = vrot.lane.b32.xlu1 %v34921_v6, %s34774_s20  ;;  %1973 = vrot.lane.b32.xlu0 %v34893_v1, %s34771_s26  ;;  %s41236_s20 = smov 60  }
  0x4e   :  { %1985 = vrot.lane.b32.xlu1 %v34934_v8, %s34771_s26  ;;  %1983 = vrot.lane.b32.xlu0 %v34929_v7, %s34771_s26 }
  0x52   :  { %1989 = vrot.lane.b32.xlu1 %v34947_v10, %s34771_s26  ;;  %1987 = vrot.lane.b32.xlu0 %v34942_v9, %s34771_s26 }
  0x56   :  { %1993 = vrot.lane.b32.xlu1 %v34960_v12, %s34771_s26  ;;  %1991 = vrot.lane.b32.xlu0 %v34955_v11, %s34771_s26 }
  0x5a   :  { %1997 = vrot.lane.b32.xlu1 %v34973_v14, %s34771_s26  ;;  %1995 = vrot.lane.b32.xlu0 %v34968_v13, %s34771_s26 }
  0x5e   :  { %2001 = vrot.lane.b32.xlu1 %v34986_v16, %s34771_s26  ;;  %1999 = vrot.lane.b32.xlu0 %v34981_v15, %s34771_s26 }
  0x62   :  { %2638 = vrot.lane.b32.xlu1 %v34898_v2, %s34775_s21  ;;  %2636 = vrot.lane.b32.xlu0 %v34912_v5, %s34775_s21 }
  0x66   :  { %2642 = vrot.lane.b32.xlu1 %v34888_v0, %s34775_s21  ;;  %2640 = vrot.lane.b32.xlu0 %v34908_v4, %s34775_s21 }
  0x6a   :  { %2632 = vrot.lane.b32.xlu1 %v34921_v6, %s34776_s22  ;;  %2634 = vrot.lane.b32.xlu0 %v34893_v1, %s34775_s21 }
  0x6e   :  { %2646 = vrot.lane.b32.xlu1 %v34934_v8, %s34775_s21  ;;  %2644 = vrot.lane.b32.xlu0 %v34929_v7, %s34775_s21 }
  0x72   :  { %2650 = vrot.lane.b32.xlu1 %v34947_v10, %s34775_s21  ;;  %2648 = vrot.lane.b32.xlu0 %v34942_v9, %s34775_s21 }
  0x74   :  { %v74_v17 = vpop.permute.xlu1 %73  ;;  %v70_v18 = vpop.permute.xlu0 %69 }
  0x76   :  { %2654 = vrot.lane.b32.xlu1 %v34960_v12, %s34775_s21  ;;  %2652 = vrot.lane.b32.xlu0 %v34955_v11, %s34775_s21 }
  0x78   :  { %v72_v19 = vpop.permute.xlu1 %71  ;;  %v68_v20 = vpop.permute.xlu0 %67 }
  0x79   :  { %v35080_v21 = vsel %vm95_vm0, %v72_v19, %v74_v17  ;;  %v35083_v22 = vsel %vm95_vm0, %v68_v20, %v70_v18  ;;  %v35086_v23 = vsel %vm95_vm0, %v70_v18, %v72_v19 }
  0x7a   :  { %2658 = vrot.lane.b32.xlu1 %v34973_v14, %s34775_s21  ;;  %31395 = vmatprep.subr.msk.mxu1 %vm113_vm1, %v35080_v21 }
  0x7b   :  { %2656 = vrot.lane.b32.xlu0 %v34968_v13, %s34775_s21  ;;  %31392 = vmatprep.subr.msk.mxu0 %vm113_vm1, %v35083_v22 }
  0x7c   :  { %31396 = vmatpush1.msk.msra.mxu1 %vm113_vm1, %v35086_v23  ;;  %v35098_v24 = vpop.permute.xlu1 %48  ;;  %v66_v25 = vpop.permute.xlu0 %65 }
  0x7d   :  { %31397 = vmatmul.mubr.msk.f32.vlgmr.msra.gmra.mrb[0].mxu1 %vm110_vm2, %v35098_v24  ;;  %v96_v26 = vsel %vm95_vm0, %v66_v25, %v68_v20 }
  0x7e   :  { %2662 = vrot.lane.b32.xlu1 %v34986_v16, %s34775_s21  ;;  %31393 = vmatpush1.msk.msra.mxu0 %vm113_vm1, %v96_v26 }
  0x7f   :  { %2660 = vrot.lane.b32.xlu0 %v34981_v15, %s34775_s21  ;;  %31394 = vmatmul.mubr.msk.f32.vlgmr.msra.gmra.mrb[0].mxu0 %vm110_vm2, %v35098_v24 }
  0x80   :  { %v78_v27 = vpop.permute.xlu1 %77  ;;  %v76_v28 = vpop.permute.xlu0 %75  ;;  %350 = vmatprep.mubr.f32.mxu0 %v41212_v3  ;;  %421 = vmatprep.mubr.f32.mxu1 %v41212_v3 }
  0x81   :  { %v35113_v29 = vsel %vm95_vm0, %v74_v17, %v76_v28  ;;  %v35116_v30 = vsel %vm95_vm0, %v76_v28, %v78_v27 }
  0x82   :  { %3300 = vrot.lane.b32.xlu1 %v34898_v2, %s34777_s24  ;;  %31398 = vmatprep.subr.msk.mxu0 %vm113_vm1, %v35116_v30 }
  0x83   :  { %3298 = vrot.lane.b32.xlu0 %v34912_v5, %s34777_s24  ;;  %31399 = vmatpush1.msk.msra.mxu0 %vm113_vm1, %v35113_v29 }
  0x84   :  { %v82_v31 = vpop.permute.xlu1 %81  ;;  %31400 = vmatmul.mubr.msk.f32.vlgmr.msra.gmra.mrb[2].mxu0 %vm110_vm2, %v35098_v24  ;;  %v80_v32 = vpop.permute.xlu0 %79 }
  0x85   :  { %v35129_v33 = vsel %vm95_vm0, %v78_v27, %v80_v32  ;;  %v35132_v34 = vsel %vm95_vm0, %v80_v32, %v82_v31  ;;  %492 = vmatprep.mubr.f32.mxu0 %v41212_v3 }
  0x86   :  { %3304 = vrot.lane.b32.xlu1 %v34888_v0, %s34777_s24  ;;  %31401 = vmatprep.subr.msk.mxu1 %vm113_vm1, %v35132_v34 }
  0x87   :  { %3302 = vrot.lane.b32.xlu0 %v34908_v4, %s34777_s24  ;;  %31402 = vmatpush1.msk.msra.mxu1 %vm113_vm1, %v35129_v33 }
  0x88   :  { %v86_v35 = vpop.permute.xlu1 %85  ;;  %31403 = vmatmul.mubr.msk.f32.vlgmr.msra.gmra.mrb[2].mxu1 %vm110_vm2, %v35098_v24  ;;  %v84_v36 = vpop.permute.xlu0 %83 }
  0x89   :  { %v35146_v37 = vsel %vm95_vm0, %v82_v31, %v84_v36  ;;  %v35149_v38 = vsel %vm95_vm0, %v84_v36, %v86_v35  ;;  %563 = vmatprep.mubr.f32.mxu1 %v41212_v3 }
  0x8a   :  { %3293 = vrot.lane.b32.xlu1 %v34921_v6, %s34778_s25  ;;  %31404 = vmatprep.subr.msk.mxu0 %vm113_vm1, %v35149_v38  ;;  %s41234_s25 = smov 86  }
  0x8b   :  { %3296 = vrot.lane.b32.xlu0 %v34893_v1, %s34777_s24  ;;  %31405 = vmatpush1.msk.msra.mxu0 %vm113_vm1, %v35146_v37 }
  0x8c   :  { %v90_v39 = vpop.permute.xlu1 %89  ;;  %31406 = vmatmul.mubr.msk.f32.vlgmr.msra.gmra.mrb[4].mxu0 %vm110_vm2, %v35098_v24  ;;  %v88_v40 = vpop.permute.xlu0 %87 }
  0x8d   :  { %v35162_v41 = vsel %vm95_vm0, %v86_v35, %v88_v40  ;;  %v35165_v42 = vsel %vm95_vm0, %v88_v40, %v90_v39  ;;  %634 = vmatprep.mubr.f32.mxu0 %v41212_v3 }
  0x8e   :  { %3308 = vrot.lane.b32.xlu1 %v34934_v8, %s34777_s24  ;;  %31407 = vmatprep.subr.msk.mxu1 %vm113_vm1, %v35165_v42 }
  0x8f   :  { %3306 = vrot.lane.b32.xlu0 %v34929_v7, %s34777_s24  ;;  %31408 = vmatpush1.msk.msra.mxu1 %vm113_vm1, %v35162_v41 }
  0x90   :  { %v35176_v43 = vpop.permute.xlu1 %93  ;;  %31409 = vmatmul.mubr.msk.f32.vlgmr.msra.gmra.mrb[4].mxu1 %vm110_vm2, %v35098_v24  ;;  %32812 = vmatprep.subr.mxu1 %v41212_v3  ;;  %v92_v44 = vpop.permute.xlu0 %91 }
  0x91   :  { %v35182_v45 = vsel %vm95_vm0, %v90_v39, %v92_v44  ;;  %32813 = vmatpush3.msk.msra.mxu1 %vm113_vm1, %v35176_v43  ;;  %v35188_v46 = vsel %vm95_vm0, %v92_v44, %v35176_v43  ;;  %32814 = vmatprep.mubr.msk.f32.mxu1 %vm34779_vm3, %v41212_v3 }
  0x92   :  { %3312 = vrot.lane.b32.xlu1 %v34947_v10, %s34777_s24  ;;  %31410 = vmatprep.subr.msk.mxu0 %vm113_vm1, %v35188_v46 }
  0x93   :  { %3310 = vrot.lane.b32.xlu0 %v34942_v9, %s34777_s24  ;;  %31411 = vmatpush1.msk.msra.mxu0 %vm113_vm1, %v35182_v45 }
  0x94   :  { %v1317_v47 = vpop.permute.xlu1 %1316  ;;  %31412 = vmatmul.mubr.msk.f32.vlgmr.msra.gmra.mrb[6].mxu0 %vm110_vm2, %v35098_v24  ;;  %32815 = vmatmul.mubr.msk.f32.vlgmr.msra.gmra.mrb[6].mxu1 %vm110_vm2, %v35098_v24  ;;  %v1315_v48 = vpop.permute.xlu0 %1314 }
  0x95   :  { %31415 = vmatprep.subr.msk.mxu0 %vm113_vm1, %v34912_v5  ;;  %31418 = vmatprep.subr.msk.mxu1 %vm113_vm1, %v34908_v4  ;;  %v35274_v58 = vsel %vm1342_vm4, %v1315_v48, %v1317_v47 }
  0x96   :  { %3316 = vrot.lane.b32.xlu1 %v34960_v12, %s34777_s24  ;;  %31416 = vmatpush1.msk.msra.mxu0 %vm113_vm1, %v34893_v1 }
  0x97   :  { %3314 = vrot.lane.b32.xlu0 %v34955_v11, %s34777_s24  ;;  %807 = vmatprep.mubr.f32.mxu0 %v41212_v3 }
  0x98   :  { %31419 = vmatpush1.msk.msra.mxu1 %vm113_vm1, %v34898_v2  ;;  %878 = vmatprep.mubr.f32.mxu1 %v41212_v3  ;;  %v35218_v49 = vpop.permute.xlu1 %1320  ;;  %v1319_v50 = vpop.permute.xlu0 %1318 }
  0x99   :  { %31417 = vmatmul.mubr.msk.f32.vlgmr.msra.gmra.mrb[0].mxu0 %vm110_vm2, %v34921_v6  ;;  %31420 = vmatmul.mubr.msk.f32.vlgmr.msra.gmra.mrb[0].mxu1 %vm110_vm2, %v34921_v6  ;;  %v35278_v59 = vsel %vm1342_vm4, %v1319_v50, %v35218_v49  ;;  %v35292_v62 = vsel %vm1342_vm4, %v1317_v47, %v1319_v50 }
  0x9a   :  { %3320 = vrot.lane.b32.xlu1 %v34973_v14, %s34777_s24  ;;  %31421 = vmatprep.subr.msk.mxu0 %vm113_vm1, %v34929_v7 }
  0x9b   :  { %3318 = vrot.lane.b32.xlu0 %v34968_v13, %s34777_s24  ;;  %31424 = vmatprep.subr.msk.mxu1 %vm113_vm1, %v34942_v9 }
  0x9c   :  { %31422 = vmatpush1.msk.msra.mxu0 %vm113_vm1, %v34888_v0  ;;  %949 = vmatprep.mubr.f32.mxu0 %v41212_v3  ;;  %v35235_v51 = vpop.permute.xlu1 %1310  ;;  %v1313_v52 = vpop.permute.xlu0 %1312 }
  0x9d   :  { %31425 = vmatpush1.msk.msra.mxu1 %vm113_vm1, %v34934_v8  ;;  %1020 = vmatprep.mubr.f32.mxu1 %v41212_v3  ;;  %v1343_v63 = vsel %vm1342_vm4, %v1313_v52, %v1315_v48 }
  0x9e   :  { %31423 = vmatmul.mubr.msk.f32.vlgmr.msra.gmra.mrb[2].mxu0 %vm110_vm2, %v34921_v6  ;;  %31426 = vmatmul.mubr.msk.f32.vlgmr.msra.gmra.mrb[2].mxu1 %vm110_vm2, %v34921_v6 }
  0x9f   :  { %31427 = vmatprep.subr.msk.mxu0 %vm113_vm1, %v34955_v11  ;;  %31430 = vmatprep.subr.msk.mxu1 %vm113_vm1, %v34968_v13 }
  0xa0   :  { %3324 = vrot.lane.b32.xlu1 %v34986_v16, %s34777_s24  ;;  %3322 = vrot.lane.b32.xlu0 %v34981_v15, %s34777_s24  ;;  %v1325_v53 = vpop.permute.xlu1 %1324  ;;  %v1323_v54 = vpop.permute.xlu0 %1322 }
  0xa1   :  { %31428 = vmatpush1.msk.msra.mxu0 %vm113_vm1, %v34947_v10  ;;  %31431 = vmatpush1.msk.msra.mxu1 %vm113_vm1, %v34960_v12  ;;  %v35306_v18 = vsel %vm1342_vm4, %v1323_v54, %v1325_v53  ;;  %v35320_v24 = vsel %vm1342_vm4, %v35218_v49, %v1323_v54 }
  0xa2   :  { %1091 = vmatprep.mubr.f32.mxu0 %v41212_v3  ;;  %1162 = vmatprep.mubr.f32.mxu1 %v41212_v3 }
  0xa3   :  { %31433 = vmatprep.subr.msk.mxu0 %vm113_vm1, %v34981_v15  ;;  %32817 = vmatprep.subr.mxu1 %v41212_v3 }
  0xa4   :  { %31429 = vmatmul.mubr.msk.f32.vlgmr.msra.gmra.mrb[4].mxu0 %vm110_vm2, %v34921_v6  ;;  %31432 = vmatmul.mubr.msk.f32.vlgmr.msra.gmra.mrb[4].mxu1 %vm110_vm2, %v34921_v6  ;;  %v1329_v56 = vpop.permute.xlu1 %1328  ;;  %v1327_v57 = vpop.permute.xlu0 %1326 }
  0xa5   :  { %31434 = vmatpush1.msk.msra.mxu0 %vm113_vm1, %v34973_v14  ;;  %32818 = vmatpush3.msk.msra.mxu1 %vm113_vm1, %v34986_v16  ;;  %v35300_v17 = vsel %vm1342_vm4, %v1327_v57, %v1329_v56  ;;  %v35323_v25 = vsel %vm1342_vm4, %v1325_v53, %v1327_v57 }
  0xa6   :  { %31438 = vmatprep.subr.msk.mxu0 %vm113_vm1, %v35274_v58  ;;  %31441 = vmatprep.subr.msk.mxu1 %vm113_vm1, %v35278_v59 }
  0xa7   :  { %3962 = vrot.lane.b32.xlu1 %v34912_v5, %s34780_s27  ;;  %3326 = vrot.lane.b32.xlu0 %v35263_v55, %s34777_s24 }
  0xa8   :  { %1233 = vmatprep.mubr.f32.mxu0 %v41212_v3  ;;  %32819 = vmatprep.mubr.msk.f32.mxu1 %vm34779_vm3, %v41212_v3  ;;  %v1333_v60 = vpop.permute.xlu1 %1332  ;;  %v1331_v61 = vpop.permute.xlu0 %1330 }
  0xa9   :  { %31435 = vmatmul.mubr.msk.f32.vlgmr.msra.gmra.mrb[6].mxu0 %vm110_vm2, %v34921_v6  ;;  %32820 = vmatmul.mubr.msk.f32.vlgmr.msra.gmra.mrb[6].mxu1 %vm110_vm2, %v34921_v6  ;;  %v35330_v26 = vsel %vm1342_vm4, %v1331_v61, %v1333_v60  ;;  %v35346_v31 = vsel %vm1342_vm4, %v1329_v56, %v1331_v61 }
  0xaa   :  { %31439 = vmatpush1.msk.msra.mxu0 %vm113_vm1, %v1343_v63  ;;  %31442 = vmatpush1.msk.msra.mxu1 %vm113_vm1, %v35292_v62 }
  0xab   :  { %31444 = vmatprep.subr.msk.mxu0 %vm113_vm1, %v35306_v18  ;;  %3966 = vrot.lane.b32.xlu1 %v34908_v4, %s34780_s27 }
  0xac   :  { %3964 = vrot.lane.b32.xlu0 %v34898_v2, %s34780_s27  ;;  %31447 = vmatprep.subr.msk.mxu1 %vm113_vm1, %v35300_v17  ;;  %v1337_v19 = vpop.permute.xlu1 %1336  ;;  %v1335_v20 = vpop.permute.xlu0 %1334 }
  0xad   :  { %1453 = vmatprep.mubr.f32.mxu0 %v41212_v3  ;;  %1524 = vmatprep.mubr.f32.mxu1 %v41212_v3  ;;  %v35352_v32 = vsel %vm1342_vm4, %v1335_v20, %v1337_v19  ;;  %v35359_v35 = vsel %vm1342_vm4, %v1333_v60, %v1335_v20 }
  0xae   :  { %31440 = vmatmul.mubr.msk.f32.vlgmr.msra.gmra.mrb[0].mxu0 %vm110_vm2, %v35235_v51  ;;  %31443 = vmatmul.mubr.msk.f32.vlgmr.msra.gmra.mrb[0].mxu1 %vm110_vm2, %v35235_v51 }
  0xaf   :  { %31445 = vmatpush1.msk.msra.mxu0 %vm113_vm1, %v35320_v24  ;;  %31448 = vmatpush1.msk.msra.mxu1 %vm113_vm1, %v35323_v25 }
  0xb0   :  { %3960 = vrot.lane.b32.xlu1 %v34893_v1, %s34780_s27  ;;  %3968 = vrot.lane.b32.xlu0 %v34888_v0, %s34780_s27  ;;  %v35340_v27 = vpop.permute.xlu1 %1340  ;;  %v1339_v28 = vpop.permute.xlu0 %1338 }
  0xb1   :  { %31450 = vmatprep.subr.msk.mxu0 %vm113_vm1, %v35330_v26  ;;  %1595 = vmatprep.mubr.f32.mxu0 %v41212_v3  ;;  %v35377_v40 = vsel %vm1342_vm4, %v1339_v28, %v35340_v27  ;;  %v35381_v44 = vsel %vm1342_vm4, %v1337_v19, %v1339_v28 }
  0xb2   :  { %1666 = vmatprep.mubr.f32.mxu1 %v41212_v3  ;;  %31446 = vmatmul.mubr.msk.f32.vlgmr.msra.gmra.mrb[2].mxu0 %vm110_vm2, %v35235_v51 }
  0xb3   :  { %31449 = vmatmul.mubr.msk.f32.vlgmr.msra.gmra.mrb[2].mxu1 %vm110_vm2, %v35235_v51  ;;  %31451 = vmatpush1.msk.msra.mxu0 %vm113_vm1, %v35346_v31 }
  0xb4   :  { %3970 = vrot.lane.b32.xlu1 %v34929_v7, %s34780_s27  ;;  %3958 = vrot.lane.b32.xlu0 %v34921_v6, %s34781_s28  ;;  %v1978_v36 = vpop.permute.xlu1 %1977  ;;  %v1976_v39 = vpop.permute.xlu0 %1975 }
  0xb5   :  { %31453 = vmatprep.subr.msk.mxu1 %vm113_vm1, %v35352_v32  ;;  %1737 = vmatprep.mubr.f32.mxu0 %v41212_v3  ;;  %v35397_v49 = vsel %vm2003_vm5, %v1976_v39, %v1978_v36 }
  0xb6   :  { %31454 = vmatpush1.msk.msra.mxu1 %vm113_vm1, %v35359_v35  ;;  %1808 = vmatprep.mubr.f32.mxu1 %v41212_v3 }
  0xb7   :  { %31452 = vmatmul.mubr.msk.f32.vlgmr.msra.gmra.mrb[4].mxu0 %vm110_vm2, %v35235_v51  ;;  %31455 = vmatmul.mubr.msk.f32.vlgmr.msra.gmra.mrb[4].mxu1 %vm110_vm2, %v35235_v51 }
  0xb8   :  { %32822 = vmatprep.subr.mxu1 %v41212_v3  ;;  %3974 = vrot.lane.b32.xlu1 %v34942_v9, %s34780_s27  ;;  %v1982_v47 = vpop.permute.xlu1 %1981  ;;  %v1980_v48 = vpop.permute.xlu0 %1979 }
  0xb9   :  { %32823 = vmatpush3.msk.msra.mxu1 %vm113_vm1, %v35340_v27  ;;  %3972 = vrot.lane.b32.xlu0 %v34934_v8, %s34780_s27  ;;  %v35400_v50 = vsel %vm2003_vm5, %v1980_v48, %v1982_v47  ;;  %v35407_v52 = vsel %vm2003_vm5, %v1978_v36, %v1980_v48 }
  0xba   :  { %31456 = vmatprep.subr.msk.mxu0 %vm113_vm1, %v35377_v40  ;;  %1879 = vmatprep.mubr.f32.mxu0 %v41212_v3 }
  0xbb   :  { %31457 = vmatpush1.msk.msra.mxu0 %vm113_vm1, %v35381_v44  ;;  %32824 = vmatprep.mubr.msk.f32.mxu1 %vm34779_vm3, %v41212_v3 }
  0xbc   :  { %31458 = vmatmul.mubr.msk.f32.vlgmr.msra.gmra.mrb[6].mxu0 %vm110_vm2, %v35235_v51  ;;  %32825 = vmatmul.mubr.msk.f32.vlgmr.msra.gmra.mrb[6].mxu1 %vm110_vm2, %v35235_v51  ;;  %v35409_v53 = vpop.permute.xlu1 %1971  ;;  %v1974_v54 = vpop.permute.xlu0 %1973 }
  0xbd   :  { %3978 = vrot.lane.b32.xlu1 %v34955_v11, %s34780_s27  ;;  %3976 = vrot.lane.b32.xlu0 %v34947_v10, %s34780_s27  ;;  %v2004_v56 = vsel %vm2003_vm5, %v1974_v54, %v1976_v39 }
  0xbe   :  { %31461 = vmatprep.subr.msk.mxu0 %vm113_vm1, %v35397_v49  ;;  %31464 = vmatprep.subr.msk.mxu1 %vm113_vm1, %v35400_v50 }
  0xbf   :  { %31465 = vmatpush1.msk.msra.mxu1 %vm113_vm1, %v35407_v52  ;;  %2185 = vmatprep.mubr.f32.mxu1 %v41212_v3 }
  0xc0   :  { %31466 = vmatmul.mubr.msk.f32.vlgmr.msra.gmra.mrb[0].mxu1 %vm110_vm2, %v35409_v53  ;;  %31462 = vmatpush1.msk.msra.mxu0 %vm113_vm1, %v2004_v56  ;;  %v1986_v51 = vpop.permute.xlu1 %1985  ;;  %v1984_v57 = vpop.permute.xlu0 %1983 }
  0xc1   :  { %3982 = vrot.lane.b32.xlu1 %v34968_v13, %s34780_s27  ;;  %3980 = vrot.lane.b32.xlu0 %v34960_v12, %s34780_s27  ;;  %v35431_v60 = vsel %vm2003_vm5, %v1982_v47, %v1984_v57  ;;  %v35434_v61 = vsel %vm2003_vm5, %v1984_v57, %v1986_v51 }
  0xc2   :  { %2114 = vmatprep.mubr.f32.mxu0 %v41212_v3  ;;  %31467 = vmatprep.subr.msk.mxu0 %vm113_vm1, %v35434_v61 }
  0xc3   :  { %31463 = vmatmul.mubr.msk.f32.vlgmr.msra.gmra.mrb[0].mxu0 %vm110_vm2, %v35409_v53  ;;  %2327 = vmatprep.mubr.f32.mxu1 %v41212_v3 }
  0xc4   :  { %31468 = vmatpush1.msk.msra.mxu0 %vm113_vm1, %v35431_v60  ;;  %2256 = vmatprep.mubr.f32.mxu0 %v41212_v3  ;;  %v1990_v63 = vpop.permute.xlu1 %1989  ;;  %v1988_v19 = vpop.permute.xlu0 %1987 }
  0xc5   :  { %3986 = vrot.lane.b32.xlu1 %v34981_v15, %s34780_s27  ;;  %3984 = vrot.lane.b32.xlu0 %v34973_v14, %s34780_s27  ;;  %v35450_v20 = vsel %vm2003_vm5, %v1986_v51, %v1988_v19  ;;  %v35453_v28 = vsel %vm2003_vm5, %v1988_v19, %v1990_v63 }
  0xc6   :  { %41337 = vst [vmem:[#allocation2_spill] sm:$0xff] %v35453_v28  ;;  %31470 = vmatprep.subr.msk.mxu1 %vm113_vm1, %v35453_v28 }
  0xc7   :  { %31469 = vmatmul.mubr.msk.f32.vlgmr.msra.gmra.mrb[2].mxu0 %vm110_vm2, %v35409_v53  ;;  %31471 = vmatpush1.msk.msra.mxu1 %vm113_vm1, %v35450_v20 }
  0xc8   :  { %v1994_v36 = vpop.permute.xlu1 %1993  ;;  %31472 = vmatmul.mubr.msk.f32.vlgmr.msra.gmra.mrb[2].mxu1 %vm110_vm2, %v35409_v53  ;;  %v1992_v39 = vpop.permute.xlu0 %1991  ;;  %2398 = vmatprep.mubr.f32.mxu0 %v41212_v3 }
  0xc9   :  { %3990 = vrot.lane.b32.xlu1 %v35263_v55, %s34780_s27  ;;  %3988 = vrot.lane.b32.xlu0 %v34986_v16, %s34780_s27  ;;  %v35469_v47 = vsel %vm2003_vm5, %v1990_v63, %v1992_v39  ;;  %v35472_v48 = vsel %vm2003_vm5, %v1992_v39, %v1994_v36 }
  0xca   :  { %41338 = vst [vmem:[#allocation3_spill] sm:$0xff] %v35472_v48  ;;  %31473 = vmatprep.subr.msk.mxu0 %vm113_vm1, %v35472_v48  ;;  %2469 = vmatprep.mubr.f32.mxu1 %v41212_v3 }
  0xcb   :  { %31474 = vmatpush1.msk.msra.mxu0 %vm113_vm1, %v35469_v47 }
  0xcc   :  { %v1998_v54 = vpop.permute.xlu1 %1997  ;;  %31475 = vmatmul.mubr.msk.f32.vlgmr.msra.gmra.mrb[4].mxu0 %vm110_vm2, %v35409_v53  ;;  %v1996_v56 = vpop.permute.xlu0 %1995 }
  0xcd   :  { %4628 = vrot.lane.b32.xlu1 %v34898_v2, %s34782_s29  ;;  %4626 = vrot.lane.b32.xlu0 %v34912_v5, %s34782_s29  ;;  %v35486_v51 = vsel %vm2003_vm5, %v1994_v36, %v1996_v56  ;;  %v35489_v57 = vsel %vm2003_vm5, %v1996_v56, %v1998_v54 }
  0xce   :  { %41339 = vst [vmem:[#allocation4_spill] sm:$0xff] %v35486_v51  ;;  %41340 = vst [vmem:[#allocation5_spill] sm:$0xff] %v35489_v57  ;;  %31476 = vmatprep.subr.msk.mxu1 %vm113_vm1, %v35489_v57  ;;  %2540 = vmatprep.mubr.f32.mxu0 %v41212_v3 }
  0xcf   :  { %31477 = vmatpush1.msk.msra.mxu1 %vm113_vm1, %v35486_v51 }
  0xd0   :  { %v35496_v63 = vpop.permute.xlu1 %2001  ;;  %31478 = vmatmul.mubr.msk.f32.vlgmr.msra.gmra.mrb[4].mxu1 %vm110_vm2, %v35409_v53  ;;  %32827 = vmatprep.subr.mxu1 %v41212_v3  ;;  %v2000_v19 = vpop.permute.xlu0 %1999 }
  0xd1   :  { %41341 = vst [vmem:[#allocation6_spill] sm:$0xff] %v35496_v63  ;;  %4632 = vrot.lane.b32.xlu1 %v34888_v0, %s34782_s29  ;;  %4630 = vrot.lane.b32.xlu0 %v34908_v4, %s34782_s29  ;;  %v35506_v36 = vsel %vm2003_vm5, %v1998_v54, %v2000_v19  ;;  %v35510_v39 = vsel %vm2003_vm5, %v2000_v19, %v35496_v63 }
  0xd2   :  { %41342 = vst [vmem:[#allocation7_spill] sm:$0xff] %v35506_v36  ;;  %41343 = vst [vmem:[#allocation8_spill] sm:$0xff] %v35510_v39  ;;  %32828 = vmatpush3.msk.msra.mxu1 %vm113_vm1, %v35496_v63  ;;  %31479 = vmatprep.subr.msk.mxu0 %vm113_vm1, %v35510_v39 }
  0xd3   :  { %31480 = vmatpush1.msk.msra.mxu0 %vm113_vm1, %v35506_v36  ;;  %32829 = vmatprep.mubr.msk.f32.mxu1 %vm34779_vm3, %v41212_v3 }
  0xd4   :  { %v2639_v56 = vpop.permute.xlu1 %2638  ;;  %31481 = vmatmul.mubr.msk.f32.vlgmr.msra.gmra.mrb[6].mxu0 %vm110_vm2, %v35409_v53  ;;  %32830 = vmatmul.mubr.msk.f32.vlgmr.msra.gmra.mrb[6].mxu1 %vm110_vm2, %v35409_v53  ;;  %v2637_v54 = vpop.permute.xlu0 %2636 }
  0xd5   :  { %4622 = vrot.lane.b32.xlu1 %v34921_v6, %s34783_s30  ;;  %4624 = vrot.lane.b32.xlu0 %v34893_v1, %s34782_s29  ;;  %v35528_v19 = vsel %vm2664_vm6, %v2637_v54, %v2639_v56  ;;  %s34790_s30 = smov 63  }
  0xd6   :  { %41344 = vst [vmem:[#allocation9_spill] sm:$0xff] %v35528_v19  ;;  %31484 = vmatprep.subr.msk.mxu0 %vm113_vm1, %v35528_v19  ;;  %2846 = vmatprep.mubr.f32.mxu1 %v41212_v3 }
  0xd7   :  { %2775 = vmatprep.mubr.f32.mxu0 %v41212_v3 }
  0xd8   :  { %v2643_v39 = vpop.permute.xlu1 %2642  ;;  %v2641_v57 = vpop.permute.xlu0 %2640 }
  0xd9   :  { %4636 = vrot.lane.b32.xlu1 %v34934_v8, %s34782_s29  ;;  %4634 = vrot.lane.b32.xlu0 %v34929_v7, %s34782_s29  ;;  %v35539_v53 = vsel %vm2664_vm6, %v2639_v56, %v2641_v57  ;;  %v35542_v63 = vsel %vm2664_vm6, %v2641_v57, %v2643_v39  ;;  %v41347_v57 = vmov 0.0  }
  0xda   :  { %41345 = vst [vmem:[#allocation10_spill] sm:$0xff] %v35539_v53  ;;  %41346 = vst [vmem:[#allocation11_spill] sm:$0xff] %v35542_v63  ;;  %31487 = vmatprep.subr.msk.mxu1 %vm113_vm1, %v35542_v63 }
  0xdb   :  { %31488 = vmatpush1.msk.msra.mxu1 %vm113_vm1, %v35539_v53 }
  0xdc   :  { %v35548_v3 = vpop.permute.xlu1 %2632  ;;  %v2635_v19 = vpop.permute.xlu0 %2634 }
  0xdd   :  { %4640 = vrot.lane.b32.xlu1 %v34947_v10, %s34782_s29  ;;  %4638 = vrot.lane.b32.xlu0 %v34942_v9, %s34782_s29  ;;  %v2665_v56 = vsel %vm2664_vm6, %v2635_v19, %v2637_v54 }
  0xde   :  { %31489 = vmatmul.mubr.msk.f32.vlgmr.msra.gmra.mrb[0].mxu1 %vm110_vm2, %v35548_v3  ;;  %31485 = vmatpush1.msk.msra.mxu0 %vm113_vm1, %v2665_v56 }
  0xdf   :  { %31486 = vmatmul.mubr.msk.f32.vlgmr.msra.gmra.mrb[0].mxu0 %vm110_vm2, %v35548_v3  ;;  %2988 = vmatprep.mubr.f32.mxu1 %v41347_v57 }
  0xe0   :  { %v2647_v63 = vpop.permute.xlu1 %2646  ;;  %v2645_v53 = vpop.permute.xlu0 %2644  ;;  %2917 = vmatprep.mubr.f32.mxu0 %v41347_v57 }
  0xe1   :  { %4644 = vrot.lane.b32.xlu1 %v34960_v12, %s34782_s29  ;;  %4642 = vrot.lane.b32.xlu0 %v34955_v11, %s34782_s29  ;;  %v35567_v54 = vsel %vm2664_vm6, %v2643_v39, %v2645_v53  ;;  %v35570_v19 = vsel %vm2664_vm6, %v2645_v53, %v2647_v63 }
  0xe2   :  { %41348 = vst [vmem:[#allocation12_spill] sm:$0xff] %v35567_v54  ;;  %41349 = vst [vmem:[#allocation13_spill] sm:$0xff] %v35570_v19  ;;  %31490 = vmatprep.subr.msk.mxu0 %vm113_vm1, %v35570_v19 }
  0xe3   :  { %31491 = vmatpush1.msk.msra.mxu0 %vm113_vm1, %v35567_v54 }
  0xe4   :  { %v2651_v56 = vpop.permute.xlu1 %2650  ;;  %31492 = vmatmul.mubr.msk.f32.vlgmr.msra.gmra.mrb[2].mxu0 %vm110_vm2, %v35548_v3  ;;  %v2649_v36 = vpop.permute.xlu0 %2648 }
  0xe5   :  { %4648 = vrot.lane.b32.xlu1 %v34973_v14, %s34782_s29  ;;  %4646 = vrot.lane.b32.xlu0 %v34968_v13, %s34782_s29  ;;  %v35583_v39 = vsel %vm2664_vm6, %v2647_v63, %v2649_v36  ;;  %v35586_v53 = vsel %vm2664_vm6, %v2649_v36, %v2651_v56 }
  0xe6   :  { %41350 = vst [vmem:[#allocation14_spill] sm:$0xff] %v35583_v39  ;;  %41351 = vst [vmem:[#allocation15_spill] sm:$0xff] %v35586_v53  ;;  %31493 = vmatprep.subr.msk.mxu1 %vm113_vm1, %v35586_v53  ;;  %3059 = vmatprep.mubr.f32.mxu0 %v41347_v57 }
  0xe7   :  { %31494 = vmatpush1.msk.msra.mxu1 %vm113_vm1, %v35583_v39 }
  0xe8   :  { %v2655_v19 = vpop.permute.xlu1 %2654  ;;  %31495 = vmatmul.mubr.msk.f32.vlgmr.msra.gmra.mrb[2].mxu1 %vm110_vm2, %v35548_v3  ;;  %v2653_v54 = vpop.permute.xlu0 %2652 }
  0xe9   :  { %4652 = vrot.lane.b32.xlu1 %v34986_v16, %s34782_s29  ;;  %4650 = vrot.lane.b32.xlu0 %v34981_v15, %s34782_s29  ;;  %v35600_v63 = vsel %vm2664_vm6, %v2651_v56, %v2653_v54  ;;  %v35603_v36 = vsel %vm2664_vm6, %v2653_v54, %v2655_v19 }
  0xea   :  { %41352 = vst [vmem:[#allocation16_spill] sm:$0xff] %v35600_v63  ;;  %41353 = vst [vmem:[#allocation17_spill] sm:$0xff] %v35603_v36  ;;  %31496 = vmatprep.subr.msk.mxu0 %vm113_vm1, %v35603_v36  ;;  %3130 = vmatprep.mubr.f32.mxu1 %v41347_v57 }
  0xeb   :  { %31497 = vmatpush1.msk.msra.mxu0 %vm113_vm1, %v35600_v63 }
  0xec   :  { %v2659_v53 = vpop.permute.xlu1 %2658  ;;  %31498 = vmatmul.mubr.msk.f32.vlgmr.msra.gmra.mrb[4].mxu0 %vm110_vm2, %v35548_v3 }
  0xed   :  { %5290 = vrot.lane.b32.xlu1 %v34912_v5, %s34784_s12  ;;  %4654 = vrot.lane.b32.xlu0 %v35263_v55, %s34782_s29  ;;  %v2657_v54 = vpop.permute.xlu0 %2656  ;;  %s34788_s29 = smov 64  }
  0xee   :  { %v35617_v56 = vsel %vm2664_vm6, %v2655_v19, %v2657_v54  ;;  %v35620_v36 = vsel %vm2664_vm6, %v2657_v54, %v2659_v53  ;;  %3201 = vmatprep.mubr.f32.mxu0 %v41347_v57 }
  0xef   :  { %41354 = vst [vmem:[#allocation18_spill] sm:$0xff] %v35617_v56  ;;  %41355 = vst [vmem:[#allocation19_spill] sm:$0xff] %v35620_v36  ;;  %31499 = vmatprep.subr.msk.mxu1 %vm113_vm1, %v35620_v36 }
  0xf0   :  { %31500 = vmatpush1.msk.msra.mxu1 %vm113_vm1, %v35617_v56  ;;  %v35627_v63 = vpop.permute.xlu1 %2662 }
  0xf1   :  { %41356 = vst [vmem:[#allocation20_spill] sm:$0xff] %v35627_v63  ;;  %5294 = vrot.lane.b32.xlu1 %v34908_v4, %s34784_s12  ;;  %5292 = vrot.lane.b32.xlu0 %v34898_v2, %s34784_s12  ;;  %v2661_v19 = vpop.permute.xlu0 %2660 }
  0xf2   :  { %31501 = vmatmul.mubr.msk.f32.vlgmr.msra.gmra.mrb[4].mxu1 %vm110_vm2, %v35548_v3  ;;  %32832 = vmatprep.subr.mxu1 %v41347_v57  ;;  %v35637_v54 = vsel %vm2664_vm6, %v2659_v53, %v2661_v19  ;;  %v35641_v36 = vsel %vm2664_vm6, %v2661_v19, %v35627_v63 }
  0xf3   :  { %41357 = vst [vmem:[#allocation21_spill] sm:$0xff] %v35637_v54  ;;  %41358 = vst [vmem:[#allocation22_spill] sm:$0xff] %v35641_v36  ;;  %32833 = vmatpush3.msk.msra.mxu1 %vm113_vm1, %v35627_v63  ;;  %31502 = vmatprep.subr.msk.mxu0 %vm113_vm1, %v35641_v36 }
  0xf4   :  { %31503 = vmatpush1.msk.msra.mxu0 %vm113_vm1, %v35637_v54  ;;  %32834 = vmatprep.mubr.msk.f32.mxu1 %vm34779_vm3, %v41347_v57  ;;  %v3301_v56 = vpop.permute.xlu1 %3300 }
  0xf5   :  { %5288 = vrot.lane.b32.xlu1 %v34893_v1, %s34784_s12  ;;  %5296 = vrot.lane.b32.xlu0 %v34888_v0, %s34784_s12  ;;  %v3299_v53 = vpop.permute.xlu0 %3298 }
  0xf6   :  { %31504 = vmatmul.mubr.msk.f32.vlgmr.msra.gmra.mrb[6].mxu0 %vm110_vm2, %v35548_v3  ;;  %32835 = vmatmul.mubr.msk.f32.vlgmr.msra.gmra.mrb[6].mxu1 %vm110_vm2, %v35548_v3  ;;  %v3330_v19 = vsel %vm3328_vm7, %v3299_v53, %v3301_v56 }
  0xf7   :  { %31507 = vmatprep.subr.msk.mxu0 %vm113_vm1, %v3330_v19  ;;  %3511 = vmatprep.mubr.f32.mxu1 %v41347_v57 }
  0xf8   :  { %v3305_v36 = vpop.permute.xlu1 %3304  ;;  %3440 = vmatprep.mubr.f32.mxu0 %v41347_v57 }
  0xf9   :  { %5298 = vrot.lane.b32.xlu1 %v34929_v7, %s34784_s12  ;;  %5286 = vrot.lane.b32.xlu0 %v34921_v6, %s34785_s13  ;;  %v3303_v0 = vpop.permute.xlu0 %3302 }
  0xfa   :  { %v3331_v1 = vsel %vm3328_vm7, %v3301_v56, %v3303_v0  ;;  %v3332_v3 = vsel %vm3328_vm7, %v3303_v0, %v3305_v36 }
  0xfb   :  { %31510 = vmatprep.subr.msk.mxu1 %vm113_vm1, %v3332_v3 }
  0xfc   :  { %31511 = vmatpush1.msk.msra.mxu1 %vm113_vm1, %v3331_v1  ;;  %v35671_v19 = vpop.permute.xlu1 %3293 }
  0xfd   :  { %5302 = vrot.lane.b32.xlu1 %v34942_v9, %s34784_s12  ;;  %5300 = vrot.lane.b32.xlu0 %v34934_v8, %s34784_s12  ;;  %v3297_v63 = vpop.permute.xlu0 %3296 }
  0xfe   :  { %v3329_v54 = vsel %vm3328_vm7, %v3297_v63, %v3299_v53  ;;  %31512 = vmatmul.mubr.msk.f32.vlgmr.msra.gmra.mrb[0].mxu1 %vm110_vm2, %v35671_v19 }
  0xff   :  { %31508 = vmatpush1.msk.msra.mxu0 %vm113_vm1, %v3329_v54  ;;  %3653 = vmatprep.mubr.f32.mxu1 %v41347_v57 }
 0x100   :  { %31509 = vmatmul.mubr.msk.f32.vlgmr.msra.gmra.mrb[0].mxu0 %vm110_vm2, %v35671_v19  ;;  %v3309_v56 = vpop.permute.xlu1 %3308 }
 0x101   :  { %5306 = vrot.lane.b32.xlu1 %v34955_v11, %s34784_s12  ;;  %5304 = vrot.lane.b32.xlu0 %v34947_v10, %s34784_s12  ;;  %v3307_v0 = vpop.permute.xlu0 %3306 }
 0x102   :  { %v3333_v63 = vsel %vm3328_vm7, %v3305_v36, %v3307_v0  ;;  %v3334_v53 = vsel %vm3328_vm7, %v3307_v0, %v3309_v56  ;;  %3582 = vmatprep.mubr.f32.mxu0 %v41347_v57 }
 0x103   :  { %31513 = vmatprep.subr.msk.mxu0 %vm113_vm1, %v3334_v53 }
 0x104   :  { %31514 = vmatpush1.msk.msra.mxu0 %vm113_vm1, %v3333_v63  ;;  %v3313_v54 = vpop.permute.xlu1 %3312 }
 0x105   :  { %5310 = vrot.lane.b32.xlu1 %v34968_v13, %s34784_s12  ;;  %5308 = vrot.lane.b32.xlu0 %v34960_v12, %s34784_s12  ;;  %v3311_v1 = vpop.permute.xlu0 %3310 }
 0x106   :  { %31515 = vmatmul.mubr.msk.f32.vlgmr.msra.gmra.mrb[2].mxu0 %vm110_vm2, %v35671_v19  ;;  %v3335_v10 = vsel %vm3328_vm7, %v3309_v56, %v3311_v1  ;;  %v3336_v36 = vsel %vm3328_vm7, %v3311_v1, %v3313_v54 }
 0x107   :  { %31516 = vmatprep.subr.msk.mxu1 %vm113_vm1, %v3336_v36  ;;  %3724 = vmatprep.mubr.f32.mxu0 %v41347_v57 }
 0x108   :  { %31517 = vmatpush1.msk.msra.mxu1 %vm113_vm1, %v3335_v10  ;;  %v3317_v3 = vpop.permute.xlu1 %3316 }
 0x109   :  { %5314 = vrot.lane.b32.xlu1 %v34981_v15, %s34784_s12  ;;  %5312 = vrot.lane.b32.xlu0 %v34973_v14, %s34784_s12  ;;  %v3315_v12 = vpop.permute.xlu0 %3314 }
 0x10a   :  { %31518 = vmatmul.mubr.msk.f32.vlgmr.msra.gmra.mrb[2].mxu1 %vm110_vm2, %v35671_v19  ;;  %v3337_v56 = vsel %vm3328_vm7, %v3313_v54, %v3315_v12  ;;  %v3338_v0 = vsel %vm3328_vm7, %v3315_v12, %v3317_v3 }
 0x10b   :  { %31519 = vmatprep.subr.msk.mxu0 %vm113_vm1, %v3338_v0  ;;  %3795 = vmatprep.mubr.f32.mxu1 %v41347_v57 }
 0x10c   :  { %31520 = vmatpush1.msk.msra.mxu0 %vm113_vm1, %v3337_v56  ;;  %v3321_v63 = vpop.permute.xlu1 %3320 }
 0x10d   :  { %5318 = vrot.lane.b32.xlu1 %v35263_v55, %s34784_s12  ;;  %5316 = vrot.lane.b32.xlu0 %v34986_v16, %s34784_s12  ;;  %v3319_v14 = vpop.permute.xlu0 %3318  ;;  %s34791_s12 = smov 62  }
 0x10e   :  { %31521 = vmatmul.mubr.msk.f32.vlgmr.msra.gmra.mrb[4].mxu0 %vm110_vm2, %v35671_v19  ;;  %v3339_v53 = vsel %vm3328_vm7, %v3317_v3, %v3319_v14  ;;  %v3340_v54 = vsel %vm3328_vm7, %v3319_v14, %v3321_v63  ;;  %v35755_v3 = vld [vmem:[%s41197_s0] sm:$0x77] }
 0x10f   :  { %31522 = vmatprep.subr.msk.mxu1 %vm113_vm1, %v3340_v54  ;;  %3866 = vmatprep.mubr.f32.mxu0 %v41347_v57 }
 0x110   :  { %31523 = vmatpush1.msk.msra.mxu1 %vm113_vm1, %v3339_v53  ;;  %v35773_v53 = vld [vmem:[%s41197_s0 + $0x20] sm:$0x77] }
 0x111   :  { %5956 = vrot.lane.b32.xlu1 %v34898_v2, %s34786_s14  ;;  %5954 = vrot.lane.b32.xlu0 %v34912_v5, %s34786_s14  ;;  %v35741_v2 = vld [vmem:[%s41197_s0 + $0x10] sm:$0x77] }
 0x112   :  { %v3325_v16 = vpop.permute.xlu1 %3324  ;;  %31524 = vmatmul.mubr.msk.f32.vlgmr.msra.gmra.mrb[4].mxu1 %vm110_vm2, %v35671_v19  ;;  %v3323_v1 = vpop.permute.xlu0 %3322  ;;  %32837 = vmatprep.subr.mxu1 %v41347_v57 }
 0x113   :  { %v3341_v10 = vsel %vm3328_vm7, %v3321_v63, %v3323_v1  ;;  %v3342_v36 = vsel %vm3328_vm7, %v3323_v1, %v3325_v16  ;;  %32839 = vmatprep.mubr.msk.f32.mxu1 %vm34779_vm3, %v41347_v57 }
 0x114   :  { %31525 = vmatprep.subr.msk.mxu0 %vm113_vm1, %v3342_v36 }
 0x115   :  { %5960 = vrot.lane.b32.xlu1 %v35741_v2, %s34786_s14  ;;  %5958 = vrot.lane.b32.xlu0 %v34908_v4, %s34786_s14 }
 0x116   :  { %31526 = vmatpush1.msk.msra.mxu0 %vm113_vm1, %v3341_v10  ;;  %v35787_v10 = vld [vmem:[%s41197_s0 + $0x28] sm:$0x77] }
 0x117   :  { %31527 = vmatmul.mubr.msk.f32.vlgmr.msra.gmra.mrb[6].mxu0 %vm110_vm2, %v35671_v19 }
 0x118   :  { %4104 = vmatprep.mubr.f32.mxu0 %v41347_v57 }
 0x119   :  { %5950 = vrot.lane.b32.xlu1 %v34921_v6, %s34787_s17  ;;  %5952 = vrot.lane.b32.xlu0 %v35755_v3, %s34786_s14  ;;  %v3963_v12 = vpop.permute.xlu1 %3962  ;;  %v3327_v56 = vpop.permute.xlu0 %3326  ;;  %s34789_s17 = smov 98  }
 0x11a   :  { %v3343_v0 = vsel %vm3328_vm7, %v3325_v16, %v3327_v56  ;;  %v35805_v56 = vld [vmem:[%s41197_s0 + $0x30] sm:$0x77] }
 0x11b   :  { %32838 = vmatpush3.msk.msra.mxu1 %vm113_vm1, %v3343_v0 }
 0x11c   :  { %32840 = vmatmul.mubr.msk.f32.vlgmr.msra.gmra.mrb[6].mxu1 %vm110_vm2, %v35671_v19 }
 0x11d   :  { %5964 = vrot.lane.b32.xlu1 %v34934_v8, %s34786_s14  ;;  %5962 = vrot.lane.b32.xlu0 %v34929_v7, %s34786_s14  ;;  %v3967_v6 = vpop.permute.xlu1 %3966 }
 0x11e   :  { %v3965_v63 = vpop.permute.xlu0 %3964  ;;  %4175 = vmatprep.mubr.f32.mxu1 %v41347_v57 }
 0x11f   :  { %v3994_v14 = vsel %vm3992_vm8, %v3963_v12, %v3965_v63  ;;  %v3995_v1 = vsel %vm3992_vm8, %v3965_v63, %v3967_v6 }
 0x120   :  { %31530 = vmatprep.subr.msk.mxu0 %vm113_vm1, %v3994_v14  ;;  %v35815_v14 = vld [vmem:[%s41197_s0 + $0x38] sm:$0x77] }
 0x121   :  { %5968 = vrot.lane.b32.xlu1 %v35773_v53, %s34786_s14  ;;  %5966 = vrot.lane.b32.xlu0 %v34942_v9, %s34786_s14 }
 0x122   :  { %v3961_v8 = vpop.permute.xlu1 %3960  ;;  %v3969_v19 = vpop.permute.xlu0 %3968 }
 0x123   :  { %v3993_v54 = vsel %vm3992_vm8, %v3961_v8, %v3963_v12  ;;  %v3996_v16 = vsel %vm3992_vm8, %v3967_v6, %v3969_v19 }
 0x124   :  { %31531 = vmatpush1.msk.msra.mxu0 %vm113_vm1, %v3993_v54  ;;  %31533 = vmatprep.subr.msk.mxu1 %vm113_vm1, %v3996_v16 }
 0x125   :  { %5972 = vrot.lane.b32.xlu1 %v35787_v10, %s34786_s14  ;;  %5970 = vrot.lane.b32.xlu0 %v34955_v11, %s34786_s14 }
 0x126   :  { %31534 = vmatpush1.msk.msra.mxu1 %vm113_vm1, %v3995_v1  ;;  %v3971_v36 = vpop.permute.xlu1 %3970  ;;  %v35794_v12 = vpop.permute.xlu0 %3958 }
 0x127   :  { %31532 = vmatmul.mubr.msk.f32.vlgmr.msra.gmra.mrb[0].mxu0 %vm110_vm2, %v35794_v12  ;;  %31535 = vmatmul.mubr.msk.f32.vlgmr.msra.gmra.mrb[0].mxu1 %vm110_vm2, %v35794_v12  ;;  %v3997_v8 = vsel %vm3992_vm8, %v3969_v19, %v3971_v36 }
 0x128   :  { %4246 = vmatprep.mubr.f32.mxu0 %v41347_v57  ;;  %4317 = vmatprep.mubr.f32.mxu1 %v41347_v57 }
 0x129   :  { %5976 = vrot.lane.b32.xlu1 %v35805_v56, %s34786_s14  ;;  %5974 = vrot.lane.b32.xlu0 %v34968_v13, %s34786_s14 }
 0x12a   :  { %v3975_v0 = vpop.permute.xlu1 %3974 }
 0x12b   :  { %v3973_v6 = vpop.permute.xlu0 %3972 }
 0x12c   :  { %v3998_v63 = vsel %vm3992_vm8, %v3971_v36, %v3973_v6  ;;  %v3999_v19 = vsel %vm3992_vm8, %v3973_v6, %v3975_v0 }
 0x12d   :  { %5980 = vrot.lane.b32.xlu1 %v35815_v14, %s34786_s14  ;;  %5978 = vrot.lane.b32.xlu0 %v34981_v15, %s34786_s14 }
 0x12e   :  { %31536 = vmatprep.subr.msk.mxu0 %vm113_vm1, %v3998_v63 }
 0x12f   :  { %31537 = vmatpush1.msk.msra.mxu0 %vm113_vm1, %v3997_v8  ;;  %v3979_v54 = vpop.permute.xlu1 %3978  ;;  %v3977_v16 = vpop.permute.xlu0 %3976 }
 0x130   :  { %31538 = vmatmul.mubr.msk.f32.vlgmr.msra.gmra.mrb[2].mxu0 %vm110_vm2, %v35794_v12  ;;  %v4000_v1 = vsel %vm3992_vm8, %v3975_v0, %v3977_v16  ;;  %v35843_v0 = vld [vmem:[%s41197_s0 + $0x8] sm:$0x77]  ;;  %v4001_v6 = vsel %vm3992_vm8, %v3977_v16, %v3979_v54 }
 0x131   :  { %6618 = vrot.lane.b32.xlu1 %v34912_v5, %s34788_s29  ;;  %5982 = vrot.lane.b32.xlu0 %v35263_v55, %s34786_s14 }
 0x132   :  { %31539 = vmatprep.subr.msk.mxu1 %vm113_vm1, %v4000_v1  ;;  %4388 = vmatprep.mubr.f32.mxu0 %v41347_v57 }
 0x133   :  { %31540 = vmatpush1.msk.msra.mxu1 %vm113_vm1, %v3999_v19  ;;  %v3983_v36 = vpop.permute.xlu1 %3982  ;;  %v3981_v63 = vpop.permute.xlu0 %3980 }
 0x134   :  { %31541 = vmatmul.mubr.msk.f32.vlgmr.msra.gmra.mrb[2].mxu1 %vm110_vm2, %v35794_v12  ;;  %v4002_v8 = vsel %vm3992_vm8, %v3979_v54, %v3981_v63  ;;  %v4003_v54 = vsel %vm3992_vm8, %v3981_v63, %v3983_v36 }
 0x135   :  { %6622 = vrot.lane.b32.xlu1 %v34908_v4, %s34788_s29  ;;  %6620 = vrot.lane.b32.xlu0 %v35843_v0, %s34788_s29 }
 0x136   :  { %31542 = vmatprep.subr.msk.mxu0 %vm113_vm1, %v4002_v8  ;;  %4459 = vmatprep.mubr.f32.mxu1 %v41347_v57 }
 0x137   :  { %31543 = vmatpush1.msk.msra.mxu0 %vm113_vm1, %v4001_v6  ;;  %v3987_v1 = vpop.permute.xlu1 %3986  ;;  %v3985_v19 = vpop.permute.xlu0 %3984 }
 0x138   :  { %31544 = vmatmul.mubr.msk.f32.vlgmr.msra.gmra.mrb[4].mxu0 %vm110_vm2, %v35794_v12  ;;  %v4004_v39 = vsel %vm3992_vm8, %v3983_v36, %v3985_v19  ;;  %v4005_v36 = vsel %vm3992_vm8, %v3985_v19, %v3987_v1 }
 0x139   :  { %6616 = vrot.lane.b32.xlu1 %v35755_v3, %s34788_s29  ;;  %6624 = vrot.lane.b32.xlu0 %v35741_v2, %s34788_s29 }
 0x13a   :  { %31545 = vmatprep.subr.msk.mxu1 %vm113_vm1, %v4004_v39  ;;  %4530 = vmatprep.mubr.f32.mxu0 %v41347_v57  ;;  %v35872_v39 = vld [vmem:[%s41198_s1] sm:$0x3f] }
 0x13b   :  { %31546 = vmatpush1.msk.msra.mxu1 %vm113_vm1, %v4003_v54  ;;  %v3991_v16 = vpop.permute.xlu1 %3990  ;;  %v3989_v8 = vpop.permute.xlu0 %3988 }
 0x13c   :  { %31547 = vmatmul.mubr.msk.f32.vlgmr.msra.gmra.mrb[4].mxu1 %vm110_vm2, %v35794_v12  ;;  %v4007_v6 = vsel %vm3992_vm8, %v3989_v8, %v3991_v16  ;;  %32842 = vmatprep.subr.mxu1 %v41347_v57  ;;  %v4006_v48 = vsel %vm3992_vm8, %v3987_v1, %v3989_v8 }
 0x13d   :  { %6626 = vrot.lane.b32.xlu1 %v34929_v7, %s34788_s29  ;;  %6614 = vrot.lane.b32.xlu0 %v35872_v39, %s34789_s17 }
 0x13e   :  { %31548 = vmatprep.subr.msk.mxu0 %vm113_vm1, %v4006_v48  ;;  %32843 = vmatpush3.msk.msra.mxu1 %vm113_vm1, %v4007_v6  ;;  %v35892_v48 = vld [vmem:[%s41197_s0 + $0x18] sm:$0x77] }
 0x13f   :  { %31549 = vmatpush1.msk.msra.mxu0 %vm113_vm1, %v4005_v36  ;;  %32844 = vmatprep.mubr.msk.f32.mxu1 %vm34779_vm3, %v41347_v57  ;;  %v4629_v63 = vpop.permute.xlu1 %4628  ;;  %v4627_v54 = vpop.permute.xlu0 %4626 }
 0x140   :  { %31550 = vmatmul.mubr.msk.f32.vlgmr.msra.gmra.mrb[6].mxu0 %vm110_vm2, %v35794_v12  ;;  %32845 = vmatmul.mubr.msk.f32.vlgmr.msra.gmra.mrb[6].mxu1 %vm110_vm2, %v35794_v12  ;;  %v4658_v16 = vsel %vm4656_vm9, %v4627_v54, %v4629_v63 }
 0x141   :  { %6630 = vrot.lane.b32.xlu1 %v34942_v9, %s34788_s29  ;;  %6628 = vrot.lane.b32.xlu0 %v35892_v48, %s34788_s29 }
 0x142   :  { %31553 = vmatprep.subr.msk.mxu0 %vm113_vm1, %v4658_v16  ;;  %4839 = vmatprep.mubr.f32.mxu1 %v41347_v57 }
 0x143   :  { %v4633_v1 = vpop.permute.xlu1 %4632  ;;  %v4631_v19 = vpop.permute.xlu0 %4630  ;;  %4768 = vmatprep.mubr.f32.mxu0 %v41347_v57 }
 0x144   :  { %v4659_v12 = vsel %vm4656_vm9, %v4629_v63, %v4631_v19  ;;  %v4660_v8 = vsel %vm4656_vm9, %v4631_v19, %v4633_v1 }
 0x145   :  { %6634 = vrot.lane.b32.xlu1 %v34955_v11, %s34788_s29  ;;  %6632 = vrot.lane.b32.xlu0 %v35773_v53, %s34788_s29 }
 0x146   :  { %31556 = vmatprep.subr.msk.mxu1 %vm113_vm1, %v4660_v8 }
 0x147   :  { %31557 = vmatpush1.msk.msra.mxu1 %vm113_vm1, %v4659_v12  ;;  %v35907_v6 = vpop.permute.xlu1 %4622  ;;  %v4625_v36 = vpop.permute.xlu0 %4624 }
 0x148   :  { %v4657_v16 = vsel %vm4656_vm9, %v4625_v36, %v4627_v54  ;;  %31558 = vmatmul.mubr.msk.f32.vlgmr.msra.gmra.mrb[0].mxu1 %vm110_vm2, %v35907_v6 }
 0x149   :  { %6638 = vrot.lane.b32.xlu1 %v34968_v13, %s34788_s29  ;;  %6636 = vrot.lane.b32.xlu0 %v35787_v10, %s34788_s29 }
 0x14a   :  { %31554 = vmatpush1.msk.msra.mxu0 %vm113_vm1, %v4657_v16  ;;  %4981 = vmatprep.mubr.f32.mxu1 %v41347_v57 }
 0x14b   :  { %31555 = vmatmul.mubr.msk.f32.vlgmr.msra.gmra.mrb[0].mxu0 %vm110_vm2, %v35907_v6  ;;  %v4637_v63 = vpop.permute.xlu1 %4636  ;;  %v4635_v19 = vpop.permute.xlu0 %4634 }
 0x14c   :  { %v4661_v54 = vsel %vm4656_vm9, %v4633_v1, %v4635_v19  ;;  %v4662_v12 = vsel %vm4656_vm9, %v4635_v19, %v4637_v63  ;;  %4910 = vmatprep.mubr.f32.mxu0 %v41347_v57 }
 0x14d   :  { %6642 = vrot.lane.b32.xlu1 %v34981_v15, %s34788_s29  ;;  %6640 = vrot.lane.b32.xlu0 %v35805_v56, %s34788_s29 }
 0x14e   :  { %31559 = vmatprep.subr.msk.mxu0 %vm113_vm1, %v4662_v12 }
 0x14f   :  { %31560 = vmatpush1.msk.msra.mxu0 %vm113_vm1, %v4661_v54  ;;  %v4641_v8 = vpop.permute.xlu1 %4640  ;;  %v4639_v36 = vpop.permute.xlu0 %4638 }
 0x150   :  { %31561 = vmatmul.mubr.msk.f32.vlgmr.msra.gmra.mrb[2].mxu0 %vm110_vm2, %v35907_v6  ;;  %v4663_v1 = vsel %vm4656_vm9, %v4637_v63, %v4639_v36  ;;  %v4664_v16 = vsel %vm4656_vm9, %v4639_v36, %v4641_v8 }
 0x151   :  { %6646 = vrot.lane.b32.xlu1 %v35263_v55, %s34788_s29  ;;  %6644 = vrot.lane.b32.xlu0 %v35815_v14, %s34788_s29 }
 0x152   :  { %31562 = vmatprep.subr.msk.mxu1 %vm113_vm1, %v4664_v16  ;;  %5052 = vmatprep.mubr.f32.mxu0 %v41347_v57 }
 0x153   :  { %31563 = vmatpush1.msk.msra.mxu1 %vm113_vm1, %v4663_v1  ;;  %v4645_v19 = vpop.permute.xlu1 %4644  ;;  %v4643_v54 = vpop.permute.xlu0 %4642 }
 0x154   :  { %31564 = vmatmul.mubr.msk.f32.vlgmr.msra.gmra.mrb[2].mxu1 %vm110_vm2, %v35907_v6  ;;  %v4665_v63 = vsel %vm4656_vm9, %v4641_v8, %v4643_v54  ;;  %v4666_v12 = vsel %vm4656_vm9, %v4643_v54, %v4645_v19 }
 0x155   :  { %7284 = vrot.lane.b32.xlu1 %v35843_v0, %s34790_s30  ;;  %7282 = vrot.lane.b32.xlu0 %v34912_v5, %s34790_s30 }
 0x156   :  { %31565 = vmatprep.subr.msk.mxu0 %vm113_vm1, %v4666_v12  ;;  %5123 = vmatprep.mubr.f32.mxu1 %v41347_v57 }
 0x157   :  { %31566 = vmatpush1.msk.msra.mxu0 %vm113_vm1, %v4665_v63  ;;  %v4649_v36 = vpop.permute.xlu1 %4648  ;;  %v4647_v1 = vpop.permute.xlu0 %4646 }
 0x158   :  { %31567 = vmatmul.mubr.msk.f32.vlgmr.msra.gmra.mrb[4].mxu0 %vm110_vm2, %v35907_v6  ;;  %v4667_v8 = vsel %vm4656_vm9, %v4645_v19, %v4647_v1  ;;  %v4668_v16 = vsel %vm4656_vm9, %v4647_v1, %v4649_v36 }
 0x159   :  { %7288 = vrot.lane.b32.xlu1 %v35741_v2, %s34790_s30  ;;  %7286 = vrot.lane.b32.xlu0 %v34908_v4, %s34790_s30 }
 0x15a   :  { %31568 = vmatprep.subr.msk.mxu1 %vm113_vm1, %v4668_v16  ;;  %5194 = vmatprep.mubr.f32.mxu0 %v41347_v57 }
 0x15b   :  { %31569 = vmatpush1.msk.msra.mxu1 %vm113_vm1, %v4667_v8  ;;  %v4653_v54 = vpop.permute.xlu1 %4652  ;;  %v4651_v63 = vpop.permute.xlu0 %4650 }
 0x15c   :  { %31570 = vmatmul.mubr.msk.f32.vlgmr.msra.gmra.mrb[4].mxu1 %vm110_vm2, %v35907_v6  ;;  %v4669_v19 = vsel %vm4656_vm9, %v4649_v36, %v4651_v63  ;;  %v4670_v12 = vsel %vm4656_vm9, %v4651_v63, %v4653_v54  ;;  %32847 = vmatprep.subr.mxu1 %v41347_v57 }
 0x15d   :  { %7278 = vrot.lane.b32.xlu1 %v35872_v39, %s34780_s27  ;;  %7280 = vrot.lane.b32.xlu0 %v35755_v3, %s34790_s30 }
 0x15e   :  { %31571 = vmatprep.subr.msk.mxu0 %vm113_vm1, %v4670_v12  ;;  %32849 = vmatprep.mubr.msk.f32.mxu1 %vm34779_vm3, %v41347_v57 }
 0x15f   :  { %31572 = vmatpush1.msk.msra.mxu0 %vm113_vm1, %v4669_v19  ;;  %v5291_v1 = vpop.permute.xlu1 %5290  ;;  %v4655_v8 = vpop.permute.xlu0 %4654 }
 0x160   :  { %31573 = vmatmul.mubr.msk.f32.vlgmr.msra.gmra.mrb[6].mxu0 %vm110_vm2, %v35907_v6  ;;  %v4671_v36 = vsel %vm4656_vm9, %v4653_v54, %v4655_v8  ;;  %vm9304_vm9 = vcmask 490496  }
 0x161   :  { %7292 = vrot.lane.b32.xlu1 %v35892_v48, %s34790_s30  ;;  %7290 = vrot.lane.b32.xlu0 %v34929_v7, %s34790_s30 }
 0x162   :  { %32848 = vmatpush3.msk.msra.mxu1 %vm113_vm1, %v4671_v36  ;;  %5432 = vmatprep.mubr.f32.mxu0 %v41347_v57 }
 0x163   :  { %32850 = vmatmul.mubr.msk.f32.vlgmr.msra.gmra.mrb[6].mxu1 %vm110_vm2, %v35907_v6  ;;  %v5295_v16 = vpop.permute.xlu1 %5294  ;;  %v5293_v63 = vpop.permute.xlu0 %5292 }
 0x164   :  { %v5322_v19 = vsel %vm5320_vm10, %v5291_v1, %v5293_v63  ;;  %5503 = vmatprep.mubr.f32.mxu1 %v41347_v57  ;;  %v5323_v36 = vsel %vm5320_vm10, %v5293_v63, %v5295_v16 }
 0x165   :  { %7296 = vrot.lane.b32.xlu1 %v35773_v53, %s34790_s30  ;;  %7294 = vrot.lane.b32.xlu0 %v34942_v9, %s34790_s30 }
 0x166   :  { %31576 = vmatprep.subr.msk.mxu0 %vm113_vm1, %v5322_v19 }
 0x167   :  { %v5289_v54 = vpop.permute.xlu1 %5288  ;;  %v5297_v12 = vpop.permute.xlu0 %5296 }
 0x168   :  { %v5321_v8 = vsel %vm5320_vm10, %v5289_v54, %v5291_v1  ;;  %v5324_v6 = vsel %vm5320_vm10, %v5295_v16, %v5297_v12 }
 0x169   :  { %7300 = vrot.lane.b32.xlu1 %v35787_v10, %s34790_s30  ;;  %7298 = vrot.lane.b32.xlu0 %v34955_v11, %s34790_s30 }
 0x16a   :  { %31577 = vmatpush1.msk.msra.mxu0 %vm113_vm1, %v5321_v8  ;;  %31579 = vmatprep.subr.msk.mxu1 %vm113_vm1, %v5324_v6 }
 0x16b   :  { %31580 = vmatpush1.msk.msra.mxu1 %vm113_vm1, %v5323_v36  ;;  %v5299_v19 = vpop.permute.xlu1 %5298  ;;  %v36003_v28 = vpop.permute.xlu0 %5286 }
 0x16c   :  { %31578 = vmatmul.mubr.msk.f32.vlgmr.msra.gmra.mrb[0].mxu0 %vm110_vm2, %v36003_v28  ;;  %31581 = vmatmul.mubr.msk.f32.vlgmr.msra.gmra.mrb[0].mxu1 %vm110_vm2, %v36003_v28  ;;  %v5325_v54 = vsel %vm5320_vm10, %v5297_v12, %v5299_v19 }
 0x16d   :  { %7304 = vrot.lane.b32.xlu1 %v35805_v56, %s34790_s30  ;;  %7302 = vrot.lane.b32.xlu0 %v34968_v13, %s34790_s30 }
 0x16e   :  { %5574 = vmatprep.mubr.f32.mxu0 %v41347_v57  ;;  %5645 = vmatprep.mubr.f32.mxu1 %v41347_v57 }
 0x16f   :  { %v5303_v1 = vpop.permute.xlu1 %5302  ;;  %v5301_v16 = vpop.permute.xlu0 %5300 }
 0x170   :  { %v5326_v63 = vsel %vm5320_vm10, %v5299_v19, %v5301_v16  ;;  %v5327_v12 = vsel %vm5320_vm10, %v5301_v16, %v5303_v1 }
 0x171   :  { %7308 = vrot.lane.b32.xlu1 %v35815_v14, %s34790_s30  ;;  %7306 = vrot.lane.b32.xlu0 %v34981_v15, %s34790_s30 }
 0x172   :  { %31582 = vmatprep.subr.msk.mxu0 %vm113_vm1, %v5326_v63 }
 0x173   :  { %31583 = vmatpush1.msk.msra.mxu0 %vm113_vm1, %v5325_v54  ;;  %v5307_v8 = vpop.permute.xlu1 %5306  ;;  %v5305_v6 = vpop.permute.xlu0 %5304 }
 0x174   :  { %31584 = vmatmul.mubr.msk.f32.vlgmr.msra.gmra.mrb[2].mxu0 %vm110_vm2, %v36003_v28  ;;  %v5328_v36 = vsel %vm5320_vm10, %v5303_v1, %v5305_v6  ;;  %v5329_v1 = vsel %vm5320_vm10, %v5305_v6, %v5307_v8 }
 0x175   :  { %7946 = vrot.lane.b32.xlu1 %v34912_v5, %s34791_s12  ;;  %7310 = vrot.lane.b32.xlu0 %v35263_v55, %s34790_s30  ;;  %s41232_s30 = smov 32  }
 0x176   :  { %31585 = vmatprep.subr.msk.mxu1 %vm113_vm1, %v5328_v36  ;;  %5716 = vmatprep.mubr.f32.mxu0 %v41347_v57 }
 0x177   :  { %31586 = vmatpush1.msk.msra.mxu1 %vm113_vm1, %v5327_v12  ;;  %v5311_v19 = vpop.permute.xlu1 %5310  ;;  %v5309_v63 = vpop.permute.xlu0 %5308 }
 0x178   :  { %31587 = vmatmul.mubr.msk.f32.vlgmr.msra.gmra.mrb[2].mxu1 %vm110_vm2, %v36003_v28  ;;  %v5330_v54 = vsel %vm5320_vm10, %v5307_v8, %v5309_v63  ;;  %v5331_v8 = vsel %vm5320_vm10, %v5309_v63, %v5311_v19 }
 0x179   :  { %7950 = vrot.lane.b32.xlu1 %v34908_v4, %s34791_s12  ;;  %7948 = vrot.lane.b32.xlu0 %v35843_v0, %s34791_s12 }
 0x17a   :  { %31588 = vmatprep.subr.msk.mxu0 %vm113_vm1, %v5330_v54  ;;  %5787 = vmatprep.mubr.f32.mxu1 %v41347_v57 }
 0x17b   :  { %31589 = vmatpush1.msk.msra.mxu0 %vm113_vm1, %v5329_v1  ;;  %v5315_v16 = vpop.permute.xlu1 %5314  ;;  %v5313_v36 = vpop.permute.xlu0 %5312 }
 0x17c   :  { %31590 = vmatmul.mubr.msk.f32.vlgmr.msra.gmra.mrb[4].mxu0 %vm110_vm2, %v36003_v28  ;;  %v5332_v12 = vsel %vm5320_vm10, %v5311_v19, %v5313_v36  ;;  %v5333_v19 = vsel %vm5320_vm10, %v5313_v36, %v5315_v16 }
 0x17d   :  { %7944 = vrot.lane.b32.xlu1 %v35755_v3, %s34791_s12  ;;  %7952 = vrot.lane.b32.xlu0 %v35741_v2, %s34791_s12 }
 0x17e   :  { %31591 = vmatprep.subr.msk.mxu1 %vm113_vm1, %v5332_v12  ;;  %5858 = vmatprep.mubr.f32.mxu0 %v41347_v57 }
 0x17f   :  { %31592 = vmatpush1.msk.msra.mxu1 %vm113_vm1, %v5331_v8  ;;  %v5319_v6 = vpop.permute.xlu1 %5318  ;;  %v5317_v54 = vpop.permute.xlu0 %5316 }
 0x180   :  { %31593 = vmatmul.mubr.msk.f32.vlgmr.msra.gmra.mrb[4].mxu1 %vm110_vm2, %v36003_v28  ;;  %v5335_v1 = vsel %vm5320_vm10, %v5317_v54, %v5319_v6  ;;  %32852 = vmatprep.subr.mxu1 %v41347_v57  ;;  %v5334_v51 = vsel %vm5320_vm10, %v5315_v16, %v5317_v54  ;;  %vm9968_vm10 = vcmask 261120  }
 0x181   :  { %7954 = vrot.lane.b32.xlu1 %v34929_v7, %s34791_s12  ;;  %7942 = vrot.lane.b32.xlu0 %v35872_v39, %s34786_s14 }
 0x182   :  { %31594 = vmatprep.subr.msk.mxu0 %vm113_vm1, %v5334_v51  ;;  %32853 = vmatpush3.msk.msra.mxu1 %vm113_vm1, %v5335_v1 }
 0x183   :  { %31595 = vmatpush1.msk.msra.mxu0 %vm113_vm1, %v5333_v19  ;;  %32854 = vmatprep.mubr.msk.f32.mxu1 %vm34779_vm3, %v41347_v57  ;;  %v5957_v63 = vpop.permute.xlu1 %5956  ;;  %v5955_v12 = vpop.permute.xlu0 %5954 }
 0x184   :  { %31596 = vmatmul.mubr.msk.f32.vlgmr.msra.gmra.mrb[6].mxu0 %vm110_vm2, %v36003_v28  ;;  %32855 = vmatmul.mubr.msk.f32.vlgmr.msra.gmra.mrb[6].mxu1 %vm110_vm2, %v36003_v28  ;;  %v5986_v8 = vsel %vm5984_vm11, %v5955_v12, %v5957_v63 }
 0x185   :  { %7958 = vrot.lane.b32.xlu1 %v34942_v9, %s34791_s12  ;;  %7956 = vrot.lane.b32.xlu0 %v35892_v48, %s34791_s12 }
 0x186   :  { %31599 = vmatprep.subr.msk.mxu0 %vm113_vm1, %v5986_v8  ;;  %6167 = vmatprep.mubr.f32.mxu1 %v41347_v57 }
 0x187   :  { %v5961_v51 = vpop.permute.xlu1 %5960  ;;  %v5959_v16 = vpop.permute.xlu0 %5958  ;;  %6096 = vmatprep.mubr.f32.mxu0 %v41347_v57 }
 0x188   :  { %v5987_v36 = vsel %vm5984_vm11, %v5957_v63, %v5959_v16  ;;  %v5988_v28 = vsel %vm5984_vm11, %v5959_v16, %v5961_v51 }
 0x189   :  { %7962 = vrot.lane.b32.xlu1 %v34955_v11, %s34791_s12  ;;  %7960 = vrot.lane.b32.xlu0 %v35773_v53, %s34791_s12 }
 0x18a   :  { %31602 = vmatprep.subr.msk.mxu1 %vm113_vm1, %v5988_v28 }
 0x18b   :  { %31603 = vmatpush1.msk.msra.mxu1 %vm113_vm1, %v5987_v36  ;;  %v36091_v6 = vpop.permute.xlu1 %5950  ;;  %v5953_v54 = vpop.permute.xlu0 %5952 }
 0x18c   :  { %v5985_v1 = vsel %vm5984_vm11, %v5953_v54, %v5955_v12  ;;  %31604 = vmatmul.mubr.msk.f32.vlgmr.msra.gmra.mrb[0].mxu1 %vm110_vm2, %v36091_v6 }
 0x18d   :  { %7966 = vrot.lane.b32.xlu1 %v34968_v13, %s34791_s12  ;;  %7964 = vrot.lane.b32.xlu0 %v35787_v10, %s34791_s12 }
 0x18e   :  { %31600 = vmatpush1.msk.msra.mxu0 %vm113_vm1, %v5985_v1  ;;  %6309 = vmatprep.mubr.f32.mxu1 %v41347_v57 }
 0x18f   :  { %31601 = vmatmul.mubr.msk.f32.vlgmr.msra.gmra.mrb[0].mxu0 %vm110_vm2, %v36091_v6  ;;  %v5965_v19 = vpop.permute.xlu1 %5964  ;;  %v5963_v63 = vpop.permute.xlu0 %5962 }
 0x190   :  { %v5989_v12 = vsel %vm5984_vm11, %v5961_v51, %v5963_v63  ;;  %v5990_v8 = vsel %vm5984_vm11, %v5963_v63, %v5965_v19  ;;  %6238 = vmatprep.mubr.f32.mxu0 %v41347_v57 }
 0x191   :  { %7970 = vrot.lane.b32.xlu1 %v34981_v15, %s34791_s12  ;;  %7968 = vrot.lane.b32.xlu0 %v35805_v56, %s34791_s12 }
 0x192   :  { %31605 = vmatprep.subr.msk.mxu0 %vm113_vm1, %v5990_v8 }
 0x193   :  { %31606 = vmatpush1.msk.msra.mxu0 %vm113_vm1, %v5989_v12  ;;  %v5969_v16 = vpop.permute.xlu1 %5968  ;;  %v5967_v36 = vpop.permute.xlu0 %5966 }
 0x194   :  { %31607 = vmatmul.mubr.msk.f32.vlgmr.msra.gmra.mrb[2].mxu0 %vm110_vm2, %v36091_v6  ;;  %v5991_v51 = vsel %vm5984_vm11, %v5965_v19, %v5967_v36  ;;  %v5992_v28 = vsel %vm5984_vm11, %v5967_v36, %v5969_v16 }
 0x195   :  { %7974 = vrot.lane.b32.xlu1 %v35263_v55, %s34791_s12  ;;  %7972 = vrot.lane.b32.xlu0 %v35815_v14, %s34791_s12 }
 0x196   :  { %31608 = vmatprep.subr.msk.mxu1 %vm113_vm1, %v5992_v28  ;;  %6380 = vmatprep.mubr.f32.mxu0 %v41347_v57 }
 0x197   :  { %31609 = vmatpush1.msk.msra.mxu1 %vm113_vm1, %v5991_v51  ;;  %v5973_v54 = vpop.permute.xlu1 %5972  ;;  %v5971_v1 = vpop.permute.xlu0 %5970 }
 0x198   :  { %31610 = vmatmul.mubr.msk.f32.vlgmr.msra.gmra.mrb[2].mxu1 %vm110_vm2, %v36091_v6  ;;  %v5993_v19 = vsel %vm5984_vm11, %v5969_v16, %v5971_v1  ;;  %v5994_v63 = vsel %vm5984_vm11, %v5971_v1, %v5973_v54 }
 0x199   :  { %8612 = vrot.lane.b32.xlu1 %v35843_v0, %s34792_s15  ;;  %8610 = vrot.lane.b32.xlu0 %v34912_v5, %s34792_s15 }
 0x19a   :  { %31611 = vmatprep.subr.msk.mxu0 %vm113_vm1, %v5994_v63  ;;  %6451 = vmatprep.mubr.f32.mxu1 %v41347_v57 }
 0x19b   :  { %31612 = vmatpush1.msk.msra.mxu0 %vm113_vm1, %v5993_v19  ;;  %v5977_v12 = vpop.permute.xlu1 %5976  ;;  %v5975_v8 = vpop.permute.xlu0 %5974 }
 0x19c   :  { %31613 = vmatmul.mubr.msk.f32.vlgmr.msra.gmra.mrb[4].mxu0 %vm110_vm2, %v36091_v6  ;;  %v5995_v16 = vsel %vm5984_vm11, %v5973_v54, %v5975_v8  ;;  %v5996_v36 = vsel %vm5984_vm11, %v5975_v8, %v5977_v12 }
 0x19d   :  { %8616 = vrot.lane.b32.xlu1 %v35741_v2, %s34792_s15  ;;  %8614 = vrot.lane.b32.xlu0 %v34908_v4, %s34792_s15 }
 0x19e   :  { %31614 = vmatprep.subr.msk.mxu1 %vm113_vm1, %v5996_v36  ;;  %6522 = vmatprep.mubr.f32.mxu0 %v41347_v57 }
 0x19f   :  { %31615 = vmatpush1.msk.msra.mxu1 %vm113_vm1, %v5995_v16  ;;  %v5981_v51 = vpop.permute.xlu1 %5980  ;;  %v5979_v28 = vpop.permute.xlu0 %5978 }
 0x1a0   :  { %31616 = vmatmul.mubr.msk.f32.vlgmr.msra.gmra.mrb[4].mxu1 %vm110_vm2, %v36091_v6  ;;  %v5997_v54 = vsel %vm5984_vm11, %v5977_v12, %v5979_v28  ;;  %v5998_v1 = vsel %vm5984_vm11, %v5979_v28, %v5981_v51  ;;  %32857 = vmatprep.subr.mxu1 %v41347_v57 }
 0x1a1   :  { %8606 = vrot.lane.b32.xlu1 %v35872_v39, %s34793_s16  ;;  %8608 = vrot.lane.b32.xlu0 %v35755_v3, %s34792_s15  ;;  %s34798_s16 = smov 31  }
 0x1a2   :  { %31617 = vmatprep.subr.msk.mxu0 %vm113_vm1, %v5998_v1  ;;  %32859 = vmatprep.mubr.msk.f32.mxu1 %vm34779_vm3, %v41347_v57 }
 0x1a3   :  { %31618 = vmatpush1.msk.msra.mxu0 %vm113_vm1, %v5997_v54  ;;  %v6619_v19 = vpop.permute.xlu1 %6618  ;;  %v5983_v63 = vpop.permute.xlu0 %5982 }
 0x1a4   :  { %31619 = vmatmul.mubr.msk.f32.vlgmr.msra.gmra.mrb[6].mxu0 %vm110_vm2, %v36091_v6  ;;  %v5999_v12 = vsel %vm5984_vm11, %v5981_v51, %v5983_v63  ;;  %vm10632_vm11 = vcmask 252928  }
 0x1a5   :  { %8620 = vrot.lane.b32.xlu1 %v35892_v48, %s34792_s15  ;;  %8618 = vrot.lane.b32.xlu0 %v34929_v7, %s34792_s15 }
 0x1a6   :  { %32858 = vmatpush3.msk.msra.mxu1 %vm113_vm1, %v5999_v12  ;;  %6760 = vmatprep.mubr.f32.mxu0 %v41347_v57 }
 0x1a7   :  { %32860 = vmatmul.mubr.msk.f32.vlgmr.msra.gmra.mrb[6].mxu1 %vm110_vm2, %v36091_v6  ;;  %v6623_v8 = vpop.permute.xlu1 %6622  ;;  %v6621_v16 = vpop.permute.xlu0 %6620 }
 0x1a8   :  { %v6650_v36 = vsel %vm6648_vm12, %v6619_v19, %v6621_v16  ;;  %6831 = vmatprep.mubr.f32.mxu1 %v41347_v57  ;;  %v6651_v1 = vsel %vm6648_vm12, %v6621_v16, %v6623_v8 }
 0x1a9   :  { %8624 = vrot.lane.b32.xlu1 %v35773_v53, %s34792_s15  ;;  %8622 = vrot.lane.b32.xlu0 %v34942_v9, %s34792_s15 }
 0x1aa   :  { %31622 = vmatprep.subr.msk.mxu0 %vm113_vm1, %v6650_v36 }
 0x1ab   :  { %v6617_v51 = vpop.permute.xlu1 %6616  ;;  %v6625_v28 = vpop.permute.xlu0 %6624 }
 0x1ac   :  { %v6649_v54 = vsel %vm6648_vm12, %v6617_v51, %v6619_v19  ;;  %v6652_v6 = vsel %vm6648_vm12, %v6623_v8, %v6625_v28 }
 0x1ad   :  { %8628 = vrot.lane.b32.xlu1 %v35787_v10, %s34792_s15  ;;  %8626 = vrot.lane.b32.xlu0 %v34955_v11, %s34792_s15 }
 0x1ae   :  { %31623 = vmatpush1.msk.msra.mxu0 %vm113_vm1, %v6649_v54  ;;  %31625 = vmatprep.subr.msk.mxu1 %vm113_vm1, %v6652_v6 }
 0x1af   :  { %31626 = vmatpush1.msk.msra.mxu1 %vm113_vm1, %v6651_v1  ;;  %v6627_v63 = vpop.permute.xlu1 %6626  ;;  %v36186_v12 = vpop.permute.xlu0 %6614 }
 0x1b0   :  { %31624 = vmatmul.mubr.msk.f32.vlgmr.msra.gmra.mrb[0].mxu0 %vm110_vm2, %v36186_v12  ;;  %31627 = vmatmul.mubr.msk.f32.vlgmr.msra.gmra.mrb[0].mxu1 %vm110_vm2, %v36186_v12  ;;  %v6653_v36 = vsel %vm6648_vm12, %v6625_v28, %v6627_v63 }
 0x1b1   :  { %8632 = vrot.lane.b32.xlu1 %v35805_v56, %s34792_s15  ;;  %8630 = vrot.lane.b32.xlu0 %v34968_v13, %s34792_s15 }
 0x1b2   :  { %6902 = vmatprep.mubr.f32.mxu0 %v41347_v57  ;;  %6973 = vmatprep.mubr.f32.mxu1 %v41347_v57 }
 0x1b3   :  { %v6631_v19 = vpop.permute.xlu1 %6630  ;;  %v6629_v8 = vpop.permute.xlu0 %6628 }
 0x1b4   :  { %v6654_v16 = vsel %vm6648_vm12, %v6627_v63, %v6629_v8  ;;  %v6655_v28 = vsel %vm6648_vm12, %v6629_v8, %v6631_v19 }
 0x1b5   :  { %8636 = vrot.lane.b32.xlu1 %v35815_v14, %s34792_s15  ;;  %8634 = vrot.lane.b32.xlu0 %v34981_v15, %s34792_s15 }
 0x1b6   :  { %31628 = vmatprep.subr.msk.mxu0 %vm113_vm1, %v6654_v16 }
 0x1b7   :  { %31629 = vmatpush1.msk.msra.mxu0 %vm113_vm1, %v6653_v36  ;;  %v6635_v51 = vpop.permute.xlu1 %6634  ;;  %v6633_v54 = vpop.permute.xlu0 %6632 }
 0x1b8   :  { %31630 = vmatmul.mubr.msk.f32.vlgmr.msra.gmra.mrb[2].mxu0 %vm110_vm2, %v36186_v12  ;;  %v6656_v6 = vsel %vm6648_vm12, %v6631_v19, %v6633_v54  ;;  %v6657_v19 = vsel %vm6648_vm12, %v6633_v54, %v6635_v51 }
 0x1b9   :  { %9274 = vrot.lane.b32.xlu1 %v34912_v5, %s41236_s20  ;;  %8638 = vrot.lane.b32.xlu0 %v35263_v55, %s34792_s15  ;;  %s34797_s15 = smov 83  }
 0x1ba   :  { %31631 = vmatprep.subr.msk.mxu1 %vm113_vm1, %v6656_v6  ;;  %7044 = vmatprep.mubr.f32.mxu0 %v41347_v57 }
 0x1bb   :  { %31632 = vmatpush1.msk.msra.mxu1 %vm113_vm1, %v6655_v28  ;;  %v6639_v1 = vpop.permute.xlu1 %6638  ;;  %v6637_v63 = vpop.permute.xlu0 %6636 }
 0x1bc   :  { %31633 = vmatmul.mubr.msk.f32.vlgmr.msra.gmra.mrb[2].mxu1 %vm110_vm2, %v36186_v12  ;;  %v6658_v16 = vsel %vm6648_vm12, %v6635_v51, %v6637_v63  ;;  %v6659_v51 = vsel %vm6648_vm12, %v6637_v63, %v6639_v1 }
 0x1bd   :  { %9278 = vrot.lane.b32.xlu1 %v34908_v4, %s41236_s20  ;;  %9276 = vrot.lane.b32.xlu0 %v35843_v0, %s41236_s20 }
 0x1be   :  { %31634 = vmatprep.subr.msk.mxu0 %vm113_vm1, %v6658_v16  ;;  %7115 = vmatprep.mubr.f32.mxu1 %v41347_v57 }
 0x1bf   :  { %31635 = vmatpush1.msk.msra.mxu0 %vm113_vm1, %v6657_v19  ;;  %v6643_v8 = vpop.permute.xlu1 %6642  ;;  %v6641_v36 = vpop.permute.xlu0 %6640 }
 0x1c0   :  { %31636 = vmatmul.mubr.msk.f32.vlgmr.msra.gmra.mrb[4].mxu0 %vm110_vm2, %v36186_v12  ;;  %v6660_v6 = vsel %vm6648_vm12, %v6639_v1, %v6641_v36  ;;  %v6661_v1 = vsel %vm6648_vm12, %v6641_v36, %v6643_v8 }
 0x1c1   :  { %9272 = vrot.lane.b32.xlu1 %v35755_v3, %s41236_s20  ;;  %9280 = vrot.lane.b32.xlu0 %v35741_v2, %s41236_s20 }
 0x1c2   :  { %31637 = vmatprep.subr.msk.mxu1 %vm113_vm1, %v6660_v6  ;;  %7186 = vmatprep.mubr.f32.mxu0 %v41347_v57 }
 0x1c3   :  { %31638 = vmatpush1.msk.msra.mxu1 %vm113_vm1, %v6659_v51  ;;  %v6647_v54 = vpop.permute.xlu1 %6646  ;;  %v6645_v28 = vpop.permute.xlu0 %6644 }
 0x1c4   :  { %31639 = vmatmul.mubr.msk.f32.vlgmr.msra.gmra.mrb[4].mxu1 %vm110_vm2, %v36186_v12  ;;  %v6663_v16 = vsel %vm6648_vm12, %v6645_v28, %v6647_v54  ;;  %32862 = vmatprep.subr.mxu1 %v41347_v57  ;;  %v6662_v19 = vsel %vm6648_vm12, %v6643_v8, %v6645_v28 }
 0x1c5   :  { %9282 = vrot.lane.b32.xlu1 %v34929_v7, %s41236_s20  ;;  %9270 = vrot.lane.b32.xlu0 %v35872_v39, %s41234_s25  ;;  %s34801_s25 = smov 77  }
 0x1c6   :  { %31640 = vmatprep.subr.msk.mxu0 %vm113_vm1, %v6662_v19  ;;  %32863 = vmatpush3.msk.msra.mxu1 %vm113_vm1, %v6663_v16 }
 0x1c7   :  { %31641 = vmatpush1.msk.msra.mxu0 %vm113_vm1, %v6661_v1  ;;  %32864 = vmatprep.mubr.msk.f32.mxu1 %vm34779_vm3, %v41347_v57  ;;  %v7285_v63 = vpop.permute.xlu1 %7284  ;;  %v7283_v6 = vpop.permute.xlu0 %7282 }
 0x1c8   :  { %31642 = vmatmul.mubr.msk.f32.vlgmr.msra.gmra.mrb[6].mxu0 %vm110_vm2, %v36186_v12  ;;  %32865 = vmatmul.mubr.msk.f32.vlgmr.msra.gmra.mrb[6].mxu1 %vm110_vm2, %v36186_v12  ;;  %v7314_v51 = vsel %vm7312_vm13, %v7283_v6, %v7285_v63 }
 0x1c9   :  { %9286 = vrot.lane.b32.xlu1 %v34942_v9, %s41236_s20  ;;  %9284 = vrot.lane.b32.xlu0 %v35892_v48, %s41236_s20 }
 0x1ca   :  { %31645 = vmatprep.subr.msk.mxu0 %vm113_vm1, %v7314_v51  ;;  %7495 = vmatprep.mubr.f32.mxu1 %v41347_v57 }
 0x1cb   :  { %v7289_v8 = vpop.permute.xlu1 %7288  ;;  %v7287_v36 = vpop.permute.xlu0 %7286  ;;  %7424 = vmatprep.mubr.f32.mxu0 %v41347_v57 }
 0x1cc   :  { %v7315_v54 = vsel %vm7312_vm13, %v7285_v63, %v7287_v36  ;;  %v7316_v12 = vsel %vm7312_vm13, %v7287_v36, %v7289_v8 }
 0x1cd   :  { %9290 = vrot.lane.b32.xlu1 %v34955_v11, %s41236_s20  ;;  %9288 = vrot.lane.b32.xlu0 %v35773_v53, %s41236_s20 }
 0x1ce   :  { %31648 = vmatprep.subr.msk.mxu1 %vm113_vm1, %v7316_v12 }
 0x1cf   :  { %31649 = vmatpush1.msk.msra.mxu1 %vm113_vm1, %v7315_v54  ;;  %v36274_v28 = vpop.permute.xlu1 %7278  ;;  %v7281_v16 = vpop.permute.xlu0 %7280 }
 0x1d0   :  { %v7313_v19 = vsel %vm7312_vm13, %v7281_v16, %v7283_v6  ;;  %31650 = vmatmul.mubr.msk.f32.vlgmr.msra.gmra.mrb[0].mxu1 %vm110_vm2, %v36274_v28 }
 0x1d1   :  { %9294 = vrot.lane.b32.xlu1 %v34968_v13, %s41236_s20  ;;  %9292 = vrot.lane.b32.xlu0 %v35787_v10, %s41236_s20 }
 0x1d2   :  { %31646 = vmatpush1.msk.msra.mxu0 %vm113_vm1, %v7313_v19  ;;  %7637 = vmatprep.mubr.f32.mxu1 %v41347_v57 }
 0x1d3   :  { %31647 = vmatmul.mubr.msk.f32.vlgmr.msra.gmra.mrb[0].mxu0 %vm110_vm2, %v36274_v28  ;;  %v7293_v1 = vpop.permute.xlu1 %7292  ;;  %v7291_v63 = vpop.permute.xlu0 %7290 }
 0x1d4   :  { %v7317_v6 = vsel %vm7312_vm13, %v7289_v8, %v7291_v63  ;;  %v7318_v51 = vsel %vm7312_vm13, %v7291_v63, %v7293_v1  ;;  %7566 = vmatprep.mubr.f32.mxu0 %v41347_v57 }
 0x1d5   :  { %9298 = vrot.lane.b32.xlu1 %v34981_v15, %s41236_s20  ;;  %9296 = vrot.lane.b32.xlu0 %v35805_v56, %s41236_s20 }
 0x1d6   :  { %31651 = vmatprep.subr.msk.mxu0 %vm113_vm1, %v7318_v51 }
 0x1d7   :  { %31652 = vmatpush1.msk.msra.mxu0 %vm113_vm1, %v7317_v6  ;;  %v7297_v36 = vpop.permute.xlu1 %7296  ;;  %v7295_v54 = vpop.permute.xlu0 %7294 }
 0x1d8   :  { %31653 = vmatmul.mubr.msk.f32.vlgmr.msra.gmra.mrb[2].mxu0 %vm110_vm2, %v36274_v28  ;;  %v7319_v8 = vsel %vm7312_vm13, %v7293_v1, %v7295_v54  ;;  %v7320_v12 = vsel %vm7312_vm13, %v7295_v54, %v7297_v36 }
 0x1d9   :  { %9302 = vrot.lane.b32.xlu1 %v35263_v55, %s41236_s20  ;;  %9300 = vrot.lane.b32.xlu0 %v35815_v14, %s41236_s20  ;;  %s34799_s20 = smov 80  }
 0x1da   :  { %31654 = vmatprep.subr.msk.mxu1 %vm113_vm1, %v7320_v12  ;;  %7708 = vmatprep.mubr.f32.mxu0 %v41347_v57 }
 0x1db   :  { %31655 = vmatpush1.msk.msra.mxu1 %vm113_vm1, %v7319_v8  ;;  %v7301_v16 = vpop.permute.xlu1 %7300  ;;  %v7299_v19 = vpop.permute.xlu0 %7298 }
 0x1dc   :  { %31656 = vmatmul.mubr.msk.f32.vlgmr.msra.gmra.mrb[2].mxu1 %vm110_vm2, %v36274_v28  ;;  %v7321_v1 = vsel %vm7312_vm13, %v7297_v36, %v7299_v19  ;;  %v7322_v63 = vsel %vm7312_vm13, %v7299_v19, %v7301_v16 }
 0x1dd   :  { %9940 = vrot.lane.b32.xlu1 %v35843_v0, %s41232_s30  ;;  %9938 = vrot.lane.b32.xlu0 %v34912_v5, %s41232_s30 }
 0x1de   :  { %31657 = vmatprep.subr.msk.mxu0 %vm113_vm1, %v7322_v63  ;;  %7779 = vmatprep.mubr.f32.mxu1 %v41347_v57 }
 0x1df   :  { %31658 = vmatpush1.msk.msra.mxu0 %vm113_vm1, %v7321_v1  ;;  %v7305_v6 = vpop.permute.xlu1 %7304  ;;  %v7303_v51 = vpop.permute.xlu0 %7302 }
 0x1e0   :  { %31659 = vmatmul.mubr.msk.f32.vlgmr.msra.gmra.mrb[4].mxu0 %vm110_vm2, %v36274_v28  ;;  %v7323_v36 = vsel %vm7312_vm13, %v7301_v16, %v7303_v51  ;;  %v7324_v54 = vsel %vm7312_vm13, %v7303_v51, %v7305_v6 }
 0x1e1   :  { %9944 = vrot.lane.b32.xlu1 %v35741_v2, %s41232_s30  ;;  %9942 = vrot.lane.b32.xlu0 %v34908_v4, %s41232_s30 }
 0x1e2   :  { %31660 = vmatprep.subr.msk.mxu1 %vm113_vm1, %v7324_v54  ;;  %7850 = vmatprep.mubr.f32.mxu0 %v41347_v57 }
 0x1e3   :  { %31661 = vmatpush1.msk.msra.mxu1 %vm113_vm1, %v7323_v36  ;;  %v7309_v8 = vpop.permute.xlu1 %7308  ;;  %v7307_v12 = vpop.permute.xlu0 %7306 }
 0x1e4   :  { %31662 = vmatmul.mubr.msk.f32.vlgmr.msra.gmra.mrb[4].mxu1 %vm110_vm2, %v36274_v28  ;;  %v7325_v16 = vsel %vm7312_vm13, %v7305_v6, %v7307_v12  ;;  %v7326_v19 = vsel %vm7312_vm13, %v7307_v12, %v7309_v8  ;;  %32867 = vmatprep.subr.mxu1 %v41347_v57 }
 0x1e5   :  { %9934 = vrot.lane.b32.xlu1 %v35872_v39, %s34797_s15  ;;  %9936 = vrot.lane.b32.xlu0 %v35755_v3, %s41232_s30  ;;  %s34802_s15 = smov 29  }
 0x1e6   :  { %31663 = vmatprep.subr.msk.mxu0 %vm113_vm1, %v7326_v19  ;;  %32869 = vmatprep.mubr.msk.f32.mxu1 %vm34779_vm3, %v41347_v57 }
 0x1e7   :  { %31664 = vmatpush1.msk.msra.mxu0 %vm113_vm1, %v7325_v16  ;;  %v7947_v2 = vpop.permute.xlu1 %7946  ;;  %v7311_v1 = vpop.permute.xlu0 %7310 }
 0x1e8   :  { %31665 = vmatmul.mubr.msk.f32.vlgmr.msra.gmra.mrb[6].mxu0 %vm110_vm2, %v36274_v28  ;;  %v7327_v63 = vsel %vm7312_vm13, %v7309_v8, %v7311_v1  ;;  %vm11296_vm13 = vcmask 244736  }
 0x1e9   :  { %9948 = vrot.lane.b32.xlu1 %v35892_v48, %s41232_s30  ;;  %9946 = vrot.lane.b32.xlu0 %v34929_v7, %s41232_s30 }
 0x1ea   :  { %32868 = vmatpush3.msk.msra.mxu1 %vm113_vm1, %v7327_v63  ;;  %8088 = vmatprep.mubr.f32.mxu0 %v41347_v57 }
 0x1eb   :  { %32870 = vmatmul.mubr.msk.f32.vlgmr.msra.gmra.mrb[6].mxu1 %vm110_vm2, %v36274_v28  ;;  %v7951_v3 = vpop.permute.xlu1 %7950  ;;  %v7949_v6 = vpop.permute.xlu0 %7948 }
 0x1ec   :  { %v7978_v51 = vsel %vm7976_vm14, %v7947_v2, %v7949_v6  ;;  %8159 = vmatprep.mubr.f32.mxu1 %v41347_v57  ;;  %v7979_v12 = vsel %vm7976_vm14, %v7949_v6, %v7951_v3 }
 0x1ed   :  { %9952 = vrot.lane.b32.xlu1 %v35773_v53, %s41232_s30  ;;  %9950 = vrot.lane.b32.xlu0 %v34942_v9, %s41232_s30 }
 0x1ee   :  { %31668 = vmatprep.subr.msk.mxu0 %vm113_vm1, %v7978_v51 }
 0x1ef   :  { %v7945_v36 = vpop.permute.xlu1 %7944  ;;  %v7953_v54 = vpop.permute.xlu0 %7952 }
 0x1f0   :  { %v7977_v8 = vsel %vm7976_vm14, %v7945_v36, %v7947_v2  ;;  %v7980_v28 = vsel %vm7976_vm14, %v7951_v3, %v7953_v54 }
 0x1f1   :  { %9956 = vrot.lane.b32.xlu1 %v35787_v10, %s41232_s30  ;;  %9954 = vrot.lane.b32.xlu0 %v34955_v11, %s41232_s30 }
 0x1f2   :  { %31669 = vmatpush1.msk.msra.mxu0 %vm113_vm1, %v7977_v8  ;;  %31671 = vmatprep.subr.msk.mxu1 %vm113_vm1, %v7980_v28 }
 0x1f3   :  { %31672 = vmatpush1.msk.msra.mxu1 %vm113_vm1, %v7979_v12  ;;  %v7955_v53 = vpop.permute.xlu1 %7954  ;;  %v36369_v16 = vpop.permute.xlu0 %7942 }
 0x1f4   :  { %31670 = vmatmul.mubr.msk.f32.vlgmr.msra.gmra.mrb[0].mxu0 %vm110_vm2, %v36369_v16  ;;  %31673 = vmatmul.mubr.msk.f32.vlgmr.msra.gmra.mrb[0].mxu1 %vm110_vm2, %v36369_v16  ;;  %v7981_v1 = vsel %vm7976_vm14, %v7953_v54, %v7955_v53 }
 0x1f5   :  { %9960 = vrot.lane.b32.xlu1 %v35805_v56, %s41232_s30  ;;  %9958 = vrot.lane.b32.xlu0 %v34968_v13, %s41232_s30 }
 0x1f6   :  { %8230 = vmatprep.mubr.f32.mxu0 %v41347_v57  ;;  %8301 = vmatprep.mubr.f32.mxu1 %v41347_v57 }
 0x1f7   :  { %v7959_v10 = vpop.permute.xlu1 %7958  ;;  %v7957_v19 = vpop.permute.xlu0 %7956 }
 0x1f8   :  { %v7982_v2 = vsel %vm7976_vm14, %v7955_v53, %v7957_v19  ;;  %v36417_v53 = vld [vmem:[%s41197_s0] sm:$0x77] }
 0x1f9   :  { %9964 = vrot.lane.b32.xlu1 %v35815_v14, %s41232_s30  ;;  %9962 = vrot.lane.b32.xlu0 %v34981_v15, %s41232_s30  ;;  %v7983_v14 = vsel %vm7976_vm14, %v7957_v19, %v7959_v10 }
 0x1fa   :  { %31674 = vmatprep.subr.msk.mxu0 %vm113_vm1, %v7982_v2 }
 0x1fb   :  { %31675 = vmatpush1.msk.msra.mxu0 %vm113_vm1, %v7981_v1  ;;  %v7963_v56 = vpop.permute.xlu1 %7962  ;;  %v7961_v63 = vpop.permute.xlu0 %7960 }
 0x1fc   :  { %31676 = vmatmul.mubr.msk.f32.vlgmr.msra.gmra.mrb[2].mxu0 %vm110_vm2, %v36369_v16  ;;  %v7984_v3 = vsel %vm7976_vm14, %v7959_v10, %v7961_v63  ;;  %v7985_v54 = vsel %vm7976_vm14, %v7961_v63, %v7963_v56 }
 0x1fd   :  { %10602 = vrot.lane.b32.xlu1 %v34912_v5, %s34798_s16  ;;  %9966 = vrot.lane.b32.xlu0 %v35263_v55, %s41232_s30  ;;  %s34806_s30 = smov 68  }
 0x1fe   :  { %31677 = vmatprep.subr.msk.mxu1 %vm113_vm1, %v7984_v3  ;;  %8372 = vmatprep.mubr.f32.mxu0 %v41347_v57 }
 0x1ff   :  { %31678 = vmatpush1.msk.msra.mxu1 %vm113_vm1, %v7983_v14  ;;  %v7967_v6 = vpop.permute.xlu1 %7966  ;;  %v7965_v51 = vpop.permute.xlu0 %7964 }
 0x200   :  { %31679 = vmatmul.mubr.msk.f32.vlgmr.msra.gmra.mrb[2].mxu1 %vm110_vm2, %v36369_v16  ;;  %v7986_v36 = vsel %vm7976_vm14, %v7963_v56, %v7965_v51  ;;  %v7987_v10 = vsel %vm7976_vm14, %v7965_v51, %v7967_v6 }
 0x201   :  { %10606 = vrot.lane.b32.xlu1 %v34908_v4, %s34798_s16  ;;  %10604 = vrot.lane.b32.xlu0 %v35843_v0, %s34798_s16  ;;  %v36424_v0 = vld [vmem:[%s41197_s0 + $0x10] sm:$0x77] }
 0x202   :  { %31680 = vmatprep.subr.msk.mxu0 %vm113_vm1, %v7986_v36  ;;  %8443 = vmatprep.mubr.f32.mxu1 %v41347_v57 }
 0x203   :  { %31681 = vmatpush1.msk.msra.mxu0 %vm113_vm1, %v7985_v54  ;;  %v7971_v8 = vpop.permute.xlu1 %7970  ;;  %v7969_v28 = vpop.permute.xlu0 %7968  ;;  %v36466_v54 = vld [vmem:[%s41197_s0 + $0x20] sm:$0x77] }
 0x204   :  { %31682 = vmatmul.mubr.msk.f32.vlgmr.msra.gmra.mrb[4].mxu0 %vm110_vm2, %v36369_v16  ;;  %v7988_v12 = vsel %vm7976_vm14, %v7967_v6, %v7969_v28  ;;  %v7989_v63 = vsel %vm7976_vm14, %v7969_v28, %v7971_v8 }
 0x205   :  { %10600 = vrot.lane.b32.xlu1 %v36417_v53, %s34798_s16  ;;  %10608 = vrot.lane.b32.xlu0 %v36424_v0, %s34798_s16 }
 0x206   :  { %31683 = vmatprep.subr.msk.mxu1 %vm113_vm1, %v7988_v12  ;;  %8514 = vmatprep.mubr.f32.mxu0 %v41347_v57  ;;  %v36482_v12 = vld [vmem:[%s41197_s0 + $0x28] sm:$0x77] }
 0x207   :  { %31684 = vmatpush1.msk.msra.mxu1 %vm113_vm1, %v7987_v10  ;;  %v7975_v19 = vpop.permute.xlu1 %7974  ;;  %v7973_v2 = vpop.permute.xlu0 %7972 }
 0x208   :  { %31685 = vmatmul.mubr.msk.f32.vlgmr.msra.gmra.mrb[4].mxu1 %vm110_vm2, %v36369_v16  ;;  %v7991_v1 = vsel %vm7976_vm14, %v7973_v2, %v7975_v19  ;;  %32872 = vmatprep.subr.mxu1 %v41347_v57  ;;  %v7990_v56 = vsel %vm7976_vm14, %v7971_v8, %v7973_v2 }
 0x209   :  { %10610 = vrot.lane.b32.xlu1 %v34929_v7, %s34798_s16  ;;  %10598 = vrot.lane.b32.xlu0 %v35872_v39, %s34799_s20 }
 0x20a   :  { %31686 = vmatprep.subr.msk.mxu0 %vm113_vm1, %v7990_v56  ;;  %32873 = vmatpush3.msk.msra.mxu1 %vm113_vm1, %v7991_v1  ;;  %v36498_v56 = vld [vmem:[%s41197_s0 + $0x30] sm:$0x77] }
 0x20b   :  { %31687 = vmatpush1.msk.msra.mxu0 %vm113_vm1, %v7989_v63  ;;  %32874 = vmatprep.mubr.msk.f32.mxu1 %vm34779_vm3, %v41347_v57  ;;  %v8613_v3 = vpop.permute.xlu1 %8612  ;;  %v8611_v14 = vpop.permute.xlu0 %8610 }
 0x20c   :  { %31688 = vmatmul.mubr.msk.f32.vlgmr.msra.gmra.mrb[6].mxu0 %vm110_vm2, %v36369_v16  ;;  %32875 = vmatmul.mubr.msk.f32.vlgmr.msra.gmra.mrb[6].mxu1 %vm110_vm2, %v36369_v16  ;;  %v8642_v39 = vsel %vm8640_vm15, %v8611_v14, %v8613_v3 }
 0x20d   :  { %10614 = vrot.lane.b32.xlu1 %v34942_v9, %s34798_s16  ;;  %10612 = vrot.lane.b32.xlu0 %v35892_v48, %s34798_s16 }
 0x20e   :  { %31691 = vmatprep.subr.msk.mxu0 %vm113_vm1, %v8642_v39  ;;  %8823 = vmatprep.mubr.f32.mxu1 %v41347_v57 }
 0x20f   :  { %v8617_v6 = vpop.permute.xlu1 %8616  ;;  %v8615_v51 = vpop.permute.xlu0 %8614  ;;  %8752 = vmatprep.mubr.f32.mxu0 %v41347_v57 }
 0x210   :  { %v8643_v36 = vsel %vm8640_vm15, %v8613_v3, %v8615_v51  ;;  %v8644_v16 = vsel %vm8640_vm15, %v8615_v51, %v8617_v6 }
 0x211   :  { %10618 = vrot.lane.b32.xlu1 %v34955_v11, %s34798_s16  ;;  %10616 = vrot.lane.b32.xlu0 %v36466_v54, %s34798_s16 }
 0x212   :  { %31694 = vmatprep.subr.msk.mxu1 %vm113_vm1, %v8644_v16 }
 0x213   :  { %31695 = vmatpush1.msk.msra.mxu1 %vm113_vm1, %v8643_v36  ;;  %v36472_v48 = vpop.permute.xlu1 %8606  ;;  %v8609_v8 = vpop.permute.xlu0 %8608 }
 0x214   :  { %v8641_v28 = vsel %vm8640_vm15, %v8609_v8, %v8611_v14  ;;  %31696 = vmatmul.mubr.msk.f32.vlgmr.msra.gmra.mrb[0].mxu1 %vm110_vm2, %v36472_v48 }
 0x215   :  { %10622 = vrot.lane.b32.xlu1 %v34968_v13, %s34798_s16  ;;  %10620 = vrot.lane.b32.xlu0 %v36482_v12, %s34798_s16 }
 0x216   :  { %31692 = vmatpush1.msk.msra.mxu0 %vm113_vm1, %v8641_v28  ;;  %8965 = vmatprep.mubr.f32.mxu1 %v41347_v57  ;;  %v36527_v28 = vld [vmem:[%s41197_s0 + $0x8] sm:$0x77] }
 0x217   :  { %31693 = vmatmul.mubr.msk.f32.vlgmr.msra.gmra.mrb[0].mxu0 %vm110_vm2, %v36472_v48  ;;  %v8621_v10 = vpop.permute.xlu1 %8620  ;;  %v8619_v19 = vpop.permute.xlu0 %8618 }
 0x218   :  { %v8645_v2 = vsel %vm8640_vm15, %v8617_v6, %v8619_v19  ;;  %v8646_v1 = vsel %vm8640_vm15, %v8619_v19, %v8621_v10  ;;  %8894 = vmatprep.mubr.f32.mxu0 %v41347_v57  ;;  %v36513_v6 = vld [vmem:[%s41197_s0 + $0x38] sm:$0x77] }
 0x219   :  { %10626 = vrot.lane.b32.xlu1 %v34981_v15, %s34798_s16  ;;  %10624 = vrot.lane.b32.xlu0 %v36498_v56, %s34798_s16 }
 0x21a   :  { %31697 = vmatprep.subr.msk.mxu0 %vm113_vm1, %v8646_v1 }
 0x21b   :  { %31698 = vmatpush1.msk.msra.mxu0 %vm113_vm1, %v8645_v2  ;;  %v8625_v63 = vpop.permute.xlu1 %8624  ;;  %v8623_v3 = vpop.permute.xlu0 %8622 }
 0x21c   :  { %31699 = vmatmul.mubr.msk.f32.vlgmr.msra.gmra.mrb[2].mxu0 %vm110_vm2, %v36472_v48  ;;  %v8647_v14 = vsel %vm8640_vm15, %v8621_v10, %v8623_v3  ;;  %v8648_v39 = vsel %vm8640_vm15, %v8623_v3, %v8625_v63 }
 0x21d   :  { %10630 = vrot.lane.b32.xlu1 %v35263_v55, %s34798_s16  ;;  %10628 = vrot.lane.b32.xlu0 %v36513_v6, %s34798_s16  ;;  %s34800_s16 = smov 30  }
 0x21e   :  { %31700 = vmatprep.subr.msk.mxu1 %vm113_vm1, %v8648_v39  ;;  %9036 = vmatprep.mubr.f32.mxu0 %v41347_v57 }
 0x21f   :  { %31701 = vmatpush1.msk.msra.mxu1 %vm113_vm1, %v8647_v14  ;;  %v8629_v51 = vpop.permute.xlu1 %8628  ;;  %v8627_v36 = vpop.permute.xlu0 %8626 }
 0x220   :  { %31702 = vmatmul.mubr.msk.f32.vlgmr.msra.gmra.mrb[2].mxu1 %vm110_vm2, %v36472_v48  ;;  %v8649_v16 = vsel %vm8640_vm15, %v8625_v63, %v8627_v36  ;;  %v8650_v8 = vsel %vm8640_vm15, %v8627_v36, %v8629_v51 }
 0x221   :  { %11268 = vrot.lane.b32.xlu1 %v36527_v28, %s34800_s16  ;;  %11266 = vrot.lane.b32.xlu0 %v34912_v5, %s34800_s16 }
 0x222   :  { %31703 = vmatprep.subr.msk.mxu0 %vm113_vm1, %v8650_v8  ;;  %9107 = vmatprep.mubr.f32.mxu1 %v41347_v57 }
 0x223   :  { %31704 = vmatpush1.msk.msra.mxu0 %vm113_vm1, %v8649_v16  ;;  %v8633_v10 = vpop.permute.xlu1 %8632  ;;  %v8631_v19 = vpop.permute.xlu0 %8630 }
 0x224   :  { %31705 = vmatmul.mubr.msk.f32.vlgmr.msra.gmra.mrb[4].mxu0 %vm110_vm2, %v36472_v48  ;;  %v8651_v2 = vsel %vm8640_vm15, %v8629_v51, %v8631_v19  ;;  %v8652_v1 = vsel %vm8640_vm15, %v8631_v19, %v8633_v10  ;;  %v36555_v51 = vld [vmem:[%s41198_s1] sm:$0x3f]  ;;  %s34805_s1 = smov 71  }
 0x225   :  { %11272 = vrot.lane.b32.xlu1 %v36424_v0, %s34800_s16  ;;  %11270 = vrot.lane.b32.xlu0 %v34908_v4, %s34800_s16 }
 0x226   :  { %31706 = vmatprep.subr.msk.mxu1 %vm113_vm1, %v8652_v1  ;;  %9178 = vmatprep.mubr.f32.mxu0 %v41347_v57 }
 0x227   :  { %31707 = vmatpush1.msk.msra.mxu1 %vm113_vm1, %v8651_v2  ;;  %v8637_v63 = vpop.permute.xlu1 %8636  ;;  %v8635_v3 = vpop.permute.xlu0 %8634 }
 0x228   :  { %31708 = vmatmul.mubr.msk.f32.vlgmr.msra.gmra.mrb[4].mxu1 %vm110_vm2, %v36472_v48  ;;  %v8653_v14 = vsel %vm8640_vm15, %v8633_v10, %v8635_v3  ;;  %v8654_v39 = vsel %vm8640_vm15, %v8635_v3, %v8637_v63  ;;  %32877 = vmatprep.subr.mxu1 %v41347_v57  ;;  %v36570_v10 = vld [vmem:[%s41197_s0 + $0x18] sm:$0x77] }
 0x229   :  { %11262 = vrot.lane.b32.xlu1 %v36555_v51, %s34801_s25  ;;  %11264 = vrot.lane.b32.xlu0 %v36417_v53, %s34800_s16  ;;  %s34804_s25 = smov 28  }
 0x22a   :  { %31709 = vmatprep.subr.msk.mxu0 %vm113_vm1, %v8654_v39  ;;  %32879 = vmatprep.mubr.msk.f32.mxu1 %vm34779_vm3, %v41347_v57 }
 0x22b   :  { %31710 = vmatpush1.msk.msra.mxu0 %vm113_vm1, %v8653_v14  ;;  %v9275_v36 = vpop.permute.xlu1 %9274  ;;  %v8639_v16 = vpop.permute.xlu0 %8638 }
 0x22c   :  { %31711 = vmatmul.mubr.msk.f32.vlgmr.msra.gmra.mrb[6].mxu0 %vm110_vm2, %v36472_v48  ;;  %v8655_v8 = vsel %vm8640_vm15, %v8637_v63, %v8639_v16  ;;  %vm11960_vm15 = vcmask 236544  }
 0x22d   :  { %11276 = vrot.lane.b32.xlu1 %v36570_v10, %s34800_s16  ;;  %11274 = vrot.lane.b32.xlu0 %v34929_v7, %s34800_s16 }
 0x22e   :  { %32878 = vmatpush3.msk.msra.mxu1 %vm113_vm1, %v8655_v8  ;;  %9416 = vmatprep.mubr.f32.mxu0 %v41347_v57 }
 0x22f   :  { %32880 = vmatmul.mubr.msk.f32.vlgmr.msra.gmra.mrb[6].mxu1 %vm110_vm2, %v36472_v48  ;;  %v9279_v19 = vpop.permute.xlu1 %9278  ;;  %v9277_v2 = vpop.permute.xlu0 %9276 }
 0x230   :  { %v9306_v1 = vsel %vm9304_vm9, %v9275_v36, %v9277_v2  ;;  %9487 = vmatprep.mubr.f32.mxu1 %v41347_v57  ;;  %v9307_v39 = vsel %vm9304_vm9, %v9277_v2, %v9279_v19 }
 0x231   :  { %11280 = vrot.lane.b32.xlu1 %v36466_v54, %s34800_s16  ;;  %11278 = vrot.lane.b32.xlu0 %v34942_v9, %s34800_s16 }
 0x232   :  { %31714 = vmatprep.subr.msk.mxu0 %vm113_vm1, %v9306_v1 }
 0x233   :  { %v9273_v63 = vpop.permute.xlu1 %9272  ;;  %v9281_v3 = vpop.permute.xlu0 %9280 }
 0x234   :  { %v9305_v14 = vsel %vm9304_vm9, %v9273_v63, %v9275_v36  ;;  %v9308_v48 = vsel %vm9304_vm9, %v9279_v19, %v9281_v3 }
 0x235   :  { %11284 = vrot.lane.b32.xlu1 %v36482_v12, %s34800_s16  ;;  %11282 = vrot.lane.b32.xlu0 %v34955_v11, %s34800_s16 }
 0x236   :  { %31715 = vmatpush1.msk.msra.mxu0 %vm113_vm1, %v9305_v14  ;;  %31717 = vmatprep.subr.msk.mxu1 %vm113_vm1, %v9308_v48 }
 0x237   :  { %31718 = vmatpush1.msk.msra.mxu1 %vm113_vm1, %v9307_v39  ;;  %v9283_v16 = vpop.permute.xlu1 %9282  ;;  %v36597_v8 = vpop.permute.xlu0 %9270 }
 0x238   :  { %31716 = vmatmul.mubr.msk.f32.vlgmr.msra.gmra.mrb[0].mxu0 %vm110_vm2, %v36597_v8  ;;  %31719 = vmatmul.mubr.msk.f32.vlgmr.msra.gmra.mrb[0].mxu1 %vm110_vm2, %v36597_v8  ;;  %v9309_v1 = vsel %vm9304_vm9, %v9281_v3, %v9283_v16 }
 0x239   :  { %11288 = vrot.lane.b32.xlu1 %v36498_v56, %s34800_s16  ;;  %11286 = vrot.lane.b32.xlu0 %v34968_v13, %s34800_s16 }
 0x23a   :  { %9558 = vmatprep.mubr.f32.mxu0 %v41347_v57  ;;  %9629 = vmatprep.mubr.f32.mxu1 %v41347_v57 }
 0x23b   :  { %v9287_v36 = vpop.permute.xlu1 %9286  ;;  %v9285_v19 = vpop.permute.xlu0 %9284 }
 0x23c   :  { %v9310_v2 = vsel %vm9304_vm9, %v9283_v16, %v9285_v19  ;;  %v9311_v3 = vsel %vm9304_vm9, %v9285_v19, %v9287_v36 }
 0x23d   :  { %11292 = vrot.lane.b32.xlu1 %v36513_v6, %s34800_s16  ;;  %11290 = vrot.lane.b32.xlu0 %v34981_v15, %s34800_s16 }
 0x23e   :  { %31720 = vmatprep.subr.msk.mxu0 %vm113_vm1, %v9310_v2 }
 0x23f   :  { %31721 = vmatpush1.msk.msra.mxu0 %vm113_vm1, %v9309_v1  ;;  %v9291_v63 = vpop.permute.xlu1 %9290  ;;  %v9289_v14 = vpop.permute.xlu0 %9288 }
 0x240   :  { %31722 = vmatmul.mubr.msk.f32.vlgmr.msra.gmra.mrb[2].mxu0 %vm110_vm2, %v36597_v8  ;;  %v9312_v48 = vsel %vm9304_vm9, %v9287_v36, %v9289_v14  ;;  %v9313_v36 = vsel %vm9304_vm9, %v9289_v14, %v9291_v63 }
 0x241   :  { %11930 = vrot.lane.b32.xlu1 %v34912_v5, %s34802_s15  ;;  %11294 = vrot.lane.b32.xlu0 %v35263_v55, %s34800_s16  ;;  %s34803_s16 = smov 74  }
 0x242   :  { %31723 = vmatprep.subr.msk.mxu1 %vm113_vm1, %v9312_v48  ;;  %9700 = vmatprep.mubr.f32.mxu0 %v41347_v57 }
 0x243   :  { %31724 = vmatpush1.msk.msra.mxu1 %vm113_vm1, %v9311_v3  ;;  %v9295_v39 = vpop.permute.xlu1 %9294  ;;  %v9293_v16 = vpop.permute.xlu0 %9292 }
 0x244   :  { %31725 = vmatmul.mubr.msk.f32.vlgmr.msra.gmra.mrb[2].mxu1 %vm110_vm2, %v36597_v8  ;;  %v9314_v2 = vsel %vm9304_vm9, %v9291_v63, %v9293_v16  ;;  %v9315_v63 = vsel %vm9304_vm9, %v9293_v16, %v9295_v39 }
 0x245   :  { %11934 = vrot.lane.b32.xlu1 %v34908_v4, %s34802_s15  ;;  %11932 = vrot.lane.b32.xlu0 %v36527_v28, %s34802_s15 }
 0x246   :  { %31726 = vmatprep.subr.msk.mxu0 %vm113_vm1, %v9314_v2  ;;  %9771 = vmatprep.mubr.f32.mxu1 %v41347_v57 }
 0x247   :  { %31727 = vmatpush1.msk.msra.mxu0 %vm113_vm1, %v9313_v36  ;;  %v9299_v19 = vpop.permute.xlu1 %9298  ;;  %v9297_v1 = vpop.permute.xlu0 %9296 }
 0x248   :  { %31728 = vmatmul.mubr.msk.f32.vlgmr.msra.gmra.mrb[4].mxu0 %vm110_vm2, %v36597_v8  ;;  %v9316_v48 = vsel %vm9304_vm9, %v9295_v39, %v9297_v1  ;;  %v9317_v39 = vsel %vm9304_vm9, %v9297_v1, %v9299_v19 }
 0x249   :  { %11928 = vrot.lane.b32.xlu1 %v36417_v53, %s34802_s15  ;;  %11936 = vrot.lane.b32.xlu0 %v36424_v0, %s34802_s15 }
 0x24a   :  { %31729 = vmatprep.subr.msk.mxu1 %vm113_vm1, %v9316_v48  ;;  %9842 = vmatprep.mubr.f32.mxu0 %v41347_v57 }
 0x24b   :  { %31730 = vmatpush1.msk.msra.mxu1 %vm113_vm1, %v9315_v63  ;;  %v9303_v14 = vpop.permute.xlu1 %9302  ;;  %v9301_v3 = vpop.permute.xlu0 %9300 }
 0x24c   :  { %31731 = vmatmul.mubr.msk.f32.vlgmr.msra.gmra.mrb[4].mxu1 %vm110_vm2, %v36597_v8  ;;  %v9319_v2 = vsel %vm9304_vm9, %v9301_v3, %v9303_v14  ;;  %32882 = vmatprep.subr.mxu1 %v41347_v57  ;;  %v9318_v36 = vsel %vm9304_vm9, %v9299_v19, %v9301_v3 }
 0x24d   :  { %11938 = vrot.lane.b32.xlu1 %v34929_v7, %s34802_s15  ;;  %11926 = vrot.lane.b32.xlu0 %v36555_v51, %s34803_s16 }
 0x24e   :  { %31732 = vmatprep.subr.msk.mxu0 %vm113_vm1, %v9318_v36  ;;  %32883 = vmatpush3.msk.msra.mxu1 %vm113_vm1, %v9319_v2 }
 0x24f   :  { %31733 = vmatpush1.msk.msra.mxu0 %vm113_vm1, %v9317_v39  ;;  %32884 = vmatprep.mubr.msk.f32.mxu1 %vm34779_vm3, %v41347_v57  ;;  %v9941_v16 = vpop.permute.xlu1 %9940  ;;  %v9939_v48 = vpop.permute.xlu0 %9938 }
 0x250   :  { %31734 = vmatmul.mubr.msk.f32.vlgmr.msra.gmra.mrb[6].mxu0 %vm110_vm2, %v36597_v8  ;;  %32885 = vmatmul.mubr.msk.f32.vlgmr.msra.gmra.mrb[6].mxu1 %vm110_vm2, %v36597_v8  ;;  %v9970_v63 = vsel %vm9968_vm10, %v9939_v48, %v9941_v16 }
 0x251   :  { %11942 = vrot.lane.b32.xlu1 %v34942_v9, %s34802_s15  ;;  %11940 = vrot.lane.b32.xlu0 %v36570_v10, %s34802_s15 }
 0x252   :  { %31737 = vmatprep.subr.msk.mxu0 %vm113_vm1, %v9970_v63  ;;  %10151 = vmatprep.mubr.f32.mxu1 %v41347_v57 }
 0x253   :  { %v9945_v19 = vpop.permute.xlu1 %9944  ;;  %v9943_v1 = vpop.permute.xlu0 %9942  ;;  %10080 = vmatprep.mubr.f32.mxu0 %v41347_v57 }
 0x254   :  { %v9971_v14 = vsel %vm9968_vm10, %v9941_v16, %v9943_v1  ;;  %v9972_v8 = vsel %vm9968_vm10, %v9943_v1, %v9945_v19 }
 0x255   :  { %11946 = vrot.lane.b32.xlu1 %v34955_v11, %s34802_s15  ;;  %11944 = vrot.lane.b32.xlu0 %v36466_v54, %s34802_s15 }
 0x256   :  { %31740 = vmatprep.subr.msk.mxu1 %vm113_vm1, %v9972_v8 }
 0x257   :  { %31741 = vmatpush1.msk.msra.mxu1 %vm113_vm1, %v9971_v14  ;;  %v36685_v3 = vpop.permute.xlu1 %9934  ;;  %v9937_v2 = vpop.permute.xlu0 %9936 }
 0x258   :  { %v9969_v36 = vsel %vm9968_vm10, %v9937_v2, %v9939_v48  ;;  %31742 = vmatmul.mubr.msk.f32.vlgmr.msra.gmra.mrb[0].mxu1 %vm110_vm2, %v36685_v3 }
 0x259   :  { %11950 = vrot.lane.b32.xlu1 %v34968_v13, %s34802_s15  ;;  %11948 = vrot.lane.b32.xlu0 %v36482_v12, %s34802_s15 }
 0x25a   :  { %31738 = vmatpush1.msk.msra.mxu0 %vm113_vm1, %v9969_v36  ;;  %10293 = vmatprep.mubr.f32.mxu1 %v41347_v57 }
 0x25b   :  { %31739 = vmatmul.mubr.msk.f32.vlgmr.msra.gmra.mrb[0].mxu0 %vm110_vm2, %v36685_v3  ;;  %v9949_v39 = vpop.permute.xlu1 %9948  ;;  %v9947_v16 = vpop.permute.xlu0 %9946 }
 0x25c   :  { %v9973_v48 = vsel %vm9968_vm10, %v9945_v19, %v9947_v16  ;;  %v9974_v63 = vsel %vm9968_vm10, %v9947_v16, %v9949_v39  ;;  %10222 = vmatprep.mubr.f32.mxu0 %v41347_v57 }
 0x25d   :  { %11954 = vrot.lane.b32.xlu1 %v34981_v15, %s34802_s15  ;;  %11952 = vrot.lane.b32.xlu0 %v36498_v56, %s34802_s15 }
 0x25e   :  { %31743 = vmatprep.subr.msk.mxu0 %vm113_vm1, %v9974_v63 }
 0x25f   :  { %31744 = vmatpush1.msk.msra.mxu0 %vm113_vm1, %v9973_v48  ;;  %v9953_v1 = vpop.permute.xlu1 %9952  ;;  %v9951_v14 = vpop.permute.xlu0 %9950 }
 0x260   :  { %31745 = vmatmul.mubr.msk.f32.vlgmr.msra.gmra.mrb[2].mxu0 %vm110_vm2, %v36685_v3  ;;  %v9975_v19 = vsel %vm9968_vm10, %v9949_v39, %v9951_v14  ;;  %v9976_v8 = vsel %vm9968_vm10, %v9951_v14, %v9953_v1 }
 0x261   :  { %11958 = vrot.lane.b32.xlu1 %v35263_v55, %s34802_s15  ;;  %11956 = vrot.lane.b32.xlu0 %v36513_v6, %s34802_s15  ;;  %s34807_s15 = smov 65  }
 0x262   :  { %31746 = vmatprep.subr.msk.mxu1 %vm113_vm1, %v9976_v8  ;;  %10364 = vmatprep.mubr.f32.mxu0 %v41347_v57 }
 0x263   :  { %31747 = vmatpush1.msk.msra.mxu1 %vm113_vm1, %v9975_v19  ;;  %v9957_v2 = vpop.permute.xlu1 %9956  ;;  %v9955_v36 = vpop.permute.xlu0 %9954 }
 0x264   :  { %31748 = vmatmul.mubr.msk.f32.vlgmr.msra.gmra.mrb[2].mxu1 %vm110_vm2, %v36685_v3  ;;  %v9977_v39 = vsel %vm9968_vm10, %v9953_v1, %v9955_v36  ;;  %v9978_v16 = vsel %vm9968_vm10, %v9955_v36, %v9957_v2 }
 0x265   :  { %12596 = vrot.lane.b32.xlu1 %v36527_v28, %s34804_s25  ;;  %12594 = vrot.lane.b32.xlu0 %v34912_v5, %s34804_s25 }
 0x266   :  { %31749 = vmatprep.subr.msk.mxu0 %vm113_vm1, %v9978_v16  ;;  %10435 = vmatprep.mubr.f32.mxu1 %v41347_v57 }
 0x267   :  { %31750 = vmatpush1.msk.msra.mxu0 %vm113_vm1, %v9977_v39  ;;  %v9961_v48 = vpop.permute.xlu1 %9960  ;;  %v9959_v63 = vpop.permute.xlu0 %9958 }
 0x268   :  { %31751 = vmatmul.mubr.msk.f32.vlgmr.msra.gmra.mrb[4].mxu0 %vm110_vm2, %v36685_v3  ;;  %v9979_v1 = vsel %vm9968_vm10, %v9957_v2, %v9959_v63  ;;  %v9980_v14 = vsel %vm9968_vm10, %v9959_v63, %v9961_v48 }
 0x269   :  { %12600 = vrot.lane.b32.xlu1 %v36424_v0, %s34804_s25  ;;  %12598 = vrot.lane.b32.xlu0 %v34908_v4, %s34804_s25 }
 0x26a   :  { %31752 = vmatprep.subr.msk.mxu1 %vm113_vm1, %v9980_v14  ;;  %10506 = vmatprep.mubr.f32.mxu0 %v41347_v57 }
 0x26b   :  { %31753 = vmatpush1.msk.msra.mxu1 %vm113_vm1, %v9979_v1  ;;  %v9965_v19 = vpop.permute.xlu1 %9964  ;;  %v9963_v8 = vpop.permute.xlu0 %9962 }
 0x26c   :  { %31754 = vmatmul.mubr.msk.f32.vlgmr.msra.gmra.mrb[4].mxu1 %vm110_vm2, %v36685_v3  ;;  %v9981_v2 = vsel %vm9968_vm10, %v9961_v48, %v9963_v8  ;;  %v9982_v36 = vsel %vm9968_vm10, %v9963_v8, %v9965_v19  ;;  %32887 = vmatprep.subr.mxu1 %v41347_v57 }
 0x26d   :  { %12590 = vrot.lane.b32.xlu1 %v36555_v51, %s34805_s1  ;;  %12592 = vrot.lane.b32.xlu0 %v36417_v53, %s34804_s25  ;;  %s34816_s1 = smov 26  }
 0x26e   :  { %31755 = vmatprep.subr.msk.mxu0 %vm113_vm1, %v9982_v36  ;;  %32889 = vmatprep.mubr.msk.f32.mxu1 %vm34779_vm3, %v41347_v57 }
 0x26f   :  { %31756 = vmatpush1.msk.msra.mxu0 %vm113_vm1, %v9981_v2  ;;  %v10603_v0 = vpop.permute.xlu1 %10602  ;;  %v9967_v39 = vpop.permute.xlu0 %9966 }
 0x270   :  { %31757 = vmatmul.mubr.msk.f32.vlgmr.msra.gmra.mrb[6].mxu0 %vm110_vm2, %v36685_v3  ;;  %v9983_v16 = vsel %vm9968_vm10, %v9965_v19, %v9967_v39  ;;  %vm12624_vm10 = vcmask 228352  }
 0x271   :  { %12604 = vrot.lane.b32.xlu1 %v36570_v10, %s34804_s25  ;;  %12602 = vrot.lane.b32.xlu0 %v34929_v7, %s34804_s25 }
 0x272   :  { %32888 = vmatpush3.msk.msra.mxu1 %vm113_vm1, %v9983_v16  ;;  %10744 = vmatprep.mubr.f32.mxu0 %v41347_v57 }
 0x273   :  { %32890 = vmatmul.mubr.msk.f32.vlgmr.msra.gmra.mrb[6].mxu1 %vm110_vm2, %v36685_v3  ;;  %v10607_v53 = vpop.permute.xlu1 %10606  ;;  %v10605_v48 = vpop.permute.xlu0 %10604 }
 0x274   :  { %v10634_v63 = vsel %vm10632_vm11, %v10603_v0, %v10605_v48  ;;  %10815 = vmatprep.mubr.f32.mxu1 %v41347_v57  ;;  %v10635_v8 = vsel %vm10632_vm11, %v10605_v48, %v10607_v53 }
 0x275   :  { %12608 = vrot.lane.b32.xlu1 %v36466_v54, %s34804_s25  ;;  %12606 = vrot.lane.b32.xlu0 %v34942_v9, %s34804_s25 }
 0x276   :  { %31760 = vmatprep.subr.msk.mxu0 %vm113_vm1, %v10634_v63 }
 0x277   :  { %v10601_v1 = vpop.permute.xlu1 %10600  ;;  %v10609_v14 = vpop.permute.xlu0 %10608 }
 0x278   :  { %v10633_v19 = vsel %vm10632_vm11, %v10601_v1, %v10603_v0  ;;  %v10636_v3 = vsel %vm10632_vm11, %v10607_v53, %v10609_v14 }
 0x279   :  { %12612 = vrot.lane.b32.xlu1 %v36482_v12, %s34804_s25  ;;  %12610 = vrot.lane.b32.xlu0 %v34955_v11, %s34804_s25 }
 0x27a   :  { %31761 = vmatpush1.msk.msra.mxu0 %vm113_vm1, %v10633_v19  ;;  %31763 = vmatprep.subr.msk.mxu1 %vm113_vm1, %v10636_v3 }
 0x27b   :  { %31764 = vmatpush1.msk.msra.mxu1 %vm113_vm1, %v10635_v8  ;;  %v10611_v54 = vpop.permute.xlu1 %10610  ;;  %v10599_v2 = vpop.permute.xlu0 %10598 }
 0x27c   :  { %31762 = vmatmul.mubr.msk.f32.vlgmr.msra.gmra.mrb[0].mxu0 %vm110_vm2, %v10599_v2  ;;  %31765 = vmatmul.mubr.msk.f32.vlgmr.msra.gmra.mrb[0].mxu1 %vm110_vm2, %v10599_v2  ;;  %v10637_v39 = vsel %vm10632_vm11, %v10609_v14, %v10611_v54 }
 0x27d   :  { %12616 = vrot.lane.b32.xlu1 %v36498_v56, %s34804_s25  ;;  %12614 = vrot.lane.b32.xlu0 %v34968_v13, %s34804_s25 }
 0x27e   :  { %10886 = vmatprep.mubr.f32.mxu0 %v41347_v57  ;;  %10957 = vmatprep.mubr.f32.mxu1 %v41347_v57 }
 0x27f   :  { %v10615_v12 = vpop.permute.xlu1 %10614  ;;  %v10613_v36 = vpop.permute.xlu0 %10612 }
 0x280   :  { %v10638_v0 = vsel %vm10632_vm11, %v10611_v54, %v10613_v36 }
 0x281   :  { %12620 = vrot.lane.b32.xlu1 %v36513_v6, %s34804_s25  ;;  %12618 = vrot.lane.b32.xlu0 %v34981_v15, %s34804_s25  ;;  %v10639_v6 = vsel %vm10632_vm11, %v10613_v36, %v10615_v12 }
 0x282   :  { %31766 = vmatprep.subr.msk.mxu0 %vm113_vm1, %v10638_v0 }
 0x283   :  { %31767 = vmatpush1.msk.msra.mxu0 %vm113_vm1, %v10637_v39  ;;  %v10619_v56 = vpop.permute.xlu1 %10618  ;;  %v10617_v16 = vpop.permute.xlu0 %10616 }
 0x284   :  { %31768 = vmatmul.mubr.msk.f32.vlgmr.msra.gmra.mrb[2].mxu0 %vm110_vm2, %v10599_v2  ;;  %v10640_v53 = vsel %vm10632_vm11, %v10615_v12, %v10617_v16  ;;  %v10641_v14 = vsel %vm10632_vm11, %v10617_v16, %v10619_v56 }
 0x285   :  { %13254 = vrot.lane.b32.xlu1 %v36555_v51, %s34806_s30  ;;  %12622 = vrot.lane.b32.xlu0 %v35263_v55, %s34804_s25  ;;  %s34809_s25 = smov 56  }
 0x286   :  { %31769 = vmatprep.subr.msk.mxu1 %vm113_vm1, %v10640_v53  ;;  %11028 = vmatprep.mubr.f32.mxu0 %v41347_v57 }
 0x287   :  { %31770 = vmatpush1.msk.msra.mxu1 %vm113_vm1, %v10639_v6  ;;  %v10623_v48 = vpop.permute.xlu1 %10622  ;;  %v10621_v63 = vpop.permute.xlu0 %10620 }
 0x288   :  { %31771 = vmatmul.mubr.msk.f32.vlgmr.msra.gmra.mrb[2].mxu1 %vm110_vm2, %v10599_v2  ;;  %v10642_v1 = vsel %vm10632_vm11, %v10619_v56, %v10621_v63  ;;  %v10643_v54 = vsel %vm10632_vm11, %v10621_v63, %v10623_v48 }
 0x289   :  { %13844 = vrot.lane.b32.xlu1 %v35263_v55, %s34770_s23  ;;  %31772 = vmatprep.subr.msk.mxu0 %vm113_vm1, %v10642_v1 }
 0x28a   :  { %31773 = vmatpush1.msk.msra.mxu0 %vm113_vm1, %v10641_v14  ;;  %11099 = vmatprep.mubr.f32.mxu1 %v41347_v57 }
 0x28b   :  { %v10627_v19 = vpop.permute.xlu1 %10626  ;;  %31774 = vmatmul.mubr.msk.f32.vlgmr.msra.gmra.mrb[4].mxu0 %vm110_vm2, %v10599_v2  ;;  %v10625_v3 = vpop.permute.xlu0 %10624  ;;  %13842 = vrot.lane.b32.xlu0 %v36555_v51, %s34807_s15  ;;  %s34817_s15 = smov 20  }
 0x28c   :  { %v10644_v8 = vsel %vm10632_vm11, %v10623_v48, %v10625_v3  ;;  %11170 = vmatprep.mubr.f32.mxu0 %v41347_v57  ;;  %v10645_v56 = vsel %vm10632_vm11, %v10625_v3, %v10627_v19 }
 0x28d   :  { %14437 = vrot.lane.b32.xlu1 %v35263_v55, %s34772_s18  ;;  %31775 = vmatprep.subr.msk.mxu1 %vm113_vm1, %v10644_v8 }
 0x28e   :  { %31776 = vmatpush1.msk.msra.mxu1 %vm113_vm1, %v10643_v54 }
 0x28f   :  { %v10631_v12 = vpop.permute.xlu1 %10630  ;;  %31777 = vmatmul.mubr.msk.f32.vlgmr.msra.gmra.mrb[4].mxu1 %vm110_vm2, %v10599_v2  ;;  %v10629_v36 = vpop.permute.xlu0 %10628  ;;  %32892 = vmatprep.subr.mxu1 %v41347_v57 }
 0x290   :  { %v10647_v0 = vsel %vm10632_vm11, %v10629_v36, %v10631_v12  ;;  %v10646_v39 = vsel %vm10632_vm11, %v10627_v19, %v10629_v36  ;;  %32894 = vmatprep.mubr.msk.f32.mxu1 %vm34779_vm3, %v41347_v57  ;;  %14435 = vrot.lane.b32.xlu0 %v36555_v51, %s34791_s12  ;;  %vm18638_vm11 = vcmask 982016  }
 0x291   :  { %15030 = vrot.lane.b32.xlu1 %v35263_v55, %s34771_s26  ;;  %31778 = vmatprep.subr.msk.mxu0 %vm113_vm1, %v10646_v39  ;;  %s34808_s26 = smov 59  }
 0x292   :  { %32893 = vmatpush3.msk.msra.mxu1 %vm113_vm1, %v10647_v0  ;;  %31779 = vmatpush1.msk.msra.mxu0 %vm113_vm1, %v10645_v56 }
 0x293   :  { %v11269_v16 = vpop.permute.xlu1 %11268  ;;  %31780 = vmatmul.mubr.msk.f32.vlgmr.msra.gmra.mrb[6].mxu0 %vm110_vm2, %v10599_v2  ;;  %32895 = vmatmul.mubr.msk.f32.vlgmr.msra.gmra.mrb[6].mxu1 %vm110_vm2, %v10599_v2  ;;  %v11267_v53 = vpop.permute.xlu0 %11266 }
 0x294   :  { %v11298_v6 = vsel %vm11296_vm13, %v11267_v53, %v11269_v16  ;;  %11479 = vmatprep.mubr.f32.mxu1 %v41347_v57  ;;  %11408 = vmatprep.mubr.f32.mxu0 %v41347_v57 }
 0x295   :  { %15623 = vrot.lane.b32.xlu1 %v35263_v55, %s34775_s21  ;;  %31783 = vmatprep.subr.msk.mxu0 %vm113_vm1, %v11298_v6 }
 0x296   :  { %15028 = vrot.lane.b32.xlu0 %v36555_v51, %s34808_s26  ;;  %s34815_s26 = smov 38  }
 0x297   :  { %v11273_v48 = vpop.permute.xlu1 %11272  ;;  %v11271_v63 = vpop.permute.xlu0 %11270 }
 0x298   :  { %v11299_v1 = vsel %vm11296_vm13, %v11269_v16, %v11271_v63  ;;  %v11300_v2 = vsel %vm11296_vm13, %v11271_v63, %v11273_v48 }
 0x299   :  { %31786 = vmatprep.subr.msk.mxu1 %vm113_vm1, %v11300_v2 }
 0x29a   :  { %31787 = vmatpush1.msk.msra.mxu1 %vm113_vm1, %v11299_v1  ;;  %15621 = vrot.lane.b32.xlu0 %v36555_v51, %s34809_s25 }
 0x29b   :  { %v11263_v14 = vpop.permute.xlu1 %11262  ;;  %v11265_v19 = vpop.permute.xlu0 %11264 }
 0x29c   :  { %v11297_v3 = vsel %vm11296_vm13, %v11265_v19, %v11267_v53  ;;  %31788 = vmatmul.mubr.msk.f32.vlgmr.msra.gmra.mrb[0].mxu1 %vm110_vm2, %v11263_v14 }
 0x29d   :  { %31784 = vmatpush1.msk.msra.mxu0 %vm113_vm1, %v11297_v3  ;;  %11621 = vmatprep.mubr.f32.mxu1 %v41347_v57 }
 0x29e   :  { %31785 = vmatmul.mubr.msk.f32.vlgmr.msra.gmra.mrb[0].mxu0 %vm110_vm2, %v11263_v14 }
 0x29f   :  { %v11277_v8 = vpop.permute.xlu1 %11276  ;;  %v11275_v54 = vpop.permute.xlu0 %11274  ;;  %11550 = vmatprep.mubr.f32.mxu0 %v41347_v57 }
 0x2a0   :  { %v11301_v12 = vsel %vm11296_vm13, %v11273_v48, %v11275_v54  ;;  %v11302_v51 = vsel %vm11296_vm13, %v11275_v54, %v11277_v8 }
 0x2a1   :  { %31789 = vmatprep.subr.msk.mxu0 %vm113_vm1, %v11302_v51 }
 0x2a2   :  { %31790 = vmatpush1.msk.msra.mxu0 %vm113_vm1, %v11301_v12 }
 0x2a3   :  { %v11281_v36 = vpop.permute.xlu1 %11280  ;;  %31791 = vmatmul.mubr.msk.f32.vlgmr.msra.gmra.mrb[2].mxu0 %vm110_vm2, %v11263_v14  ;;  %v11279_v0 = vpop.permute.xlu0 %11278 }
 0x2a4   :  { %v11303_v39 = vsel %vm11296_vm13, %v11277_v8, %v11279_v0  ;;  %v11304_v56 = vsel %vm11296_vm13, %v11279_v0, %v11281_v36  ;;  %11692 = vmatprep.mubr.f32.mxu0 %v41347_v57 }
 0x2a5   :  { %31792 = vmatprep.subr.msk.mxu1 %vm113_vm1, %v11304_v56 }
 0x2a6   :  { %31793 = vmatpush1.msk.msra.mxu1 %vm113_vm1, %v11303_v39 }
 0x2a7   :  { %v11285_v16 = vpop.permute.xlu1 %11284  ;;  %31794 = vmatmul.mubr.msk.f32.vlgmr.msra.gmra.mrb[2].mxu1 %vm110_vm2, %v11263_v14  ;;  %v11283_v53 = vpop.permute.xlu0 %11282 }
 0x2a8   :  { %v11305_v6 = vsel %vm11296_vm13, %v11281_v36, %v11283_v53  ;;  %v11306_v48 = vsel %vm11296_vm13, %v11283_v53, %v11285_v16  ;;  %11763 = vmatprep.mubr.f32.mxu1 %v41347_v57 }
 0x2a9   :  { %31795 = vmatprep.subr.msk.mxu0 %vm113_vm1, %v11306_v48 }
 0x2aa   :  { %31796 = vmatpush1.msk.msra.mxu0 %vm113_vm1, %v11305_v6 }
 0x2ab   :  { %v11289_v63 = vpop.permute.xlu1 %11288  ;;  %31797 = vmatmul.mubr.msk.f32.vlgmr.msra.gmra.mrb[4].mxu0 %vm110_vm2, %v11263_v14  ;;  %v11287_v1 = vpop.permute.xlu0 %11286 }
 0x2ac   :  { %v11307_v2 = vsel %vm11296_vm13, %v11285_v16, %v11287_v1  ;;  %v11308_v19 = vsel %vm11296_vm13, %v11287_v1, %v11289_v63  ;;  %11834 = vmatprep.mubr.f32.mxu0 %v41347_v57 }
 0x2ad   :  { %31798 = vmatprep.subr.msk.mxu1 %vm113_vm1, %v11308_v19 }
 0x2ae   :  { %31799 = vmatpush1.msk.msra.mxu1 %vm113_vm1, %v11307_v2 }
 0x2af   :  { %v11293_v3 = vpop.permute.xlu1 %11292  ;;  %31800 = vmatmul.mubr.msk.f32.vlgmr.msra.gmra.mrb[4].mxu1 %vm110_vm2, %v11263_v14  ;;  %v11291_v8 = vpop.permute.xlu0 %11290  ;;  %32897 = vmatprep.subr.mxu1 %v41347_v57 }
 0x2b0   :  { %v11309_v54 = vsel %vm11296_vm13, %v11289_v63, %v11291_v8  ;;  %v11310_v12 = vsel %vm11296_vm13, %v11291_v8, %v11293_v3  ;;  %32899 = vmatprep.mubr.msk.f32.mxu1 %vm34779_vm3, %v41347_v57 }
 0x2b1   :  { %31801 = vmatprep.subr.msk.mxu0 %vm113_vm1, %v11310_v12 }
 0x2b2   :  { %31802 = vmatpush1.msk.msra.mxu0 %vm113_vm1, %v11309_v54 }
 0x2b3   :  { %v11931_v51 = vpop.permute.xlu1 %11930  ;;  %31803 = vmatmul.mubr.msk.f32.vlgmr.msra.gmra.mrb[6].mxu0 %vm110_vm2, %v11263_v14  ;;  %v11295_v36 = vpop.permute.xlu0 %11294 }
 0x2b4   :  { %v11311_v0 = vsel %vm11296_vm13, %v11293_v3, %v11295_v36  ;;  %12072 = vmatprep.mubr.f32.mxu0 %v41347_v57 }
 0x2b5   :  { %32898 = vmatpush3.msk.msra.mxu1 %vm113_vm1, %v11311_v0 }
 0x2b6   :  { %32900 = vmatmul.mubr.msk.f32.vlgmr.msra.gmra.mrb[6].mxu1 %vm110_vm2, %v11263_v14 }
 0x2b7   :  { %v11935_v39 = vpop.permute.xlu1 %11934  ;;  %v11933_v56 = vpop.permute.xlu0 %11932  ;;  %12143 = vmatprep.mubr.f32.mxu1 %v41347_v57 }
 0x2b8   :  { %v11962_v16 = vsel %vm11960_vm15, %v11931_v51, %v11933_v56  ;;  %v11963_v1 = vsel %vm11960_vm15, %v11933_v56, %v11935_v39 }
 0x2b9   :  { %31806 = vmatprep.subr.msk.mxu0 %vm113_vm1, %v11962_v16  ;;  %v34810_v16 = vmov 0  }
 0x2ba   :  { %34218 = vset.pattern.permute.xlu1 %v34810_v16  ;;  %34219 = vset.pattern.permute.xlu0 %v34810_v16 }
 0x2bb   :  { %v11929_v53 = vpop.permute.xlu1 %11928  ;;  %v11937_v6 = vpop.permute.xlu0 %11936 }
 0x2bc   :  { %v11961_v48 = vsel %vm11960_vm15, %v11929_v53, %v11931_v51  ;;  %v11964_v63 = vsel %vm11960_vm15, %v11935_v39, %v11937_v6  ;;  %v16214_v53 = vld [vmem:[%s41199_s2] sm:$0x3f]  ;;  %s34818_s2 = smov 14  }
 0x2bd   :  { %31807 = vmatpush1.msk.msra.mxu0 %vm113_vm1, %v11961_v48  ;;  %31809 = vmatprep.subr.msk.mxu1 %vm113_vm1, %v11964_v63 }
 0x2be   :  { %31810 = vmatpush1.msk.msra.mxu1 %vm113_vm1, %v11963_v1  ;;  %16454 = vperm.xlu1 %34218, %v16214_v53  }
 0x2bf   :  { %v11939_v14 = vpop.permute.xlu1 %11938  ;;  %v11927_v2 = vpop.permute.xlu0 %11926 }
 0x2c0   :  { %31808 = vmatmul.mubr.msk.f32.vlgmr.msra.gmra.mrb[0].mxu0 %vm110_vm2, %v11927_v2  ;;  %31811 = vmatmul.mubr.msk.f32.vlgmr.msra.gmra.mrb[0].mxu1 %vm110_vm2, %v11927_v2  ;;  %v11965_v54 = vsel %vm11960_vm15, %v11937_v6, %v11939_v14 }
 0x2c1   :  { %12214 = vmatprep.mubr.f32.mxu0 %v41347_v57  ;;  %12285 = vmatprep.mubr.f32.mxu1 %v41347_v57 }
 0x2c3   :  { %v11943_v19 = vpop.permute.xlu1 %11942  ;;  %v11941_v3 = vpop.permute.xlu0 %11940 }
 0x2c4   :  { %v11966_v8 = vsel %vm11960_vm15, %v11939_v14, %v11941_v3  ;;  %v11967_v0 = vsel %vm11960_vm15, %v11941_v3, %v11943_v19 }
 0x2c5   :  { %31812 = vmatprep.subr.msk.mxu0 %vm113_vm1, %v11966_v8 }
 0x2c6   :  { %31813 = vmatpush1.msk.msra.mxu0 %vm113_vm1, %v11965_v54 }
 0x2c7   :  { %v11947_v12 = vpop.permute.xlu1 %11946  ;;  %31814 = vmatmul.mubr.msk.f32.vlgmr.msra.gmra.mrb[2].mxu0 %vm110_vm2, %v11927_v2  ;;  %v11945_v51 = vpop.permute.xlu0 %11944 }
 0x2c8   :  { %v11968_v36 = vsel %vm11960_vm15, %v11943_v19, %v11945_v51  ;;  %12356 = vmatprep.mubr.f32.mxu0 %v41347_v57  ;;  %v11969_v48 = vsel %vm11960_vm15, %v11945_v51, %v11947_v12 }
 0x2c9   :  { %31815 = vmatprep.subr.msk.mxu1 %vm113_vm1, %v11968_v36 }
 0x2ca   :  { %31816 = vmatpush1.msk.msra.mxu1 %vm113_vm1, %v11967_v0 }
 0x2cb   :  { %v11951_v39 = vpop.permute.xlu1 %11950  ;;  %31817 = vmatmul.mubr.msk.f32.vlgmr.msra.gmra.mrb[2].mxu1 %vm110_vm2, %v11927_v2  ;;  %v11949_v56 = vpop.permute.xlu0 %11948 }
 0x2cc   :  { %v11970_v6 = vsel %vm11960_vm15, %v11947_v12, %v11949_v56  ;;  %12427 = vmatprep.mubr.f32.mxu1 %v41347_v57  ;;  %v11971_v19 = vsel %vm11960_vm15, %v11949_v56, %v11951_v39 }
 0x2cd   :  { %31818 = vmatprep.subr.msk.mxu0 %vm113_vm1, %v11970_v6 }
 0x2ce   :  { %31819 = vmatpush1.msk.msra.mxu0 %vm113_vm1, %v11969_v48 }
 0x2cf   :  { %v11955_v63 = vpop.permute.xlu1 %11954  ;;  %31820 = vmatmul.mubr.msk.f32.vlgmr.msra.gmra.mrb[4].mxu0 %vm110_vm2, %v11927_v2  ;;  %v11953_v1 = vpop.permute.xlu0 %11952 }
 0x2d0   :  { %v11972_v14 = vsel %vm11960_vm15, %v11951_v39, %v11953_v1  ;;  %12498 = vmatprep.mubr.f32.mxu0 %v41347_v57  ;;  %v11973_v51 = vsel %vm11960_vm15, %v11953_v1, %v11955_v63 }
 0x2d1   :  { %31821 = vmatprep.subr.msk.mxu1 %vm113_vm1, %v11972_v14 }
 0x2d2   :  { %31822 = vmatpush1.msk.msra.mxu1 %vm113_vm1, %v11971_v19 }
 0x2d3   :  { %v11959_v3 = vpop.permute.xlu1 %11958  ;;  %31823 = vmatmul.mubr.msk.f32.vlgmr.msra.gmra.mrb[4].mxu1 %vm110_vm2, %v11927_v2  ;;  %v11957_v8 = vpop.permute.xlu0 %11956  ;;  %32902 = vmatprep.subr.mxu1 %v41347_v57 }
 0x2d4   :  { %v11975_v54 = vsel %vm11960_vm15, %v11957_v8, %v11959_v3  ;;  %v11974_v12 = vsel %vm11960_vm15, %v11955_v63, %v11957_v8  ;;  %32904 = vmatprep.mubr.msk.f32.mxu1 %vm34779_vm3, %v41347_v57 }
 0x2d5   :  { %31824 = vmatprep.subr.msk.mxu0 %vm113_vm1, %v11974_v12  ;;  %32903 = vmatpush3.msk.msra.mxu1 %vm113_vm1, %v11975_v54 }
 0x2d6   :  { %31825 = vmatpush1.msk.msra.mxu0 %vm113_vm1, %v11973_v51 }
 0x2d7   :  { %v12597_v36 = vpop.permute.xlu1 %12596  ;;  %31826 = vmatmul.mubr.msk.f32.vlgmr.msra.gmra.mrb[6].mxu0 %vm110_vm2, %v11927_v2  ;;  %32905 = vmatmul.mubr.msk.f32.vlgmr.msra.gmra.mrb[6].mxu1 %vm110_vm2, %v11927_v2  ;;  %v12595_v0 = vpop.permute.xlu0 %12594 }
 0x2d8   :  { %v12626_v39 = vsel %vm12624_vm10, %v12595_v0, %v12597_v36  ;;  %12807 = vmatprep.mubr.f32.mxu1 %v41347_v57  ;;  %12736 = vmatprep.mubr.f32.mxu0 %v41347_v57 }
 0x2d9   :  { %31829 = vmatprep.subr.msk.mxu0 %vm113_vm1, %v12626_v39 }
 0x2db   :  { %v12601_v56 = vpop.permute.xlu1 %12600  ;;  %v12599_v16 = vpop.permute.xlu0 %12598 }
 0x2dc   :  { %v12627_v53 = vsel %vm12624_vm10, %v12597_v36, %v12599_v16  ;;  %v12628_v6 = vsel %vm12624_vm10, %v12599_v16, %v12601_v56 }
 0x2dd   :  { %31832 = vmatprep.subr.msk.mxu1 %vm113_vm1, %v12628_v6 }
 0x2de   :  { %31833 = vmatpush1.msk.msra.mxu1 %vm113_vm1, %v12627_v53 }
 0x2df   :  { %v12591_v2 = vpop.permute.xlu1 %12590  ;;  %v12593_v48 = vpop.permute.xlu0 %12592 }
 0x2e0   :  { %v12625_v63 = vsel %vm12624_vm10, %v12593_v48, %v12595_v0  ;;  %31834 = vmatmul.mubr.msk.f32.vlgmr.msra.gmra.mrb[0].mxu1 %vm110_vm2, %v12591_v2 }
 0x2e1   :  { %31830 = vmatpush1.msk.msra.mxu0 %vm113_vm1, %v12625_v63  ;;  %12949 = vmatprep.mubr.f32.mxu1 %v41347_v57 }
 0x2e2   :  { %31831 = vmatmul.mubr.msk.f32.vlgmr.msra.gmra.mrb[0].mxu0 %vm110_vm2, %v12591_v2 }
 0x2e3   :  { %v12605_v1 = vpop.permute.xlu1 %12604  ;;  %v12603_v14 = vpop.permute.xlu0 %12602  ;;  %12878 = vmatprep.mubr.f32.mxu0 %v41347_v57 }
 0x2e4   :  { %v12629_v19 = vsel %vm12624_vm10, %v12601_v56, %v12603_v14  ;;  %v12630_v3 = vsel %vm12624_vm10, %v12603_v14, %v12605_v1 }
 0x2e5   :  { %31835 = vmatprep.subr.msk.mxu0 %vm113_vm1, %v12630_v3 }
 0x2e6   :  { %31836 = vmatpush1.msk.msra.mxu0 %vm113_vm1, %v12629_v19 }
 0x2e7   :  { %v12609_v8 = vpop.permute.xlu1 %12608  ;;  %31837 = vmatmul.mubr.msk.f32.vlgmr.msra.gmra.mrb[2].mxu0 %vm110_vm2, %v12591_v2  ;;  %v12607_v54 = vpop.permute.xlu0 %12606 }
 0x2e8   :  { %v12631_v12 = vsel %vm12624_vm10, %v12605_v1, %v12607_v54  ;;  %v12632_v51 = vsel %vm12624_vm10, %v12607_v54, %v12609_v8  ;;  %13020 = vmatprep.mubr.f32.mxu0 %v41347_v57 }
 0x2e9   :  { %31838 = vmatprep.subr.msk.mxu1 %vm113_vm1, %v12632_v51 }
 0x2ea   :  { %31839 = vmatpush1.msk.msra.mxu1 %vm113_vm1, %v12631_v12  ;;  %v34762_v12 = vld [vmem:[%s41197_s0 + $0x10] sm:$0x77] }
 0x2eb   :  { %v12613_v36 = vpop.permute.xlu1 %12612  ;;  %31840 = vmatmul.mubr.msk.f32.vlgmr.msra.gmra.mrb[2].mxu1 %vm110_vm2, %v12591_v2  ;;  %v12611_v0 = vpop.permute.xlu0 %12610 }
 0x2ec   :  { %v12633_v39 = vsel %vm12624_vm10, %v12609_v8, %v12611_v0  ;;  %v12634_v56 = vsel %vm12624_vm10, %v12611_v0, %v12613_v36  ;;  %13091 = vmatprep.mubr.f32.mxu1 %v41347_v57 }
 0x2ed   :  { %31841 = vmatprep.subr.msk.mxu0 %vm113_vm1, %v12634_v56 }
 0x2ee   :  { %31842 = vmatpush1.msk.msra.mxu0 %vm113_vm1, %v12633_v39 }
 0x2ef   :  { %v12617_v16 = vpop.permute.xlu1 %12616  ;;  %31843 = vmatmul.mubr.msk.f32.vlgmr.msra.gmra.mrb[4].mxu0 %vm110_vm2, %v12591_v2  ;;  %v12615_v53 = vpop.permute.xlu0 %12614 }
 0x2f0   :  { %v12635_v6 = vsel %vm12624_vm10, %v12613_v36, %v12615_v53  ;;  %v12636_v48 = vsel %vm12624_vm10, %v12615_v53, %v12617_v16  ;;  %13162 = vmatprep.mubr.f32.mxu0 %v41347_v57 }
 0x2f1   :  { %31844 = vmatprep.subr.msk.mxu1 %vm113_vm1, %v12636_v48  ;;  %v37355_v48 = vld [vmem:[%s41200_s3] sm:$0xff] }
 0x2f2   :  { %31845 = vmatpush1.msk.msra.mxu1 %vm113_vm1, %v12635_v6  ;;  %v37346_v6 = vld [vmem:[%s41200_s3 + $0x10] sm:$0xff] }
 0x2f3   :  { %v12621_v63 = vpop.permute.xlu1 %12620  ;;  %31846 = vmatmul.mubr.msk.f32.vlgmr.msra.gmra.mrb[4].mxu1 %vm110_vm2, %v12591_v2  ;;  %v12619_v1 = vpop.permute.xlu0 %12618  ;;  %32907 = vmatprep.subr.mxu1 %v41347_v57 }
 0x2f4   :  { %v12637_v14 = vsel %vm12624_vm10, %v12617_v16, %v12619_v1  ;;  %v12638_v19 = vsel %vm12624_vm10, %v12619_v1, %v12621_v63  ;;  %32909 = vmatprep.mubr.msk.f32.mxu1 %vm34779_vm3, %v41347_v57 }
 0x2f5   :  { %31847 = vmatprep.subr.msk.mxu0 %vm113_vm1, %v12638_v19 }
 0x2f6   :  { %31848 = vmatpush1.msk.msra.mxu0 %vm113_vm1, %v12637_v14 }
 0x2f7   :  { %31849 = vmatmul.mubr.msk.f32.vlgmr.msra.gmra.mrb[6].mxu0 %vm110_vm2, %v12591_v2  ;;  %v12623_v3 = vpop.permute.xlu0 %12622  ;;  %31852 = vmatprep.subr.msk.mxu0 %vm113_vm1, %v36527_v28  ;;  %v13255_v54 = vpop.permute.xlu1 %13254  ;;  %v34764_v28 = vld [vmem:[%s41197_s0 + $0x28] sm:$0x77] }
 0x2f8   :  { %v12639_v8 = vsel %vm12624_vm10, %v12621_v63, %v12623_v3  ;;  %31853 = vmatpush1.msk.msra.mxu0 %vm113_vm1, %v34912_v5  ;;  %13324 = vmatprep.mubr.f32.mxu0 %v41347_v57  ;;  %v34763_v5 = vld [vmem:[%s41197_s0 + $0x20] sm:$0x77] }
 0x2f9   :  { %32908 = vmatpush3.msk.msra.mxu1 %vm113_vm1, %v12639_v8  ;;  %31858 = vmatprep.subr.msk.mxu0 %vm113_vm1, %v36570_v10 }
 0x2fa   :  { %32910 = vmatmul.mubr.msk.f32.vlgmr.msra.gmra.mrb[6].mxu1 %vm110_vm2, %v12591_v2  ;;  %31855 = vmatprep.subr.msk.mxu1 %vm113_vm1, %v34762_v12 }
 0x2fb   :  { %31854 = vmatmul.mubr.msk.f32.vlgmr.msra.gmra.mrb[0].mxu0 %vm110_vm2, %v13255_v54  ;;  %31856 = vmatpush1.msk.msra.mxu1 %vm113_vm1, %v34908_v4  ;;  %v34765_v4 = vld [vmem:[%s41197_s0 + $0x38] sm:$0x77] }
 0x2fc   :  { %13395 = vmatprep.mubr.f32.mxu1 %v41347_v57  ;;  %31859 = vmatpush1.msk.msra.mxu0 %vm113_vm1, %v34929_v7  ;;  %v34766_v7 = vld [vmem:[%s41197_s0 + $0x30] sm:$0x77]  ;;  %s41446_s0 = smov 32  }
 0x2fd   :  { %13466 = vmatprep.mubr.f32.mxu0 %v41347_v57  ;;  %31861 = vmatprep.subr.msk.mxu1 %vm113_vm1, %v34763_v5 }
 0x2fe   :  { %31857 = vmatmul.mubr.msk.f32.vlgmr.msra.gmra.mrb[0].mxu1 %vm110_vm2, %v13255_v54  ;;  %31864 = vmatprep.subr.msk.mxu0 %vm113_vm1, %v34764_v28 }
 0x2ff   :  { %31860 = vmatmul.mubr.msk.f32.vlgmr.msra.gmra.mrb[2].mxu0 %vm110_vm2, %v13255_v54  ;;  %31862 = vmatpush1.msk.msra.mxu1 %vm113_vm1, %v34942_v9  ;;  %v13843_v9 = vpop.permute.xlu0 %13842 }
 0x300   :  { %13537 = vmatprep.mubr.f32.mxu1 %v41347_v57  ;;  %31865 = vmatpush1.msk.msra.mxu0 %vm113_vm1, %v34955_v11  ;;  %v13845_v11 = vpop.permute.xlu1 %13844 }
 0x301   :  { %13608 = vmatprep.mubr.f32.mxu0 %v41347_v57  ;;  %31870 = vmatprep.subr.msk.mxu0 %vm113_vm1, %v34765_v4 }
 0x302   :  { %31863 = vmatmul.mubr.msk.f32.vlgmr.msra.gmra.mrb[2].mxu1 %vm110_vm2, %v13255_v54  ;;  %31867 = vmatprep.subr.msk.mxu1 %vm113_vm1, %v34766_v7 }
 0x303   :  { %31866 = vmatmul.mubr.msk.f32.vlgmr.msra.gmra.mrb[4].mxu0 %vm110_vm2, %v13255_v54  ;;  %31868 = vmatpush1.msk.msra.mxu1 %vm113_vm1, %v34968_v13  ;;  %v13846_v13 = vsel %vm95_vm0, %v35176_v43, %v13845_v11  ;;  %v41365_v43 = vld [vmem:[#allocation8_spill] sm:$0xff] }
 0x304   :  { %31871 = vmatpush1.msk.msra.mxu0 %vm113_vm1, %v34981_v15  ;;  %13679 = vmatprep.mubr.f32.mxu1 %v41347_v57  ;;  %v14436_v15 = vpop.permute.xlu0 %14435 }
 0x305   :  { %31875 = vmatprep.subr.msk.mxu0 %vm113_vm1, %v35086_v23  ;;  %32912 = vmatprep.subr.mxu1 %v41347_v57 }
 0x306   :  { %31869 = vmatmul.mubr.msk.f32.vlgmr.msra.gmra.mrb[4].mxu1 %vm110_vm2, %v13255_v54  ;;  %13750 = vmatprep.mubr.f32.mxu0 %v41347_v57 }
 0x307   :  { %32913 = vmatpush3.msk.msra.mxu1 %vm113_vm1, %v35263_v55  ;;  %31872 = vmatmul.mubr.msk.f32.vlgmr.msra.gmra.mrb[6].mxu0 %vm110_vm2, %v13255_v54  ;;  %v41368_v55 = vld [vmem:[#allocation12_spill] sm:$0xff] }
 0x308   :  { %31876 = vmatpush1.msk.msra.mxu0 %vm113_vm1, %v35083_v22  ;;  %31878 = vmatprep.subr.msk.mxu1 %vm113_vm1, %v35113_v29  ;;  %v15029_v23 = vpop.permute.xlu0 %15028 }
 0x309   :  { %31881 = vmatprep.subr.msk.mxu0 %vm113_vm1, %v35129_v33  ;;  %32914 = vmatprep.mubr.msk.f32.mxu1 %vm34779_vm3, %v41347_v57  ;;  %v41360_v33 = vld [vmem:[#allocation2_spill] sm:$0xff] }
 0x30a   :  { %32915 = vmatmul.mubr.msk.f32.vlgmr.msra.gmra.mrb[6].mxu1 %vm110_vm2, %v13255_v54  ;;  %13917 = vmatprep.mubr.f32.mxu0 %v41347_v57 }
 0x30b   :  { %31879 = vmatpush1.msk.msra.mxu1 %vm113_vm1, %v35080_v21  ;;  %31877 = vmatmul.mubr.msk.f32.vlgmr.msra.gmra.mrb[0].mxu0 %vm110_vm2, %v13843_v9  ;;  %v14438_v21 = vpop.permute.xlu1 %14437 }
 0x30c   :  { %31882 = vmatpush1.msk.msra.mxu0 %vm113_vm1, %v35116_v30  ;;  %31884 = vmatprep.subr.msk.mxu1 %vm113_vm1, %v35146_v37  ;;  %v14439_v22 = vsel %vm1342_vm4, %v35340_v27, %v14438_v21  ;;  %v41359_v30 = vld [vmem:[#allocation4_spill] sm:$0xff]  ;;  %v41362_v37 = vld [vmem:[#allocation7_spill] sm:$0xff]  ;;  %v41375_v27 = vld [vmem:[#allocation17_spill] sm:$0xff] }
 0x30d   :  { %31887 = vmatprep.subr.msk.mxu0 %vm113_vm1, %v35162_v41  ;;  %13988 = vmatprep.mubr.f32.mxu1 %v41347_v57 }
 0x30e   :  { %31880 = vmatmul.mubr.msk.f32.vlgmr.msra.gmra.mrb[0].mxu1 %vm110_vm2, %v13843_v9  ;;  %14059 = vmatprep.mubr.f32.mxu0 %v41347_v57 }
 0x30f   :  { %31885 = vmatpush1.msk.msra.mxu1 %vm113_vm1, %v35132_v34  ;;  %31883 = vmatmul.mubr.msk.f32.vlgmr.msra.gmra.mrb[2].mxu0 %vm110_vm2, %v13843_v9  ;;  %v15031_v29 = vpop.permute.xlu1 %15030  ;;  %v41361_v34 = vld [vmem:[#allocation3_spill] sm:$0xff] }
 0x310   :  { %31888 = vmatpush1.msk.msra.mxu0 %vm113_vm1, %v35149_v38  ;;  %31890 = vmatprep.subr.msk.mxu1 %vm113_vm1, %v35182_v45  ;;  %v41363_v38 = vld [vmem:[#allocation6_spill] sm:$0xff] }
 0x311   :  { %31893 = vmatprep.subr.msk.mxu0 %vm113_vm1, %v13846_v13  ;;  %14130 = vmatprep.mubr.f32.mxu1 %v41347_v57  ;;  %v15032_v41 = vsel %vm2003_vm5, %v41363_v38, %v15031_v29  ;;  %v41366_v45 = vld [vmem:[#allocation10_spill] sm:$0xff]  ;;  %vm18091_vm5 = vcmask 998400  }
 0x312   :  { %31886 = vmatmul.mubr.msk.f32.vlgmr.msra.gmra.mrb[2].mxu1 %vm110_vm2, %v13843_v9  ;;  %14201 = vmatprep.mubr.f32.mxu0 %v41347_v57 }
 0x313   :  { %31891 = vmatpush1.msk.msra.mxu1 %vm113_vm1, %v35165_v42  ;;  %31889 = vmatmul.mubr.msk.f32.vlgmr.msra.gmra.mrb[4].mxu0 %vm110_vm2, %v13843_v9  ;;  %v41364_v42 = vld [vmem:[#allocation5_spill] sm:$0xff] }
 0x314   :  { %31894 = vmatpush1.msk.msra.mxu0 %vm113_vm1, %v35188_v46  ;;  %14272 = vmatprep.mubr.f32.mxu1 %v41347_v57  ;;  %v41367_v46 = vld [vmem:[#allocation9_spill] sm:$0xff] }
 0x315   :  { %31898 = vmatprep.subr.msk.mxu0 %vm113_vm1, %v35292_v62  ;;  %32917 = vmatprep.subr.mxu1 %v41347_v57  ;;  %v41370_v62 = vld [vmem:[#allocation11_spill] sm:$0xff] }
 0x316   :  { %31892 = vmatmul.mubr.msk.f32.vlgmr.msra.gmra.mrb[4].mxu1 %vm110_vm2, %v13843_v9  ;;  %14343 = vmatprep.mubr.f32.mxu0 %v41347_v57 }
 0x317   :  { %32918 = vmatpush3.msk.msra.mxu1 %vm113_vm1, %v13845_v11  ;;  %31895 = vmatmul.mubr.msk.f32.vlgmr.msra.gmra.mrb[6].mxu0 %vm110_vm2, %v13843_v9 }
 0x318   :  { %31899 = vmatpush1.msk.msra.mxu0 %vm113_vm1, %v35274_v58  ;;  %31901 = vmatprep.subr.msk.mxu1 %vm113_vm1, %v35320_v24  ;;  %v15622_v58 = vpop.permute.xlu0 %15621  ;;  %v15624_v24 = vpop.permute.xlu1 %15623 }
 0x319   :  { %31904 = vmatprep.subr.msk.mxu0 %vm113_vm1, %v35323_v25  ;;  %32919 = vmatprep.mubr.msk.f32.mxu1 %vm34779_vm3, %v41347_v57  ;;  %v41373_v25 = vld [vmem:[#allocation18_spill] sm:$0xff] }
 0x31a   :  { %32920 = vmatmul.mubr.msk.f32.vlgmr.msra.gmra.mrb[6].mxu1 %vm110_vm2, %v13843_v9  ;;  %14510 = vmatprep.mubr.f32.mxu0 %v41347_v57 }
 0x31b   :  { %31902 = vmatpush1.msk.msra.mxu1 %vm113_vm1, %v35278_v59  ;;  %31900 = vmatmul.mubr.msk.f32.vlgmr.msra.gmra.mrb[0].mxu0 %vm110_vm2, %v14436_v15  ;;  %v41369_v59 = vld [vmem:[#allocation14_spill] sm:$0xff] }
 0x31c   :  { %31905 = vmatpush1.msk.msra.mxu0 %vm113_vm1, %v35306_v18  ;;  %31907 = vmatprep.subr.msk.mxu1 %vm113_vm1, %v35346_v31  ;;  %v41372_v18 = vld [vmem:[#allocation16_spill] sm:$0xff]  ;;  %v41376_v31 = vld [vmem:[#allocation21_spill] sm:$0xff] }
 0x31d   :  { %31910 = vmatprep.subr.msk.mxu0 %vm113_vm1, %v35359_v35  ;;  %14581 = vmatprep.mubr.f32.mxu1 %v41347_v57 }
 0x31e   :  { %31903 = vmatmul.mubr.msk.f32.vlgmr.msra.gmra.mrb[0].mxu1 %vm110_vm2, %v14436_v15  ;;  %14652 = vmatprep.mubr.f32.mxu0 %v41347_v57 }
 0x31f   :  { %31908 = vmatpush1.msk.msra.mxu1 %vm113_vm1, %v35300_v17  ;;  %31906 = vmatmul.mubr.msk.f32.vlgmr.msra.gmra.mrb[2].mxu0 %vm110_vm2, %v14436_v15  ;;  %v41371_v17 = vld [vmem:[#allocation13_spill] sm:$0xff] }
 0x320   :  { %31911 = vmatpush1.msk.msra.mxu0 %vm113_vm1, %v35330_v26  ;;  %31913 = vmatprep.subr.msk.mxu1 %vm113_vm1, %v35381_v44  ;;  %v41374_v26 = vld [vmem:[#allocation15_spill] sm:$0xff]  ;;  %v41379_v44 = vld [vmem:[#allocation22_spill] sm:$0xff] }
 0x321   :  { %31916 = vmatprep.subr.msk.mxu0 %vm113_vm1, %v14439_v22  ;;  %14723 = vmatprep.mubr.f32.mxu1 %v41347_v57 }
 0x322   :  { %31909 = vmatmul.mubr.msk.f32.vlgmr.msra.gmra.mrb[2].mxu1 %vm110_vm2, %v14436_v15  ;;  %14794 = vmatprep.mubr.f32.mxu0 %v41347_v57 }
 0x323   :  { %31914 = vmatpush1.msk.msra.mxu1 %vm113_vm1, %v35352_v32  ;;  %31912 = vmatmul.mubr.msk.f32.vlgmr.msra.gmra.mrb[4].mxu0 %vm110_vm2, %v14436_v15  ;;  %v41377_v32 = vld [vmem:[#allocation20_spill] sm:$0xff] }
 0x324   :  { %31917 = vmatpush1.msk.msra.mxu0 %vm113_vm1, %v35377_v40  ;;  %14865 = vmatprep.mubr.f32.mxu1 %v41347_v57  ;;  %v15625_v35 = vsel %vm2664_vm6, %v41377_v32, %v15624_v24  ;;  %v41378_v40 = vld [vmem:[#allocation19_spill] sm:$0xff] }
 0x325   :  { %31921 = vmatprep.subr.msk.mxu0 %vm113_vm1, %v35407_v52  ;;  %32922 = vmatprep.subr.mxu1 %v41347_v57 }
 0x326   :  { %31915 = vmatmul.mubr.msk.f32.vlgmr.msra.gmra.mrb[4].mxu1 %vm110_vm2, %v14436_v15  ;;  %14936 = vmatprep.mubr.f32.mxu0 %v41347_v57 }
 0x327   :  { %32923 = vmatpush3.msk.msra.mxu1 %vm113_vm1, %v14438_v21  ;;  %31918 = vmatmul.mubr.msk.f32.vlgmr.msra.gmra.mrb[6].mxu0 %vm110_vm2, %v14436_v15 }
 0x328   :  { %31922 = vmatpush1.msk.msra.mxu0 %vm113_vm1, %v35397_v49  ;;  %31924 = vmatprep.subr.msk.mxu1 %vm113_vm1, %v35431_v60 }
 0x329   :  { %31927 = vmatprep.subr.msk.mxu0 %vm113_vm1, %v35450_v20  ;;  %32924 = vmatprep.mubr.msk.f32.mxu1 %vm34779_vm3, %v41347_v57 }
 0x32a   :  { %32925 = vmatmul.mubr.msk.f32.vlgmr.msra.gmra.mrb[6].mxu1 %vm110_vm2, %v14436_v15  ;;  %15103 = vmatprep.mubr.f32.mxu0 %v41347_v57 }
 0x32b   :  { %31925 = vmatpush1.msk.msra.mxu1 %vm113_vm1, %v35400_v50  ;;  %31923 = vmatmul.mubr.msk.f32.vlgmr.msra.gmra.mrb[0].mxu0 %vm110_vm2, %v15029_v23 }
 0x32c   :  { %31928 = vmatpush1.msk.msra.mxu0 %vm113_vm1, %v35434_v61  ;;  %31930 = vmatprep.subr.msk.mxu1 %vm113_vm1, %v35469_v47 }
 0x32d   :  { %31933 = vmatprep.subr.msk.mxu0 %vm113_vm1, %v41359_v30  ;;  %15174 = vmatprep.mubr.f32.mxu1 %v41347_v57 }
 0x32e   :  { %31926 = vmatmul.mubr.msk.f32.vlgmr.msra.gmra.mrb[0].mxu1 %vm110_vm2, %v15029_v23  ;;  %15245 = vmatprep.mubr.f32.mxu0 %v41347_v57 }
 0x32f   :  { %31931 = vmatpush1.msk.msra.mxu1 %vm113_vm1, %v41360_v33  ;;  %31929 = vmatmul.mubr.msk.f32.vlgmr.msra.gmra.mrb[2].mxu0 %vm110_vm2, %v15029_v23 }
 0x330   :  { %31934 = vmatpush1.msk.msra.mxu0 %vm113_vm1, %v41361_v34  ;;  %31936 = vmatprep.subr.msk.mxu1 %vm113_vm1, %v41362_v37 }
 0x331   :  { %31939 = vmatprep.subr.msk.mxu0 %vm113_vm1, %v15032_v41  ;;  %15316 = vmatprep.mubr.f32.mxu1 %v41347_v57 }
 0x332   :  { %31932 = vmatmul.mubr.msk.f32.vlgmr.msra.gmra.mrb[2].mxu1 %vm110_vm2, %v15029_v23  ;;  %15387 = vmatprep.mubr.f32.mxu0 %v41347_v57 }
 0x333   :  { %31937 = vmatpush1.msk.msra.mxu1 %vm113_vm1, %v41364_v42  ;;  %31935 = vmatmul.mubr.msk.f32.vlgmr.msra.gmra.mrb[4].mxu0 %vm110_vm2, %v15029_v23 }
 0x334   :  { %31940 = vmatpush1.msk.msra.mxu0 %vm113_vm1, %v41365_v43  ;;  %15458 = vmatprep.mubr.f32.mxu1 %v41347_v57 }
 0x335   :  { %31944 = vmatprep.subr.msk.mxu0 %vm113_vm1, %v41366_v45  ;;  %32927 = vmatprep.subr.mxu1 %v41347_v57 }
 0x336   :  { %31938 = vmatmul.mubr.msk.f32.vlgmr.msra.gmra.mrb[4].mxu1 %vm110_vm2, %v15029_v23  ;;  %15529 = vmatprep.mubr.f32.mxu0 %v41347_v57 }
 0x337   :  { %32928 = vmatpush3.msk.msra.mxu1 %vm113_vm1, %v15031_v29  ;;  %31941 = vmatmul.mubr.msk.f32.vlgmr.msra.gmra.mrb[6].mxu0 %vm110_vm2, %v15029_v23 }
 0x338   :  { %31945 = vmatpush1.msk.msra.mxu0 %vm113_vm1, %v41367_v46  ;;  %31947 = vmatprep.subr.msk.mxu1 %vm113_vm1, %v41368_v55 }
 0x339   :  { %31950 = vmatprep.subr.msk.mxu0 %vm113_vm1, %v41369_v59  ;;  %32929 = vmatprep.mubr.msk.f32.mxu1 %vm34779_vm3, %v41347_v57 }
 0x33a   :  { %32930 = vmatmul.mubr.msk.f32.vlgmr.msra.gmra.mrb[6].mxu1 %vm110_vm2, %v15029_v23  ;;  %15696 = vmatprep.mubr.f32.mxu0 %v41347_v57 }
 0x33b   :  { %31948 = vmatpush1.msk.msra.mxu1 %vm113_vm1, %v41370_v62  ;;  %31946 = vmatmul.mubr.msk.f32.vlgmr.msra.gmra.mrb[0].mxu0 %vm110_vm2, %v15622_v58 }
 0x33c   :  { %31951 = vmatpush1.msk.msra.mxu0 %vm113_vm1, %v41371_v17  ;;  %31953 = vmatprep.subr.msk.mxu1 %vm113_vm1, %v41372_v18 }
 0x33d   :  { %31956 = vmatprep.subr.msk.mxu0 %vm113_vm1, %v41373_v25  ;;  %15767 = vmatprep.mubr.f32.mxu1 %v41347_v57  ;;  %v37373_v63 = vpop.permute.xlu1 %16454 }
 0x33e   :  { %31949 = vmatmul.mubr.msk.f32.vlgmr.msra.gmra.mrb[0].mxu1 %vm110_vm2, %v15622_v58  ;;  %15838 = vmatprep.mubr.f32.mxu0 %v41347_v57 }
 0x33f   :  { %31954 = vmatpush1.msk.msra.mxu1 %vm113_vm1, %v41374_v26  ;;  %31952 = vmatmul.mubr.msk.f32.vlgmr.msra.gmra.mrb[2].mxu0 %vm110_vm2, %v15622_v58 }
 0x340   :  { %31957 = vmatpush1.msk.msra.mxu0 %vm113_vm1, %v41375_v27  ;;  %31959 = vmatprep.subr.msk.mxu1 %vm113_vm1, %v41376_v31 }
 0x341   :  { %31962 = vmatprep.subr.msk.mxu0 %vm113_vm1, %v15625_v35  ;;  %15909 = vmatprep.mubr.f32.mxu1 %v41347_v57 }
 0x342   :  { %31955 = vmatmul.mubr.msk.f32.vlgmr.msra.gmra.mrb[2].mxu1 %vm110_vm2, %v15622_v58  ;;  %15980 = vmatprep.mubr.f32.mxu0 %v41347_v57 }
 0x343   :  { %31960 = vmatpush1.msk.msra.mxu1 %vm113_vm1, %v41378_v40  ;;  %31958 = vmatmul.mubr.msk.f32.vlgmr.msra.gmra.mrb[4].mxu0 %vm110_vm2, %v15622_v58 }
 0x344   :  { %31963 = vmatpush1.msk.msra.mxu0 %vm113_vm1, %v41379_v44  ;;  %16051 = vmatprep.mubr.f32.mxu1 %v41347_v57 }
 0x345   :  { %16122 = vmatprep.mubr.f32.mxu0 %v41347_v57  ;;  %32932 = vmatprep.subr.mxu1 %v41347_v57 }
 0x346   :  { %31961 = vmatmul.mubr.msk.f32.vlgmr.msra.gmra.mrb[4].mxu1 %vm110_vm2, %v15622_v58 }
 0x347   :  { %31964 = vmatmul.mubr.msk.f32.vlgmr.msra.gmra.mrb[6].mxu0 %vm110_vm2, %v15622_v58  ;;  %32933 = vmatpush3.msk.msra.mxu1 %vm113_vm1, %v15624_v24  ;;  %vm16548_vm1 = vcmask 1045504  }
 0x348   :  { %32934 = vmatprep.mubr.msk.f32.mxu1 %vm34779_vm3, %v41347_v57  ;;  %16789 = vmatprep.mubr.f32.mxu0 %v41347_v57 }
 0x34a   :  { %32935 = vmatmul.mubr.msk.f32.vlgmr.msra.gmra.mrb[6].mxu1 %vm110_vm2, %v15622_v58  ;;  %vm16543_vm2 = vcmask 48128  }
 0x34b   :  { %16635 = vmatprep.mubr.f32.mxu1 %v41347_v57 }
 0x40e   :  { %v37243_v49 = vpop.f32.mrb[0].mxu0 }
 0x40f   :  { %v37245_v50 = vpop.f32.mrb[1].mxu0 }
 0x411   :  { %v37247_v52 = vpop.f32.mrb[0].mxu1 }
 0x412   :  { %v37249_v60 = vpop.f32.mrb[1].mxu1  ;;  %v37251_v61 = vpop.f32.mrb[2].mxu0 }
 0x413   :  { %16238 = vrot.lane.b32.xlu0 %v37251_v61, %s34770_s23  ;;  %v37255_v20 = vpop.f32.mrb[3].mxu0 }
 0x415   :  { %v37257_v47 = vpop.f32.mrb[2].mxu1 }
 0x416   :  { %16242 = vrot.lane.b32.xlu1 %v37257_v47, %s34770_s23  ;;  %v37261_v10 = vpop.f32.mrb[3].mxu1  ;;  %v37263_v2 = vpop.f32.mrb[4].mxu0 }
 0x417   :  { %41380 = vst [vmem:[#allocation4_spill] sm:$0xff] %v37261_v10  ;;  %16316 = vrot.lane.b32.xlu0 %v37257_v47, %s34777_s24  ;;  %v37267_v51 = vpop.f32.mrb[5].mxu0 }
 0x419   :  { %v37269_v36 = vpop.f32.mrb[4].mxu1 }
 0x41a   :  { %v37271_v0 = vpop.f32.mrb[5].mxu1  ;;  %16314 = vrot.lane.b32.xlu1 %v37255_v20, %s34777_s24  ;;  %v37275_v39 = vpop.f32.mrb[6].mxu0 }
 0x41b   :  { %16312 = vrot.lane.b32.xlu0 %v37251_v61, %s34777_s24  ;;  %v37279_v56 = vpop.f32.mrb[7].mxu0 }
 0x41d   :  { %v37281_v16 = vpop.f32.mrb[6].mxu1 }
 0x41e   :  { %v32936_v53 = vpop.f32.mrb[7].mxu1  ;;  %16318 = vrot.lane.b32.xlu1 %v37261_v10, %s34777_s24 }
 0x41f   :  { %16390 = vrot.lane.b32.xlu0 %v37257_v47, %s34780_s27 }
 0x422   :  { %16388 = vrot.lane.b32.xlu1 %v37255_v20, %s34780_s27 }
 0x423   :  { %16386 = vrot.lane.b32.xlu0 %v37251_v61, %s34780_s27 }
 0x426   :  { %16392 = vrot.lane.b32.xlu1 %v37261_v10, %s34780_s27 }
 0x427   :  { %16240 = vrot.lane.b32.xlu0 %v37255_v20, %s34770_s23 }
 0x42a   :  { %16252 = vrot.lane.b32.xlu1 %v37271_v0, %s34770_s23 }
 0x42b   :  { %16244 = vrot.lane.b32.xlu0 %v37261_v10, %s34770_s23 }
 0x42e   :  { %16326 = vrot.lane.b32.xlu1 %v37271_v0, %s34777_s24 }
 0x42f   :  { %16250 = vrot.lane.b32.xlu0 %v37269_v36, %s34770_s23 }
 0x432   :  { %16400 = vrot.lane.b32.xlu1 %v37271_v0, %s34780_s27 }
 0x433   :  { %16324 = vrot.lane.b32.xlu0 %v37269_v36, %s34777_s24 }
 0x436   :  { %16256 = vrot.lane.b32.xlu1 %v37279_v56, %s34770_s23 }
 0x437   :  { %16254 = vrot.lane.b32.xlu0 %v37275_v39, %s34770_s23 }
 0x43a   :  { %16330 = vrot.lane.b32.xlu1 %v37279_v56, %s34777_s24 }
 0x43b   :  { %16328 = vrot.lane.b32.xlu0 %v37275_v39, %s34777_s24 }
 0x43e   :  { %16404 = vrot.lane.b32.xlu1 %v37279_v56, %s34780_s27 }
 0x43f   :  { %16402 = vrot.lane.b32.xlu0 %v37275_v39, %s34780_s27 }
 0x442   :  { %16232 = vrot.lane.b32.xlu1 %v37245_v50, %s34770_s23 }
 0x443   :  { %16398 = vrot.lane.b32.xlu0 %v37269_v36, %s34780_s27 }
 0x446   :  { %16236 = vrot.lane.b32.xlu1 %v37249_v60, %s34770_s23 }
 0x447   :  { %16234 = vrot.lane.b32.xlu0 %v37247_v52, %s34770_s23 }
 0x44a   :  { %16306 = vrot.lane.b32.xlu1 %v37245_v50, %s34777_s24 }
 0x44b   :  { %16230 = vrot.lane.b32.xlu0 %v37243_v49, %s34770_s23 }
 0x44e   :  { %16310 = vrot.lane.b32.xlu1 %v37249_v60, %s34777_s24 }
 0x44f   :  { %16308 = vrot.lane.b32.xlu0 %v37247_v52, %s34777_s24 }
 0x452   :  { %16380 = vrot.lane.b32.xlu1 %v37245_v50, %s34780_s27 }
 0x453   :  { %16304 = vrot.lane.b32.xlu0 %v37243_v49, %s34777_s24 }
 0x456   :  { %16384 = vrot.lane.b32.xlu1 %v37249_v60, %s34780_s27 }
 0x457   :  { %16382 = vrot.lane.b32.xlu0 %v37247_v52, %s34780_s27 }
 0x45a   :  { %16495 = vrot.lane.b32.xlu1 %v37346_v6, %s34773_s19 }
 0x45b   :  { %16378 = vrot.lane.b32.xlu0 %v37243_v49, %s34780_s27 }
 0x45e   :  { %16248 = vrot.lane.b32.xlu1 %v37267_v51, %s34770_s23 }
 0x45f   :  { %16493 = vrot.lane.b32.xlu0 %v37355_v48, %s34773_s19 }
 0x462   :  { %16322 = vrot.lane.b32.xlu1 %v37267_v51, %s34777_s24 }
 0x463   :  { %16246 = vrot.lane.b32.xlu0 %v37263_v2, %s34770_s23 }
 0x466   :  { %16396 = vrot.lane.b32.xlu1 %v37267_v51, %s34780_s27 }
 0x467   :  { %16320 = vrot.lane.b32.xlu0 %v37263_v2, %s34777_s24 }
 0x46b   :  { %16394 = vrot.lane.b32.xlu0 %v37263_v2, %s34780_s27 }
 0x46f   :  { %17517 = vrot.lane.b32.xlu0 %v37355_v48, %s34776_s22 }
 0x485   :  { %v37375_v1 = vpop.permute.xlu0 %16238 }
 0x488   :  { %v16243_v14 = vpop.permute.xlu1 %16242 }
 0x489   :  { %v16317_v19 = vpop.permute.xlu0 %16316 }
 0x48c   :  { %v16315_v3 = vpop.permute.xlu1 %16314 }
 0x48d   :  { %v37377_v8 = vpop.permute.xlu0 %16312  ;;  %v16339_v40 = vsel %vm3328_vm7, %v16315_v3, %v16317_v19 }
 0x48e   :  { %v16338_v53 = vsel %vm3328_vm7, %v37377_v8, %v16315_v3 }
 0x490   :  { %v37379_v54 = vpop.permute.xlu1 %16318 }
 0x491   :  { %41381 = vst [vmem:[#allocation2_spill] sm:$0xff] %v37379_v54  ;;  %v16391_v12 = vpop.permute.xlu0 %16390  ;;  %v16340_v18 = vsel %vm3328_vm7, %v16317_v19, %v37379_v54 }
 0x494   :  { %v37381_v5 = vpop.permute.xlu1 %16388 }
 0x495   :  { %v37383_v28 = vpop.permute.xlu0 %16386 }
 0x498   :  { %v37385_v4 = vpop.permute.xlu1 %16392 }
 0x499   :  { %v16241_v7 = vpop.permute.xlu0 %16240  ;;  %v16414_v19 = vsel %vm3992_vm8, %v16391_v12, %v37385_v4 }
 0x49a   :  { %v16265_v59 = vsel %vm95_vm0, %v16241_v7, %v16243_v14  ;;  %v16264_v31 = vsel %vm95_vm0, %v37375_v1, %v16241_v7 }
 0x49b   :  { %v16294_v24 = vmax.f32 %v37255_v20, %v16265_v59 }
 0x49c   :  { %v16253_v9 = vpop.permute.xlu1 %16252 }
 0x49d   :  { %v37387_v11 = vpop.permute.xlu0 %16244  ;;  %v16368_v59 = vmax.f32 %v16294_v24, %v16339_v40 }
 0x49e   :  { %41382 = vst [vmem:[#allocation3_spill] sm:$0xff] %v37387_v11  ;;  %v16266_v55 = vsel %vm95_vm0, %v16243_v14, %v37387_v11  ;;  %v16413_v14 = vsel %vm3992_vm8, %v37381_v5, %v16391_v12 }
 0x49f   :  { %v16295_v62 = vmax.f32 %v37257_v47, %v16266_v55  ;;  %v16293_v55 = vmax.f32 %v37251_v61, %v16264_v31 }
 0x4a0   :  { %v37389_v13 = vpop.permute.xlu1 %16326 }
 0x4a1   :  { %v37391_v15 = vpop.permute.xlu0 %16250  ;;  %v16369_v32 = vmax.f32 %v16295_v62, %v16340_v18 }
 0x4a2   :  { %v16270_v44 = vsel %vm95_vm0, %v37391_v15, %v16253_v9 }
 0x4a3   :  { %v16299_v3 = vmax.f32 %v37269_v36, %v16270_v44 }
 0x4a4   :  { %v37393_v21 = vpop.permute.xlu1 %16400 }
 0x4a5   :  { %v37395_v22 = vpop.permute.xlu0 %16324 }
 0x4a8   :  { %v37397_v23 = vpop.permute.xlu1 %16256 }
 0x4a9   :  { %v37399_v29 = vpop.permute.xlu0 %16254 }
 0x4ac   :  { %v37401_v30 = vpop.permute.xlu1 %16330 }
 0x4ad   :  { %v37403_v33 = vpop.permute.xlu0 %16328 }
 0x4b0   :  { %v37405_v34 = vpop.permute.xlu1 %16404 }
 0x4b1   :  { %v37407_v37 = vpop.permute.xlu0 %16402 }
 0x4b4   :  { %v16233_v38 = vpop.permute.xlu1 %16232 }
 0x4b5   :  { %v37409_v41 = vpop.permute.xlu0 %16398 }
 0x4b6   :  { %v16418_v31 = vsel %vm3992_vm8, %v37409_v41, %v37393_v21 }
 0x4b8   :  { %v37411_v42 = vpop.permute.xlu1 %16236 }
 0x4b9   :  { %v16235_v43 = vpop.permute.xlu0 %16234 }
 0x4ba   :  { %v16261_v25 = vsel %vm95_vm0, %v16233_v38, %v16235_v43  ;;  %v16262_v26 = vsel %vm95_vm0, %v16235_v43, %v37411_v42 }
 0x4bb   :  { %v16290_v7 = vmax.f32 %v37245_v50, %v16261_v25  ;;  %v16291_v43 = vmax.f32 %v37247_v52, %v16262_v26  ;;  %v16344_v50 = vsel %vm3328_vm7, %v37395_v22, %v37389_v13  ;;  %v16367_v25 = vmax.f32 %v16293_v55, %v16338_v53 }
 0x4bc   :  { %v16307_v45 = vpop.permute.xlu1 %16306  ;;  %v16442_v26 = vmax.f32 %v16368_v59, %v16413_v14  ;;  %v16272_v14 = vsel %vm95_vm0, %v37399_v29, %v37397_v23 }
 0x4bd   :  { %v16231_v46 = vpop.permute.xlu0 %16230 }
 0x4be   :  { %v16260_v62 = vsel %vm95_vm0, %v16231_v46, %v16233_v38  ;;  %v16271_v38 = vsel %vm95_vm0, %v16253_v9, %v37399_v29  ;;  %v16462_v29 = vadd.f32 %v37373_v63, %v16442_v26 }
 0x4bf   :  { %v16289_v46 = vmax.f32 %v37243_v49, %v16260_v62  ;;  %v16300_v9 = vmax.f32 %v37271_v0, %v16271_v38  ;;  %v16345_v49 = vsel %vm3328_vm7, %v37389_v13, %v37403_v33  ;;  %v16419_v0 = vsel %vm3992_vm8, %v37393_v21, %v37407_v37 }
 0x4c0   :  { %v37415_v58 = vpop.permute.xlu1 %16310  ;;  %v16412_v13 = vsel %vm3992_vm8, %v37383_v28, %v37381_v5  ;;  %v16346_v21 = vsel %vm3328_vm7, %v37403_v33, %v37401_v30  ;;  %v16301_v5 = vmax.f32 %v37275_v39, %v16272_v14 }
 0x4c1   :  { %v16309_v17 = vpop.permute.xlu0 %16308 }
 0x4c2   :  { %v16335_v47 = vsel %vm3328_vm7, %v16307_v45, %v16309_v17  ;;  %v16336_v20 = vsel %vm3328_vm7, %v16309_v17, %v37415_v58  ;;  %v16443_v17 = vmax.f32 %v16369_v32, %v16414_v19  ;;  %v16373_v32 = vmax.f32 %v16299_v3, %v16344_v50 }
 0x4c3   :  { %v16364_v10 = vmax.f32 %v16290_v7, %v16335_v47  ;;  %v16365_v54 = vmax.f32 %v16291_v43, %v16336_v20  ;;  %v16374_v7 = vmax.f32 %v16300_v9, %v16345_v49  ;;  %v16441_v43 = vmax.f32 %v16367_v25, %v16412_v13 }
 0x4c4   :  { %v16381_v27 = vpop.permute.xlu1 %16380  ;;  %v16463_v44 = vadd.f32 %v37373_v63, %v16443_v17  ;;  %v16420_v17 = vsel %vm3992_vm8, %v37407_v37, %v37405_v34  ;;  %v16375_v3 = vmax.f32 %v16301_v5, %v16346_v21  ;;  %v37503_v50 = vmax.f32 %v16462_v29, 0.0 }
 0x4c5   :  { %v16305_v35 = vpop.permute.xlu0 %16304  ;;  %v16448_v55 = vmax.f32 %v16374_v7, %v16419_v0  ;;  %v16461_v33 = vadd.f32 %v37373_v63, %v16441_v43  ;;  %v16263_v25 = vsel %vm95_vm0, %v37411_v42, %v37375_v1 }
 0x4c6   :  { %v16334_v52 = vsel %vm3328_vm7, %v16305_v35, %v16307_v45  ;;  %v37486_v19 = vmax.f32 %v16463_v44, 0.0  ;;  %v16449_v39 = vmax.f32 %v16375_v3, %v16420_v17 }
 0x4c7   :  { %v16363_v45 = vmax.f32 %v16289_v46, %v16334_v52  ;;  %v16468_v52 = vadd.f32 %v37373_v63, %v16448_v55  ;;  %v37512_v37 = vmax.f32 %v16461_v33, 0.0 }
 0x4c8   :  { %v37443_v18 = vpop.permute.xlu1 %16384  ;;  %41383 = vst [vmem:[#allocation7_spill] sm:$0xff] %v37486_v19 }
 0x4c9   :  { %v16383_v11 = vpop.permute.xlu0 %16382  ;;  %v37515_v38 = vmax.f32 %v16468_v52, 0.0 }
 0x4ca   :  { %v16409_v12 = vsel %vm3992_vm8, %v16381_v27, %v16383_v11  ;;  %v16410_v61 = vsel %vm3992_vm8, %v16383_v11, %v37443_v18 }
 0x4cb   :  { %v16438_v36 = vmax.f32 %v16364_v10, %v16409_v12  ;;  %v16439_v24 = vmax.f32 %v16365_v54, %v16410_v61  ;;  %v16447_v54 = vmax.f32 %v16373_v32, %v16418_v31  ;;  %v16469_v61 = vadd.f32 %v37373_v63, %v16449_v39 }
 0x4cc   :  { %v16337_v32 = vsel %vm3328_vm7, %v37415_v58, %v37377_v8 }
 0x4cd   :  { %v16458_v35 = vadd.f32 %v37373_v63, %v16438_v36  ;;  %v16459_v40 = vadd.f32 %v37373_v63, %v16439_v24  ;;  %v16379_v11 = vpop.permute.xlu0 %16378  ;;  %v16467_v59 = vadd.f32 %v37373_v63, %v16447_v54  ;;  %v37521_v46 = vmax.f32 %v16469_v61, 0.0  ;;  %v37551_v36 = vpop.permute.xlu1 %16495 }
 0x4ce   :  { %v16408_v10 = vsel %vm3992_vm8, %v16379_v11, %v16381_v27 }
 0x4cf   :  { %v37467_v47 = vmax.f32 %v16458_v35, 0.0  ;;  %v37469_v20 = vmax.f32 %v16459_v40, 0.0  ;;  %v16437_v53 = vmax.f32 %v16363_v45, %v16408_v10  ;;  %v37506_v12 = vmax.f32 %v16467_v59, 0.0 }
 0x4d0   :  { %v16292_v45 = vmax.f32 %v37249_v60, %v16263_v25  ;;  %v16411_v35 = vsel %vm3992_vm8, %v37443_v18, %v37383_v28 }
 0x4d1   :  { %v16457_v27 = vadd.f32 %v37373_v63, %v16437_v53  ;;  %17523 = vrot.lane.b32.xlu1 %v37467_v47, %s34775_s21  ;;  %17525 = vrot.lane.b32.xlu0 %v37469_v20, %s34775_s21  ;;  %41384 = vst [vmem:[#allocation6_spill] sm:$0xff] %v37506_v12  ;;  %v37553_v24 = vpop.permute.xlu0 %16493  ;;  %v16249_v26 = vpop.permute.xlu1 %16248 }
 0x4d2   :  { %v16366_v1 = vmax.f32 %v16292_v45, %v16337_v32  ;;  %v16269_v8 = vsel %vm95_vm0, %v16249_v26, %v37391_v15 }
 0x4d3   :  { %v37493_v62 = vmax.f32 %v16457_v27, 0.0  ;;  %v16298_v15 = vmax.f32 %v37267_v51, %v16269_v8 }
 0x4d4   :  { %v16440_v42 = vmax.f32 %v16366_v1, %v16411_v35 }
 0x4d5   :  { %17521 = vrot.lane.b32.xlu1 %v37493_v62, %s34775_s21  ;;  %16521 = vrot.lane.b32.xlu0 %v37486_v19, %s34772_s18  ;;  %v37562_v31 = vpop.permute.xlu0 %16246  ;;  %v16323_v40 = vpop.permute.xlu1 %16322 }
 0x4d6   :  { %v16460_v60 = vadd.f32 %v37373_v63, %v16440_v42  ;;  %v16268_v28 = vsel %vm95_vm0, %v37562_v31, %v16249_v26  ;;  %v16343_v44 = vsel %vm3328_vm7, %v16323_v40, %v37395_v22 }
 0x4d7   :  { %v16297_v10 = vmax.f32 %v37263_v2, %v16268_v28  ;;  %v16372_v14 = vmax.f32 %v16298_v15, %v16343_v44 }
 0x4d8   :  { %v37600_v49 = vmax.f32 %v16460_v60, 0.0 }
 0x4d9   :  { %16519 = vrot.lane.b32.xlu1 %v37503_v50, %s34772_s18  ;;  %16527 = vrot.lane.b32.xlu0 %v37506_v12, %s34772_s18  ;;  %v37579_v11 = vpop.permute.xlu0 %16320  ;;  %v16397_v58 = vpop.permute.xlu1 %16396 }
 0x4da   :  { %v16342_v9 = vsel %vm3328_vm7, %v37579_v11, %v16323_v40  ;;  %v16417_v54 = vsel %vm3992_vm8, %v16397_v58, %v37409_v41 }
 0x4db   :  { %v16371_v0 = vmax.f32 %v16297_v10, %v16342_v9  ;;  %v16446_v22 = vmax.f32 %v16372_v14, %v16417_v54 }
 0x4dd   :  { %16517 = vrot.lane.b32.xlu1 %v37512_v37, %s34772_s18  ;;  %16529 = vrot.lane.b32.xlu0 %v37515_v38, %s34772_s18  ;;  %v37590_v18 = vpop.permute.xlu0 %16394  ;;  %v16466_v2 = vadd.f32 %v37373_v63, %v16446_v22 }
 0x4de   :  { %v16416_v53 = vsel %vm3992_vm8, %v37590_v18, %v16397_v58 }
 0x4df   :  { %v16445_v13 = vmax.f32 %v16371_v0, %v16416_v53  ;;  %v37622_v41 = vmax.f32 %v16466_v2, 0.0 }
 0x4e1   :  { %16531 = vrot.lane.b32.xlu1 %v37521_v46, %s34772_s18  ;;  %17531 = vrot.lane.b32.xlu0 %v37503_v50, %s34775_s21  ;;  %v16465_v51 = vadd.f32 %v37373_v63, %v16445_v13  ;;  %v37662_v27 = vpop.permute.xlu0 %17517 }
 0x4e3   :  { %v37624_v7 = vmax.f32 %v16465_v51, 0.0 }
 0x4e5   :  { %17519 = vrot.lane.b32.xlu1 %v37346_v6, %s34776_s22  ;;  %17529 = vrot.lane.b32.xlu0 %v37512_v37, %s34775_s21 }
 0x4e9   :  { %17533 = vrot.lane.b32.xlu1 %v37486_v19, %s34775_s21  ;;  %18069 = vrot.lane.b32.xlu0 %v37467_v47, %s34773_s19 }
 0x4ed   :  { %17541 = vrot.lane.b32.xlu1 %v37515_v38, %s34775_s21  ;;  %18067 = vrot.lane.b32.xlu0 %v37493_v62, %s34773_s19 }
 0x4f1   :  { %17539 = vrot.lane.b32.xlu1 %v37506_v12, %s34775_s21  ;;  %18065 = vrot.lane.b32.xlu0 %v37346_v6, %s34781_s28 }
 0x4f5   :  { %18071 = vrot.lane.b32.xlu1 %v37469_v20, %s34773_s19  ;;  %18079 = vrot.lane.b32.xlu0 %v37486_v19, %s34773_s19 }
 0x4f9   :  { %18063 = vrot.lane.b32.xlu1 %v37355_v48, %s34781_s28  ;;  %18087 = vrot.lane.b32.xlu0 %v37515_v38, %s34773_s19  ;;  %s34811_s28 = smov 120  }
 0x4fd   :  { %18077 = vrot.lane.b32.xlu1 %v37503_v50, %s34773_s19  ;;  %18085 = vrot.lane.b32.xlu0 %v37506_v12, %s34773_s19 }
 0x501   :  { %18075 = vrot.lane.b32.xlu1 %v37512_v37, %s34773_s19  ;;  %16513 = vrot.lane.b32.xlu0 %v37469_v20, %s34772_s18 }
 0x505   :  { %16511 = vrot.lane.b32.xlu1 %v37467_v47, %s34772_s18  ;;  %18616 = vrot.lane.b32.xlu0 %v37467_v47, %s34811_s28 }
 0x509   :  { %16509 = vrot.lane.b32.xlu1 %v37493_v62, %s34772_s18  ;;  %18614 = vrot.lane.b32.xlu0 %v37493_v62, %s34811_s28 }
 0x50d   :  { %18618 = vrot.lane.b32.xlu1 %v37469_v20, %s34811_s28  ;;  %17543 = vrot.lane.b32.xlu0 %v37521_v46, %s34775_s21 }
 0x511   :  { %18610 = vrot.lane.b32.xlu1 %v37355_v48, %s34785_s13  ;;  %16515 = vrot.lane.b32.xlu0 %v37600_v49, %s34772_s18 }
 0x515   :  { %18612 = vrot.lane.b32.xlu1 %v37346_v6, %s34785_s13  ;;  %18624 = vrot.lane.b32.xlu0 %v37503_v50, %s34811_s28 }
 0x519   :  { %18626 = vrot.lane.b32.xlu1 %v37486_v19, %s34811_s28  ;;  %18622 = vrot.lane.b32.xlu0 %v37512_v37, %s34811_s28 }
 0x51d   :  { %16525 = vrot.lane.b32.xlu1 %v37622_v41, %s34772_s18  ;;  %16523 = vrot.lane.b32.xlu0 %v37624_v7, %s34772_s18 }
 0x521   :  { %18634 = vrot.lane.b32.xlu1 %v37515_v38, %s34811_s28  ;;  %19164 = vrot.lane.b32.xlu0 %v37467_v47, %s34788_s29 }
 0x525   :  { %18632 = vrot.lane.b32.xlu1 %v37506_v12, %s34811_s28  ;;  %19162 = vrot.lane.b32.xlu0 %v37493_v62, %s34788_s29 }
 0x529   :  { %18089 = vrot.lane.b32.xlu1 %v37521_v46, %s34773_s19  ;;  %19159 = vrot.lane.b32.xlu0 %v37346_v6, %s34789_s17 }
 0x52d   :  { %19166 = vrot.lane.b32.xlu1 %v37469_v20, %s34788_s29  ;;  %19174 = vrot.lane.b32.xlu0 %v37486_v19, %s34788_s29 }
 0x531   :  { %19157 = vrot.lane.b32.xlu1 %v37355_v48, %s34789_s17  ;;  %19182 = vrot.lane.b32.xlu0 %v37515_v38, %s34788_s29 }
 0x535   :  { %19172 = vrot.lane.b32.xlu1 %v37503_v50, %s34788_s29  ;;  %19180 = vrot.lane.b32.xlu0 %v37506_v12, %s34788_s29 }
 0x539   :  { %19170 = vrot.lane.b32.xlu1 %v37512_v37, %s34788_s29  ;;  %18636 = vrot.lane.b32.xlu0 %v37521_v46, %s34811_s28 }
 0x53d   :  { %17527 = vrot.lane.b32.xlu1 %v37600_v49, %s34775_s21  ;;  %19713 = vrot.lane.b32.xlu0 %v37467_v47, %s34791_s12 }
 0x541   :  { %19184 = vrot.lane.b32.xlu1 %v37521_v46, %s34788_s29  ;;  %19711 = vrot.lane.b32.xlu0 %v37493_v62, %s34791_s12 }
 0x543   :  { %v37668_v43 = vpop.permute.xlu0 %17525  ;;  %v37670_v29 = vpop.permute.xlu1 %17523 }
 0x544   :  { %v37807_v15 = vsel %vm2664_vm6, %v37670_v29, %v37668_v43 }
 0x545   :  { %19715 = vrot.lane.b32.xlu1 %v37469_v20, %s34791_s12  ;;  %16258 = vrot.lane.b32.xlu0 %v37281_v16, %s34770_s23  ;;  %s41389_s23 = smov 60   ;;  %41392 = vst [vmem:[#allocation14_spill] sm:$0xff] %v37807_v15 }
 0x547   :  { %v37676_v21 = vpop.permute.xlu0 %16521  ;;  %v37678_v5 = vpop.permute.xlu1 %17521 }
 0x548   :  { %v17545_v53 = vsel %vm2664_vm6, %v37678_v5, %v37670_v29 }
 0x549   :  { %19707 = vrot.lane.b32.xlu1 %v37355_v48, %s34786_s14  ;;  %16332 = vrot.lane.b32.xlu0 %v37281_v16, %s34777_s24  ;;  %s41391_s24 = smov 86  }
 0x54b   :  { %v37684_v55 = vpop.permute.xlu0 %16527  ;;  %v16520_v59 = vpop.permute.xlu1 %16519 }
 0x54c   :  { %v37688_v17 = vsel %vm1342_vm4, %v16520_v59, %v37676_v21 }
 0x54d   :  { %17537 = vrot.lane.b32.xlu1 %v37622_v41, %s34775_s21  ;;  %19709 = vrot.lane.b32.xlu0 %v37346_v6, %s34786_s14 }
 0x54e   :  { %31975 = vmatprep.subr.msk.mxu0 %vm16548_vm1, %v37688_v17 }
 0x54f   :  { %v16530_v3 = vpop.permute.xlu0 %16529  ;;  %v37696_v33 = vpop.permute.xlu1 %16517 }
 0x550   :  { %v37700_v39 = vsel %vm1342_vm4, %v37696_v33, %v16520_v59  ;;  %v37727_v26 = vsel %vm1342_vm4, %v37684_v55, %v16530_v3 }
 0x551   :  { %41385 = vst [vmem:[#allocation5_spill] sm:$0xff] %v37700_v39  ;;  %17535 = vrot.lane.b32.xlu1 %v37624_v7, %s34775_s21  ;;  %19723 = vrot.lane.b32.xlu0 %v37486_v19, %s34791_s12  ;;  %41387 = vst [vmem:[#allocation10_spill] sm:$0xff] %v37727_v26 }
 0x552   :  { %31976 = vmatpush1.msk.msra.mxu0 %vm16548_vm1, %v37700_v39 }
 0x553   :  { %31977 = vmatmul.mubr.msk.f32.vlgmr.msra.gmra.mrb[8].mxu0 %vm16543_vm2, %v37553_v24  ;;  %v37710_v52 = vpop.permute.xlu0 %17531  ;;  %v37712_v61 = vpop.permute.xlu1 %16531 }
 0x554   :  { %16795 = vmatprep.mubr.f32.mxu0 %v41347_v57  ;;  %v37717_v25 = vsel %vm1342_vm4, %v16530_v3, %v37712_v61 }
 0x555   :  { %41386 = vst [vmem:[#allocation8_spill] sm:$0xff] %v37717_v25  ;;  %19721 = vrot.lane.b32.xlu1 %v37503_v50, %s34791_s12  ;;  %19719 = vrot.lane.b32.xlu0 %v37512_v37, %s34791_s12 }
 0x556   :  { %31983 = vmatprep.subr.msk.mxu0 %vm16548_vm1, %v37717_v25 }
 0x557   :  { %31978 = vmatmul.mubr.msk.f32.gmra.mrb[10].mxu0 %vm16543_vm2, %v37551_v36  ;;  %v37731_v32 = vpop.permute.xlu0 %17529  ;;  %v37733_v45 = vpop.permute.xlu1 %17519 }
 0x558   :  { %31984 = vmatpush1.msk.msra.mxu0 %vm16548_vm1, %v37727_v26  ;;  %16943 = vmatprep.mubr.f32.mxu0 %v41347_v57  ;;  %v37864_v29 = vsel %vm2664_vm6, %v37731_v32, %v37710_v52 }
 0x559   :  { %31990 = vmatprep.subr.msk.mxu0 %vm16548_vm1, %v37467_v47  ;;  %16406 = vrot.lane.b32.xlu1 %v37281_v16, %s34780_s27  ;;  %41394 = vst [vmem:[#allocation13_spill] sm:$0xff] %v37864_v29  ;;  %s34812_s27 = smov 58  }
 0x55a   :  { %19733 = vrot.lane.b32.xlu0 %v37521_v46, %s34791_s12 }
 0x55b   :  { %31985 = vmatmul.mubr.msk.f32.vlgmr.msra.gmra.mrb[12].mxu0 %vm16543_vm2, %v37553_v24  ;;  %v37746_v35 = vpop.permute.xlu0 %18069  ;;  %v37748_v1 = vpop.permute.xlu1 %17533 }
 0x55c   :  { %41388 = vst [vmem:[#allocation9_spill] sm:$0xff] %v37748_v1  ;;  %31991 = vmatpush1.msk.msra.mxu0 %vm16548_vm1, %v37493_v62  ;;  %16949 = vmatprep.mubr.f32.mxu0 %v41347_v57  ;;  %v37838_v22 = vsel %vm2664_vm6, %v37710_v52, %v37748_v1 }
 0x55d   :  { %31998 = vmatprep.subr.msk.mxu0 %vm16548_vm1, %v37503_v50  ;;  %19731 = vrot.lane.b32.xlu1 %v37515_v38, %s34791_s12  ;;  %41393 = vst [vmem:[#allocation11_spill] sm:$0xff] %v37838_v22 }
 0x55e   :  { %18073 = vrot.lane.b32.xlu0 %v37600_v49, %s34773_s19 }
 0x55f   :  { %31986 = vmatmul.mubr.msk.f32.gmra.mrb[14].mxu0 %vm16543_vm2, %v37551_v36  ;;  %v37761_v42 = vpop.permute.xlu0 %18067  ;;  %v37763_v40 = vpop.permute.xlu1 %17541 }
 0x560   :  { %17121 = vmatprep.mubr.f32.mxu0 %v41347_v57 }
 0x561   :  { %19729 = vrot.lane.b32.xlu1 %v37506_v12, %s34791_s12 }
 0x562   :  { %20264 = vrot.lane.b32.xlu0 %v37469_v20, %s41389_s23 }
 0x563   :  { %31992 = vmatmul.mubr.msk.f32.vlgmr.msra.gmra.mrb[16].mxu0 %vm16543_vm2, %v37355_v48  ;;  %v37772_v60 = vpop.permute.xlu0 %18065  ;;  %v37774_v8 = vpop.permute.xlu1 %17539 }
 0x564   :  { %31999 = vmatpush1.msk.msra.mxu0 %vm16548_vm1, %v37512_v37  ;;  %17127 = vmatprep.mubr.f32.mxu0 %v41347_v57 }
 0x565   :  { %32006 = vmatprep.subr.msk.mxu0 %vm16548_vm1, %v37515_v38  ;;  %20262 = vrot.lane.b32.xlu1 %v37467_v47, %s41389_s23 }
 0x566   :  { %18083 = vrot.lane.b32.xlu0 %v37622_v41, %s34773_s19 }
 0x567   :  { %31993 = vmatmul.mubr.msk.f32.gmra.mrb[18].mxu0 %vm16543_vm2, %v37346_v6  ;;  %v37787_v28 = vpop.permute.xlu0 %18079  ;;  %v37789_v58 = vpop.permute.xlu1 %18071 }
 0x568   :  { %41390 = vst [vmem:[#allocation12_spill] sm:$0xff] %v37787_v28  ;;  %17275 = vmatprep.mubr.f32.mxu0 %v41347_v57  ;;  %v37920_v39 = vsel %vm18091_vm5, %v37746_v35, %v37789_v58 }
 0x569   :  { %20260 = vrot.lane.b32.xlu1 %v37493_v62, %s41389_s23  ;;  %41397 = vst [vmem:[#allocation15_spill] sm:$0xff] %v37920_v39 }
 0x56a   :  { %20256 = vrot.lane.b32.xlu0 %v37355_v48, %s41391_s24 }
 0x56b   :  { %32000 = vmatmul.mubr.msk.f32.vlgmr.msra.gmra.mrb[8].mxu0 %vm16543_vm2, %v37355_v48  ;;  %v37798_v44 = vpop.permute.xlu0 %18087  ;;  %v37800_v9 = vpop.permute.xlu1 %18063 }
 0x56c   :  { %32007 = vmatpush1.msk.msra.mxu0 %vm16548_vm1, %v37506_v12  ;;  %17281 = vmatprep.mubr.f32.mxu0 %v41347_v57 }
 0x56d   :  { %32013 = vmatprep.subr.msk.mxu0 %vm16548_vm1, %v37807_v15  ;;  %18081 = vrot.lane.b32.xlu1 %v37624_v7, %s34773_s19 }
 0x56e   :  { %20270 = vrot.lane.b32.xlu0 %v37503_v50, %s41389_s23 }
 0x56f   :  { %32001 = vmatmul.mubr.msk.f32.gmra.mrb[10].mxu0 %vm16543_vm2, %v37346_v6  ;;  %v37818_v10 = vpop.permute.xlu0 %18085  ;;  %v37820_v54 = vpop.permute.xlu1 %18077 }
 0x570   :  { %17429 = vmatprep.mubr.f32.mxu0 %v41347_v57 }
 0x571   :  { %20258 = vrot.lane.b32.xlu1 %v37346_v6, %s41391_s24  ;;  %s34820_s24 = smov 2  }
 0x572   :  { %20268 = vrot.lane.b32.xlu0 %v37512_v37, %s41389_s23 }
 0x573   :  { %32008 = vmatmul.mubr.msk.f32.vlgmr.msra.gmra.mrb[12].mxu0 %vm16543_vm2, %v37355_v48  ;;  %v16514_v14 = vpop.permute.xlu0 %16513  ;;  %v37832_v0 = vpop.permute.xlu1 %18075 }
 0x574   :  { %32014 = vmatpush1.msk.msra.mxu0 %vm16548_vm1, %v17545_v53  ;;  %17435 = vmatprep.mubr.f32.mxu0 %v41347_v57 }
 0x575   :  { %32021 = vmatprep.subr.msk.mxu0 %vm16548_vm1, %v37838_v22  ;;  %20272 = vrot.lane.b32.xlu1 %v37486_v19, %s41389_s23 }
 0x576   :  { %20280 = vrot.lane.b32.xlu0 %v37515_v38, %s41389_s23 }
 0x577   :  { %32009 = vmatmul.mubr.msk.f32.gmra.mrb[14].mxu0 %vm16543_vm2, %v37346_v6  ;;  %v37849_v13 = vpop.permute.xlu0 %18616  ;;  %v16512_v2 = vpop.permute.xlu1 %16511 }
 0x578   :  { %v37852_v51 = vsel %vm1342_vm4, %v16512_v2, %v16514_v14  ;;  %17645 = vmatprep.mubr.f32.mxu0 %v41347_v57 }
 0x579   :  { %18620 = vrot.lane.b32.xlu1 %v37600_v49, %s34811_s28  ;;  %31967 = vmatprep.subr.msk.mxu1 %vm16548_vm1, %v37852_v51 }
 0x57a   :  { %20278 = vrot.lane.b32.xlu0 %v37506_v12, %s41389_s23 }
 0x57b   :  { %32015 = vmatmul.mubr.msk.f32.vlgmr.msra.gmra.mrb[16].mxu0 %vm16543_vm2, %v37662_v27  ;;  %v37868_v5 = vpop.permute.xlu0 %18614  ;;  %v16510_v59 = vpop.permute.xlu1 %16509 }
 0x57c   :  { %32022 = vmatpush1.msk.msra.mxu0 %vm16548_vm1, %v37864_v29  ;;  %v16533_v3 = vsel %vm1342_vm4, %v16510_v59, %v16512_v2  ;;  %17651 = vmatprep.mubr.f32.mxu0 %v41347_v57  ;;  %v37905_v59 = vsel %vm2664_vm6, %v37774_v8, %v37763_v40  ;;  %v18639_v22 = vsel %vm18638_vm11, %v37868_v5, %v37849_v13 }
 0x57d   :  { %20282 = vrot.lane.b32.xlu1 %v37521_v46, %s41389_s23  ;;  %31968 = vmatpush1.msk.msra.mxu1 %vm16548_vm1, %v16533_v3  ;;  %41396 = vst [vmem:[#allocation18_spill] sm:$0xff] %v37905_v59 }
 0x57e   :  { %18628 = vrot.lane.b32.xlu0 %v37624_v7, %s34811_s28  ;;  %31969 = vmatmul.mubr.msk.f32.vlgmr.msra.gmra.mrb[8].mxu1 %vm16543_vm2, %v37553_v24 }
 0x57f   :  { %32016 = vmatmul.mubr.msk.f32.gmra.mrb[18].mxu0 %vm16543_vm2, %v37733_v45  ;;  %v37883_v52 = vpop.permute.xlu0 %17543  ;;  %v37885_v53 = vpop.permute.xlu1 %18618  ;;  %16641 = vmatprep.mubr.f32.mxu1 %v41347_v57 }
 0x580   :  { %17799 = vmatprep.mubr.f32.mxu0 %v41347_v57  ;;  %v37892_v2 = vsel %vm2664_vm6, %v37763_v40, %v37883_v52 }
 0x581   :  { %41395 = vst [vmem:[#allocation16_spill] sm:$0xff] %v37892_v2  ;;  %18630 = vrot.lane.b32.xlu1 %v37622_v41, %s34811_s28  ;;  %32029 = vmatprep.subr.msk.mxu0 %vm16548_vm1, %v37892_v2  ;;  %v38067_v2 = vsel %vm18091_vm5, %v37818_v10, %v37798_v44 }
 0x582   :  { %20813 = vrot.lane.b32.xlu0 %v37469_v20, %s34812_s27  ;;  %31970 = vmatmul.mubr.msk.f32.gmra.mrb[10].mxu1 %vm16543_vm2, %v37551_v36  ;;  %41406 = vst [vmem:[#allocation26_spill] sm:$0xff] %v38067_v2 }
 0x583   :  { %32023 = vmatmul.mubr.msk.f32.vlgmr.msra.gmra.mrb[8].mxu0 %vm16543_vm2, %v37662_v27  ;;  %v16516_v3 = vpop.permute.xlu0 %16515  ;;  %v37909_v29 = vpop.permute.xlu1 %18610  ;;  %16712 = vmatprep.mubr.f32.mxu1 %v41347_v57 }
 0x584   :  { %32030 = vmatpush1.msk.msra.mxu0 %vm16548_vm1, %v37905_v59  ;;  %v37915_v26 = vsel %vm1342_vm4, %v16514_v14, %v16516_v3  ;;  %v37924_v40 = vsel %vm1342_vm4, %v16516_v3, %v37696_v33  ;;  %17805 = vmatprep.mubr.f32.mxu0 %v41347_v57  ;;  %v18092_v3 = vsel %vm18091_vm5, %v37761_v42, %v37746_v35 }
 0x585   :  { %41398 = vst [vmem:[#allocation17_spill] sm:$0xff] %v37924_v40  ;;  %32036 = vmatprep.subr.msk.mxu0 %vm16548_vm1, %v37920_v39  ;;  %20811 = vrot.lane.b32.xlu1 %v37467_v47, %s34812_s27  ;;  %v37966_v39 = vsel %vm18091_vm5, %v37820_v54, %v37787_v28 }
 0x586   :  { %20805 = vrot.lane.b32.xlu0 %v37355_v48, %s34799_s20  ;;  %31971 = vmatprep.subr.msk.mxu1 %vm16548_vm1, %v37924_v40  ;;  %41400 = vst [vmem:[#allocation20_spill] sm:$0xff] %v37966_v39 }
 0x587   :  { %31972 = vmatpush1.msk.msra.mxu1 %vm16548_vm1, %v37915_v26  ;;  %32024 = vmatmul.mubr.msk.f32.gmra.mrb[10].mxu0 %vm16543_vm2, %v37733_v45  ;;  %v37939_v33 = vpop.permute.xlu0 %18624  ;;  %v37941_v14 = vpop.permute.xlu1 %18612 }
 0x588   :  { %31973 = vmatmul.mubr.msk.f32.vlgmr.msra.gmra.mrb[12].mxu1 %vm16543_vm2, %v37553_v24  ;;  %17953 = vmatprep.mubr.f32.mxu0 %v41347_v57 }
 0x589   :  { %20809 = vrot.lane.b32.xlu1 %v37493_v62, %s34812_s27  ;;  %16718 = vmatprep.mubr.f32.mxu1 %v41347_v57 }
 0x58a   :  { %20819 = vrot.lane.b32.xlu0 %v37503_v50, %s34812_s27 }
 0x58b   :  { %32031 = vmatmul.mubr.msk.f32.vlgmr.msra.gmra.mrb[12].mxu0 %vm16543_vm2, %v37662_v27  ;;  %v37956_v59 = vpop.permute.xlu0 %18622  ;;  %v37958_v40 = vpop.permute.xlu1 %18626 }
 0x58c   :  { %41399 = vst [vmem:[#allocation21_spill] sm:$0xff] %v37958_v40  ;;  %32037 = vmatpush1.msk.msra.mxu0 %vm16548_vm1, %v18092_v3  ;;  %31974 = vmatmul.mubr.msk.f32.gmra.mrb[14].mxu1 %vm16543_vm2, %v37551_v36 }
 0x58d   :  { %32044 = vmatprep.subr.msk.mxu0 %vm16548_vm1, %v37966_v39  ;;  %20807 = vrot.lane.b32.xlu1 %v37346_v6, %s34799_s20 }
 0x58e   :  { %20817 = vrot.lane.b32.xlu0 %v37512_v37, %s34812_s27  ;;  %17959 = vmatprep.mubr.f32.mxu0 %v41347_v57 }
 0x58f   :  { %32032 = vmatmul.mubr.msk.f32.gmra.mrb[14].mxu0 %vm16543_vm2, %v37733_v45  ;;  %v37977_v35 = vpop.permute.xlu0 %16523  ;;  %v16526_v42 = vpop.permute.xlu1 %16525  ;;  %16866 = vmatprep.mubr.f32.mxu1 %v41347_v57 }
 0x590   :  { %41401 = vst [vmem:[#allocation19_spill] sm:$0xff] %v37977_v35  ;;  %v16539_v3 = vsel %vm1342_vm4, %v37977_v35, %v16526_v42  ;;  %v37984_v39 = vsel %vm1342_vm4, %v16526_v42, %v37684_v55  ;;  %18192 = vmatprep.mubr.f32.mxu0 %v41347_v57  ;;  %v37997_v35 = vsel %vm18091_vm5, %v37832_v0, %v37820_v54 }
 0x591   :  { %41402 = vst [vmem:[#allocation22_spill] sm:$0xff] %v37984_v39  ;;  %20821 = vrot.lane.b32.xlu1 %v37486_v19, %s34812_s27  ;;  %31979 = vmatprep.subr.msk.mxu1 %vm16548_vm1, %v37984_v39  ;;  %41403 = vst [vmem:[#allocation23_spill] sm:$0xff] %v37997_v35 }
 0x592   :  { %20829 = vrot.lane.b32.xlu0 %v37515_v38, %s34812_s27  ;;  %31980 = vmatpush1.msk.msra.mxu1 %vm16548_vm1, %v16539_v3 }
 0x593   :  { %32038 = vmatmul.mubr.msk.f32.vlgmr.msra.gmra.mrb[16].mxu0 %vm16543_vm2, %v37800_v9  ;;  %v38001_v55 = vpop.permute.xlu0 %19164  ;;  %31981 = vmatmul.mubr.msk.f32.vlgmr.msra.gmra.mrb[16].mxu1 %vm16543_vm2, %v37553_v24  ;;  %v38005_v42 = vpop.permute.xlu1 %18634 }
 0x594   :  { %32045 = vmatpush1.msk.msra.mxu0 %vm16548_vm1, %v37997_v35  ;;  %32937 = vmatprep.subr.msk.mxu1 %vm16548_vm1, %v37712_v61 }
 0x595   :  { %32938 = vmatpush3.msk.msra.mxu1 %vm16548_vm1, %v37712_v61  ;;  %19168 = vrot.lane.b32.xlu1 %v37600_v49, %s34788_s29 }
 0x596   :  { %20827 = vrot.lane.b32.xlu0 %v37506_v12, %s34812_s27  ;;  %31994 = vmatprep.subr.msk.mxu1 %vm16548_vm1, %v37600_v49 }
 0x597   :  { %18198 = vmatprep.mubr.f32.mxu0 %v41347_v57  ;;  %16872 = vmatprep.mubr.f32.mxu1 %v41347_v57  ;;  %v38021_v54 = vpop.permute.xlu0 %19162  ;;  %v38023_v3 = vpop.permute.xlu1 %18632 }
 0x598   :  { %32039 = vmatmul.mubr.msk.f32.gmra.mrb[18].mxu0 %vm16543_vm2, %v37772_v60  ;;  %31982 = vmatmul.mubr.msk.f32.gmra.mrb[18].mxu1 %vm16543_vm2, %v37551_v36 }
 0x599   :  { %32939 = vmatprep.mubr.msk.f32.mxu1 %vm16543_vm2, %v37553_v24  ;;  %20831 = vrot.lane.b32.xlu1 %v37521_v46, %s34812_s27 }
 0x59a   :  { %19176 = vrot.lane.b32.xlu0 %v37624_v7, %s34788_s29  ;;  %18346 = vmatprep.mubr.f32.mxu0 %v41347_v57 }
 0x59b   :  { %v38036_v35 = vpop.permute.xlu0 %19159  ;;  %v38038_v39 = vpop.permute.xlu1 %18089 }
 0x59c   :  { %32046 = vmatmul.mubr.msk.f32.vlgmr.msra.gmra.mrb[8].mxu0 %vm16543_vm2, %v37800_v9  ;;  %32940 = vmatmul.mubr.msk.f32.vlgmr.msra.gmra.mrb[20].mxu1 %vm16543_vm2, %v37551_v36  ;;  %v38047_v24 = vsel %vm18091_vm5, %v37798_v44, %v38038_v39 }
 0x59d   :  { %41404 = vst [vmem:[#allocation24_spill] sm:$0xff] %v38047_v24  ;;  %31995 = vmatpush1.msk.msra.mxu1 %vm16548_vm1, %v37469_v20  ;;  %19178 = vrot.lane.b32.xlu1 %v37622_v41, %s34788_s29 }
 0x59e   :  { %32002 = vmatprep.subr.msk.mxu1 %vm16548_vm1, %v37622_v41  ;;  %21363 = vrot.lane.b32.xlu0 %v37469_v20, %s34809_s25 }
 0x59f   :  { %18352 = vmatprep.mubr.f32.mxu0 %v41347_v57  ;;  %32052 = vmatprep.subr.msk.mxu0 %vm16548_vm1, %v38047_v24  ;;  %v38060_v36 = vpop.permute.xlu0 %19174  ;;  %v38062_v28 = vpop.permute.xlu1 %19166  ;;  %v38079_v24 = vsel %vm18638_vm11, %v37849_v13, %v37885_v53 }
 0x5a0   :  { %41405 = vst [vmem:[#allocation25_spill] sm:$0xff] %v38060_v36  ;;  %17198 = vmatprep.mubr.f32.mxu1 %v41347_v57  ;;  %32047 = vmatmul.mubr.msk.f32.gmra.mrb[10].mxu0 %vm16543_vm2, %v37772_v60  ;;  %41407 = vst [vmem:[#allocation27_spill] sm:$0xff] %v38079_v24 }
 0x5a1   :  { %32053 = vmatpush1.msk.msra.mxu0 %vm16548_vm1, %v38067_v2  ;;  %31996 = vmatmul.mubr.msk.f32.vlgmr.msra.gmra.mrb[12].mxu1 %vm16543_vm2, %v37355_v48 }
 0x5a2   :  { %32003 = vmatpush1.msk.msra.mxu1 %vm16548_vm1, %v37624_v7  ;;  %32059 = vmatprep.subr.msk.mxu0 %vm16548_vm1, %v38079_v24  ;;  %v38106_v24 = vsel %vm18638_vm11, %v37939_v33, %v37958_v40  ;;  %v38140_v40 = vsel %vm18638_vm11, %v37956_v59, %v37939_v33 }
 0x5a3   :  { %32942 = vmatprep.subr.msk.mxu1 %vm16548_vm1, %v37521_v46  ;;  %21361 = vrot.lane.b32.xlu1 %v37467_v47, %s34809_s25  ;;  %v38089_v44 = vpop.permute.xlu0 %19182  ;;  %v38091_v2 = vpop.permute.xlu1 %19157  ;;  %41408 = vst [vmem:[#allocation28_spill] sm:$0xff] %v38106_v24  ;;  %41410 = vst [vmem:[#allocation30_spill] sm:$0xff] %v38140_v40 }
 0x5a4   :  { %18500 = vmatprep.mubr.f32.mxu0 %v41347_v57  ;;  %17204 = vmatprep.mubr.f32.mxu1 %v41347_v57 }
 0x5a5   :  { %32054 = vmatmul.mubr.msk.f32.vlgmr.msra.gmra.mrb[12].mxu0 %vm16543_vm2, %v37800_v9  ;;  %31997 = vmatmul.mubr.msk.f32.gmra.mrb[14].mxu1 %vm16543_vm2, %v37346_v6 }
 0x5a6   :  { %32060 = vmatpush1.msk.msra.mxu0 %vm16548_vm1, %v18639_v22  ;;  %18506 = vmatprep.mubr.f32.mxu0 %v41347_v57 }
 0x5a7   :  { %32067 = vmatprep.subr.msk.mxu0 %vm16548_vm1, %v38106_v24  ;;  %21359 = vrot.lane.b32.xlu1 %v37493_v62, %s34809_s25  ;;  %v38113_v13 = vpop.permute.xlu0 %19180  ;;  %v38115_v5 = vpop.permute.xlu1 %19172 }
 0x5a8   :  { %17352 = vmatprep.mubr.f32.mxu1 %v41347_v57 }
 0x5a9   :  { %32055 = vmatmul.mubr.msk.f32.gmra.mrb[14].mxu0 %vm16543_vm2, %v37772_v60  ;;  %32004 = vmatmul.mubr.msk.f32.vlgmr.msra.gmra.mrb[16].mxu1 %vm16543_vm2, %v37355_v48 }
 0x5aa   :  { %32943 = vmatpush3.msk.msra.mxu1 %vm16548_vm1, %v37521_v46  ;;  %18739 = vmatprep.mubr.f32.mxu0 %v41347_v57 }
 0x5ab   :  { %21355 = vrot.lane.b32.xlu1 %v37355_v48, %s34803_s16  ;;  %17358 = vmatprep.mubr.f32.mxu1 %v41347_v57  ;;  %v38128_v62 = vpop.permute.xlu0 %18636  ;;  %v38130_v22 = vpop.permute.xlu1 %19170 }
 0x5ac   :  { %v38135_v24 = vsel %vm18638_vm11, %v38005_v42, %v38128_v62 }
 0x5ad   :  { %41409 = vst [vmem:[#allocation29_spill] sm:$0xff] %v38135_v24  ;;  %32061 = vmatmul.mubr.msk.f32.vlgmr.msra.gmra.mrb[16].mxu0 %vm16543_vm2, %v37909_v29  ;;  %32005 = vmatmul.mubr.msk.f32.gmra.mrb[18].mxu1 %vm16543_vm2, %v37346_v6 }
 0x5ae   :  { %32068 = vmatpush1.msk.msra.mxu0 %vm16548_vm1, %v38140_v40  ;;  %18745 = vmatprep.mubr.f32.mxu0 %v41347_v57 }
 0x5af   :  { %21357 = vrot.lane.b32.xlu1 %v37346_v6, %s34803_s16  ;;  %32075 = vmatprep.subr.msk.mxu0 %vm16548_vm1, %v38135_v24  ;;  %v38153_v1 = vpop.permute.xlu0 %19713  ;;  %v17528_v33 = vpop.permute.xlu1 %17527  ;;  %v19188_v24 = vsel %vm6648_vm12, %v38021_v54, %v38001_v55  ;;  %s34813_s16 = smov 50  }
 0x5b0   :  { %32944 = vmatprep.mubr.msk.f32.mxu1 %vm16543_vm2, %v37355_v48  ;;  %v38159_v15 = vsel %vm2664_vm6, %v37668_v43, %v17528_v33  ;;  %v38163_v40 = vsel %vm2664_vm6, %v17528_v33, %v37731_v32  ;;  %v38195_v32 = vsel %vm6648_vm12, %v38001_v55, %v38062_v28 }
 0x5b1   :  { %41411 = vst [vmem:[#allocation31_spill] sm:$0xff] %v38159_v15  ;;  %41412 = vst [vmem:[#allocation32_spill] sm:$0xff] %v38163_v40  ;;  %32062 = vmatmul.mubr.msk.f32.gmra.mrb[18].mxu0 %vm16543_vm2, %v37941_v14  ;;  %32945 = vmatmul.mubr.msk.f32.vlgmr.msra.gmra.mrb[20].mxu1 %vm16543_vm2, %v37346_v6  ;;  %v38184_v6 = vsel %vm18638_vm11, %v38023_v3, %v38005_v42 }
 0x5b2   :  { %32017 = vmatprep.subr.msk.mxu1 %vm16548_vm1, %v38163_v40  ;;  %18893 = vmatprep.mubr.f32.mxu0 %v41347_v57  ;;  %41413 = vst [vmem:[#allocation33_spill] sm:$0xff] %v38184_v6  ;;  %41414 = vst [vmem:[#allocation34_spill] sm:$0xff] %v38195_v32  ;;  %v38228_v40 = vsel %vm6648_vm12, %v38115_v5, %v38060_v36 }
 0x5b3   :  { %21371 = vrot.lane.b32.xlu1 %v37486_v19, %s34809_s25  ;;  %32018 = vmatpush1.msk.msra.mxu1 %vm16548_vm1, %v38159_v15  ;;  %v38176_v48 = vpop.permute.xlu0 %19711  ;;  %v38178_v43 = vpop.permute.xlu1 %19184  ;;  %41415 = vst [vmem:[#allocation35_spill] sm:$0xff] %v38228_v40 }
 0x5b4   :  { %17722 = vmatprep.mubr.f32.mxu1 %v41347_v57 }
 0x5b5   :  { %32069 = vmatmul.mubr.msk.f32.vlgmr.msra.gmra.mrb[8].mxu0 %vm16543_vm2, %v37909_v29  ;;  %32019 = vmatmul.mubr.msk.f32.vlgmr.msra.gmra.mrb[12].mxu1 %vm16543_vm2, %v37662_v27 }
 0x5b6   :  { %32076 = vmatpush1.msk.msra.mxu0 %vm16548_vm1, %v38184_v6  ;;  %18899 = vmatprep.mubr.f32.mxu0 %v41347_v57 }
 0x5b7   :  { %32082 = vmatprep.subr.msk.mxu0 %vm16548_vm1, %v38195_v32  ;;  %19727 = vrot.lane.b32.xlu1 %v37622_v41, %s34791_s12  ;;  %v38202_v42 = vpop.permute.xlu0 %16258  ;;  %v38204_v33 = vpop.permute.xlu1 %19715 }
 0x5b8   :  { %17728 = vmatprep.mubr.f32.mxu1 %v41347_v57 }
 0x5b9   :  { %32070 = vmatmul.mubr.msk.f32.gmra.mrb[10].mxu0 %vm16543_vm2, %v37941_v14  ;;  %32020 = vmatmul.mubr.msk.f32.gmra.mrb[14].mxu1 %vm16543_vm2, %v37733_v45 }
 0x5ba   :  { %19047 = vmatprep.mubr.f32.mxu0 %v41347_v57  ;;  %17876 = vmatprep.mubr.f32.mxu1 %v41347_v57 }
 0x5bb   :  { %21379 = vrot.lane.b32.xlu1 %v37515_v38, %s34809_s25  ;;  %v38215_v6 = vpop.permute.xlu0 %16332  ;;  %v38217_v32 = vpop.permute.xlu1 %19707 }
 0x5bd   :  { %32077 = vmatmul.mubr.msk.f32.vlgmr.msra.gmra.mrb[12].mxu0 %vm16543_vm2, %v37909_v29 }
 0x5be   :  { %32083 = vmatpush1.msk.msra.mxu0 %vm16548_vm1, %v19188_v24  ;;  %19053 = vmatprep.mubr.f32.mxu0 %v41347_v57 }
 0x5bf   :  { %32090 = vmatprep.subr.msk.mxu0 %vm16548_vm1, %v38228_v40  ;;  %21377 = vrot.lane.b32.xlu1 %v37506_v12, %s34809_s25  ;;  %v38235_v15 = vpop.permute.xlu0 %19709  ;;  %v17538_v55 = vpop.permute.xlu1 %17537  ;;  %v38314_v12 = vsel %vm6648_vm12, %v38113_v13, %v38089_v44 }
 0x5c0   :  { %v38239_v54 = vsel %vm2664_vm6, %v17538_v55, %v37774_v8  ;;  %v38257_v8 = vsel %vm6648_vm12, %v38130_v22, %v38115_v5  ;;  %41421 = vst [vmem:[#allocation41_spill] sm:$0xff] %v38314_v12 }
 0x5c1   :  { %41416 = vst [vmem:[#allocation36_spill] sm:$0xff] %v38239_v54  ;;  %32078 = vmatmul.mubr.msk.f32.gmra.mrb[14].mxu0 %vm16543_vm2, %v37941_v14  ;;  %32025 = vmatprep.subr.msk.mxu1 %vm16548_vm1, %v38239_v54  ;;  %41419 = vst [vmem:[#allocation39_spill] sm:$0xff] %v38257_v8  ;;  %v16273_v54 = vsel %vm95_vm0, %v37397_v23, %v38202_v42 }
 0x5c2   :  { %19289 = vmatprep.mubr.f32.mxu0 %v41347_v57 }
 0x5c3   :  { %20266 = vrot.lane.b32.xlu1 %v37600_v49, %s41389_s23  ;;  %v38248_v24 = vpop.permute.xlu0 %19723  ;;  %v38250_v40 = vpop.permute.xlu1 %17535 }
 0x5c4   :  { %41417 = vst [vmem:[#allocation37_spill] sm:$0xff] %v38248_v24  ;;  %41418 = vst [vmem:[#allocation38_spill] sm:$0xff] %v38250_v40  ;;  %v17551_v36 = vsel %vm2664_vm6, %v38250_v40, %v17538_v55  ;;  %v38270_v55 = vsel %vm6648_vm12, %v38089_v44, %v38178_v43  ;;  %v16347_v40 = vsel %vm3328_vm7, %v37401_v30, %v38215_v6 }
 0x5c5   :  { %32084 = vmatmul.mubr.msk.f32.vlgmr.msra.gmra.mrb[16].mxu0 %vm16543_vm2, %v38091_v2  ;;  %32026 = vmatpush1.msk.msra.mxu1 %vm16548_vm1, %v17551_v36  ;;  %41420 = vst [vmem:[#allocation40_spill] sm:$0xff] %v38270_v55  ;;  %v38278_v36 = vld [vmem:[%s41200_s3 + $0x10] sm:$0xff] }
 0x5c6   :  { %32091 = vmatpush1.msk.msra.mxu0 %vm16548_vm1, %v38257_v8  ;;  %19295 = vmatprep.mubr.f32.mxu0 %v41347_v57  ;;  %v16302_v8 = vmax.f32 %v37279_v56, %v16273_v54 }
 0x5c7   :  { %32098 = vmatprep.subr.msk.mxu0 %vm16548_vm1, %v38270_v55  ;;  %21907 = vrot.lane.b32.xlu1 %v38278_v36, %s34806_s30  ;;  %v38282_v23 = vpop.permute.xlu0 %19719  ;;  %v38284_v5 = vpop.permute.xlu1 %19721 }
 0x5c8   :  { %32027 = vmatmul.mubr.msk.f32.vlgmr.msra.gmra.mrb[16].mxu1 %vm16543_vm2, %v37662_v27  ;;  %32947 = vmatprep.subr.msk.mxu1 %vm16548_vm1, %v37883_v52  ;;  %v16376_v55 = vmax.f32 %v16302_v8, %v16347_v40  ;;  %v38325_v8 = vsel %vm7976_vm14, %v38153_v1, %v38204_v33 }
 0x5c9   :  { %32085 = vmatmul.mubr.msk.f32.gmra.mrb[18].mxu0 %vm16543_vm2, %v38036_v35  ;;  %32948 = vmatpush3.msk.msra.mxu1 %vm16548_vm1, %v37883_v52  ;;  %41422 = vst [vmem:[#allocation42_spill] sm:$0xff] %v38325_v8 }
 0x5ca   :  { %17882 = vmatprep.mubr.f32.mxu1 %v41347_v57  ;;  %19443 = vmatprep.mubr.f32.mxu0 %v41347_v57 }
 0x5cb   :  { %20274 = vrot.lane.b32.xlu1 %v37624_v7, %s41389_s23  ;;  %v38302_v30 = vpop.permute.xlu1 %16406 }
 0x5cc   :  { %32028 = vmatmul.mubr.msk.f32.gmra.mrb[18].mxu1 %vm16543_vm2, %v37733_v45  ;;  %v38306_v56 = vpop.permute.xlu0 %19733  ;;  %v16421_v54 = vsel %vm3992_vm8, %v37405_v34, %v38302_v30 }
 0x5cd   :  { %32092 = vmatmul.mubr.msk.f32.vlgmr.msra.gmra.mrb[8].mxu0 %vm16543_vm2, %v38091_v2  ;;  %32949 = vmatprep.mubr.msk.f32.mxu1 %vm16543_vm2, %v37662_v27  ;;  %v16450_v40 = vmax.f32 %v16376_v55, %v16421_v54 }
 0x5ce   :  { %32099 = vmatpush1.msk.msra.mxu0 %vm16548_vm1, %v38314_v12  ;;  %19449 = vmatprep.mubr.f32.mxu0 %v41347_v57 }
 0x5cf   :  { %32105 = vmatprep.subr.msk.mxu0 %vm16548_vm1, %v38325_v8  ;;  %v16470_v34 = vadd.f32 %v37373_v63, %v16450_v40  ;;  %20815 = vrot.lane.b32.xlu1 %v37600_v49, %s34812_s27  ;;  %v19732_v27 = vpop.permute.xlu1 %19731 }
 0x5d0   :  { %32950 = vmatmul.mubr.msk.f32.vlgmr.msra.gmra.mrb[20].mxu1 %vm16543_vm2, %v37733_v45  ;;  %v18074_v44 = vpop.permute.xlu0 %18073 }
 0x5d1   :  { %v38335_v55 = vmax.f32 %v16470_v34, 0.0  ;;  %32093 = vmatmul.mubr.msk.f32.gmra.mrb[10].mxu0 %vm16543_vm2, %v38036_v35  ;;  %v38341_v54 = vsel %vm18091_vm5, %v37789_v58, %v18074_v44  ;;  %v38345_v40 = vsel %vm18091_vm5, %v18074_v44, %v37832_v0  ;;  %18269 = vmatprep.mubr.f32.mxu1 %v41347_v57  ;;  %v19737_v0 = vsel %vm7976_vm14, %v38176_v48, %v38153_v1 }
 0x5d2   :  { %41423 = vst [vmem:[#allocation43_spill] sm:$0xff] %v38341_v54  ;;  %41424 = vst [vmem:[#allocation44_spill] sm:$0xff] %v38345_v40  ;;  %32040 = vmatprep.subr.msk.mxu1 %vm16548_vm1, %v38345_v40  ;;  %19597 = vmatprep.mubr.f32.mxu0 %v41347_v57  ;;  %v38373_v34 = vsel %vm7976_vm14, %v38284_v5, %v38248_v24 }
 0x5d3   :  { %20825 = vrot.lane.b32.xlu1 %v37622_v41, %s34812_s27  ;;  %32041 = vmatpush1.msk.msra.mxu1 %vm16548_vm1, %v38341_v54  ;;  %v38355_v45 = vpop.permute.xlu1 %19729  ;;  %41425 = vst [vmem:[#allocation45_spill] sm:$0xff] %v38373_v34 }
 0x5d4   :  { %v38357_v58 = vpop.permute.xlu0 %20264  ;;  %32042 = vmatmul.mubr.msk.f32.vlgmr.msra.gmra.mrb[12].mxu1 %vm16543_vm2, %v37800_v9  ;;  %19186 = vrot.lane.b32.xlu0 %v38335_v55, %s34788_s29  ;;  %v38455_v40 = vsel %vm7976_vm14, %v38355_v45, %v19732_v27 }
 0x5d5   :  { %32100 = vmatmul.mubr.msk.f32.vlgmr.msra.gmra.mrb[12].mxu0 %vm16543_vm2, %v38091_v2  ;;  %18275 = vmatprep.mubr.f32.mxu1 %v41347_v57 }
 0x5d6   :  { %32106 = vmatpush1.msk.msra.mxu0 %vm16548_vm1, %v19737_v0  ;;  %19603 = vmatprep.mubr.f32.mxu0 %v41347_v57 }
 0x5d7   :  { %32113 = vmatprep.subr.msk.mxu0 %vm16548_vm1, %v38373_v34  ;;  %22401 = vrot.lane.b32.xlu1 %v38278_v36, %s34791_s12  ;;  %v38380_v1 = vpop.permute.xlu1 %20262  ;;  %v38413_v34 = vsel %vm7976_vm14, %v19732_v27, %v38306_v56 }
 0x5d8   :  { %v18084_v48 = vpop.permute.xlu0 %18083  ;;  %32043 = vmatmul.mubr.msk.f32.gmra.mrb[14].mxu1 %vm16543_vm2, %v37772_v60  ;;  %19717 = vrot.lane.b32.xlu0 %v37600_v49, %s34791_s12  ;;  %41428 = vst [vmem:[#allocation48_spill] sm:$0xff] %v38413_v34 }
 0x5d9   :  { %32101 = vmatmul.mubr.msk.f32.gmra.mrb[14].mxu0 %vm16543_vm2, %v38036_v35  ;;  %v38390_v44 = vsel %vm18091_vm5, %v18084_v48, %v37818_v10  ;;  %18423 = vmatprep.mubr.f32.mxu1 %v41347_v57  ;;  %v38405_v10 = vsel %vm7976_vm14, %v38282_v23, %v38284_v5 }
 0x5da   :  { %41426 = vst [vmem:[#allocation46_spill] sm:$0xff] %v38390_v44  ;;  %32048 = vmatprep.subr.msk.mxu1 %vm16548_vm1, %v38390_v44  ;;  %19838 = vmatprep.mubr.f32.mxu0 %v41347_v57  ;;  %41427 = vst [vmem:[#allocation47_spill] sm:$0xff] %v38405_v10 }
 0x5db   :  { %20833 = vrot.lane.b32.xlu1 %v38335_v55, %s34812_s27  ;;  %v20261_v0 = vpop.permute.xlu1 %20260 }
 0x5dc   :  { %v38398_v12 = vpop.permute.xlu0 %20256  ;;  %21369 = vrot.lane.b32.xlu0 %v37503_v50, %s34809_s25 }
 0x5dd   :  { %32107 = vmatmul.mubr.msk.f32.vlgmr.msra.gmra.mrb[16].mxu0 %vm16543_vm2, %v38217_v32 }
 0x5de   :  { %32114 = vmatpush1.msk.msra.mxu0 %vm16548_vm1, %v38405_v10  ;;  %19844 = vmatprep.mubr.f32.mxu0 %v41347_v57 }
 0x5df   :  { %32121 = vmatprep.subr.msk.mxu0 %vm16548_vm1, %v38413_v34  ;;  %21365 = vrot.lane.b32.xlu1 %v37600_v49, %s34809_s25  ;;  %v38420_v5 = vpop.permute.xlu1 %18081  ;;  %v41430_v34 = vld [vmem:[#allocation3_spill] sm:$0xff] }
 0x5e0   :  { %41429 = vst [vmem:[#allocation49_spill] sm:$0xff] %v38420_v5  ;;  %v38422_v8 = vpop.permute.xlu0 %20270  ;;  %21367 = vrot.lane.b32.xlu0 %v37512_v37, %s34809_s25  ;;  %v18098_v10 = vsel %vm18091_vm5, %v38420_v5, %v18084_v48  ;;  %v16267_v24 = vsel %vm95_vm0, %v41430_v34, %v37562_v31  ;;  %v41431_v5 = vld [vmem:[#allocation2_spill] sm:$0xff]  ;;  %v41432_v31 = vld [vmem:[#allocation4_spill] sm:$0xff]  ;;  %41433 = vst [vmem:[#allocation3_spill] sm:$0xff] %v38455_v40  ;;  %vm20835_vm0 = vcmask 474112  }
 0x5e1   :  { %32108 = vmatmul.mubr.msk.f32.gmra.mrb[18].mxu0 %vm16543_vm2, %v38235_v15  ;;  %32049 = vmatpush1.msk.msra.mxu1 %vm16548_vm1, %v18098_v10  ;;  %v16341_v10 = vsel %vm3328_vm7, %v41431_v5, %v37579_v11  ;;  %v16296_v34 = vmax.f32 %v41432_v31, %v16267_v24  ;;  %v16415_v11 = vsel %vm3992_vm8, %v37385_v4, %v37590_v18  ;;  %vm21385_vm7 = vcmask 457728  }
 0x5e2   :  { %19992 = vmatprep.mubr.f32.mxu0 %v41347_v57  ;;  %32050 = vmatmul.mubr.msk.f32.vlgmr.msra.gmra.mrb[16].mxu1 %vm16543_vm2, %v37800_v9  ;;  %v38468_v24 = vsel %vm9304_vm9, %v38380_v1, %v38357_v58  ;;  %vm27413_vm8 = vcmask 15360  }
 0x5e3   :  { %21373 = vrot.lane.b32.xlu1 %v37624_v7, %s34809_s25  ;;  %32952 = vmatprep.subr.msk.mxu1 %vm16548_vm1, %v38038_v39  ;;  %v38441_v48 = vpop.permute.xlu1 %20258  ;;  %41434 = vst [vmem:[#allocation2_spill] sm:$0xff] %v38468_v24  ;;  %v16370_v27 = vmax.f32 %v16296_v34, %v16341_v10 }
 0x5e4   :  { %v38446_v44 = vpop.permute.xlu0 %20268  ;;  %19725 = vrot.lane.b32.xlu0 %v37624_v7, %s34791_s12  ;;  %32953 = vmatpush3.msk.msra.mxu1 %vm16548_vm1, %v38038_v39 }
 0x5e5   :  { %32115 = vmatmul.mubr.msk.f32.vlgmr.msra.gmra.mrb[8].mxu0 %vm16543_vm2, %v38217_v32  ;;  %18429 = vmatprep.mubr.f32.mxu1 %v41347_v57  ;;  %v16444_v18 = vmax.f32 %v16370_v27, %v16415_v11  ;;  %v20286_v11 = vsel %vm9304_vm9, %v20261_v0, %v38380_v1 }
 0x5e6   :  { %32122 = vmatpush1.msk.msra.mxu0 %vm16548_vm1, %v38455_v40  ;;  %19998 = vmatprep.mubr.f32.mxu0 %v41347_v57 }
 0x5e7   :  { %32128 = vmatprep.subr.msk.mxu0 %vm16548_vm1, %v38468_v24  ;;  %22904 = vrot.lane.b32.xlu1 %v38278_v36, %s34809_s25  ;;  %v38475_v5 = vpop.permute.xlu1 %20272 }
 0x5e8   :  { %41435 = vst [vmem:[#allocation4_spill] sm:$0xff] %v38475_v5  ;;  %32051 = vmatmul.mubr.msk.f32.gmra.mrb[18].mxu1 %vm16543_vm2, %v37772_v60  ;;  %v38479_v4 = vpop.permute.xlu0 %20280  ;;  %21381 = vrot.lane.b32.xlu0 %v37521_v46, %s34809_s25 }
 0x5e9   :  { %32116 = vmatmul.mubr.msk.f32.gmra.mrb[10].mxu0 %vm16543_vm2, %v38235_v15  ;;  %32954 = vmatprep.mubr.msk.f32.mxu1 %vm16543_vm2, %v37800_v9  ;;  %v16464_v9 = vadd.f32 %v37373_v63, %v16444_v18 }
 0x5ea   :  { %20146 = vmatprep.mubr.f32.mxu0 %v41347_v57 }
 0x5eb   :  { %21383 = vrot.lane.b32.xlu1 %v38335_v55, %s34809_s25  ;;  %v18621_v10 = vpop.permute.xlu1 %18620  ;;  %v38534_v27 = vmax.f32 %v16464_v9, 0.0  ;;  %v38551_v9 = vsel %vm9304_vm9, %v38446_v44, %v38422_v8 }
 0x5ec   :  { %32955 = vmatmul.mubr.msk.f32.vlgmr.msra.gmra.mrb[20].mxu1 %vm16543_vm2, %v37772_v60  ;;  %v38492_v31 = vpop.permute.xlu0 %20278  ;;  %19735 = vrot.lane.b32.xlu0 %v38335_v55, %s34791_s12  ;;  %v38498_v34 = vsel %vm18638_vm11, %v18621_v10, %v37956_v59  ;;  %v38507_v60 = vsel %vm18638_vm11, %v37885_v53, %v18621_v10  ;;  %v38515_v59 = vsel %vm9304_vm9, %v38422_v8, %v38475_v5  ;;  %v38523_v53 = vld [vmem:[%s41200_s3] sm:$0xff] }
 0x5ed   :  { %32123 = vmatmul.mubr.msk.f32.vlgmr.msra.gmra.mrb[12].mxu0 %vm16543_vm2, %v38217_v32  ;;  %41436 = vst [vmem:[#allocation50_spill] sm:$0xff] %v38507_v60  ;;  %32063 = vmatprep.subr.msk.mxu1 %vm16548_vm1, %v38498_v34  ;;  %41437 = vst [vmem:[#allocation51_spill] sm:$0xff] %v38515_v59 }
 0x5ee   :  { %32129 = vmatpush1.msk.msra.mxu0 %vm16548_vm1, %v20286_v11  ;;  %20152 = vmatprep.mubr.f32.mxu0 %v41347_v57  ;;  %41439 = vst [vmem:[#allocation53_spill] sm:$0xff] %v38534_v27  ;;  %41440 = vst [vmem:[#allocation54_spill] sm:$0xff] %v38551_v9 }
 0x5ef   :  { %32136 = vmatprep.subr.msk.mxu0 %vm16548_vm1, %v38515_v59  ;;  %23404 = vrot.lane.b32.xlu1 %v38523_v53, %s34813_s16  ;;  %v38527_v1 = vpop.permute.xlu1 %20282 }
 0x5f0   :  { %32064 = vmatpush1.msk.msra.mxu1 %vm16548_vm1, %v38507_v60  ;;  %18816 = vmatprep.mubr.f32.mxu1 %v41347_v57  ;;  %v38532_v0 = vpop.permute.xlu0 %18628  ;;  %v38568_v8 = vsel %vm9304_vm9, %v38479_v4, %v38527_v1 }
 0x5f1   :  { %41438 = vst [vmem:[#allocation52_spill] sm:$0xff] %v38532_v0  ;;  %32124 = vmatmul.mubr.msk.f32.gmra.mrb[14].mxu0 %vm16543_vm2, %v38235_v15  ;;  %21905 = vrot.lane.b32.xlu0 %v38523_v53, %s34806_s30  ;;  %41441 = vst [vmem:[#allocation55_spill] sm:$0xff] %v38568_v8  ;;  %s34814_s30 = smov 44  }
 0x5f2   :  { %32065 = vmatmul.mubr.msk.f32.vlgmr.msra.gmra.mrb[12].mxu1 %vm16543_vm2, %v37909_v29  ;;  %20387 = vmatprep.mubr.f32.mxu0 %v41347_v57 }
 0x5f3   :  { %23408 = vrot.lane.b32.xlu1 %v38534_v27, %s34773_s19  ;;  %18822 = vmatprep.mubr.f32.mxu1 %v41347_v57  ;;  %v18631_v18 = vpop.permute.xlu1 %18630 }
 0x5f4   :  { %v38546_v10 = vpop.permute.xlu0 %20813  ;;  %v38559_v11 = vsel %vm18638_vm11, %v18631_v18, %v38023_v3  ;;  %v18645_v40 = vsel %vm18638_vm11, %v38532_v0, %v18631_v18  ;;  %v38600_v0 = vsel %vm9304_vm9, %v38492_v31, %v38479_v4 }
 0x5f5   :  { %32130 = vmatmul.mubr.msk.f32.vlgmr.msra.gmra.mrb[16].mxu0 %vm16543_vm2, %v38398_v12  ;;  %20276 = vrot.lane.b32.xlu0 %v37622_v41, %s41389_s23  ;;  %41442 = vst [vmem:[#allocation56_spill] sm:$0xff] %v38600_v0 }
 0x5f6   :  { %32137 = vmatpush1.msk.msra.mxu0 %vm16548_vm1, %v38551_v9  ;;  %32066 = vmatmul.mubr.msk.f32.gmra.mrb[14].mxu1 %vm16543_vm2, %v37941_v14 }
 0x5f7   :  { %32144 = vmatprep.subr.msk.mxu0 %vm16548_vm1, %v38568_v8  ;;  %23906 = vrot.lane.b32.xlu1 %v38523_v53, %s34814_s30  ;;  %v20812_v3 = vpop.permute.xlu1 %20811 }
 0x5f8   :  { %32071 = vmatprep.subr.msk.mxu1 %vm16548_vm1, %v38559_v11  ;;  %20393 = vmatprep.mubr.f32.mxu0 %v41347_v57  ;;  %v38579_v9 = vpop.permute.xlu0 %20805  ;;  %v38612_v8 = vsel %vm20835_vm0, %v20812_v3, %v38546_v10 }
 0x5f9   :  { %32072 = vmatpush1.msk.msra.mxu1 %vm16548_vm1, %v18645_v40  ;;  %18970 = vmatprep.mubr.f32.mxu1 %v41347_v57  ;;  %41443 = vst [vmem:[#allocation57_spill] sm:$0xff] %v38612_v8 }
 0x5fa   :  { %32131 = vmatmul.mubr.msk.f32.gmra.mrb[18].mxu0 %vm16543_vm2, %v38441_v48  ;;  %20284 = vrot.lane.b32.xlu0 %v38335_v55, %s41389_s23 }
 0x5fb   :  { %32073 = vmatmul.mubr.msk.f32.vlgmr.msra.gmra.mrb[16].mxu1 %vm16543_vm2, %v37909_v29  ;;  %32957 = vmatprep.subr.msk.mxu1 %vm16548_vm1, %v38128_v62  ;;  %v20810_v18 = vpop.permute.xlu1 %20809 }
 0x5fc   :  { %32958 = vmatpush3.msk.msra.mxu1 %vm16548_vm1, %v38128_v62  ;;  %23910 = vrot.lane.b32.xlu1 %v38534_v27, %s34811_s28  ;;  %v20820_v40 = vpop.permute.xlu0 %20819  ;;  %v20836_v24 = vsel %vm20835_vm0, %v20810_v18, %v20812_v3 }
 0x5fd   :  { %20541 = vmatprep.mubr.f32.mxu0 %v41347_v57  ;;  %18976 = vmatprep.mubr.f32.mxu1 %v41347_v57 }
 0x5fe   :  { %32138 = vmatmul.mubr.msk.f32.vlgmr.msra.gmra.mrb[8].mxu0 %vm16543_vm2, %v38398_v12  ;;  %22399 = vrot.lane.b32.xlu0 %v38523_v53, %s34791_s12 }
 0x5ff   :  { %32145 = vmatpush1.msk.msra.mxu0 %vm16548_vm1, %v38600_v0  ;;  %32074 = vmatmul.mubr.msk.f32.gmra.mrb[18].mxu1 %vm16543_vm2, %v37941_v14  ;;  %v38614_v59 = vpop.permute.xlu1 %20807 }
 0x600   :  { %32151 = vmatprep.subr.msk.mxu0 %vm16548_vm1, %v38612_v8  ;;  %32959 = vmatprep.mubr.msk.f32.mxu1 %vm16543_vm2, %v37909_v29  ;;  %v38620_v4 = vpop.permute.xlu0 %20817 }
 0x601   :  { %24408 = vrot.lane.b32.xlu1 %v38523_v53, %s34815_s26  ;;  %20547 = vmatprep.mubr.f32.mxu0 %v41347_v57 }
 0x602   :  { %32139 = vmatmul.mubr.msk.f32.gmra.mrb[10].mxu0 %vm16543_vm2, %v38441_v48  ;;  %20823 = vrot.lane.b32.xlu0 %v37624_v7, %s34812_s27 }
 0x603   :  { %32960 = vmatmul.mubr.msk.f32.vlgmr.msra.gmra.mrb[20].mxu1 %vm16543_vm2, %v37941_v14  ;;  %20695 = vmatprep.mubr.f32.mxu0 %v41347_v57  ;;  %v38632_v29 = vpop.permute.xlu1 %20821 }
 0x604   :  { %41444 = vst [vmem:[#allocation58_spill] sm:$0xff] %v38632_v29  ;;  %v20830_v0 = vpop.permute.xlu0 %20829  ;;  %19366 = vmatprep.mubr.f32.mxu1 %v41347_v57  ;;  %v38639_v8 = vsel %vm20835_vm0, %v20820_v40, %v38632_v29 }
 0x605   :  { %24413 = vrot.lane.b32.xlu1 %v38534_v27, %s34788_s29  ;;  %41445 = vst [vmem:[#allocation59_spill] sm:$0xff] %v38639_v8 }
 0x606   :  { %32146 = vmatmul.mubr.msk.f32.vlgmr.msra.gmra.mrb[12].mxu0 %vm16543_vm2, %v38398_v12  ;;  %22404 = vrot.lane.b32.xlu0 %v38534_v27, %s34772_s18 }
 0x607   :  { %32152 = vmatpush1.msk.msra.mxu0 %vm16548_vm1, %v20836_v24  ;;  %20701 = vmatprep.mubr.f32.mxu0 %v41347_v57  ;;  %v19169_v7 = vpop.permute.xlu1 %19168  ;;  %v38684_v24 = vsel %vm20835_vm0, %v38620_v4, %v20820_v40 }
 0x608   :  { %32159 = vmatprep.subr.msk.mxu0 %vm16548_vm1, %v38639_v8  ;;  %v38652_v14 = vsel %vm6648_vm12, %v38062_v28, %v19169_v7  ;;  %v38656_v3 = vsel %vm6648_vm12, %v19169_v7, %v38130_v22  ;;  %v38660_v18 = vpop.permute.xlu0 %20827  ;;  %41448 = vst [vmem:[#allocation61_spill] sm:$0xff] %v38684_v24  ;;  %v16303_v7 = vmax.f32 %v37281_v16, %v38202_v42 }
 0x609   :  { %24911 = vrot.lane.b32.xlu1 %v38278_v36, %s41446_s0  ;;  %32086 = vmatprep.subr.msk.mxu1 %vm16548_vm1, %v38656_v3 }
 0x60a   :  { %32147 = vmatmul.mubr.msk.f32.gmra.mrb[14].mxu0 %vm16543_vm2, %v38441_v48  ;;  %22406 = vrot.lane.b32.xlu0 %v38335_v55, %s34772_s18  ;;  %v16377_v16 = vmax.f32 %v16303_v7, %v38215_v6 }
 0x60b   :  { %20937 = vmatprep.mubr.f32.mxu0 %v41347_v57  ;;  %32087 = vmatpush1.msk.msra.mxu1 %vm16548_vm1, %v38652_v14  ;;  %v38671_v28 = vpop.permute.xlu1 %20831 }
 0x60c   :  { %32088 = vmatmul.mubr.msk.f32.vlgmr.msra.gmra.mrb[12].mxu1 %vm16543_vm2, %v38091_v2  ;;  %v38679_v22 = vsel %vm20835_vm0, %v20830_v0, %v38671_v28  ;;  %v19177_v8 = vpop.permute.xlu0 %19176  ;;  %v16451_v42 = vmax.f32 %v16377_v16, %v38302_v30  ;;  %v38802_v16 = vld [vmem:[%s41200_s3 + $0x18] sm:$0xff] }
 0x60d   :  { %25409 = vrot.lane.b32.xlu1 %v38523_v53, %s34816_s1  ;;  %41447 = vst [vmem:[#allocation60_spill] sm:$0xff] %v38679_v22  ;;  %19372 = vmatprep.mubr.f32.mxu1 %v41347_v57 }
 0x60e   :  { %32153 = vmatmul.mubr.msk.f32.vlgmr.msra.gmra.mrb[16].mxu0 %vm16543_vm2, %v38579_v9  ;;  %21375 = vrot.lane.b32.xlu0 %v37622_v41, %s34809_s25 }
 0x60f   :  { %32160 = vmatpush1.msk.msra.mxu0 %vm16548_vm1, %v38684_v24  ;;  %20943 = vmatprep.mubr.f32.mxu0 %v41347_v57  ;;  %v19179_v29 = vpop.permute.xlu1 %19178 }
 0x610   :  { %32167 = vmatprep.subr.msk.mxu0 %vm16548_vm1, %v38679_v22  ;;  %32089 = vmatmul.mubr.msk.f32.gmra.mrb[14].mxu1 %vm16543_vm2, %v38036_v35  ;;  %v19194_v40 = vsel %vm6648_vm12, %v19177_v8, %v19179_v29  ;;  %v38702_v5 = vsel %vm6648_vm12, %v19179_v29, %v38113_v13  ;;  %v38717_v13 = vpop.permute.xlu0 %21363  ;;  %v38724_v8 = vsel %vm20835_vm0, %v38660_v18, %v20830_v0 }
 0x611   :  { %25413 = vrot.lane.b32.xlu1 %v38534_v27, %s41389_s23  ;;  %32094 = vmatprep.subr.msk.mxu1 %vm16548_vm1, %v38702_v5  ;;  %41449 = vst [vmem:[#allocation62_spill] sm:$0xff] %v38724_v8  ;;  %v16471_v29 = vadd.f32 %v37373_v63, %v16451_v42 }
 0x612   :  { %32154 = vmatmul.mubr.msk.f32.gmra.mrb[18].mxu0 %vm16543_vm2, %v38614_v59  ;;  %22902 = vrot.lane.b32.xlu0 %v38523_v53, %s34809_s25 }
 0x613   :  { %21091 = vmatprep.mubr.f32.mxu0 %v41347_v57  ;;  %32095 = vmatpush1.msk.msra.mxu1 %vm16548_vm1, %v19194_v40  ;;  %v38748_v63 = vmax.f32 %v16471_v29, 0.0 }
 0x614   :  { %19520 = vmatprep.mubr.f32.mxu1 %v41347_v57 }
 0x615   :  { %25909 = vrot.lane.b32.xlu1 %v38523_v53, %s34817_s15  ;;  %32096 = vmatmul.mubr.msk.f32.vlgmr.msra.gmra.mrb[16].mxu1 %vm16543_vm2, %v38091_v2  ;;  %v21362_v6 = vpop.permute.xlu1 %21361  ;;  %41451 = vst [vmem:[#allocation64_spill] sm:$0xff] %v38748_v63 }
 0x616   :  { %32161 = vmatmul.mubr.msk.f32.vlgmr.msra.gmra.mrb[8].mxu0 %vm16543_vm2, %v38579_v9  ;;  %22906 = vrot.lane.b32.xlu0 %v38534_v27, %s34775_s21  ;;  %v38732_v30 = vsel %vm21385_vm7, %v21362_v6, %v38717_v13 }
 0x617   :  { %41450 = vst [vmem:[#allocation63_spill] sm:$0xff] %v38732_v30  ;;  %32168 = vmatpush1.msk.msra.mxu0 %vm16548_vm1, %v38724_v8  ;;  %21097 = vmatprep.mubr.f32.mxu0 %v41347_v57 }
 0x618   :  { %32174 = vmatprep.subr.msk.mxu0 %vm16548_vm1, %v38732_v30  ;;  %19526 = vmatprep.mubr.f32.mxu1 %v41347_v57 }
 0x619   :  { %25911 = vrot.lane.b32.xlu1 %v38278_v36, %s34817_s15  ;;  %32097 = vmatmul.mubr.msk.f32.gmra.mrb[18].mxu1 %vm16543_vm2, %v38036_v35  ;;  %v21360_v0 = vpop.permute.xlu1 %21359 }
 0x61a   :  { %32162 = vmatmul.mubr.msk.f32.gmra.mrb[10].mxu0 %vm16543_vm2, %v38614_v59  ;;  %22908 = vrot.lane.b32.xlu0 %v38335_v55, %s34775_s21  ;;  %v21386_v7 = vsel %vm21385_vm7, %v21360_v0, %v21362_v6  ;;  %v38813_v6 = vld [vmem:[%s41200_s3 + $0x8] sm:$0xff] }
 0x61b   :  { %32964 = vmatprep.mubr.msk.f32.mxu1 %vm16543_vm2, %v38091_v2  ;;  %21245 = vmatprep.mubr.f32.mxu0 %v41347_v57 }
 0x61d   :  { %25415 = vrot.lane.b32.xlu1 %v38748_v63, %s41389_s23  ;;  %v38768_v2 = vpop.permute.xlu1 %21355  ;;  %s34819_s23 = smov 8  }
 0x61e   :  { %32169 = vmatmul.mubr.msk.f32.vlgmr.msra.gmra.mrb[12].mxu0 %vm16543_vm2, %v38579_v9  ;;  %23406 = vrot.lane.b32.xlu0 %v38278_v36, %s34813_s16  ;;  %s34821_s16 = smov 118  }
 0x61f   :  { %32175 = vmatpush1.msk.msra.mxu0 %vm16548_vm1, %v21386_v7  ;;  %21251 = vmatprep.mubr.f32.mxu0 %v41347_v57  ;;  %v29412_v7 = vld [vmem:[%s41201_s4] sm:$0xff] }
 0x621   :  { %26411 = vrot.lane.b32.xlu1 %v38278_v36, %s34818_s2  ;;  %v38778_v40 = vpop.permute.xlu1 %21357 }
 0x622   :  { %23410 = vrot.lane.b32.xlu0 %v38335_v55, %s34773_s19  ;;  %32170 = vmatmul.mubr.msk.f32.gmra.mrb[14].mxu0 %vm16543_vm2, %v38614_v59 }
 0x623   :  { %21487 = vmatprep.mubr.f32.mxu0 %v41347_v57 }
 0x625   :  { %25915 = vrot.lane.b32.xlu1 %v38748_v63, %s34812_s27  ;;  %v38804_v42 = vpop.permute.xlu1 %21371 }
 0x626   :  { %23908 = vrot.lane.b32.xlu0 %v38278_v36, %s34814_s30  ;;  %32176 = vmatmul.mubr.msk.f32.vlgmr.msra.gmra.mrb[16].mxu0 %vm16543_vm2, %v38768_v2  ;;  %41452 = vst [vmem:[#allocation65_spill] sm:$0xff] %v38804_v42  ;;  %s34822_s30 = smov 112  }
 0x627   :  { %21493 = vmatprep.mubr.f32.mxu0 %v41347_v57 }
 0x629   :  { %26911 = vrot.lane.b32.xlu1 %v38278_v36, %s34819_s23  ;;  %v19728_v29 = vpop.permute.xlu1 %19727 }
 0x62a   :  { %23912 = vrot.lane.b32.xlu0 %v38335_v55, %s34811_s28  ;;  %32177 = vmatmul.mubr.msk.f32.gmra.mrb[18].mxu0 %vm16543_vm2, %v38778_v40 }
 0x62b   :  { %21641 = vmatprep.mubr.f32.mxu0 %v41347_v57 }
 0x62d   :  { %27405 = vrot.lane.b32.xlu1 %v38523_v53, %s34820_s24 }
 0x62e   :  { %24410 = vrot.lane.b32.xlu0 %v38278_v36, %s34815_s26 }
 0x631   :  { %27409 = vrot.lane.b32.xlu1 %v38278_v36, %s34820_s24 }
 0x632   :  { %24909 = vrot.lane.b32.xlu0 %v38523_v53, %s41446_s0 }
 0x635   :  { %27416 = vrot.lane.b32.xlu1 %v38748_v63, %s34772_s18 }
 0x636   :  { %24913 = vrot.lane.b32.xlu0 %v38534_v27, %s34791_s12 }
 0x639   :  { %27914 = vrot.lane.b32.xlu1 %v38802_v16, %s34775_s21 }
 0x63a   :  { %25411 = vrot.lane.b32.xlu0 %v38278_v36, %s34816_s1  ;;  %v21380_v36 = vpop.permute.xlu1 %21379 }
 0x63d   :  { %28412 = vrot.lane.b32.xlu1 %v38813_v6, %s34821_s16 }
 0x63e   :  { %24415 = vrot.lane.b32.xlu0 %v38748_v63, %s34788_s29  ;;  %v38845_v30 = vpop.permute.xlu1 %21377 }
 0x641   :  { %28416 = vrot.lane.b32.xlu1 %v38748_v63, %s34773_s19 }
 0x642   :  { %24915 = vrot.lane.b32.xlu0 %v38748_v63, %s34791_s12 }
 0x645   :  { %28914 = vrot.lane.b32.xlu1 %v38802_v16, %s34822_s30 }
 0x646   :  { %25913 = vrot.lane.b32.xlu0 %v38534_v27, %s34812_s27  ;;  %v38827_v0 = vpop.permute.xlu0 %19186 }
 0x647   :  { %v38835_v8 = vsel %vm6648_vm12, %v38178_v43, %v38827_v0 }
 0x648   :  { %32962 = vmatprep.subr.msk.mxu1 %vm16548_vm1, %v38835_v8 }
 0x649   :  { %29744 = vperm.xlu1 %34218, %v29412_v7   ;;  %32963 = vmatpush3.msk.msra.mxu1 %vm16548_vm1, %v38835_v8 }
 0x64a   :  { %26409 = vrot.lane.b32.xlu0 %v38523_v53, %s34818_s2  ;;  %v19718_v24 = vpop.permute.xlu0 %19717  ;;  %32965 = vmatmul.mubr.msk.f32.vlgmr.msra.gmra.mrb[20].mxu1 %vm16543_vm2, %v38036_v35 }
 0x64b   :  { %v38849_v43 = vsel %vm7976_vm14, %v38204_v33, %v19718_v24  ;;  %v38853_v22 = vsel %vm7976_vm14, %v19718_v24, %v38282_v23  ;;  %19915 = vmatprep.mubr.f32.mxu1 %v41347_v57  ;;  %v38866_v33 = vsel %vm7976_vm14, %v19728_v29, %v38355_v45  ;;  %v20267_v24 = vpop.permute.xlu1 %20266 }
 0x64c   :  { %32109 = vmatprep.subr.msk.mxu1 %vm16548_vm1, %v38853_v22 }
 0x64d   :  { %32110 = vmatpush1.msk.msra.mxu1 %vm16548_vm1, %v38849_v43 }
 0x64e   :  { %26413 = vrot.lane.b32.xlu0 %v38534_v27, %s34809_s25  ;;  %v21370_v35 = vpop.permute.xlu0 %21369  ;;  %32111 = vmatmul.mubr.msk.f32.vlgmr.msra.gmra.mrb[12].mxu1 %vm16543_vm2, %v38217_v32 }
 0x64f   :  { %32117 = vmatprep.subr.msk.mxu1 %vm16548_vm1, %v38866_v33  ;;  %v38872_v23 = vsel %vm21385_vm7, %v21370_v35, %v38804_v42  ;;  %19921 = vmatprep.mubr.f32.mxu1 %v41347_v57 }
 0x650   :  { %41453 = vst [vmem:[#allocation66_spill] sm:$0xff] %v38872_v23  ;;  %32182 = vmatprep.subr.msk.mxu0 %vm16548_vm1, %v38872_v23 }
 0x651   :  { %v38877_v7 = vpop.f32.mrb[8].mxu1 }
 0x652   :  { %41454 = vst [vmem:[#allocation67_spill] sm:$0xff] %v38877_v7  ;;  %26909 = vrot.lane.b32.xlu0 %v38523_v53, %s34819_s23  ;;  %v38881_v45 = vpop.permute.xlu0 %21367  ;;  %32112 = vmatmul.mubr.msk.f32.gmra.mrb[14].mxu1 %vm16543_vm2, %v38235_v15  ;;  %v38885_v27 = vpop.f32.mrb[9].mxu1 }
 0x653   :  { %41455 = vst [vmem:[#allocation68_spill] sm:$0xff] %v38885_v27  ;;  %v38889_v42 = vsel %vm21385_vm7, %v38881_v45, %v21370_v35  ;;  %20069 = vmatprep.mubr.f32.mxu1 %v41347_v57  ;;  %v38904_v27 = vpop.permute.xlu1 %21907 }
 0x654   :  { %32183 = vmatpush1.msk.msra.mxu0 %vm16548_vm1, %v38889_v42 }
 0x655   :  { %32184 = vmatmul.mubr.msk.f32.vlgmr.msra.gmra.mrb[8].mxu0 %vm16543_vm2, %v38768_v2  ;;  %v38896_v53 = vpop.f32.mrb[10].mxu1 }
 0x656   :  { %41456 = vst [vmem:[#allocation69_spill] sm:$0xff] %v38896_v53  ;;  %26415 = vrot.lane.b32.xlu0 %v38748_v63, %s34809_s25  ;;  %v19726_v7 = vpop.permute.xlu0 %19725  ;;  %v38900_v23 = vpop.f32.mrb[11].mxu1  ;;  %21647 = vmatprep.mubr.f32.mxu0 %v41347_v57 }
 0x657   :  { %41457 = vst [vmem:[#allocation70_spill] sm:$0xff] %v38900_v23  ;;  %v19743_v35 = vsel %vm7976_vm14, %v19726_v7, %v19728_v29  ;;  %v38923_v7 = vsel %vm21385_vm7, %v38845_v30, %v21380_v36 }
 0x658   :  { %32118 = vmatpush1.msk.msra.mxu1 %vm16548_vm1, %v19743_v35  ;;  %v20275_v35 = vpop.permute.xlu1 %20274 }
 0x659   :  { %32119 = vmatmul.mubr.msk.f32.vlgmr.msra.gmra.mrb[16].mxu1 %vm16543_vm2, %v38217_v32  ;;  %32185 = vmatmul.mubr.msk.f32.gmra.mrb[10].mxu0 %vm16543_vm2, %v38778_v40 }
 0x65a   :  { %27407 = vrot.lane.b32.xlu0 %v38813_v6, %s34820_s24  ;;  %v38913_v53 = vpop.permute.xlu0 %21381  ;;  %20075 = vmatprep.mubr.f32.mxu1 %v41347_v57 }
 0x65b   :  { %v38918_v29 = vsel %vm21385_vm7, %v21380_v36, %v38913_v53  ;;  %21795 = vmatprep.mubr.f32.mxu0 %v41347_v57 }
 0x65c   :  { %32190 = vmatprep.subr.msk.mxu0 %vm16548_vm1, %v38918_v29 }
 0x65d   :  { %32120 = vmatmul.mubr.msk.f32.gmra.mrb[18].mxu1 %vm16543_vm2, %v38235_v15  ;;  %32191 = vmatpush1.msk.msra.mxu0 %vm16548_vm1, %v38923_v7 }
 0x65e   :  { %27411 = vrot.lane.b32.xlu0 %v38802_v16, %s34820_s24  ;;  %v38933_v23 = vpop.permute.xlu0 %19735  ;;  %32969 = vmatprep.mubr.msk.f32.mxu1 %vm16543_vm2, %v38217_v32  ;;  %v38959_v32 = vsel %vm9304_vm9, %v20267_v24, %v38446_v44 }
 0x65f   :  { %32192 = vmatmul.mubr.msk.f32.vlgmr.msra.gmra.mrb[12].mxu0 %vm16543_vm2, %v38768_v2  ;;  %32197 = vmatprep.subr.msk.mxu0 %vm16548_vm1, %v37469_v20  ;;  %v38944_v36 = vsel %vm7976_vm14, %v38306_v56, %v38933_v23 }
 0x660   :  { %32198 = vmatpush1.msk.msra.mxu0 %vm16548_vm1, %v37467_v47  ;;  %32967 = vmatprep.subr.msk.mxu1 %vm16548_vm1, %v38944_v36  ;;  %v38963_v47 = vsel %vm9304_vm9, %v38357_v58, %v20267_v24 }
 0x661   :  { %32205 = vmatprep.subr.msk.mxu0 %vm16548_vm1, %v37486_v19  ;;  %32968 = vmatpush3.msk.msra.mxu1 %vm16548_vm1, %v38944_v36  ;;  %v20816_v19 = vpop.permute.xlu1 %20815 }
 0x662   :  { %27912 = vrot.lane.b32.xlu0 %v38813_v6, %s34775_s21  ;;  %21801 = vmatprep.mubr.f32.mxu0 %v41347_v57 }
 0x663   :  { %v38965_v56 = vpop.permute.xlu0 %21905  ;;  %32970 = vmatmul.mubr.msk.f32.vlgmr.msra.gmra.mrb[20].mxu1 %vm16543_vm2, %v38235_v15  ;;  %32132 = vmatprep.subr.msk.mxu1 %vm16548_vm1, %v38959_v32 }
 0x664   :  { %32193 = vmatmul.mubr.msk.f32.gmra.mrb[14].mxu0 %vm16543_vm2, %v38778_v40  ;;  %32133 = vmatpush1.msk.msra.mxu1 %vm16548_vm1, %v38963_v47 }
 0x665   :  { %20464 = vmatprep.mubr.f32.mxu1 %v41347_v57  ;;  %21981 = vmatprep.mubr.f32.mxu0 %v41347_v57  ;;  %v20826_v24 = vpop.permute.xlu1 %20825 }
 0x666   :  { %27916 = vrot.lane.b32.xlu0 %v38748_v63, %s34775_s21 }
 0x667   :  { %v20277_v58 = vpop.permute.xlu0 %20276  ;;  %32134 = vmatmul.mubr.msk.f32.vlgmr.msra.gmra.mrb[12].mxu1 %vm16543_vm2, %v38398_v12 }
 0x668   :  { %v20292_v15 = vsel %vm9304_vm9, %v20275_v35, %v20277_v58  ;;  %32199 = vmatmul.mubr.msk.f32.vlgmr.msra.gmra.mrb[16].mxu0 %vm16543_vm2, %v38965_v56  ;;  %v38986_v44 = vsel %vm9304_vm9, %v20277_v58, %v38492_v31  ;;  %20470 = vmatprep.mubr.f32.mxu1 %v41347_v57 }
 0x669   :  { %32206 = vmatpush1.msk.msra.mxu0 %vm16548_vm1, %v37503_v50  ;;  %32140 = vmatprep.subr.msk.mxu1 %vm16548_vm1, %v38986_v44 }
 0x66a   :  { %32213 = vmatprep.subr.msk.mxu0 %vm16548_vm1, %v37521_v46  ;;  %28414 = vrot.lane.b32.xlu0 %v38802_v16, %s34821_s16  ;;  %v39016_v16 = vpop.permute.xlu1 %22401 }
 0x66b   :  { %32141 = vmatpush1.msk.msra.mxu1 %vm16548_vm1, %v20292_v15  ;;  %21987 = vmatprep.mubr.f32.mxu0 %v41347_v57  ;;  %v39051_v15 = vsel %vm20835_vm0, %v38546_v10, %v20816_v19 }
 0x66c   :  { %v38999_v31 = vpop.permute.xlu0 %20284  ;;  %32135 = vmatmul.mubr.msk.f32.gmra.mrb[14].mxu1 %vm16543_vm2, %v38441_v48  ;;  %32200 = vmatmul.mubr.msk.f32.gmra.mrb[18].mxu0 %vm16543_vm2, %v38904_v27 }
 0x66d   :  { %v39008_v35 = vsel %vm9304_vm9, %v38527_v1, %v38999_v31  ;;  %20618 = vmatprep.mubr.f32.mxu1 %v41347_v57  ;;  %22135 = vmatprep.mubr.f32.mxu0 %v41347_v57  ;;  %v39030_v1 = vsel %vm20835_vm0, %v20816_v19, %v38620_v4 }
 0x66e   :  { %28912 = vrot.lane.b32.xlu0 %v38813_v6, %s34822_s30  ;;  %32972 = vmatprep.subr.msk.mxu1 %vm16548_vm1, %v39008_v35  ;;  %v39046_v4 = vpop.permute.xlu1 %20833 }
 0x670   :  { %v39018_v58 = vpop.permute.xlu0 %22399  ;;  %32142 = vmatmul.mubr.msk.f32.vlgmr.msra.gmra.mrb[16].mxu1 %vm16543_vm2, %v38398_v12  ;;  %32207 = vmatmul.mubr.msk.f32.vlgmr.msra.gmra.mrb[8].mxu0 %vm16543_vm2, %v38965_v56 }
 0x671   :  { %32973 = vmatpush3.msk.msra.mxu1 %vm16548_vm1, %v39008_v35  ;;  %32214 = vmatpush1.msk.msra.mxu0 %vm16548_vm1, %v37515_v38 }
 0x672   :  { %32155 = vmatprep.subr.msk.mxu1 %vm16548_vm1, %v39030_v1  ;;  %32220 = vmatprep.subr.msk.mxu0 %vm16548_vm1, %v37915_v26 }
 0x673   :  { %28916 = vrot.lane.b32.xlu0 %v38748_v63, %s34811_s28  ;;  %20624 = vmatprep.mubr.f32.mxu1 %v41347_v57 }
 0x674   :  { %22141 = vmatprep.mubr.f32.mxu0 %v41347_v57  ;;  %v20824_v6 = vpop.permute.xlu0 %20823  ;;  %32143 = vmatmul.mubr.msk.f32.gmra.mrb[18].mxu1 %vm16543_vm2, %v38441_v48 }
 0x675   :  { %32208 = vmatmul.mubr.msk.f32.gmra.mrb[10].mxu0 %vm16543_vm2, %v38904_v27  ;;  %32974 = vmatprep.mubr.msk.f32.mxu1 %vm16543_vm2, %v38398_v12  ;;  %v39063_v12 = vsel %vm20835_vm0, %v20826_v24, %v38660_v18  ;;  %v20842_v10 = vsel %vm20835_vm0, %v20824_v6, %v20826_v24 }
 0x676   :  { %22289 = vmatprep.mubr.f32.mxu0 %v41347_v57 }
 0x678   :  { %v39053_v63 = vpop.permute.xlu0 %22404  ;;  %32975 = vmatmul.mubr.msk.f32.vlgmr.msra.gmra.mrb[20].mxu1 %vm16543_vm2, %v38441_v48  ;;  %v21366_v48 = vpop.permute.xlu1 %21365 }
 0x679   :  { %32156 = vmatpush1.msk.msra.mxu1 %vm16548_vm1, %v39051_v15  ;;  %32215 = vmatmul.mubr.msk.f32.vlgmr.msra.gmra.mrb[12].mxu0 %vm16543_vm2, %v38965_v56  ;;  %v39068_v19 = vsel %vm1342_vm4, %v37676_v21, %v39053_v63  ;;  %v39118_v6 = vsel %vm21385_vm7, %v21366_v48, %v38881_v45  ;;  %v41459_v45 = vld [vmem:[#allocation31_spill] sm:$0xff] }
 0x67a   :  { %32221 = vmatpush1.msk.msra.mxu0 %vm16548_vm1, %v37852_v51  ;;  %32163 = vmatprep.subr.msk.mxu1 %vm16548_vm1, %v39063_v12  ;;  %v39089_v51 = vsel %vm20835_vm0, %v38671_v28, %v39046_v4 }
 0x67b   :  { %32228 = vmatprep.subr.msk.mxu0 %vm16548_vm1, %v39068_v19  ;;  %21014 = vmatprep.mubr.f32.mxu1 %v41347_v57 }
 0x67c   :  { %22295 = vmatprep.mubr.f32.mxu0 %v41347_v57  ;;  %32157 = vmatmul.mubr.msk.f32.vlgmr.msra.gmra.mrb[12].mxu1 %vm16543_vm2, %v38579_v9  ;;  %v39081_v21 = vpop.permute.xlu0 %22406  ;;  %v21374_v18 = vpop.permute.xlu1 %21373 }
 0x67d   :  { %32164 = vmatpush1.msk.msra.mxu1 %vm16548_vm1, %v20842_v10  ;;  %32216 = vmatmul.mubr.msk.f32.gmra.mrb[14].mxu0 %vm16543_vm2, %v38904_v27  ;;  %v39105_v28 = vsel %vm1342_vm4, %v37712_v61, %v39081_v21 }
 0x67e   :  { %32977 = vmatprep.subr.msk.mxu1 %vm16548_vm1, %v39089_v51  ;;  %21020 = vmatprep.mubr.f32.mxu1 %v41347_v57  ;;  %41458 = vst [vmem:[#allocation71_spill] sm:$0xff] %v39105_v28 }
 0x67f   :  { %22484 = vmatprep.mubr.f32.mxu0 %v41347_v57 }
 0x680   :  { %32158 = vmatmul.mubr.msk.f32.gmra.mrb[14].mxu1 %vm16543_vm2, %v38614_v59  ;;  %v21376_v24 = vpop.permute.xlu0 %21375  ;;  %v39124_v61 = vpop.permute.xlu1 %22904 }
 0x681   :  { %32222 = vmatmul.mubr.msk.f32.vlgmr.msra.gmra.mrb[16].mxu0 %vm16543_vm2, %v39018_v58  ;;  %21168 = vmatprep.mubr.f32.mxu1 %v41347_v57 }
 0x682   :  { %32229 = vmatpush1.msk.msra.mxu0 %vm16548_vm1, %v37688_v17  ;;  %22490 = vmatprep.mubr.f32.mxu0 %v41347_v57 }
 0x683   :  { %32236 = vmatprep.subr.msk.mxu0 %vm16548_vm1, %v39105_v28  ;;  %v39141_v28 = vsel %vm21385_vm7, %v38717_v13, %v21366_v48  ;;  %v41461_v48 = vld [vmem:[#allocation14_spill] sm:$0xff] }
 0x684   :  { %32165 = vmatmul.mubr.msk.f32.vlgmr.msra.gmra.mrb[16].mxu1 %vm16543_vm2, %v38579_v9  ;;  %v39128_v10 = vpop.permute.xlu0 %22902 }
 0x685   :  { %32978 = vmatpush3.msk.msra.mxu1 %vm16548_vm1, %v39089_v51  ;;  %32223 = vmatmul.mubr.msk.f32.gmra.mrb[18].mxu0 %vm16543_vm2, %v39016_v16 }
 0x686   :  { %32178 = vmatprep.subr.msk.mxu1 %vm16548_vm1, %v39118_v6  ;;  %21174 = vmatprep.mubr.f32.mxu1 %v41347_v57 }
 0x687   :  { %22638 = vmatprep.mubr.f32.mxu0 %v41347_v57 }
 0x688   :  { %32166 = vmatmul.mubr.msk.f32.gmra.mrb[18].mxu1 %vm16543_vm2, %v38614_v59  ;;  %v39158_v13 = vpop.permute.xlu0 %22906 }
 0x689   :  { %32230 = vmatmul.mubr.msk.f32.vlgmr.msra.gmra.mrb[8].mxu0 %vm16543_vm2, %v39018_v58  ;;  %32979 = vmatprep.mubr.msk.f32.mxu1 %vm16543_vm2, %v38579_v9  ;;  %v39151_v9 = vsel %vm21385_vm7, %v21376_v24, %v38845_v30  ;;  %41460 = vst [vmem:[#allocation31_spill] sm:$0xff] %v39158_v13 }
 0x68a   :  { %32237 = vmatpush1.msk.msra.mxu0 %vm16548_vm1, %v37717_v25  ;;  %22644 = vmatprep.mubr.f32.mxu0 %v41347_v57  ;;  %v39153_v25 = vpop.permute.xlu1 %21383 }
 0x68b   :  { %32243 = vmatprep.subr.msk.mxu0 %vm16548_vm1, %v41459_v45  ;;  %v39170_v30 = vsel %vm21385_vm7, %v38913_v53, %v39153_v25 }
 0x68c   :  { %32980 = vmatmul.mubr.msk.f32.vlgmr.msra.gmra.mrb[20].mxu1 %vm16543_vm2, %v38614_v59  ;;  %v21392_v59 = vsel %vm21385_vm7, %v21374_v18, %v21376_v24  ;;  %v41462_v18 = vld [vmem:[#allocation9_spill] sm:$0xff]  ;;  %v39191_v53 = vpop.permute.xlu0 %22908 }
 0x68d   :  { %32179 = vmatpush1.msk.msra.mxu1 %vm16548_vm1, %v39141_v28  ;;  %32231 = vmatmul.mubr.msk.f32.gmra.mrb[10].mxu0 %vm16543_vm2, %v39016_v16  ;;  %v39179_v24 = vsel %vm2664_vm6, %v41462_v18, %v39158_v13  ;;  %v41466_v18 = vld [vmem:[#allocation16_spill] sm:$0xff] }
 0x68e   :  { %32186 = vmatprep.subr.msk.mxu1 %vm16548_vm1, %v39151_v9  ;;  %21564 = vmatprep.mubr.f32.mxu1 %v41347_v57  ;;  %41463 = vst [vmem:[#allocation14_spill] sm:$0xff] %v39179_v24 }
 0x68f   :  { %22792 = vmatprep.mubr.f32.mxu0 %v41347_v57 }
 0x690   :  { %32180 = vmatmul.mubr.msk.f32.vlgmr.msra.gmra.mrb[12].mxu1 %vm16543_vm2, %v38768_v2 }
 0x691   :  { %32187 = vmatpush1.msk.msra.mxu1 %vm16548_vm1, %v21392_v59  ;;  %32238 = vmatmul.mubr.msk.f32.vlgmr.msra.gmra.mrb[12].mxu0 %vm16543_vm2, %v39018_v58  ;;  %v41464_v59 = vld [vmem:[#allocation11_spill] sm:$0xff] }
 0x692   :  { %32244 = vmatpush1.msk.msra.mxu0 %vm16548_vm1, %v41461_v48  ;;  %32982 = vmatprep.subr.msk.mxu1 %vm16548_vm1, %v39170_v30  ;;  %v39206_v48 = vsel %vm2664_vm6, %v37883_v52, %v39191_v53  ;;  %v39221_v52 = vpop.permute.xlu1 %23404 }
 0x693   :  { %32251 = vmatprep.subr.msk.mxu0 %vm16548_vm1, %v39179_v24  ;;  %21570 = vmatprep.mubr.f32.mxu1 %v41347_v57  ;;  %41465 = vst [vmem:[#allocation9_spill] sm:$0xff] %v39206_v48  ;;  %v41482_v24 = vld [vmem:[#allocation21_spill] sm:$0xff] }
 0x694   :  { %22798 = vmatprep.mubr.f32.mxu0 %v41347_v57  ;;  %32181 = vmatmul.mubr.msk.f32.gmra.mrb[14].mxu1 %vm16543_vm2, %v38778_v40 }
 0x695   :  { %32239 = vmatmul.mubr.msk.f32.gmra.mrb[14].mxu0 %vm16543_vm2, %v39016_v16  ;;  %21718 = vmatprep.mubr.f32.mxu1 %v41347_v57 }
 0x696   :  { %22986 = vmatprep.mubr.f32.mxu0 %v41347_v57 }
 0x698   :  { %32188 = vmatmul.mubr.msk.f32.vlgmr.msra.gmra.mrb[16].mxu1 %vm16543_vm2, %v38768_v2 }
 0x699   :  { %32983 = vmatpush3.msk.msra.mxu1 %vm16548_vm1, %v39170_v30  ;;  %32245 = vmatmul.mubr.msk.f32.vlgmr.msra.gmra.mrb[16].mxu0 %vm16543_vm2, %v39128_v10 }
 0x69a   :  { %32252 = vmatpush1.msk.msra.mxu0 %vm16548_vm1, %v41464_v59  ;;  %32201 = vmatprep.subr.msk.mxu1 %vm16548_vm1, %v37512_v37  ;;  %v41475_v59 = vld [vmem:[#allocation17_spill] sm:$0xff] }
 0x69b   :  { %32259 = vmatprep.subr.msk.mxu0 %vm16548_vm1, %v39206_v48  ;;  %21724 = vmatprep.mubr.f32.mxu1 %v41347_v57  ;;  %v41467_v48 = vld [vmem:[#allocation6_spill] sm:$0xff] }
 0x69c   :  { %22992 = vmatprep.mubr.f32.mxu0 %v41347_v57  ;;  %32189 = vmatmul.mubr.msk.f32.gmra.mrb[18].mxu1 %vm16543_vm2, %v38778_v40 }
 0x69d   :  { %32246 = vmatmul.mubr.msk.f32.gmra.mrb[18].mxu0 %vm16543_vm2, %v39124_v61  ;;  %32984 = vmatprep.mubr.msk.f32.mxu1 %vm16543_vm2, %v38768_v2  ;;  %v39244_v2 = vpop.permute.xlu1 %23408 }
 0x69e   :  { %23140 = vmatprep.mubr.f32.mxu0 %v41347_v57  ;;  %41468 = vst [vmem:[#allocation6_spill] sm:$0xff] %v39244_v2 }
 0x6a0   :  { %32985 = vmatmul.mubr.msk.f32.vlgmr.msra.gmra.mrb[20].mxu1 %vm16543_vm2, %v38778_v40  ;;  %v39249_v40 = vpop.permute.xlu0 %23406 }
 0x6a1   :  { %32202 = vmatpush1.msk.msra.mxu1 %vm16548_vm1, %v37600_v49  ;;  %32253 = vmatmul.mubr.msk.f32.vlgmr.msra.gmra.mrb[8].mxu0 %vm16543_vm2, %v39128_v10 }
 0x6a2   :  { %32260 = vmatpush1.msk.msra.mxu0 %vm16548_vm1, %v41466_v18  ;;  %32209 = vmatprep.subr.msk.mxu1 %vm16548_vm1, %v41467_v48 }
 0x6a3   :  { %32266 = vmatprep.subr.msk.mxu0 %vm16548_vm1, %v38341_v54  ;;  %22058 = vmatprep.mubr.f32.mxu1 %v41347_v57  ;;  %v41470_v54 = vld [vmem:[#allocation12_spill] sm:$0xff] }
 0x6a4   :  { %23146 = vmatprep.mubr.f32.mxu0 %v41347_v57  ;;  %32203 = vmatmul.mubr.msk.f32.vlgmr.msra.gmra.mrb[12].mxu1 %vm16543_vm2, %v38965_v56  ;;  %v39259_v18 = vsel %vm18091_vm5, %v41470_v54, %v39244_v2  ;;  %v39273_v54 = vpop.permute.xlu0 %23410 }
 0x6a5   :  { %32210 = vmatpush1.msk.msra.mxu1 %vm16548_vm1, %v37622_v41  ;;  %32254 = vmatmul.mubr.msk.f32.gmra.mrb[10].mxu0 %vm16543_vm2, %v39124_v61  ;;  %v41469_v41 = vld [vmem:[#allocation15_spill] sm:$0xff]  ;;  %v39287_v2 = vsel %vm18091_vm5, %v38038_v39, %v39273_v54  ;;  %v39304_v39 = vpop.permute.xlu1 %23906 }
 0x6a6   :  { %32987 = vmatprep.subr.msk.mxu1 %vm16548_vm1, %v38335_v55  ;;  %22064 = vmatprep.mubr.f32.mxu1 %v41347_v57  ;;  %41471 = vst [vmem:[#allocation15_spill] sm:$0xff] %v39259_v18  ;;  %41474 = vst [vmem:[#allocation12_spill] sm:$0xff] %v39287_v2 }
 0x6a7   :  { %23294 = vmatprep.mubr.f32.mxu0 %v41347_v57 }
 0x6a8   :  { %32204 = vmatmul.mubr.msk.f32.gmra.mrb[14].mxu1 %vm16543_vm2, %v38904_v27 }
 0x6a9   :  { %32261 = vmatmul.mubr.msk.f32.vlgmr.msra.gmra.mrb[12].mxu0 %vm16543_vm2, %v39128_v10  ;;  %22212 = vmatprep.mubr.f32.mxu1 %v41347_v57 }
 0x6aa   :  { %32267 = vmatpush1.msk.msra.mxu0 %vm16548_vm1, %v41469_v41  ;;  %23300 = vmatprep.mubr.f32.mxu0 %v41347_v57  ;;  %v41472_v41 = vld [vmem:[#allocation5_spill] sm:$0xff] }
 0x6ab   :  { %32274 = vmatprep.subr.msk.mxu0 %vm16548_vm1, %v39259_v18  ;;  %v41473_v18 = vld [vmem:[#allocation20_spill] sm:$0xff] }
 0x6ac   :  { %32211 = vmatmul.mubr.msk.f32.vlgmr.msra.gmra.mrb[16].mxu1 %vm16543_vm2, %v38965_v56 }
 0x6ad   :  { %32988 = vmatpush3.msk.msra.mxu1 %vm16548_vm1, %v38335_v55  ;;  %32262 = vmatmul.mubr.msk.f32.gmra.mrb[14].mxu0 %vm16543_vm2, %v39124_v61 }
 0x6ae   :  { %32224 = vmatprep.subr.msk.mxu1 %vm16548_vm1, %v41472_v41  ;;  %22218 = vmatprep.mubr.f32.mxu1 %v41347_v57 }
 0x6af   :  { %23488 = vmatprep.mubr.f32.mxu0 %v41347_v57 }
 0x6b0   :  { %32212 = vmatmul.mubr.msk.f32.gmra.mrb[18].mxu1 %vm16543_vm2, %v38904_v27 }
 0x6b1   :  { %32268 = vmatmul.mubr.msk.f32.vlgmr.msra.gmra.mrb[16].mxu0 %vm16543_vm2, %v39221_v52  ;;  %32989 = vmatprep.mubr.msk.f32.mxu1 %vm16543_vm2, %v38965_v56  ;;  %v41476_v56 = vld [vmem:[#allocation10_spill] sm:$0xff] }
 0x6b2   :  { %32275 = vmatpush1.msk.msra.mxu0 %vm16548_vm1, %v41473_v18  ;;  %23494 = vmatprep.mubr.f32.mxu0 %v41347_v57  ;;  %v41481_v18 = vld [vmem:[#allocation13_spill] sm:$0xff] }
 0x6b3   :  { %32282 = vmatprep.subr.msk.mxu0 %vm16548_vm1, %v39287_v2  ;;  %v41477_v2 = vld [vmem:[#allocation22_spill] sm:$0xff] }
 0x6b4   :  { %32990 = vmatmul.mubr.msk.f32.vlgmr.msra.gmra.mrb[20].mxu1 %vm16543_vm2, %v38904_v27  ;;  %v41478_v27 = vld [vmem:[#allocation24_spill] sm:$0xff] }
 0x6b5   :  { %32225 = vmatpush1.msk.msra.mxu1 %vm16548_vm1, %v41475_v59  ;;  %32269 = vmatmul.mubr.msk.f32.gmra.mrb[18].mxu0 %vm16543_vm2, %v39249_v40 }
 0x6b6   :  { %32232 = vmatprep.subr.msk.mxu1 %vm16548_vm1, %v41476_v56  ;;  %22561 = vmatprep.mubr.f32.mxu1 %v41347_v57 }
 0x6b7   :  { %23642 = vmatprep.mubr.f32.mxu0 %v41347_v57 }
 0x6b8   :  { %32226 = vmatmul.mubr.msk.f32.vlgmr.msra.gmra.mrb[12].mxu1 %vm16543_vm2, %v39018_v58 }
 0x6b9   :  { %32233 = vmatpush1.msk.msra.mxu1 %vm16548_vm1, %v41477_v2  ;;  %32276 = vmatmul.mubr.msk.f32.vlgmr.msra.gmra.mrb[8].mxu0 %vm16543_vm2, %v39221_v52  ;;  %v39324_v2 = vpop.permute.xlu1 %23910 }
 0x6ba   :  { %32283 = vmatpush1.msk.msra.mxu0 %vm16548_vm1, %v41478_v27  ;;  %32992 = vmatprep.subr.msk.mxu1 %vm16548_vm1, %v39081_v21  ;;  %41479 = vst [vmem:[#allocation5_spill] sm:$0xff] %v39324_v2  ;;  %v41480_v27 = vld [vmem:[#allocation27_spill] sm:$0xff]  ;;  %v39341_v13 = vsel %vm18638_vm11, %v41482_v24, %v39324_v2  ;;  %v41486_v2 = vld [vmem:[#allocation18_spill] sm:$0xff] }
 0x6bb   :  { %32289 = vmatprep.subr.msk.mxu0 %vm16548_vm1, %v38507_v60  ;;  %22567 = vmatprep.mubr.f32.mxu1 %v41347_v57  ;;  %v39328_v60 = vpop.permute.xlu0 %23908  ;;  %41483 = vst [vmem:[#allocation17_spill] sm:$0xff] %v39341_v13 }
 0x6bc   :  { %23648 = vmatprep.mubr.f32.mxu0 %v41347_v57  ;;  %32227 = vmatmul.mubr.msk.f32.gmra.mrb[14].mxu1 %vm16543_vm2, %v39016_v16 }
 0x6bd   :  { %32277 = vmatmul.mubr.msk.f32.gmra.mrb[10].mxu0 %vm16543_vm2, %v39249_v40  ;;  %22715 = vmatprep.mubr.f32.mxu1 %v41347_v57 }
 0x6be   :  { %23796 = vmatprep.mubr.f32.mxu0 %v41347_v57 }
 0x6bf   :  { %v39354_v24 = vpop.permute.xlu0 %23912 }
 0x6c0   :  { %32234 = vmatmul.mubr.msk.f32.vlgmr.msra.gmra.mrb[16].mxu1 %vm16543_vm2, %v39018_v58 }
 0x6c1   :  { %32993 = vmatpush3.msk.msra.mxu1 %vm16548_vm1, %v39081_v21  ;;  %32284 = vmatmul.mubr.msk.f32.vlgmr.msra.gmra.mrb[12].mxu0 %vm16543_vm2, %v39221_v52 }
 0x6c2   :  { %32290 = vmatpush1.msk.msra.mxu0 %vm16548_vm1, %v41480_v27  ;;  %32247 = vmatprep.subr.msk.mxu1 %vm16548_vm1, %v41481_v18  ;;  %v41484_v27 = vld [vmem:[#allocation32_spill] sm:$0xff] }
 0x6c3   :  { %32297 = vmatprep.subr.msk.mxu0 %vm16548_vm1, %v39341_v13  ;;  %22721 = vmatprep.mubr.f32.mxu1 %v41347_v57  ;;  %v41485_v13 = vld [vmem:[#allocation28_spill] sm:$0xff] }
 0x6c4   :  { %23802 = vmatprep.mubr.f32.mxu0 %v41347_v57  ;;  %32235 = vmatmul.mubr.msk.f32.gmra.mrb[18].mxu1 %vm16543_vm2, %v39016_v16 }
 0x6c5   :  { %32285 = vmatmul.mubr.msk.f32.gmra.mrb[14].mxu0 %vm16543_vm2, %v39249_v40  ;;  %32994 = vmatprep.mubr.msk.f32.mxu1 %vm16543_vm2, %v39018_v58  ;;  %v39369_v58 = vsel %vm18638_vm11, %v38128_v62, %v39354_v24  ;;  %v39387_v62 = vpop.permute.xlu1 %24408 }
 0x6c6   :  { %23990 = vmatprep.mubr.f32.mxu0 %v41347_v57  ;;  %41487 = vst [vmem:[#allocation10_spill] sm:$0xff] %v39369_v58 }
 0x6c8   :  { %32995 = vmatmul.mubr.msk.f32.vlgmr.msra.gmra.mrb[20].mxu1 %vm16543_vm2, %v39016_v16  ;;  %v41488_v16 = vld [vmem:[#allocation36_spill] sm:$0xff] }
 0x6c9   :  { %32248 = vmatpush1.msk.msra.mxu1 %vm16548_vm1, %v41484_v27  ;;  %32291 = vmatmul.mubr.msk.f32.vlgmr.msra.gmra.mrb[16].mxu0 %vm16543_vm2, %v39304_v39 }
 0x6ca   :  { %32298 = vmatpush1.msk.msra.mxu0 %vm16548_vm1, %v41485_v13  ;;  %32255 = vmatprep.subr.msk.mxu1 %vm16548_vm1, %v41486_v2  ;;  %v41492_v2 = vld [vmem:[#allocation34_spill] sm:$0xff] }
 0x6cb   :  { %32305 = vmatprep.subr.msk.mxu0 %vm16548_vm1, %v39369_v58  ;;  %23063 = vmatprep.mubr.f32.mxu1 %v41347_v57  ;;  %v41490_v58 = vld [vmem:[#allocation23_spill] sm:$0xff] }
 0x6cc   :  { %23996 = vmatprep.mubr.f32.mxu0 %v41347_v57  ;;  %32249 = vmatmul.mubr.msk.f32.vlgmr.msra.gmra.mrb[12].mxu1 %vm16543_vm2, %v39128_v10 }
 0x6cd   :  { %32256 = vmatpush1.msk.msra.mxu1 %vm16548_vm1, %v41488_v16  ;;  %32292 = vmatmul.mubr.msk.f32.gmra.mrb[18].mxu0 %vm16543_vm2, %v39328_v60  ;;  %v41489_v16 = vld [vmem:[#allocation29_spill] sm:$0xff] }
 0x6ce   :  { %32997 = vmatprep.subr.msk.mxu1 %vm16548_vm1, %v39191_v53  ;;  %23069 = vmatprep.mubr.f32.mxu1 %v41347_v57 }
 0x6cf   :  { %24144 = vmatprep.mubr.f32.mxu0 %v41347_v57 }
 0x6d0   :  { %32250 = vmatmul.mubr.msk.f32.gmra.mrb[14].mxu1 %vm16543_vm2, %v39124_v61 }
 0x6d1   :  { %32299 = vmatmul.mubr.msk.f32.vlgmr.msra.gmra.mrb[8].mxu0 %vm16543_vm2, %v39304_v39  ;;  %23217 = vmatprep.mubr.f32.mxu1 %v41347_v57 }
 0x6d2   :  { %32306 = vmatpush1.msk.msra.mxu0 %vm16548_vm1, %v41489_v16  ;;  %24150 = vmatprep.mubr.f32.mxu0 %v41347_v57  ;;  %v24414_v16 = vpop.permute.xlu1 %24413 }
 0x6d3   :  { %32312 = vmatprep.subr.msk.mxu0 %vm16548_vm1, %v38652_v14  ;;  %v41491_v14 = vld [vmem:[#allocation25_spill] sm:$0xff] }
 0x6d4   :  { %32257 = vmatmul.mubr.msk.f32.vlgmr.msra.gmra.mrb[16].mxu1 %vm16543_vm2, %v39128_v10  ;;  %v24417_v13 = vsel %vm6648_vm12, %v41491_v14, %v24414_v16  ;;  %v41498_v14 = vld [vmem:[#allocation30_spill] sm:$0xff] }
 0x6d5   :  { %32998 = vmatpush3.msk.msra.mxu1 %vm16548_vm1, %v39191_v53  ;;  %32300 = vmatmul.mubr.msk.f32.gmra.mrb[10].mxu0 %vm16543_vm2, %v39328_v60 }
 0x6d6   :  { %32270 = vmatprep.subr.msk.mxu1 %vm16548_vm1, %v41490_v58  ;;  %23223 = vmatprep.mubr.f32.mxu1 %v41347_v57  ;;  %v41493_v58 = vld [vmem:[#allocation44_spill] sm:$0xff] }
 0x6d7   :  { %24298 = vmatprep.mubr.f32.mxu0 %v41347_v57 }
 0x6d8   :  { %32258 = vmatmul.mubr.msk.f32.gmra.mrb[18].mxu1 %vm16543_vm2, %v39124_v61 }
 0x6d9   :  { %32307 = vmatmul.mubr.msk.f32.vlgmr.msra.gmra.mrb[12].mxu0 %vm16543_vm2, %v39304_v39  ;;  %32999 = vmatprep.mubr.msk.f32.mxu1 %vm16543_vm2, %v39128_v10  ;;  %v41494_v10 = vld [vmem:[#allocation26_spill] sm:$0xff] }
 0x6da   :  { %32313 = vmatpush1.msk.msra.mxu0 %vm16548_vm1, %v41492_v2  ;;  %24304 = vmatprep.mubr.f32.mxu0 %v41347_v57  ;;  %v39439_v2 = vpop.permute.xlu0 %24410 }
 0x6db   :  { %32320 = vmatprep.subr.msk.mxu0 %vm16548_vm1, %v24417_v13  ;;  %v41495_v13 = vld [vmem:[#allocation46_spill] sm:$0xff] }
 0x6dc   :  { %33000 = vmatmul.mubr.msk.f32.vlgmr.msra.gmra.mrb[20].mxu1 %vm16543_vm2, %v39124_v61  ;;  %v41496_v61 = vld [vmem:[#allocation35_spill] sm:$0xff] }
 0x6dd   :  { %32271 = vmatpush1.msk.msra.mxu1 %vm16548_vm1, %v41493_v58  ;;  %32308 = vmatmul.mubr.msk.f32.gmra.mrb[14].mxu0 %vm16543_vm2, %v39328_v60 }
 0x6de   :  { %32278 = vmatprep.subr.msk.mxu1 %vm16548_vm1, %v41494_v10  ;;  %23565 = vmatprep.mubr.f32.mxu1 %v41347_v57  ;;  %v39453_v16 = vpop.permute.xlu0 %24909 }
 0x6df   :  { %24491 = vmatprep.mubr.f32.mxu0 %v41347_v57 }
 0x6e0   :  { %32272 = vmatmul.mubr.msk.f32.vlgmr.msra.gmra.mrb[12].mxu1 %vm16543_vm2, %v39221_v52 }
 0x6e1   :  { %32279 = vmatpush1.msk.msra.mxu1 %vm16548_vm1, %v41495_v13  ;;  %32314 = vmatmul.mubr.msk.f32.vlgmr.msra.gmra.mrb[16].mxu0 %vm16543_vm2, %v39387_v62 }
 0x6e2   :  { %32321 = vmatpush1.msk.msra.mxu0 %vm16548_vm1, %v41496_v61  ;;  %33002 = vmatprep.subr.msk.mxu1 %vm16548_vm1, %v39273_v54  ;;  %v24914_v13 = vpop.permute.xlu0 %24913 }
 0x6e3   :  { %32328 = vmatprep.subr.msk.mxu0 %vm16548_vm1, %v38835_v8  ;;  %23571 = vmatprep.mubr.f32.mxu1 %v41347_v57  ;;  %v41497_v8 = vld [vmem:[#allocation40_spill] sm:$0xff] }
 0x6e4   :  { %24497 = vmatprep.mubr.f32.mxu0 %v41347_v57  ;;  %32273 = vmatmul.mubr.msk.f32.gmra.mrb[14].mxu1 %vm16543_vm2, %v39249_v40 }
 0x6e5   :  { %32315 = vmatmul.mubr.msk.f32.gmra.mrb[18].mxu0 %vm16543_vm2, %v39439_v2  ;;  %23719 = vmatprep.mubr.f32.mxu1 %v41347_v57 }
 0x6e6   :  { %24645 = vmatprep.mubr.f32.mxu0 %v41347_v57 }
 0x6e8   :  { %32280 = vmatmul.mubr.msk.f32.vlgmr.msra.gmra.mrb[16].mxu1 %vm16543_vm2, %v39221_v52 }
 0x6e9   :  { %33003 = vmatpush3.msk.msra.mxu1 %vm16548_vm1, %v39273_v54  ;;  %32322 = vmatmul.mubr.msk.f32.vlgmr.msra.gmra.mrb[8].mxu0 %vm16543_vm2, %v39387_v62 }
 0x6ea   :  { %32329 = vmatpush1.msk.msra.mxu0 %vm16548_vm1, %v41497_v8  ;;  %32293 = vmatprep.subr.msk.mxu1 %vm16548_vm1, %v41498_v14  ;;  %v41500_v8 = vld [vmem:[#allocation42_spill] sm:$0xff]  ;;  %v41501_v14 = vld [vmem:[#allocation33_spill] sm:$0xff] }
 0x6eb   :  { %32335 = vmatprep.subr.msk.mxu0 %vm16548_vm1, %v38849_v43  ;;  %23725 = vmatprep.mubr.f32.mxu1 %v41347_v57  ;;  %v41499_v43 = vld [vmem:[#allocation37_spill] sm:$0xff] }
 0x6ec   :  { %24651 = vmatprep.mubr.f32.mxu0 %v41347_v57  ;;  %32281 = vmatmul.mubr.msk.f32.gmra.mrb[18].mxu1 %vm16543_vm2, %v39249_v40  ;;  %v24917_v61 = vsel %vm7976_vm14, %v41499_v43, %v24914_v13  ;;  %v39521_v13 = vpop.permute.xlu0 %25411  ;;  %v41504_v43 = vld [vmem:[#allocation48_spill] sm:$0xff] }
 0x6ed   :  { %32323 = vmatmul.mubr.msk.f32.gmra.mrb[10].mxu0 %vm16543_vm2, %v39439_v2  ;;  %33004 = vmatprep.mubr.msk.f32.mxu1 %vm16543_vm2, %v39221_v52  ;;  %v41502_v52 = vld [vmem:[#allocation45_spill] sm:$0xff] }
 0x6ee   :  { %24799 = vmatprep.mubr.f32.mxu0 %v41347_v57 }
 0x6f0   :  { %33005 = vmatmul.mubr.msk.f32.vlgmr.msra.gmra.mrb[20].mxu1 %vm16543_vm2, %v39249_v40  ;;  %v41503_v40 = vld [vmem:[#allocation39_spill] sm:$0xff] }
 0x6f1   :  { %32294 = vmatpush1.msk.msra.mxu1 %vm16548_vm1, %v38498_v34  ;;  %32330 = vmatmul.mubr.msk.f32.vlgmr.msra.gmra.mrb[12].mxu0 %vm16543_vm2, %v39387_v62 }
 0x6f2   :  { %32336 = vmatpush1.msk.msra.mxu0 %vm16548_vm1, %v41500_v8  ;;  %32301 = vmatprep.subr.msk.mxu1 %vm16548_vm1, %v41501_v14  ;;  %v41505_v8 = vld [vmem:[#allocation41_spill] sm:$0xff] }
 0x6f3   :  { %32343 = vmatprep.subr.msk.mxu0 %vm16548_vm1, %v24917_v61  ;;  %24067 = vmatprep.mubr.f32.mxu1 %v41347_v57  ;;  %v24416_v61 = vpop.permute.xlu0 %24415 }
 0x6f4   :  { %24805 = vmatprep.mubr.f32.mxu0 %v41347_v57  ;;  %32295 = vmatmul.mubr.msk.f32.vlgmr.msra.gmra.mrb[12].mxu1 %vm16543_vm2, %v39304_v39 }
 0x6f5   :  { %32302 = vmatpush1.msk.msra.mxu1 %vm16548_vm1, %v38559_v11  ;;  %32331 = vmatmul.mubr.msk.f32.gmra.mrb[14].mxu0 %vm16543_vm2, %v39439_v2  ;;  %v39507_v11 = vpop.permute.xlu1 %24911 }
 0x6f6   :  { %33007 = vmatprep.subr.msk.mxu1 %vm16548_vm1, %v39354_v24  ;;  %24073 = vmatprep.mubr.f32.mxu1 %v41347_v57 }
 0x6f7   :  { %24991 = vmatprep.mubr.f32.mxu0 %v41347_v57 }
 0x6f8   :  { %32296 = vmatmul.mubr.msk.f32.gmra.mrb[14].mxu1 %vm16543_vm2, %v39328_v60 }
 0x6f9   :  { %32337 = vmatmul.mubr.msk.f32.vlgmr.msra.gmra.mrb[16].mxu0 %vm16543_vm2, %v39453_v16  ;;  %24221 = vmatprep.mubr.f32.mxu1 %v41347_v57 }
 0x6fa   :  { %32344 = vmatpush1.msk.msra.mxu0 %vm16548_vm1, %v41502_v52  ;;  %24997 = vmatprep.mubr.f32.mxu0 %v41347_v57  ;;  %v41507_v52 = vld [vmem:[#allocation2_spill] sm:$0xff] }
 0x6fb   :  { %32351 = vmatprep.subr.msk.mxu0 %vm16548_vm1, %v38944_v36  ;;  %v39525_v36 = vpop.permute.xlu1 %25409 }
 0x6fc   :  { %32303 = vmatmul.mubr.msk.f32.vlgmr.msra.gmra.mrb[16].mxu1 %vm16543_vm2, %v39304_v39 }
 0x6fd   :  { %33008 = vmatpush3.msk.msra.mxu1 %vm16548_vm1, %v39354_v24  ;;  %32338 = vmatmul.mubr.msk.f32.gmra.mrb[18].mxu0 %vm16543_vm2, %v39507_v11 }
 0x6fe   :  { %32316 = vmatprep.subr.msk.mxu1 %vm16548_vm1, %v41503_v40  ;;  %24227 = vmatprep.mubr.f32.mxu1 %v41347_v57  ;;  %v24916_v40 = vpop.permute.xlu0 %24915 }
 0x6ff   :  { %25145 = vmatprep.mubr.f32.mxu0 %v41347_v57 }
 0x700   :  { %32304 = vmatmul.mubr.msk.f32.gmra.mrb[18].mxu1 %vm16543_vm2, %v39328_v60 }
 0x701   :  { %32345 = vmatmul.mubr.msk.f32.vlgmr.msra.gmra.mrb[8].mxu0 %vm16543_vm2, %v39453_v16  ;;  %33009 = vmatprep.mubr.msk.f32.mxu1 %vm16543_vm2, %v39304_v39  ;;  %v25414_v39 = vpop.permute.xlu1 %25413 }
 0x702   :  { %32352 = vmatpush1.msk.msra.mxu0 %vm16548_vm1, %v41504_v43  ;;  %25151 = vmatprep.mubr.f32.mxu0 %v41347_v57  ;;  %v41511_v43 = vld [vmem:[#allocation3_spill] sm:$0xff] }
 0x703   :  { %32358 = vmatprep.subr.msk.mxu0 %vm16548_vm1, %v38963_v47 }
 0x704   :  { %33010 = vmatmul.mubr.msk.f32.vlgmr.msra.gmra.mrb[20].mxu1 %vm16543_vm2, %v39328_v60  ;;  %v24418_v60 = vsel %vm6648_vm12, %v38827_v0, %v24416_v61  ;;  %v41509_v0 = vld [vmem:[#allocation47_spill] sm:$0xff]  ;;  %v41514_v61 = vld [vmem:[#allocation54_spill] sm:$0xff] }
 0x705   :  { %32317 = vmatpush1.msk.msra.mxu1 %vm16548_vm1, %v38656_v3  ;;  %32346 = vmatmul.mubr.msk.f32.gmra.mrb[10].mxu0 %vm16543_vm2, %v39507_v11  ;;  %v41506_v3 = vld [vmem:[#allocation4_spill] sm:$0xff] }
 0x706   :  { %32324 = vmatprep.subr.msk.mxu1 %vm16548_vm1, %v41505_v8  ;;  %24568 = vmatprep.mubr.f32.mxu1 %v41347_v57  ;;  %v25417_v47 = vsel %vm9304_vm9, %v41506_v3, %v25414_v39  ;;  %v41515_v39 = vld [vmem:[#allocation59_spill] sm:$0xff]  ;;  %v41516_v3 = vld [vmem:[#allocation56_spill] sm:$0xff] }
 0x707   :  { %25299 = vmatprep.mubr.f32.mxu0 %v41347_v57 }
 0x708   :  { %32318 = vmatmul.mubr.msk.f32.vlgmr.msra.gmra.mrb[12].mxu1 %vm16543_vm2, %v39387_v62 }
 0x709   :  { %32325 = vmatpush1.msk.msra.mxu1 %vm16548_vm1, %v38702_v5  ;;  %32353 = vmatmul.mubr.msk.f32.vlgmr.msra.gmra.mrb[12].mxu0 %vm16543_vm2, %v39453_v16  ;;  %v41508_v5 = vld [vmem:[#allocation51_spill] sm:$0xff] }
 0x70a   :  { %32359 = vmatpush1.msk.msra.mxu0 %vm16548_vm1, %v41507_v52  ;;  %33012 = vmatprep.subr.msk.mxu1 %vm16548_vm1, %v24418_v60 }
 0x70b   :  { %32366 = vmatprep.subr.msk.mxu0 %vm16548_vm1, %v25417_v47  ;;  %24574 = vmatprep.mubr.f32.mxu1 %v41347_v57  ;;  %v41520_v47 = vld [vmem:[#allocation61_spill] sm:$0xff] }
 0x70c   :  { %25305 = vmatprep.mubr.f32.mxu0 %v41347_v57  ;;  %32319 = vmatmul.mubr.msk.f32.gmra.mrb[14].mxu1 %vm16543_vm2, %v39439_v2 }
 0x70d   :  { %32354 = vmatmul.mubr.msk.f32.gmra.mrb[14].mxu0 %vm16543_vm2, %v39507_v11  ;;  %24722 = vmatprep.mubr.f32.mxu1 %v41347_v57 }
 0x70e   :  { %25491 = vmatprep.mubr.f32.mxu0 %v41347_v57 }
 0x710   :  { %32326 = vmatmul.mubr.msk.f32.vlgmr.msra.gmra.mrb[16].mxu1 %vm16543_vm2, %v39387_v62 }
 0x711   :  { %33013 = vmatpush3.msk.msra.mxu1 %vm16548_vm1, %v24418_v60  ;;  %32360 = vmatmul.mubr.msk.f32.vlgmr.msra.gmra.mrb[16].mxu0 %vm16543_vm2, %v39525_v36 }
 0x712   :  { %32367 = vmatpush1.msk.msra.mxu0 %vm16548_vm1, %v41508_v5  ;;  %32339 = vmatprep.subr.msk.mxu1 %vm16548_vm1, %v41509_v0  ;;  %v41521_v0 = vld [vmem:[#allocation66_spill] sm:$0xff] }
 0x713   :  { %32374 = vmatprep.subr.msk.mxu0 %vm16548_vm1, %v39008_v35  ;;  %24728 = vmatprep.mubr.f32.mxu1 %v41347_v57  ;;  %v41510_v35 = vld [vmem:[#allocation55_spill] sm:$0xff] }
 0x714   :  { %25497 = vmatprep.mubr.f32.mxu0 %v41347_v57  ;;  %32327 = vmatmul.mubr.msk.f32.gmra.mrb[18].mxu1 %vm16543_vm2, %v39439_v2 }
 0x715   :  { %32361 = vmatmul.mubr.msk.f32.gmra.mrb[18].mxu0 %vm16543_vm2, %v39521_v13  ;;  %33014 = vmatprep.mubr.msk.f32.mxu1 %vm16543_vm2, %v39387_v62 }
 0x716   :  { %25645 = vmatprep.mubr.f32.mxu0 %v41347_v57 }
 0x718   :  { %33015 = vmatmul.mubr.msk.f32.vlgmr.msra.gmra.mrb[20].mxu1 %vm16543_vm2, %v39439_v2  ;;  %v41513_v2 = vld [vmem:[#allocation57_spill] sm:$0xff] }
 0x719   :  { %32340 = vmatpush1.msk.msra.mxu1 %vm16548_vm1, %v38853_v22  ;;  %32368 = vmatmul.mubr.msk.f32.vlgmr.msra.gmra.mrb[8].mxu0 %vm16543_vm2, %v39525_v36  ;;  %v24918_v22 = vsel %vm7976_vm14, %v38933_v23, %v24916_v40  ;;  %v39618_v23 = vpop.permute.xlu1 %25909  ;;  %v41522_v40 = vld [vmem:[#allocation62_spill] sm:$0xff] }
 0x71a   :  { %32375 = vmatpush1.msk.msra.mxu0 %vm16548_vm1, %v41510_v35  ;;  %32347 = vmatprep.subr.msk.mxu1 %vm16548_vm1, %v41511_v43  ;;  %v41534_v35 = vld [vmem:[#allocation16_spill] sm:$0xff]  ;;  %v41536_v43 = vld [vmem:[#allocation43_spill] sm:$0xff] }
 0x71b   :  { %32381 = vmatprep.subr.msk.mxu0 %vm16548_vm1, %v39051_v15  ;;  %25068 = vmatprep.mubr.f32.mxu1 %v41347_v57  ;;  %v25914_v15 = vpop.permute.xlu0 %25913 }
 0x71c   :  { %25651 = vmatprep.mubr.f32.mxu0 %v41347_v57  ;;  %32341 = vmatmul.mubr.msk.f32.vlgmr.msra.gmra.mrb[12].mxu1 %vm16543_vm2, %v39453_v16 }
 0x71d   :  { %32348 = vmatpush1.msk.msra.mxu1 %vm16548_vm1, %v38866_v33  ;;  %32369 = vmatmul.mubr.msk.f32.gmra.mrb[10].mxu0 %vm16543_vm2, %v39521_v13  ;;  %v41512_v33 = vld [vmem:[#allocation58_spill] sm:$0xff]  ;;  %v39635_v8 = vpop.permute.xlu1 %25911 }
 0x71e   :  { %33017 = vmatprep.subr.msk.mxu1 %vm16548_vm1, %v24918_v22  ;;  %25074 = vmatprep.mubr.f32.mxu1 %v41347_v57  ;;  %v25917_v62 = vsel %vm20835_vm0, %v41512_v33, %v25914_v15  ;;  %v41538_v15 = vld [vmem:[#allocation6_spill] sm:$0xff]  ;;  %v41539_v33 = vld [vmem:[#allocation20_spill] sm:$0xff] }
 0x71f   :  { %25799 = vmatprep.mubr.f32.mxu0 %v41347_v57 }
 0x720   :  { %32342 = vmatmul.mubr.msk.f32.gmra.mrb[14].mxu1 %vm16543_vm2, %v39507_v11 }
 0x721   :  { %32376 = vmatmul.mubr.msk.f32.vlgmr.msra.gmra.mrb[12].mxu0 %vm16543_vm2, %v39525_v36  ;;  %25222 = vmatprep.mubr.f32.mxu1 %v41347_v57  ;;  %v25416_v60 = vpop.permute.xlu1 %25415 }
 0x722   :  { %32382 = vmatpush1.msk.msra.mxu0 %vm16548_vm1, %v41513_v2  ;;  %25805 = vmatprep.mubr.f32.mxu0 %v41347_v57  ;;  %v41540_v2 = vld [vmem:[#allocation15_spill] sm:$0xff] }
 0x723   :  { %32389 = vmatprep.subr.msk.mxu0 %vm16548_vm1, %v25917_v62 }
 0x724   :  { %32349 = vmatmul.mubr.msk.f32.vlgmr.msra.gmra.mrb[16].mxu1 %vm16543_vm2, %v39453_v16 }
 0x725   :  { %33018 = vmatpush3.msk.msra.mxu1 %vm16548_vm1, %v24918_v22  ;;  %32377 = vmatmul.mubr.msk.f32.gmra.mrb[14].mxu0 %vm16543_vm2, %v39521_v13  ;;  %v39694_v52 = vpop.permute.xlu1 %26411  ;;  %v41537_v22 = vld [vmem:[#allocation49_spill] sm:$0xff] }
 0x726   :  { %32362 = vmatprep.subr.msk.mxu1 %vm16548_vm1, %v41514_v61  ;;  %25228 = vmatprep.mubr.f32.mxu1 %v41347_v57 }
 0x727   :  { %25991 = vmatprep.mubr.f32.mxu0 %v41347_v57 }
 0x728   :  { %32350 = vmatmul.mubr.msk.f32.gmra.mrb[18].mxu1 %vm16543_vm2, %v39507_v11 }
 0x729   :  { %32383 = vmatmul.mubr.msk.f32.vlgmr.msra.gmra.mrb[16].mxu0 %vm16543_vm2, %v39618_v23  ;;  %33019 = vmatprep.mubr.msk.f32.mxu1 %vm16543_vm2, %v39453_v16  ;;  %v39662_v16 = vpop.permute.xlu0 %26409  ;;  %v25916_v5 = vpop.permute.xlu1 %25915 }
 0x72a   :  { %32390 = vmatpush1.msk.msra.mxu0 %vm16548_vm1, %v41515_v39  ;;  %25997 = vmatprep.mubr.f32.mxu0 %v41347_v57  ;;  %v41541_v39 = vld [vmem:[#allocation23_spill] sm:$0xff] }
 0x72b   :  { %32397 = vmatprep.subr.msk.mxu0 %vm16548_vm1, %v39089_v51  ;;  %v25418_v51 = vsel %vm9304_vm9, %v38999_v31, %v25416_v60  ;;  %v41518_v31 = vld [vmem:[#allocation65_spill] sm:$0xff]  ;;  %v41542_v60 = vld [vmem:[#allocation24_spill] sm:$0xff]  ;;  %vm31357_vm9 = vcmask 9216  }
 0x72c   :  { %33020 = vmatmul.mubr.msk.f32.vlgmr.msra.gmra.mrb[20].mxu1 %vm16543_vm2, %v39507_v11  ;;  %v41519_v11 = vld [vmem:[#allocation63_spill] sm:$0xff] }
 0x72d   :  { %32363 = vmatpush1.msk.msra.mxu1 %vm16548_vm1, %v38959_v32  ;;  %32384 = vmatmul.mubr.msk.f32.gmra.mrb[18].mxu0 %vm16543_vm2, %v39635_v8  ;;  %v41517_v32 = vld [vmem:[#allocation60_spill] sm:$0xff] }
 0x72e   :  { %32370 = vmatprep.subr.msk.mxu1 %vm16548_vm1, %v41516_v3  ;;  %25568 = vmatprep.mubr.f32.mxu1 %v41347_v57  ;;  %v41545_v3 = vld [vmem:[#allocation28_spill] sm:$0xff] }
 0x72f   :  { %26145 = vmatprep.mubr.f32.mxu0 %v41347_v57 }
 0x730   :  { %32364 = vmatmul.mubr.msk.f32.vlgmr.msra.gmra.mrb[12].mxu1 %vm16543_vm2, %v39525_v36 }
 0x731   :  { %32371 = vmatpush1.msk.msra.mxu1 %vm16548_vm1, %v38986_v44  ;;  %32391 = vmatmul.mubr.msk.f32.vlgmr.msra.gmra.mrb[8].mxu0 %vm16543_vm2, %v39618_v23  ;;  %v26414_v44 = vpop.permute.xlu0 %26413 }
 0x732   :  { %32398 = vmatpush1.msk.msra.mxu0 %vm16548_vm1, %v41517_v32  ;;  %33022 = vmatprep.subr.msk.mxu1 %vm16548_vm1, %v25418_v51 }
 0x733   :  { %32404 = vmatprep.subr.msk.mxu0 %vm16548_vm1, %v39141_v28  ;;  %25574 = vmatprep.mubr.f32.mxu1 %v41347_v57  ;;  %v26417_v28 = vsel %vm21385_vm7, %v41518_v31, %v26414_v44  ;;  %v41548_v31 = vld [vmem:[#allocation30_spill] sm:$0xff] }
 0x734   :  { %26151 = vmatprep.mubr.f32.mxu0 %v41347_v57  ;;  %32365 = vmatmul.mubr.msk.f32.gmra.mrb[14].mxu1 %vm16543_vm2, %v39521_v13 }
 0x735   :  { %32392 = vmatmul.mubr.msk.f32.gmra.mrb[10].mxu0 %vm16543_vm2, %v39635_v8  ;;  %25722 = vmatprep.mubr.f32.mxu1 %v41347_v57 }
 0x736   :  { %26299 = vmatprep.mubr.f32.mxu0 %v41347_v57 }
 0x738   :  { %32372 = vmatmul.mubr.msk.f32.vlgmr.msra.gmra.mrb[16].mxu1 %vm16543_vm2, %v39525_v36 }
 0x739   :  { %33023 = vmatpush3.msk.msra.mxu1 %vm16548_vm1, %v25418_v51  ;;  %32399 = vmatmul.mubr.msk.f32.vlgmr.msra.gmra.mrb[12].mxu0 %vm16543_vm2, %v39618_v23  ;;  %v41546_v51 = vld [vmem:[#allocation52_spill] sm:$0xff] }
 0x73a   :  { %32405 = vmatpush1.msk.msra.mxu0 %vm16548_vm1, %v41519_v11  ;;  %32385 = vmatprep.subr.msk.mxu1 %vm16548_vm1, %v41520_v47  ;;  %v41550_v11 = vld [vmem:[#allocation29_spill] sm:$0xff] }
 0x73b   :  { %32412 = vmatprep.subr.msk.mxu0 %vm16548_vm1, %v26417_v28  ;;  %25728 = vmatprep.mubr.f32.mxu1 %v41347_v57  ;;  %v41549_v28 = vld [vmem:[#allocation17_spill] sm:$0xff] }
 0x73c   :  { %26305 = vmatprep.mubr.f32.mxu0 %v41347_v57  ;;  %32373 = vmatmul.mubr.msk.f32.gmra.mrb[18].mxu1 %vm16543_vm2, %v39521_v13 }
 0x73d   :  { %32400 = vmatmul.mubr.msk.f32.gmra.mrb[14].mxu0 %vm16543_vm2, %v39635_v8  ;;  %33024 = vmatprep.mubr.msk.f32.mxu1 %vm16543_vm2, %v39525_v36 }
 0x73e   :  { %26491 = vmatprep.mubr.f32.mxu0 %v41347_v57 }
 0x740   :  { %33025 = vmatmul.mubr.msk.f32.vlgmr.msra.gmra.mrb[20].mxu1 %vm16543_vm2, %v39521_v13 }
 0x741   :  { %32386 = vmatpush1.msk.msra.mxu1 %vm16548_vm1, %v39030_v1  ;;  %32406 = vmatmul.mubr.msk.f32.vlgmr.msra.gmra.mrb[16].mxu0 %vm16543_vm2, %v39662_v16  ;;  %v25918_v1 = vsel %vm20835_vm0, %v39046_v4, %v25916_v5  ;;  %v29413_v4 = vld [vmem:[%s41201_s4 + $0x8] sm:$0xff]  ;;  %s34823_s4 = smov 4  }
 0x742   :  { %32413 = vmatpush1.msk.msra.mxu0 %vm16548_vm1, %v41521_v0  ;;  %32393 = vmatprep.subr.msk.mxu1 %vm16548_vm1, %v41522_v40  ;;  %v41552_v5 = vld [vmem:[#allocation67_spill] sm:$0xff] }
 0x743   :  { %32420 = vmatprep.subr.msk.mxu0 %vm16548_vm1, %v39170_v30  ;;  %26068 = vmatprep.mubr.f32.mxu1 %v41347_v57 }
 0x744   :  { %26497 = vmatprep.mubr.f32.mxu0 %v41347_v57  ;;  %32387 = vmatmul.mubr.msk.f32.vlgmr.msra.gmra.mrb[12].mxu1 %vm16543_vm2, %v39618_v23 }
 0x745   :  { %32394 = vmatpush1.msk.msra.mxu1 %vm16548_vm1, %v39063_v12  ;;  %32407 = vmatmul.mubr.msk.f32.gmra.mrb[18].mxu0 %vm16543_vm2, %v39694_v52  ;;  %v41524_v12 = vld [vmem:[#allocation7_spill] sm:$0xff] }
 0x746   :  { %33027 = vmatprep.subr.msk.mxu1 %vm16548_vm1, %v25918_v1  ;;  %26074 = vmatprep.mubr.f32.mxu1 %v41347_v57 }
 0x747   :  { %26645 = vmatprep.mubr.f32.mxu0 %v41347_v57  ;;  %29749 = vperm.xlu0 %34219, %v29413_v4  }
 0x748   :  { %32388 = vmatmul.mubr.msk.f32.gmra.mrb[14].mxu1 %vm16543_vm2, %v39635_v8 }
 0x749   :  { %32414 = vmatmul.mubr.msk.f32.vlgmr.msra.gmra.mrb[8].mxu0 %vm16543_vm2, %v39662_v16  ;;  %26222 = vmatprep.mubr.f32.mxu1 %v41347_v57 }
 0x74a   :  { %32421 = vmatpush1.msk.msra.mxu0 %vm16548_vm1, %v38918_v29  ;;  %26651 = vmatprep.mubr.f32.mxu0 %v41347_v57 }
 0x74b   :  { %32427 = vmatprep.subr.msk.mxu0 %vm16548_vm1, %v37600_v49  ;;  %v39751_v49 = vpop.permute.xlu0 %26909 }
 0x74c   :  { %32395 = vmatmul.mubr.msk.f32.vlgmr.msra.gmra.mrb[16].mxu1 %vm16543_vm2, %v39618_v23 }
 0x74d   :  { %33028 = vmatpush3.msk.msra.mxu1 %vm16548_vm1, %v25918_v1  ;;  %32415 = vmatmul.mubr.msk.f32.gmra.mrb[10].mxu0 %vm16543_vm2, %v39694_v52  ;;  %v41553_v1 = vld [vmem:[#allocation68_spill] sm:$0xff] }
 0x74e   :  { %32408 = vmatprep.subr.msk.mxu1 %vm16548_vm1, %v38889_v42  ;;  %26228 = vmatprep.mubr.f32.mxu1 %v41347_v57  ;;  %v41523_v42 = vld [vmem:[#allocation53_spill] sm:$0xff] }
 0x74f   :  { %26799 = vmatprep.mubr.f32.mxu0 %v41347_v57  ;;  %v26416_v29 = vpop.permute.xlu0 %26415 }
 0x750   :  { %32396 = vmatmul.mubr.msk.f32.gmra.mrb[18].mxu1 %vm16543_vm2, %v39635_v8 }
 0x751   :  { %32422 = vmatmul.mubr.msk.f32.vlgmr.msra.gmra.mrb[12].mxu0 %vm16543_vm2, %v39662_v16  ;;  %33029 = vmatprep.mubr.msk.f32.mxu1 %vm16543_vm2, %v39618_v23  ;;  %v28418_v23 = vsel %vm18091_vm5, %v41538_v15, %v41537_v22 }
 0x752   :  { %32428 = vmatpush1.msk.msra.mxu0 %vm16548_vm1, %v37469_v20  ;;  %26805 = vmatprep.mubr.f32.mxu0 %v41347_v57  ;;  %v26418_v20 = vsel %vm21385_vm7, %v39153_v25, %v26416_v29  ;;  %v41554_v29 = vld [vmem:[#allocation69_spill] sm:$0xff] }
 0x753   :  { %32435 = vmatprep.subr.msk.mxu0 %vm16548_vm1, %v41523_v42 }
 0x754   :  { %33030 = vmatmul.mubr.msk.f32.vlgmr.msra.gmra.mrb[20].mxu1 %vm16543_vm2, %v39635_v8 }
 0x755   :  { %32409 = vmatpush1.msk.msra.mxu1 %vm16548_vm1, %v39118_v6  ;;  %32423 = vmatmul.mubr.msk.f32.gmra.mrb[14].mxu0 %vm16543_vm2, %v39694_v52  ;;  %v27408_v6 = vpop.permute.xlu0 %27407 }
 0x756   :  { %32416 = vmatprep.subr.msk.mxu1 %vm16548_vm1, %v38923_v7  ;;  %26568 = vmatprep.mubr.f32.mxu1 %v41347_v57  ;;  %v26912_v7 = vpop.permute.xlu1 %26911 }
 0x757   :  { %26985 = vmatprep.mubr.f32.mxu0 %v41347_v57 }
 0x758   :  { %32410 = vmatmul.mubr.msk.f32.vlgmr.msra.gmra.mrb[12].mxu1 %vm16543_vm2, %v39662_v16 }
 0x759   :  { %32417 = vmatpush1.msk.msra.mxu1 %vm16548_vm1, %v39151_v9  ;;  %32429 = vmatmul.mubr.msk.f32.vlgmr.msra.gmra.mrb[16].mxu0 %vm16543_vm2, %v39751_v49 }
 0x75a   :  { %32436 = vmatpush1.msk.msra.mxu0 %vm16548_vm1, %v41524_v12  ;;  %33032 = vmatprep.subr.msk.mxu1 %vm16548_vm1, %v26418_v20  ;;  %v27406_v25 = vpop.permute.xlu1 %27405 }
 0x75b   :  { %32443 = vmatprep.subr.msk.mxu0 %vm16548_vm1, %v38335_v55  ;;  %26574 = vmatprep.mubr.f32.mxu1 %v41347_v57 }
 0x75c   :  { %26991 = vmatprep.mubr.f32.mxu0 %v41347_v57  ;;  %32411 = vmatmul.mubr.msk.f32.gmra.mrb[14].mxu1 %vm16543_vm2, %v39694_v52 }
 0x75d   :  { %32430 = vmatmul.mubr.msk.f32.gmra.mrb[18].mxu0 %vm16543_vm2, %v26912_v7  ;;  %26722 = vmatprep.mubr.f32.mxu1 %v41347_v57 }
 0x75e   :  { %27139 = vmatprep.mubr.f32.mxu0 %v41347_v57 }
 0x760   :  { %32418 = vmatmul.mubr.msk.f32.vlgmr.msra.gmra.mrb[16].mxu1 %vm16543_vm2, %v39662_v16 }
 0x761   :  { %33033 = vmatpush3.msk.msra.mxu1 %vm16548_vm1, %v26418_v20  ;;  %32437 = vmatmul.mubr.msk.f32.vlgmr.msra.gmra.mrb[8].mxu0 %vm16543_vm2, %v39751_v49 }
 0x762   :  { %32444 = vmatpush1.msk.msra.mxu0 %vm16548_vm1, %v37521_v46  ;;  %32431 = vmatprep.subr.msk.mxu1 %vm16548_vm1, %v37503_v50  ;;  %v27410_v50 = vpop.permute.xlu1 %27409  ;;  %v41525_v46 = vld [vmem:[#allocation19_spill] sm:$0xff] }
 0x763   :  { %32450 = vmatprep.subr.msk.mxu0 %vm16548_vm1, %v41475_v59  ;;  %26728 = vmatprep.mubr.f32.mxu1 %v41347_v57  ;;  %v27418_v55 = vsel %vm1342_vm4, %v39053_v63, %v41525_v46  ;;  %v27412_v63 = vpop.permute.xlu0 %27411  ;;  %v41529_v59 = vld [vmem:[#allocation38_spill] sm:$0xff] }
 0x764   :  { %27145 = vmatprep.mubr.f32.mxu0 %v41347_v57  ;;  %32419 = vmatmul.mubr.msk.f32.gmra.mrb[18].mxu1 %vm16543_vm2, %v39694_v52  ;;  %v27415_v9 = vsel %vm27413_vm8, %v27410_v50, %v27412_v63 }
 0x765   :  { %32438 = vmatmul.mubr.msk.f32.gmra.mrb[10].mxu0 %vm16543_vm2, %v26912_v7  ;;  %33034 = vmatprep.mubr.msk.f32.mxu1 %vm16543_vm2, %v39662_v16  ;;  %v41547_v16 = vld [vmem:[#allocation5_spill] sm:$0xff] }
 0x766   :  { %27293 = vmatprep.mubr.f32.mxu0 %v41347_v57  ;;  %v28918_v32 = vsel %vm18638_vm11, %v41547_v16, %v41546_v51 }
 0x768   :  { %33035 = vmatmul.mubr.msk.f32.vlgmr.msra.gmra.mrb[20].mxu1 %vm16543_vm2, %v39694_v52 }
 0x769   :  { %32432 = vmatpush1.msk.msra.mxu1 %vm16548_vm1, %v37512_v37  ;;  %32445 = vmatmul.mubr.msk.f32.vlgmr.msra.gmra.mrb[12].mxu0 %vm16543_vm2, %v39751_v49  ;;  %v27414_v37 = vsel %vm27413_vm8, %v27406_v25, %v27408_v6  ;;  %v41555_v25 = vld [vmem:[#allocation70_spill] sm:$0xff] }
 0x76a   :  { %32451 = vmatpush1.msk.msra.mxu0 %vm16548_vm1, %v37915_v26  ;;  %32439 = vmatprep.subr.msk.mxu1 %vm16548_vm1, %v37515_v38  ;;  %v41526_v38 = vld [vmem:[#allocation64_spill] sm:$0xff]  ;;  %v27417_v26 = vpop.permute.xlu1 %27416 }
 0x76b   :  { %32458 = vmatprep.subr.msk.mxu0 %vm16548_vm1, %v27418_v55  ;;  %27062 = vmatprep.mubr.f32.mxu1 %v41347_v57  ;;  %v27419_v30 = vsel %vm1342_vm4, %v39081_v21, %v27417_v26  ;;  %v27913_v21 = vpop.permute.xlu0 %27912 }
 0x76c   :  { %27299 = vmatprep.mubr.f32.mxu0 %v41347_v57  ;;  %32433 = vmatmul.mubr.msk.f32.vlgmr.msra.gmra.mrb[12].mxu1 %vm16543_vm2, %v39751_v49 }
 0x76d   :  { %32440 = vmatpush1.msk.msra.mxu1 %vm16548_vm1, %v41467_v48  ;;  %32446 = vmatmul.mubr.msk.f32.gmra.mrb[14].mxu0 %vm16543_vm2, %v26912_v7  ;;  %v41530_v48 = vld [vmem:[#allocation31_spill] sm:$0xff] }
 0x76e   :  { %33037 = vmatprep.subr.msk.mxu1 %vm16548_vm1, %v41526_v38  ;;  %27068 = vmatprep.mubr.f32.mxu1 %v41347_v57  ;;  %v27915_v36 = vpop.permute.xlu1 %27914 }
 0x76f   :  { %27494 = vmatprep.mubr.f32.mxu0 %v41347_v57 }
 0x770   :  { %32434 = vmatmul.mubr.msk.f32.gmra.mrb[14].mxu1 %vm16543_vm2, %v26912_v7 }
 0x771   :  { %32452 = vmatmul.mubr.msk.f32.vlgmr.msra.gmra.mrb[16].mxu0 %vm16543_vm2, %v27414_v37  ;;  %27216 = vmatprep.mubr.f32.mxu1 %v41347_v57 }
 0x772   :  { %32459 = vmatpush1.msk.msra.mxu0 %vm16548_vm1, %v39068_v19  ;;  %27500 = vmatprep.mubr.f32.mxu0 %v41347_v57  ;;  %v41527_v19 = vld [vmem:[#allocation71_spill] sm:$0xff] }
 0x773   :  { %32466 = vmatprep.subr.msk.mxu0 %vm16548_vm1, %v27419_v30 }
 0x774   :  { %32441 = vmatmul.mubr.msk.f32.vlgmr.msra.gmra.mrb[16].mxu1 %vm16543_vm2, %v39751_v49 }
 0x775   :  { %33038 = vmatpush3.msk.msra.mxu1 %vm16548_vm1, %v41526_v38  ;;  %32453 = vmatmul.mubr.msk.f32.gmra.mrb[18].mxu0 %vm16543_vm2, %v27415_v9 }
 0x776   :  { %32454 = vmatprep.subr.msk.mxu1 %vm16548_vm1, %v37688_v17  ;;  %27222 = vmatprep.mubr.f32.mxu1 %v41347_v57  ;;  %v41528_v17 = vld [vmem:[#allocation8_spill] sm:$0xff] }
 0x777   :  { %27648 = vmatprep.mubr.f32.mxu0 %v41347_v57 }
 0x778   :  { %32442 = vmatmul.mubr.msk.f32.gmra.mrb[18].mxu1 %vm16543_vm2, %v26912_v7 }
 0x779   :  { %32460 = vmatmul.mubr.msk.f32.vlgmr.msra.gmra.mrb[8].mxu0 %vm16543_vm2, %v27414_v37  ;;  %33039 = vmatprep.mubr.msk.f32.mxu1 %vm16543_vm2, %v39751_v49 }
 0x77a   :  { %32467 = vmatpush1.msk.msra.mxu0 %vm16548_vm1, %v41527_v19  ;;  %27654 = vmatprep.mubr.f32.mxu0 %v41347_v57 }
 0x77b   :  { %32473 = vmatprep.subr.msk.mxu0 %vm16548_vm1, %v41484_v27  ;;  %v41532_v27 = vld [vmem:[#allocation11_spill] sm:$0xff] }
 0x77c   :  { %33040 = vmatmul.mubr.msk.f32.vlgmr.msra.gmra.mrb[20].mxu1 %vm16543_vm2, %v26912_v7 }
 0x77d   :  { %32455 = vmatpush1.msk.msra.mxu1 %vm16548_vm1, %v41472_v41  ;;  %32461 = vmatmul.mubr.msk.f32.gmra.mrb[10].mxu0 %vm16543_vm2, %v27415_v9  ;;  %v27918_v41 = vsel %vm2664_vm6, %v41530_v48, %v41529_v59 }
 0x77e   :  { %32462 = vmatprep.subr.msk.mxu1 %vm16548_vm1, %v41528_v17  ;;  %27571 = vmatprep.mubr.f32.mxu1 %v41347_v57 }
 0x77f   :  { %27802 = vmatprep.mubr.f32.mxu0 %v41347_v57 }
 0x780   :  { %32456 = vmatmul.mubr.msk.f32.vlgmr.msra.gmra.mrb[12].mxu1 %vm16543_vm2, %v27414_v37 }
 0x781   :  { %32463 = vmatpush1.msk.msra.mxu1 %vm16548_vm1, %v41476_v56  ;;  %32468 = vmatmul.mubr.msk.f32.vlgmr.msra.gmra.mrb[12].mxu0 %vm16543_vm2, %v27414_v37  ;;  %v41531_v56 = vld [vmem:[#allocation14_spill] sm:$0xff] }
 0x782   :  { %32474 = vmatpush1.msk.msra.mxu0 %vm16548_vm1, %v41459_v45  ;;  %33042 = vmatprep.subr.msk.mxu1 %vm16548_vm1, %v27417_v26  ;;  %v27917_v45 = vpop.permute.xlu0 %27916 }
 0x783   :  { %32481 = vmatprep.subr.msk.mxu0 %vm16548_vm1, %v27918_v41  ;;  %27577 = vmatprep.mubr.f32.mxu1 %v41347_v57  ;;  %v27919_v13 = vsel %vm2664_vm6, %v39191_v53, %v27917_v45  ;;  %v41533_v53 = vld [vmem:[#allocation9_spill] sm:$0xff] }
 0x784   :  { %27808 = vmatprep.mubr.f32.mxu0 %v41347_v57  ;;  %32457 = vmatmul.mubr.msk.f32.gmra.mrb[14].mxu1 %vm16543_vm2, %v27415_v9 }
 0x785   :  { %32469 = vmatmul.mubr.msk.f32.gmra.mrb[14].mxu0 %vm16543_vm2, %v27415_v9  ;;  %27725 = vmatprep.mubr.f32.mxu1 %v41347_v57 }
 0x786   :  { %27994 = vmatprep.mubr.f32.mxu0 %v41347_v57  ;;  %v28415_v8 = vpop.permute.xlu0 %28414 }
 0x788   :  { %32464 = vmatmul.mubr.msk.f32.vlgmr.msra.gmra.mrb[16].mxu1 %vm16543_vm2, %v27414_v37 }
 0x789   :  { %33043 = vmatpush3.msk.msra.mxu1 %vm16548_vm1, %v27417_v26  ;;  %32475 = vmatmul.mubr.msk.f32.vlgmr.msra.gmra.mrb[16].mxu0 %vm16543_vm2, %v27913_v21 }
 0x78a   :  { %32482 = vmatpush1.msk.msra.mxu0 %vm16548_vm1, %v41531_v56  ;;  %32477 = vmatprep.subr.msk.mxu1 %vm16548_vm1, %v41532_v27 }
 0x78b   :  { %32489 = vmatprep.subr.msk.mxu0 %vm16548_vm1, %v27919_v13  ;;  %27731 = vmatprep.mubr.f32.mxu1 %v41347_v57 }
 0x78c   :  { %28000 = vmatprep.mubr.f32.mxu0 %v41347_v57  ;;  %32465 = vmatmul.mubr.msk.f32.gmra.mrb[18].mxu1 %vm16543_vm2, %v27415_v9 }
 0x78d   :  { %32476 = vmatmul.mubr.msk.f32.gmra.mrb[18].mxu0 %vm16543_vm2, %v27915_v36  ;;  %33044 = vmatprep.mubr.msk.f32.mxu1 %vm16543_vm2, %v27414_v37 }
 0x78e   :  { %28148 = vmatprep.mubr.f32.mxu0 %v41347_v57 }
 0x790   :  { %33045 = vmatmul.mubr.msk.f32.vlgmr.msra.gmra.mrb[20].mxu1 %vm16543_vm2, %v27415_v9 }
 0x791   :  { %32478 = vmatpush1.msk.msra.mxu1 %vm16548_vm1, %v41481_v18  ;;  %32483 = vmatmul.mubr.msk.f32.vlgmr.msra.gmra.mrb[8].mxu0 %vm16543_vm2, %v27913_v21  ;;  %v41535_v18 = vld [vmem:[#allocation18_spill] sm:$0xff] }
 0x792   :  { %32490 = vmatpush1.msk.msra.mxu0 %vm16548_vm1, %v41533_v53  ;;  %32485 = vmatprep.subr.msk.mxu1 %vm16548_vm1, %v41534_v35 }
 0x793   :  { %32496 = vmatprep.subr.msk.mxu0 %vm16548_vm1, %v41493_v58  ;;  %28071 = vmatprep.mubr.f32.mxu1 %v41347_v57  ;;  %v28413_v58 = vpop.permute.xlu1 %28412 }
 0x794   :  { %28154 = vmatprep.mubr.f32.mxu0 %v41347_v57  ;;  %32479 = vmatmul.mubr.msk.f32.vlgmr.msra.gmra.mrb[12].mxu1 %vm16543_vm2, %v27913_v21 }
 0x795   :  { %32484 = vmatmul.mubr.msk.f32.gmra.mrb[10].mxu0 %vm16543_vm2, %v27915_v36  ;;  %32486 = vmatpush1.msk.msra.mxu1 %vm16548_vm1, %v41535_v18 }
 0x796   :  { %33047 = vmatprep.subr.msk.mxu1 %vm16548_vm1, %v27917_v45  ;;  %28077 = vmatprep.mubr.f32.mxu1 %v41347_v57 }
 0x797   :  { %28302 = vmatprep.mubr.f32.mxu0 %v41347_v57  ;;  %v28417_v62 = vpop.permute.xlu1 %28416 }
 0x798   :  { %32480 = vmatmul.mubr.msk.f32.gmra.mrb[14].mxu1 %vm16543_vm2, %v27915_v36  ;;  %v28419_v61 = vsel %vm18091_vm5, %v39273_v54, %v28417_v62  ;;  %v41543_v54 = vld [vmem:[#allocation12_spill] sm:$0xff] }
 0x799   :  { %32491 = vmatmul.mubr.msk.f32.vlgmr.msra.gmra.mrb[12].mxu0 %vm16543_vm2, %v27913_v21  ;;  %28225 = vmatprep.mubr.f32.mxu1 %v41347_v57 }
 0x79a   :  { %32497 = vmatpush1.msk.msra.mxu0 %vm16548_vm1, %v41536_v43  ;;  %28308 = vmatprep.mubr.f32.mxu0 %v41347_v57 }
 0x79b   :  { %32504 = vmatprep.subr.msk.mxu0 %vm16548_vm1, %v28418_v23  ;;  %v28915_v52 = vpop.permute.xlu1 %28914 }
 0x79c   :  { %32487 = vmatmul.mubr.msk.f32.vlgmr.msra.gmra.mrb[16].mxu1 %vm16543_vm2, %v27913_v21 }
 0x79d   :  { %32492 = vmatmul.mubr.msk.f32.gmra.mrb[14].mxu0 %vm16543_vm2, %v27915_v36  ;;  %33048 = vmatpush3.msk.msra.mxu1 %vm16548_vm1, %v27917_v45 }
 0x79e   :  { %32500 = vmatprep.subr.msk.mxu1 %vm16548_vm1, %v41539_v33  ;;  %28231 = vmatprep.mubr.f32.mxu1 %v41347_v57 }
 0x79f   :  { %28494 = vmatprep.mubr.f32.mxu0 %v41347_v57  ;;  %v40184_v27 = vpop.permute.xlu1 %29744 }
 0x7a0   :  { %32488 = vmatmul.mubr.msk.f32.gmra.mrb[18].mxu1 %vm16543_vm2, %v27915_v36 }
 0x7a1   :  { %32498 = vmatmul.mubr.msk.f32.vlgmr.msra.gmra.mrb[16].mxu0 %vm16543_vm2, %v28413_v58  ;;  %33049 = vmatprep.mubr.msk.f32.mxu1 %vm16543_vm2, %v27913_v21 }
 0x7a2   :  { %32505 = vmatpush1.msk.msra.mxu0 %vm16548_vm1, %v41540_v2  ;;  %28500 = vmatprep.mubr.f32.mxu0 %v41347_v57 }
 0x7a3   :  { %32512 = vmatprep.subr.msk.mxu0 %vm16548_vm1, %v28419_v61 }
 0x7a4   :  { %33050 = vmatmul.mubr.msk.f32.vlgmr.msra.gmra.mrb[20].mxu1 %vm16543_vm2, %v27915_v36 }
 0x7a5   :  { %32499 = vmatmul.mubr.msk.f32.gmra.mrb[18].mxu0 %vm16543_vm2, %v28415_v8  ;;  %32501 = vmatpush1.msk.msra.mxu1 %vm16548_vm1, %v41541_v39 }
 0x7a6   :  { %32508 = vmatprep.subr.msk.mxu1 %vm16548_vm1, %v41542_v60  ;;  %28571 = vmatprep.mubr.f32.mxu1 %v41347_v57 }
 0x7a7   :  { %28648 = vmatprep.mubr.f32.mxu0 %v41347_v57 }
 0x7a8   :  { %32502 = vmatmul.mubr.msk.f32.vlgmr.msra.gmra.mrb[12].mxu1 %vm16543_vm2, %v28413_v58 }
 0x7a9   :  { %32506 = vmatmul.mubr.msk.f32.vlgmr.msra.gmra.mrb[8].mxu0 %vm16543_vm2, %v28413_v58  ;;  %32509 = vmatpush1.msk.msra.mxu1 %vm16548_vm1, %v41494_v10  ;;  %v28913_v10 = vpop.permute.xlu0 %28912 }
 0x7aa   :  { %32513 = vmatpush1.msk.msra.mxu0 %vm16548_vm1, %v41543_v54  ;;  %33052 = vmatprep.subr.msk.mxu1 %vm16548_vm1, %v28417_v62 }
 0x7ab   :  { %32519 = vmatprep.subr.msk.mxu0 %vm16548_vm1, %v38498_v34  ;;  %28577 = vmatprep.mubr.f32.mxu1 %v41347_v57  ;;  %v41544_v34 = vld [vmem:[#allocation50_spill] sm:$0xff] }
 0x7ac   :  { %28654 = vmatprep.mubr.f32.mxu0 %v41347_v57  ;;  %32503 = vmatmul.mubr.msk.f32.gmra.mrb[14].mxu1 %vm16543_vm2, %v28415_v8 }
 0x7ad   :  { %32507 = vmatmul.mubr.msk.f32.gmra.mrb[10].mxu0 %vm16543_vm2, %v28415_v8  ;;  %28725 = vmatprep.mubr.f32.mxu1 %v41347_v57  ;;  %v28917_v44 = vpop.permute.xlu0 %28916 }
 0x7ae   :  { %28802 = vmatprep.mubr.f32.mxu0 %v41347_v57  ;;  %v28919_v47 = vsel %vm18638_vm11, %v39354_v24, %v28917_v44  ;;  %v41551_v24 = vld [vmem:[#allocation10_spill] sm:$0xff] }
 0x7b0   :  { %32510 = vmatmul.mubr.msk.f32.vlgmr.msra.gmra.mrb[16].mxu1 %vm16543_vm2, %v28413_v58 }
 0x7b1   :  { %32514 = vmatmul.mubr.msk.f32.vlgmr.msra.gmra.mrb[12].mxu0 %vm16543_vm2, %v28413_v58  ;;  %33053 = vmatpush3.msk.msra.mxu1 %vm16548_vm1, %v28417_v62 }
 0x7b2   :  { %32520 = vmatpush1.msk.msra.mxu0 %vm16548_vm1, %v41544_v34  ;;  %32523 = vmatprep.subr.msk.mxu1 %vm16548_vm1, %v41545_v3 }
 0x7b3   :  { %32527 = vmatprep.subr.msk.mxu0 %vm16548_vm1, %v28918_v32  ;;  %28731 = vmatprep.mubr.f32.mxu1 %v41347_v57 }
 0x7b4   :  { %28808 = vmatprep.mubr.f32.mxu0 %v41347_v57  ;;  %32511 = vmatmul.mubr.msk.f32.gmra.mrb[18].mxu1 %vm16543_vm2, %v28415_v8 }
 0x7b5   :  { %32515 = vmatmul.mubr.msk.f32.gmra.mrb[14].mxu0 %vm16543_vm2, %v28415_v8  ;;  %33054 = vmatprep.mubr.msk.f32.mxu1 %vm16543_vm2, %v28413_v58 }
 0x7b6   :  { %28994 = vmatprep.mubr.f32.mxu0 %v41347_v57 }
 0x7b8   :  { %33055 = vmatmul.mubr.msk.f32.vlgmr.msra.gmra.mrb[20].mxu1 %vm16543_vm2, %v28415_v8 }
 0x7b9   :  { %32521 = vmatmul.mubr.msk.f32.vlgmr.msra.gmra.mrb[16].mxu0 %vm16543_vm2, %v28913_v10  ;;  %32524 = vmatpush1.msk.msra.mxu1 %vm16548_vm1, %v41548_v31 }
 0x7ba   :  { %32528 = vmatpush1.msk.msra.mxu0 %vm16548_vm1, %v41549_v28  ;;  %32531 = vmatprep.subr.msk.mxu1 %vm16548_vm1, %v41550_v11 }
 0x7bb   :  { %32535 = vmatprep.subr.msk.mxu0 %vm16548_vm1, %v28919_v47  ;;  %29000 = vmatprep.mubr.f32.mxu0 %v41347_v57 }
 0x7bc   :  { %29071 = vmatprep.mubr.f32.mxu1 %v41347_v57 }
 0x7bd   :  { %32522 = vmatmul.mubr.msk.f32.gmra.mrb[18].mxu0 %vm16543_vm2, %v28915_v52  ;;  %32525 = vmatmul.mubr.msk.f32.vlgmr.msra.gmra.mrb[12].mxu1 %vm16543_vm2, %v28913_v10 }
 0x7be   :  { %32532 = vmatpush1.msk.msra.mxu1 %vm16548_vm1, %v41501_v14  ;;  %29077 = vmatprep.mubr.f32.mxu1 %v41347_v57 }
 0x7bf   :  { %33057 = vmatprep.subr.msk.mxu1 %vm16548_vm1, %v28917_v44  ;;  %29148 = vmatprep.mubr.f32.mxu0 %v41347_v57 }
 0x7c1   :  { %32526 = vmatmul.mubr.msk.f32.gmra.mrb[14].mxu1 %vm16543_vm2, %v28915_v52  ;;  %32529 = vmatmul.mubr.msk.f32.vlgmr.msra.gmra.mrb[8].mxu0 %vm16543_vm2, %v28913_v10 }
 0x7c2   :  { %32536 = vmatpush1.msk.msra.mxu0 %vm16548_vm1, %v41551_v24  ;;  %29154 = vmatprep.mubr.f32.mxu0 %v41347_v57 }
 0x7c3   :  { %29225 = vmatprep.mubr.f32.mxu1 %v41347_v57 }
 0x7c5   :  { %32530 = vmatmul.mubr.msk.f32.gmra.mrb[10].mxu0 %vm16543_vm2, %v28915_v52  ;;  %32533 = vmatmul.mubr.msk.f32.vlgmr.msra.gmra.mrb[16].mxu1 %vm16543_vm2, %v28913_v10 }
 0x7c6   :  { %33058 = vmatpush3.msk.msra.mxu1 %vm16548_vm1, %v28917_v44  ;;  %29231 = vmatprep.mubr.f32.mxu1 %v41347_v57  ;;  %v40182_v56 = vpop.permute.xlu0 %29749 }
 0x7c7   :  { %29302 = vmatprep.mubr.f32.mxu0 %v41347_v57 }
 0x7c9   :  { %32534 = vmatmul.mubr.msk.f32.gmra.mrb[18].mxu1 %vm16543_vm2, %v28915_v52  ;;  %32537 = vmatmul.mubr.msk.f32.vlgmr.msra.gmra.mrb[12].mxu0 %vm16543_vm2, %v28913_v10 }
 0x7ca   :  { %33059 = vmatprep.mubr.msk.f32.mxu1 %vm16543_vm2, %v28913_v10  ;;  %29308 = vmatprep.mubr.f32.mxu0 %v41347_v57 }
 0x7cd   :  { %32538 = vmatmul.mubr.msk.f32.gmra.mrb[14].mxu0 %vm16543_vm2, %v28915_v52  ;;  %33060 = vmatmul.mubr.msk.f32.vlgmr.msra.gmra.mrb[20].mxu1 %vm16543_vm2, %v28915_v52 }
 0x7ce   :  { %33092 = vmatprep.mubr.msk.f32.mxu0 %vm34779_vm3, %v41347_v57 }
 0x88c   :  { %v28996_v14 = vpop.f32.mrb[16].mxu0 }
 0x88d   :  { %v40033_v0 = vadd.f32 %v28996_v14, %v41552_v5  ;;  %v28998_v40 = vpop.f32.mrb[17].mxu0 }
 0x88e   :  { %v40036_v4 = vadd.f32 %v28998_v40, %v41553_v1 }
 0x890   :  { %v29002_v49 = vpop.f32.mrb[18].mxu0  ;;  %v40038_v42 = vpop.f32.mrb[12].mxu1 }
 0x891   :  { %v40041_v20 = vadd.f32 %v29002_v49, %v41554_v29  ;;  %29542 = vrot.lane.b32.xlu1 %v40038_v42, %s34788_s29  ;;  %29440 = vrot.lane.b32.xlu0 %v40038_v42, %s34772_s18  ;;  %v29004_v12 = vpop.f32.mrb[19].mxu0  ;;  %v40047_v7 = vpop.f32.mrb[13].mxu1 }
 0x892   :  { %v40050_v50 = vadd.f32 %v29004_v12, %v41555_v25 }
 0x894   :  { %v40052_v46 = vpop.f32.mrb[14].mxu1  ;;  %v40054_v55 = vpop.f32.mrb[8].mxu0 }
 0x895   :  { %29644 = vrot.lane.b32.xlu1 %v40038_v42, %s34791_s12  ;;  %29442 = vrot.lane.b32.xlu0 %v40047_v7, %s34772_s18  ;;  %v40060_v6 = vpop.f32.mrb[15].mxu1  ;;  %v29152_v37 = vpop.f32.mrb[9].mxu0 }
 0x898   :  { %v40062_v38 = vpop.f32.mrb[10].mxu0  ;;  %v40064_v26 = vpop.f32.mrb[16].mxu1 }
 0x899   :  { %29544 = vrot.lane.b32.xlu0 %v40047_v7, %s34788_s29  ;;  %29564 = vrot.lane.b32.xlu1 %v40052_v46, %s34788_s29  ;;  %v29158_v63 = vpop.f32.mrb[11].mxu0  ;;  %v40070_v9 = vpop.f32.mrb[17].mxu1 }
 0x89c   :  { %v40072_v30 = vpop.f32.mrb[18].mxu1  ;;  %v40074_v19 = vpop.f32.mrb[12].mxu0 }
 0x89d   :  { %29646 = vrot.lane.b32.xlu0 %v40047_v7, %s34791_s12  ;;  %29666 = vrot.lane.b32.xlu1 %v40052_v46, %s34791_s12  ;;  %v40080_v17 = vpop.f32.mrb[19].mxu1  ;;  %v40082_v21 = vpop.f32.mrb[13].mxu0 }
 0x8a0   :  { %v40084_v59 = vpop.f32.mrb[14].mxu0  ;;  %v40086_v48 = vpop.f32.mrb[20].mxu1 }
 0x8a1   :  { %29462 = vrot.lane.b32.xlu0 %v40052_v46, %s34772_s18  ;;  %29450 = vrot.lane.b32.xlu1 %v40070_v9, %s34772_s18  ;;  %v40092_v41 = vpop.f32.mrb[15].mxu0  ;;  %v40094_v45 = vpop.f32.mrb[21].mxu1 }
 0x8a5   :  { %29464 = vrot.lane.b32.xlu0 %v40060_v6, %s34772_s18  ;;  %29470 = vrot.lane.b32.xlu1 %v40072_v30, %s34772_s18 }
 0x8a9   :  { %29566 = vrot.lane.b32.xlu0 %v40060_v6, %s34788_s29  ;;  %29572 = vrot.lane.b32.xlu1 %v40072_v30, %s34788_s29 }
 0x8ad   :  { %29668 = vrot.lane.b32.xlu0 %v40060_v6, %s34791_s12  ;;  %29674 = vrot.lane.b32.xlu1 %v40072_v30, %s34791_s12 }
 0x8b1   :  { %29448 = vrot.lane.b32.xlu0 %v40064_v26, %s34772_s18  ;;  %29478 = vrot.lane.b32.xlu1 %v40086_v48, %s34772_s18 }
 0x8b5   :  { %29550 = vrot.lane.b32.xlu0 %v40064_v26, %s34788_s29  ;;  %29580 = vrot.lane.b32.xlu1 %v40086_v48, %s34788_s29 }
 0x8b9   :  { %29652 = vrot.lane.b32.xlu0 %v40064_v26, %s34791_s12  ;;  %29682 = vrot.lane.b32.xlu1 %v40086_v48, %s34791_s12 }
 0x8bd   :  { %29552 = vrot.lane.b32.xlu0 %v40070_v9, %s34788_s29  ;;  %29456 = vrot.lane.b32.xlu1 %v40094_v45, %s34772_s18 }
 0x8c1   :  { %29654 = vrot.lane.b32.xlu0 %v40070_v9, %s34791_s12  ;;  %29558 = vrot.lane.b32.xlu1 %v40094_v45, %s34788_s29 }
 0x8c5   :  { %29472 = vrot.lane.b32.xlu0 %v40080_v17, %s34772_s18  ;;  %29660 = vrot.lane.b32.xlu1 %v40094_v45, %s34791_s12 }
 0x8c9   :  { %29574 = vrot.lane.b32.xlu0 %v40080_v17, %s34788_s29  ;;  %29438 = vrot.lane.b32.xlu1 %v40036_v4, %s34772_s18 }
 0x8cd   :  { %29676 = vrot.lane.b32.xlu0 %v40080_v17, %s34791_s12  ;;  %29458 = vrot.lane.b32.xlu1 %v40041_v20, %s34772_s18 }
 0x8d1   :  { %29436 = vrot.lane.b32.xlu0 %v40033_v0, %s34772_s18  ;;  %29560 = vrot.lane.b32.xlu1 %v40041_v20, %s34788_s29 }
 0x8d5   :  { %29538 = vrot.lane.b32.xlu0 %v40033_v0, %s34788_s29  ;;  %29662 = vrot.lane.b32.xlu1 %v40041_v20, %s34791_s12 }
 0x8d9   :  { %29640 = vrot.lane.b32.xlu0 %v40033_v0, %s34791_s12  ;;  %29460 = vrot.lane.b32.xlu1 %v40050_v50, %s34772_s18 }
 0x8dd   :  { %29540 = vrot.lane.b32.xlu0 %v40036_v4, %s34788_s29  ;;  %29444 = vrot.lane.b32.xlu1 %v40054_v55, %s34772_s18 }
 0x8e1   :  { %29642 = vrot.lane.b32.xlu0 %v40036_v4, %s34791_s12  ;;  %29546 = vrot.lane.b32.xlu1 %v40054_v55, %s34788_s29 }
 0x8e5   :  { %29562 = vrot.lane.b32.xlu0 %v40050_v50, %s34788_s29  ;;  %29648 = vrot.lane.b32.xlu1 %v40054_v55, %s34791_s12 }
 0x8e9   :  { %29664 = vrot.lane.b32.xlu0 %v40050_v50, %s34791_s12  ;;  %29466 = vrot.lane.b32.xlu1 %v40062_v38, %s34772_s18 }
 0x8ed   :  { %29446 = vrot.lane.b32.xlu0 %v29152_v37, %s34772_s18  ;;  %29568 = vrot.lane.b32.xlu1 %v40062_v38, %s34788_s29 }
 0x8f1   :  { %29548 = vrot.lane.b32.xlu0 %v29152_v37, %s34788_s29  ;;  %29670 = vrot.lane.b32.xlu1 %v40062_v38, %s34791_s12 }
 0x8f5   :  { %29650 = vrot.lane.b32.xlu0 %v29152_v37, %s34791_s12  ;;  %29468 = vrot.lane.b32.xlu1 %v29158_v63, %s34772_s18 }
 0x8f9   :  { %29570 = vrot.lane.b32.xlu1 %v29158_v63, %s34788_s29  ;;  %29454 = vrot.lane.b32.xlu0 %v40082_v21, %s34772_s18 }
 0x8fd   :  { %29672 = vrot.lane.b32.xlu1 %v29158_v63, %s34791_s12  ;;  %29556 = vrot.lane.b32.xlu0 %v40082_v21, %s34788_s29 }
 0x901   :  { %29452 = vrot.lane.b32.xlu1 %v40074_v19, %s34772_s18  ;;  %29658 = vrot.lane.b32.xlu0 %v40082_v21, %s34791_s12 }
 0x903   :  { %v40190_v13 = vpop.permute.xlu0 %29440  ;;  %v40192_v36 = vpop.permute.xlu1 %29542 }
 0x905   :  { %29554 = vrot.lane.b32.xlu1 %v40074_v19, %s34788_s29  ;;  %29476 = vrot.lane.b32.xlu0 %v40092_v41, %s34772_s18 }
 0x907   :  { %v40198_v53 = vpop.permute.xlu0 %29442  ;;  %v40200_v35 = vpop.permute.xlu1 %29644 }
 0x908   :  { %v29482_v33 = vsel %vm1342_vm4, %v40190_v13, %v40198_v53 }
 0x909   :  { %29656 = vrot.lane.b32.xlu1 %v40074_v19, %s34791_s12  ;;  %29578 = vrot.lane.b32.xlu0 %v40092_v41, %s34788_s29  ;;  %v29520_v8 = vmax.f32 %v40038_v42, %v29482_v33 }
 0x90b   :  { %v40206_v18 = vpop.permute.xlu0 %29544  ;;  %v40208_v58 = vpop.permute.xlu1 %29564 }
 0x90c   :  { %v29584_v61 = vsel %vm6648_vm12, %v40192_v36, %v40206_v18 }
 0x90d   :  { %29474 = vrot.lane.b32.xlu1 %v40084_v59, %s34772_s18  ;;  %29680 = vrot.lane.b32.xlu0 %v40092_v41, %s34791_s12  ;;  %v29622_v54 = vmax.f32 %v29520_v8, %v29584_v61 }
 0x90f   :  { %v40214_v43 = vpop.permute.xlu0 %29646  ;;  %v40216_v22 = vpop.permute.xlu1 %29666 }
 0x910   :  { %v29686_v39 = vsel %vm7976_vm14, %v40200_v35, %v40214_v43 }
 0x911   :  { %29576 = vrot.lane.b32.xlu1 %v40084_v59, %s34788_s29  ;;  %v29724_v51 = vmax.f32 %v29622_v54, %v29686_v39 }
 0x913   :  { %v40220_v15 = vpop.permute.xlu0 %29462  ;;  %v40222_v23 = vpop.permute.xlu1 %29450  ;;  %v29754_v11 = vadd.f32 %v40184_v27, %v29724_v51 }
 0x915   :  { %29678 = vrot.lane.b32.xlu1 %v40084_v59, %s34791_s12  ;;  %v29774_v5 = vmax.f32 %v29754_v11, 0.0 }
 0x917   :  { %v40229_v62 = vpop.permute.xlu0 %29464  ;;  %v29471_v2 = vpop.permute.xlu1 %29470 }
 0x918   :  { %v29491_v60 = vsel %vm1342_vm4, %v40220_v15, %v40229_v62 }
 0x919   :  { %v29530_v16 = vmax.f32 %v40052_v46, %v29491_v60 }
 0x91b   :  { %v40241_v10 = vpop.permute.xlu0 %29566  ;;  %v29573_v34 = vpop.permute.xlu1 %29572 }
 0x91c   :  { %v29593_v3 = vsel %vm6648_vm12, %v40208_v58, %v40241_v10 }
 0x91d   :  { %v29632_v32 = vmax.f32 %v29530_v16, %v29593_v3 }
 0x91f   :  { %v40247_v44 = vpop.permute.xlu0 %29668  ;;  %v29675_v31 = vpop.permute.xlu1 %29674 }
 0x920   :  { %v29695_v28 = vsel %vm7976_vm14, %v40216_v22, %v40247_v44 }
 0x921   :  { %v29734_v47 = vmax.f32 %v29632_v32, %v29695_v28 }
 0x923   :  { %v29764_v52 = vadd.f32 %v40182_v56, %v29734_v47  ;;  %v29449_v24 = vpop.permute.xlu0 %29448  ;;  %v40254_v14 = vpop.permute.xlu1 %29478 }
 0x924   :  { %v29537_v37 = vmax.f32 %v40086_v48, %v40254_v14  ;;  %v29485_v60 = vsel %vm1342_vm4, %v29449_v24, %v40222_v23 }
 0x925   :  { %v29784_v40 = vmax.f32 %v29764_v52, 0.0  ;;  %v29523_v28 = vmax.f32 %v40064_v26, %v29485_v60 }
 0x927   :  { %v29551_v1 = vpop.permute.xlu0 %29550  ;;  %v40256_v49 = vpop.permute.xlu1 %29580  ;;  %v34230_v42 = vpack.i.bf16 %v29784_v40, %v29774_v5 }
 0x928   :  { %v29639_v63 = vmax.f32 %v29537_v37, %v40256_v49 }
 0x929   :  { %34231 = vrot.lane.b32.xlu0 %v34230_v42, %s34776_s22  ;;  %34221 = vrot.lane.b32.xlu1 %v34230_v42, %s34775_s21 }
 0x92b   :  { %v29653_v29 = vpop.permute.xlu0 %29652  ;;  %v40260_v12 = vpop.permute.xlu1 %29682 }
 0x92c   :  { %v29741_v8 = vmax.f32 %v29639_v63, %v40260_v12 }
 0x92d   :  { %34226 = vrot.lane.b32.xlu1 %v34230_v42, %s34811_s28 }
 0x92e   :  { %v29771_v51 = vadd.f32 %v40182_v56, %v29741_v8 }
 0x92f   :  { %v40263_v25 = vpop.permute.xlu0 %29552  ;;  %v40265_v46 = vpop.permute.xlu1 %29456 }
 0x930   :  { %v29527_v39 = vmax.f32 %v40094_v45, %v40265_v46  ;;  %v29587_v16 = vsel %vm6648_vm12, %v29551_v1, %v40263_v25  ;;  %v29791_v40 = vmax.f32 %v29771_v51, 0.0 }
 0x931   :  { %34236 = vrot.lane.b32.xlu1 %v34230_v42, %s34822_s30  ;;  %v29625_v52 = vmax.f32 %v29523_v28, %v29587_v16 }
 0x933   :  { %v40271_v33 = vpop.permute.xlu0 %29654  ;;  %v40273_v61 = vpop.permute.xlu1 %29558 }
 0x934   :  { %v29629_v54 = vmax.f32 %v29527_v39, %v40273_v61  ;;  %v29689_v45 = vsel %vm7976_vm14, %v29653_v29, %v40271_v33 }
 0x935   :  { %34241 = vperm.xlu1 %34218, %v34230_v42   ;;  %v29727_v37 = vmax.f32 %v29625_v52, %v29689_v45 }
 0x937   :  { %v40281_v48 = vpop.permute.xlu0 %29472  ;;  %v40283_v3 = vpop.permute.xlu1 %29660  ;;  %v29757_v60 = vadd.f32 %v40184_v27, %v29727_v37 }
 0x938   :  { %v29731_v32 = vmax.f32 %v29629_v54, %v40283_v3  ;;  %v29494_v11 = vsel %vm1342_vm4, %v29471_v2, %v40281_v48 }
 0x939   :  { %v29533_v26 = vmax.f32 %v40072_v30, %v29494_v11  ;;  %v29777_v16 = vmax.f32 %v29757_v60, 0.0 }
 0x93a   :  { %v29761_v47 = vadd.f32 %v40184_v27, %v29731_v32 }
 0x93b   :  { %v40295_v24 = vpop.permute.xlu0 %29574  ;;  %v29439_v5 = vpop.permute.xlu1 %29438 }
 0x93c   :  { %v29781_v42 = vmax.f32 %v29761_v47, 0.0  ;;  %v29596_v1 = vsel %vm6648_vm12, %v29573_v34, %v40295_v24 }
 0x93d   :  { %v29635_v29 = vmax.f32 %v29533_v26, %v29596_v1 }
 0x93e   :  { %v40300_v63 = vpack.i.bf16 %v29791_v40, %v29781_v42  ;;  %v29481_v42 = vsel %vm1342_vm4, %v29439_v5, %v40190_v13 }
 0x93f   :  { %v40302_v8 = vpop.permute.xlu0 %29676  ;;  %v29459_v2 = vpop.permute.xlu1 %29458 }
 0x940   :  { %v29698_v39 = vsel %vm7976_vm14, %v29675_v31, %v40302_v8  ;;  %34271 = vrot.lane.b32.xlu0 %v40300_v63, %s34823_s4 }
 0x941   :  { %v29737_v54 = vmax.f32 %v29635_v29, %v29698_v39  ;;  %v29519_v29 = vmax.f32 %v40036_v4, %v29481_v42 }
 0x943   :  { %v29767_v34 = vadd.f32 %v40182_v56, %v29737_v54  ;;  %v29437_v51 = vpop.permute.xlu0 %29436  ;;  %v29561_v30 = vpop.permute.xlu1 %29560 }
 0x944   :  { %34276 = vrot.lane.b32.xlu0 %v40300_v63, %s34775_s21  ;;  %v29480_v39 = vsel %vm1342_vm4, %v29437_v51, %v29439_v5 }
 0x945   :  { %v29787_v32 = vmax.f32 %v29767_v34, 0.0 }
 0x947   :  { %v29539_v28 = vpop.permute.xlu0 %29538  ;;  %v29663_v45 = vpop.permute.xlu1 %29662  ;;  %v34245_v11 = vpack.i.bf16 %v29787_v32, %v29777_v16 }
 0x949   :  { %34246 = vrot.lane.b32.xlu1 %v34245_v11, %s34775_s21 }
 0x94b   :  { %v29641_v31 = vpop.permute.xlu0 %29640  ;;  %v29461_v47 = vpop.permute.xlu1 %29460 }
 0x94c   :  { %v29489_v60 = vsel %vm1342_vm4, %v29459_v2, %v29461_v47  ;;  %v29490_v54 = vsel %vm1342_vm4, %v29461_v47, %v40220_v15 }
 0x94d   :  { %34251 = vrot.lane.b32.xlu1 %v34245_v11, %s34811_s28  ;;  %v29528_v2 = vmax.f32 %v40041_v20, %v29489_v60  ;;  %v29529_v51 = vmax.f32 %v40050_v50, %v29490_v54 }
 0x94f   :  { %v29541_v52 = vpop.permute.xlu0 %29540  ;;  %v40314_v40 = vpop.permute.xlu1 %29444 }
 0x950   :  { %v29583_v26 = vsel %vm6648_vm12, %v29541_v52, %v40192_v36  ;;  %v29582_v34 = vsel %vm6648_vm12, %v29539_v28, %v29541_v52  ;;  %v29518_v36 = vmax.f32 %v40033_v0, %v29480_v39  ;;  %v29483_v28 = vsel %vm1342_vm4, %v40198_v53, %v40314_v40 }
 0x951   :  { %34256 = vrot.lane.b32.xlu1 %v34245_v11, %s34776_s22  ;;  %v29621_v16 = vmax.f32 %v29519_v29, %v29583_v26 }
 0x953   :  { %v29643_v1 = vpop.permute.xlu0 %29642  ;;  %v40319_v37 = vpop.permute.xlu1 %29546 }
 0x954   :  { %v29685_v13 = vsel %vm7976_vm14, %v29643_v1, %v40200_v35  ;;  %v29684_v15 = vsel %vm7976_vm14, %v29641_v31, %v29643_v1  ;;  %v29620_v35 = vmax.f32 %v29518_v36, %v29582_v34  ;;  %v29585_v20 = vsel %vm6648_vm12, %v40206_v18, %v40319_v37 }
 0x955   :  { %34261 = vrot.lane.b32.xlu1 %v34245_v11, %s34822_s30  ;;  %v29723_v47 = vmax.f32 %v29621_v16, %v29685_v13 }
 0x956   :  { %v29722_v26 = vmax.f32 %v29620_v35, %v29684_v15 }
 0x957   :  { %v29563_v32 = vpop.permute.xlu0 %29562  ;;  %v29649_v57 = vpop.permute.xlu1 %29648  ;;  %v29753_v31 = vadd.f32 %v40184_v27, %v29723_v47 }
 0x958   :  { %v29591_v4 = vsel %vm6648_vm12, %v29561_v30, %v29563_v32  ;;  %v29592_v5 = vsel %vm6648_vm12, %v29563_v32, %v40208_v58  ;;  %v29687_v29 = vsel %vm7976_vm14, %v40214_v43, %v29649_v57  ;;  %v29752_v54 = vadd.f32 %v40184_v27, %v29722_v26 }
 0x959   :  { %34266 = vperm.xlu1 %34218, %v34245_v11   ;;  %v29630_v52 = vmax.f32 %v29528_v2, %v29591_v4  ;;  %v29631_v0 = vmax.f32 %v29529_v51, %v29592_v5  ;;  %v29521_v11 = vmax.f32 %v40047_v7, %v29483_v28  ;;  %v29773_v34 = vmax.f32 %v29753_v31, 0.0 }
 0x95a   :  { %v29772_v15 = vmax.f32 %v29752_v54, 0.0 }
 0x95b   :  { %v29665_v42 = vpop.permute.xlu0 %29664  ;;  %v29467_v30 = vpop.permute.xlu1 %29466  ;;  %v29623_v39 = vmax.f32 %v29521_v11, %v29585_v20 }
 0x95c   :  { %v29693_v50 = vsel %vm7976_vm14, %v29663_v45, %v29665_v42  ;;  %v29694_v58 = vsel %vm7976_vm14, %v29665_v42, %v40216_v22  ;;  %v29492_v18 = vsel %vm1342_vm4, %v40229_v62, %v29467_v30 }
 0x95d   :  { %v29732_v1 = vmax.f32 %v29630_v52, %v29693_v50  ;;  %v29733_v53 = vmax.f32 %v29631_v0, %v29694_v58  ;;  %34281 = vrot.lane.b32.xlu1 %v40300_v63, %s34811_s28  ;;  %v29725_v16 = vmax.f32 %v29623_v39, %v29687_v29  ;;  %v29531_v43 = vmax.f32 %v40060_v6, %v29492_v18 }
 0x95f   :  { %v29762_v45 = vadd.f32 %v40182_v56, %v29732_v1  ;;  %v29763_v22 = vadd.f32 %v40182_v56, %v29733_v53  ;;  %v29447_v60 = vpop.permute.xlu0 %29446  ;;  %v29569_v7 = vpop.permute.xlu1 %29568 }
 0x960   :  { %v29594_v13 = vsel %vm6648_vm12, %v40241_v10, %v29569_v7  ;;  %v29755_v10 = vadd.f32 %v40184_v27, %v29725_v16  ;;  %v29484_v6 = vsel %vm1342_vm4, %v40314_v40, %v29447_v60 }
 0x961   :  { %v29783_v32 = vmax.f32 %v29763_v22, 0.0  ;;  %34286 = vrot.lane.b32.xlu1 %v40300_v63, %s34776_s22  ;;  %v29782_v62 = vmax.f32 %v29762_v45, 0.0  ;;  %v29633_v36 = vmax.f32 %v29531_v43, %v29594_v13  ;;  %v29522_v42 = vmax.f32 %v40054_v55, %v29484_v6 }
 0x962   :  { %v29775_v0 = vmax.f32 %v29755_v10, 0.0 }
 0x963   :  { %v29549_v4 = vpop.permute.xlu0 %29548  ;;  %v29671_v5 = vpop.permute.xlu1 %29670  ;;  %v40364_v2 = vpack.i.bf16 %v29783_v32, %v29773_v34  ;;  %v34305_v52 = vpack.i.bf16 %v29782_v62, %v29772_v15 }
 0x964   :  { %v29696_v51 = vsel %vm7976_vm14, %v40247_v44, %v29671_v5  ;;  %v29586_v44 = vsel %vm6648_vm12, %v40319_v37, %v29549_v4 }
 0x965   :  { %v29735_v47 = vmax.f32 %v29633_v36, %v29696_v51  ;;  %34296 = vrot.lane.b32.xlu1 %v40364_v2, %s34822_s30  ;;  %34291 = vrot.lane.b32.xlu0 %v40364_v2, %s34776_s22  ;;  %v29624_v50 = vmax.f32 %v29522_v42, %v29586_v44 }
 0x967   :  { %v29765_v63 = vadd.f32 %v40182_v56, %v29735_v47  ;;  %v29651_v35 = vpop.permute.xlu0 %29650  ;;  %v29469_v28 = vpop.permute.xlu1 %29468 }
 0x968   :  { %v29688_v20 = vsel %vm7976_vm14, %v29649_v57, %v29651_v35  ;;  %v29493_v40 = vsel %vm1342_vm4, %v29467_v30, %v29469_v28 }
 0x969   :  { %v29785_v26 = vmax.f32 %v29765_v63, 0.0  ;;  %34306 = vrot.lane.b32.xlu0 %v34305_v52, %s34811_s28  ;;  %34301 = vrot.lane.b32.xlu1 %v34305_v52, %s34775_s21  ;;  %v29726_v37 = vmax.f32 %v29624_v50, %v29688_v20  ;;  %v29532_v53 = vmax.f32 %v40062_v38, %v29493_v40 }
 0x96b   :  { %v29455_v58 = vpop.permute.xlu0 %29454  ;;  %v29571_v11 = vpop.permute.xlu1 %29570  ;;  %v40383_v31 = vpack.i.bf16 %v29785_v26, %v29775_v0  ;;  %v29756_v18 = vadd.f32 %v40184_v27, %v29726_v37 }
 0x96c   :  { %v29595_v1 = vsel %vm6648_vm12, %v29569_v7, %v29571_v11  ;;  %v29488_v54 = vsel %vm1342_vm4, %v29455_v58, %v40265_v46 }
 0x96d   :  { %34326 = vrot.lane.b32.xlu0 %v40364_v2, %s34811_s28  ;;  %34311 = vrot.lane.b32.xlu1 %v34305_v52, %s34776_s22  ;;  %v29634_v55 = vmax.f32 %v29532_v53, %v29595_v1  ;;  %v29776_v60 = vmax.f32 %v29756_v18, 0.0  ;;  %v29526_v43 = vmax.f32 %v40082_v21, %v29488_v54 }
 0x96f   :  { %v29557_v29 = vpop.permute.xlu0 %29556  ;;  %v29673_v57 = vpop.permute.xlu1 %29672 }
 0x970   :  { %v29697_v30 = vsel %vm7976_vm14, %v29671_v5, %v29673_v57  ;;  %v29590_v32 = vsel %vm6648_vm12, %v29557_v29, %v40273_v61 }
 0x971   :  { %v29736_v39 = vmax.f32 %v29634_v55, %v29697_v30  ;;  %34316 = vrot.lane.b32.xlu1 %v34305_v52, %s34822_s30  ;;  %34336 = vrot.lane.b32.xlu0 %v40383_v31, %s34775_s21  ;;  %v29628_v4 = vmax.f32 %v29526_v43, %v29590_v32 }
 0x973   :  { %v29766_v38 = vadd.f32 %v40182_v56, %v29736_v39  ;;  %v29659_v45 = vpop.permute.xlu0 %29658  ;;  %v29453_v22 = vpop.permute.xlu1 %29452 }
 0x974   :  { %v29692_v62 = vsel %vm7976_vm14, %v29659_v45, %v40283_v3  ;;  %v29486_v51 = vsel %vm1342_vm4, %v40222_v23, %v29453_v22  ;;  %v29487_v15 = vsel %vm1342_vm4, %v29453_v22, %v29455_v58 }
 0x975   :  { %v29786_v7 = vmax.f32 %v29766_v38, 0.0  ;;  %34321 = vrot.lane.b32.xlu1 %v40364_v2, %s34775_s21  ;;  %34341 = vrot.lane.b32.xlu0 %v40383_v31, %s34811_s28  ;;  %v29730_v21 = vmax.f32 %v29628_v4, %v29692_v62  ;;  %v29524_v3 = vmax.f32 %v40070_v9, %v29486_v51  ;;  %v29525_v63 = vmax.f32 %v40074_v19, %v29487_v15 }
 0x977   :  { %v29477_v13 = vpop.permute.xlu0 %29476  ;;  %v29555_v34 = vpop.permute.xlu1 %29554  ;;  %v34350_v16 = vpack.i.bf16 %v29786_v7, %v29776_v60  ;;  %v29760_v28 = vadd.f32 %v40184_v27, %v29730_v21 }
 0x978   :  { %v29497_v36 = vsel %vm1342_vm4, %v29477_v13, %v40254_v14  ;;  %v29588_v23 = vsel %vm6648_vm12, %v40263_v25, %v29555_v34  ;;  %v29589_v35 = vsel %vm6648_vm12, %v29555_v34, %v29557_v29 }
 0x979   :  { %34331 = vperm.xlu1 %34218, %v34305_v52   ;;  %34346 = vrot.lane.b32.xlu0 %v40383_v31, %s34776_s22  ;;  %v29536_v10 = vmax.f32 %v40092_v41, %v29497_v36  ;;  %v29626_v44 = vmax.f32 %v29524_v3, %v29588_v23  ;;  %v29627_v25 = vmax.f32 %v29525_v63, %v29589_v35  ;;  %v29780_v50 = vmax.f32 %v29760_v28, 0.0 }
 0x97b   :  { %v29579_v46 = vpop.permute.xlu0 %29578  ;;  %v29657_v5 = vpop.permute.xlu1 %29656 }
 0x97c   :  { %v29599_v61 = vsel %vm6648_vm12, %v29579_v46, %v40256_v49  ;;  %v29690_v19 = vsel %vm7976_vm14, %v40271_v33, %v29657_v5  ;;  %v29691_v0 = vsel %vm7976_vm14, %v29657_v5, %v29659_v45 }
 0x97d   :  { %34351 = vrot.lane.b32.xlu0 %v34350_v16, %s34823_s4  ;;  %v29638_v47 = vmax.f32 %v29536_v10, %v29599_v61  ;;  %v29728_v58 = vmax.f32 %v29626_v44, %v29690_v19  ;;  %v29729_v33 = vmax.f32 %v29627_v25, %v29691_v0 }
 0x97f   :  { %v29681_v14 = vpop.permute.xlu0 %29680  ;;  %v29475_v6 = vpop.permute.xlu1 %29474  ;;  %v29759_v30 = vadd.f32 %v40184_v27, %v29729_v33 }
 0x980   :  { %v29701_v49 = vsel %vm7976_vm14, %v29681_v14, %v40260_v12  ;;  %v29495_v52 = vsel %vm1342_vm4, %v40281_v48, %v29475_v6  ;;  %v29496_v9 = vsel %vm1342_vm4, %v29475_v6, %v29477_v13 }
 0x981   :  { %v29740_v41 = vmax.f32 %v29638_v47, %v29701_v49  ;;  %34356 = vrot.lane.b32.xlu0 %v34350_v16, %s34775_s21  ;;  %v29534_v26 = vmax.f32 %v40080_v17, %v29495_v52  ;;  %v29535_v20 = vmax.f32 %v40084_v59, %v29496_v9  ;;  %v29779_v60 = vmax.f32 %v29759_v30, 0.0  ;;  %v30525_v30 = vld [vmem:[%s41202_s5 + $0x8] sm:$0xff] }
 0x982   :  { %30784 = vmatprep.mubr.f32.mxu1 %v30525_v30 }
 0x983   :  { %v29770_v42 = vadd.f32 %v40182_v56, %v29740_v41  ;;  %v29577_v12 = vpop.permute.xlu1 %29576 }
 0x984   :  { %v29597_v48 = vsel %vm6648_vm12, %v40295_v24, %v29577_v12  ;;  %v29598_v40 = vsel %vm6648_vm12, %v29577_v12, %v29579_v46  ;;  %v29758_v24 = vadd.f32 %v40184_v27, %v29728_v58  ;;  %vm30674_vm12 = vcmask 130048  }
 0x985   :  { %v29790_v11 = vmax.f32 %v29770_v42, 0.0  ;;  %34361 = vrot.lane.b32.xlu0 %v34350_v16, %s34811_s28  ;;  %v29636_v1 = vmax.f32 %v29534_v26, %v29597_v48  ;;  %v29637_v37 = vmax.f32 %v29535_v20, %v29598_v40  ;;  %v29792_v20 = vlaneseq }
 0x986   :  { %v29778_v38 = vmax.f32 %v29758_v24, 0.0 }
 0x987   :  { %v29679_v53 = vpop.permute.xlu1 %29678  ;;  %v40440_v55 = vpack.i.bf16 %v29790_v11, %v29780_v50  ;;  %v40494_v40 = vand.u32 127, %v29792_v20 }
 0x988   :  { %v29699_v17 = vsel %vm7976_vm14, %v40302_v8, %v29679_v53  ;;  %v29700_v59 = vsel %vm7976_vm14, %v29679_v53, %v29681_v14  ;;  %vm31270_vm14 = vcmask 687104  }
 0x989   :  { %v29738_v29 = vmax.f32 %v29636_v1, %v29699_v17  ;;  %v29739_v57 = vmax.f32 %v29637_v37, %v29700_v59  ;;  %34366 = vrot.lane.b32.xlu0 %v34350_v16, %s34776_s22  ;;  %vm29908_vm4 = vcmp.eq.s32.totalorder %v40494_v40, 0  ;;  %vm30273_vm6 = vcmp.eq.s32.totalorder %v40494_v40, 1  ;;  %v30535_v40 = vld [vmem:[%s41202_s5 + $0x58] sm:$0xff] }
 0x98b   :  { %v29768_v18 = vadd.f32 %v40182_v56, %v29738_v29  ;;  %v29769_v39 = vadd.f32 %v40182_v56, %v29739_v57 }
 0x98d   :  { %v29788_v45 = vmax.f32 %v29768_v18, 0.0  ;;  %v29789_v22 = vmax.f32 %v29769_v39, 0.0  ;;  %v34824_v18 = vmov 0.0|0.0  }
 0x98e   :  { %33209 = vmatprep.subr.bf16.mxu0 %v34824_v18 }
 0x98f   :  { %v34375_v7 = vpack.i.bf16 %v29788_v45, %v29778_v38  ;;  %v34415_v8 = vpack.i.bf16 %v29789_v22, %v29779_v60 }
 0x991   :  { %34376 = vrot.lane.b32.xlu0 %v34375_v7, %s34822_s30  ;;  %34371 = vrot.lane.b32.xlu1 %v34375_v7, %s34776_s22 }
 0x995   :  { %34391 = vrot.lane.b32.xlu0 %v40440_v55, %s34775_s21  ;;  %34381 = vrot.lane.b32.xlu1 %v34375_v7, %s34775_s21 }
 0x999   :  { %34411 = vrot.lane.b32.xlu0 %v40440_v55, %s34776_s22  ;;  %34386 = vrot.lane.b32.xlu1 %v34375_v7, %s34811_s28 }
 0x99b   :  { %v34232_v56 = vpop.permute.xlu0 %34231  ;;  %v34222_v27 = vpop.permute.xlu1 %34221 }
 0x99d   :  { %34416 = vrot.lane.b32.xlu0 %v34415_v8, %s34775_s21  ;;  %34396 = vrot.lane.b32.xlu1 %v40440_v55, %s34811_s28 }
 0x99f   :  { %v34227_v54 = vpop.permute.xlu1 %34226 }
 0x9a1   :  { %34421 = vrot.lane.b32.xlu0 %v34415_v8, %s34811_s28  ;;  %34401 = vperm.xlu1 %34218, %v40364_v2  }
 0x9a3   :  { %v34237_v13 = vpop.permute.xlu1 %34236 }
 0x9a5   :  { %34436 = vrot.lane.b32.xlu0 %v34415_v8, %s34822_s30  ;;  %34406 = vperm.xlu1 %34218, %v34375_v7  }
 0x9a9   :  { %34441 = vperm.xlu0 %34219, %v34415_v8   ;;  %34426 = vrot.lane.b32.xlu1 %v34415_v8, %s34776_s22 }
 0x9ad   :  { %34456 = vperm.xlu0 %34219, %v34232_v56   ;;  %34431 = vperm.xlu1 %34218, %v40383_v31  }
 0x9b1   :  { %34446 = vperm.xlu1 %34218, %v34222_v27  }
 0x9b2   :  { %v34272_v34 = vpop.permute.xlu0 %34271 }
 0x9b3   :  { %34486 = vrot.lane.b32.xlu0 %v34272_v34, %s34775_s21 }
 0x9b4   :  { %v40468_v32 = vpop.permute.xlu1 %34241 }
 0x9b5   :  { %34451 = vperm.xlu1 %34218, %v34227_v54  }
 0x9b6   :  { %v40466_v16 = vpop.permute.xlu0 %34276 }
 0x9b7   :  { %34491 = vrot.lane.b32.xlu0 %v40466_v16, %s34775_s21 }
 0x9b9   :  { %34461 = vperm.xlu1 %34218, %v34237_v13  }
 0x9bb   :  { %v34247_v2 = vpop.permute.xlu1 %34246 }
 0x9bd   :  { %34466 = vperm.xlu1 %34218, %v34247_v2  }
 0x9bf   :  { %v34252_v43 = vpop.permute.xlu1 %34251 }
 0x9c1   :  { %34471 = vperm.xlu1 %34218, %v34252_v43  }
 0x9c3   :  { %v34257_v62 = vpop.permute.xlu1 %34256 }
 0x9c5   :  { %34476 = vperm.xlu1 %34218, %v34257_v62  }
 0x9c7   :  { %v34262_v31 = vpop.permute.xlu1 %34261 }
 0x9c9   :  { %34481 = vperm.xlu1 %34218, %v34262_v31  }
 0x9d7   :  { %v34292_v36 = vpop.permute.xlu0 %34291 }
 0x9d8   :  { %v40473_v4 = vpop.permute.xlu1 %34266 }
 0x9db   :  { %v34307_v46 = vpop.permute.xlu0 %34306 }
 0x9dc   :  { %v34282_v5 = vpop.permute.xlu1 %34281 }
 0x9dd   :  { %34496 = vrot.lane.b32.xlu0 %v34282_v5, %s34775_s21 }
 0x9df   :  { %v34327_v51 = vpop.permute.xlu0 %34326 }
 0x9e0   :  { %v34287_v61 = vpop.permute.xlu1 %34286 }
 0x9e1   :  { %34501 = vperm.xlu0 %34219, %v34292_v36  }
 0x9e3   :  { %v40476_v21 = vpop.permute.xlu0 %34336 }
 0x9e4   :  { %v34297_v15 = vpop.permute.xlu1 %34296 }
 0x9e5   :  { %34541 = vrot.lane.b32.xlu0 %v40476_v21, %s34775_s21  ;;  %34506 = vperm.xlu1 %34218, %v34297_v15  }
 0x9e7   :  { %v34342_v10 = vpop.permute.xlu0 %34341 }
 0x9e8   :  { %v34302_v3 = vpop.permute.xlu1 %34301 }
 0x9e9   :  { %34546 = vrot.lane.b32.xlu0 %v34342_v10, %s34775_s21  ;;  %34511 = vperm.xlu1 %34218, %v34302_v3   ;;  %v34244_v3 = vunpack.i.h.bf16 %v40468_v32 }
 0x9eb   :  { %v34347_v47 = vpop.permute.xlu0 %34346 }
 0x9ec   :  { %v34312_v14 = vpop.permute.xlu1 %34311 }
 0x9ed   :  { %34551 = vrot.lane.b32.xlu0 %v34347_v47, %s34775_s21  ;;  %34516 = vperm.xlu1 %34218, %v34307_v46   ;;  %v34243_v47 = vunpack.i.l.bf16 %v40468_v32  ;;  %v30130_v32 = vsel %vm29908_vm4, %v34244_v3, 0.0 }
 0x9ef   :  { %v34352_v6 = vpop.permute.xlu0 %34351 }
 0x9f0   :  { %v34317_v63 = vpop.permute.xlu1 %34316 }
 0x9f1   :  { %34556 = vrot.lane.b32.xlu0 %v34352_v6, %s34775_s21  ;;  %34521 = vperm.xlu1 %34218, %v34312_v14  }
 0x9f3   :  { %v40482_v23 = vpop.permute.xlu0 %34356 }
 0x9f4   :  { %v34322_v35 = vpop.permute.xlu1 %34321 }
 0x9f5   :  { %34561 = vrot.lane.b32.xlu0 %v40482_v23, %s34775_s21  ;;  %34526 = vperm.xlu1 %34218, %v34317_v63  }
 0x9f7   :  { %v34362_v49 = vpop.permute.xlu0 %34361 }
 0x9f8   :  { %v40488_v28 = vpop.permute.xlu1 %34331 }
 0x9f9   :  { %34566 = vrot.lane.b32.xlu0 %v34362_v49, %s34775_s21  ;;  %34531 = vperm.xlu1 %34218, %v34322_v35   ;;  %v34334_v15 = vunpack.i.h.bf16 %v40488_v28  ;;  %v34333_v10 = vunpack.i.l.bf16 %v40488_v28  ;;  %v34268_v49 = vunpack.i.l.bf16 %v40473_v4 }
 0x9fb   :  { %v34367_v41 = vpop.permute.xlu0 %34366  ;;  %v30110_v14 = vsel %vm29908_vm4, %v34334_v15, 0.0  ;;  %v30109_v6 = vsel %vm29908_vm4, %v34333_v10, 0.0 }
 0x9fd   :  { %34536 = vperm.xlu1 %34218, %v34327_v51  }
 0xa03   :  { %v34377_v52 = vpop.permute.xlu0 %34376  ;;  %v34372_v9 = vpop.permute.xlu1 %34371 }
 0xa04   :  { %34571 = vperm.xlu0 %34219, %v34372_v9   ;;  %v30129_v9 = vsel %vm29908_vm4, %v34243_v47, 0.0 }
 0xa07   :  { %v34392_v19 = vpop.permute.xlu0 %34391  ;;  %v34382_v44 = vpop.permute.xlu1 %34381 }
 0xa08   :  { %34576 = vperm.xlu0 %34219, %v34377_v52   ;;  %34581 = vperm.xlu1 %34218, %v34382_v44  }
 0xa0b   :  { %v34412_v25 = vpop.permute.xlu0 %34411  ;;  %v34387_v0 = vpop.permute.xlu1 %34386 }
 0xa0c   :  { %34586 = vrot.lane.b32.xlu0 %v34392_v19, %s34775_s21  ;;  %34626 = vperm.xlu1 %34218, %v34387_v0  }
 0xa0f   :  { %v34397_v42 = vpop.permute.xlu1 %34396  ;;  %v34417_v12 = vpop.permute.xlu0 %34416 }
 0xa10   :  { %34591 = vrot.lane.b32.xlu0 %v34397_v42, %s34775_s21  ;;  %34636 = vrot.lane.b32.xlu1 %v34287_v61, %s34775_s21 }
 0xa13   :  { %v34422_v26 = vpop.permute.xlu0 %34421 }
 0xa14   :  { %34596 = vrot.lane.b32.xlu0 %v34412_v25, %s34775_s21  ;;  %34646 = vperm.xlu1 %34218, %v34392_v19   ;;  %v30474_v19 = vsel %vm30273_vm6, %v34268_v49, %v30109_v6 }
 0xa17   :  { %v34437_v24 = vpop.permute.xlu0 %34436 }
 0xa18   :  { %34601 = vperm.xlu0 %34219, %v34417_v12  }
 0xa1c   :  { %34606 = vperm.xlu0 %34219, %v34422_v26  }
 0xa20   :  { %v34402_v48 = vpop.permute.xlu1 %34401 }
 0xa21   :  { %v34404_v50 = vunpack.i.h.bf16 %v34402_v48  ;;  %v34403_v58 = vunpack.i.l.bf16 %v34402_v48 }
 0xa23   :  { %v30120_v37 = vsel %vm29908_vm4, %v34404_v50, 0.0  ;;  %v30119_v53 = vsel %vm29908_vm4, %v34403_v58, 0.0 }
 0xa24   :  { %v34407_v11 = vpop.permute.xlu1 %34406 }
 0xa25   :  { %v34409_v33 = vunpack.i.h.bf16 %v34407_v11  ;;  %v34408_v1 = vunpack.i.l.bf16 %v34407_v11 }
 0xa27   :  { %v40504_v17 = vsel %vm30273_vm6, %v34408_v1, %v30119_v53  ;;  %v40508_v59 = vsel %vm30273_vm6, %v34409_v33, %v30120_v37 }
 0xa28   :  { %v33172_v29 = vpack.c.bf16 %v40508_v59, %v40504_v17  ;;  %v34427_v57 = vpop.permute.xlu1 %34426  ;;  %v40521_v38 = vpop.permute.xlu0 %34441  ;;  %v30587_v17 = vld [vmem:[%s41203_s6 + $0x18] sm:$0xff] }
 0xa29   :  { %34611 = vperm.xlu0 %34219, %v34427_v57   ;;  %v34444_v25 = vunpack.i.h.bf16 %v40521_v38 }
 0xa2c   :  { %v40519_v39 = vpop.permute.xlu1 %34431  ;;  %v40525_v22 = vpop.permute.xlu0 %34456 }
 0xa2d   :  { %34616 = vperm.xlu0 %34219, %v34437_v24  }
 0xa30   :  { %v40523_v45 = vpop.permute.xlu1 %34446  ;;  %v40529_v60 = vpop.permute.xlu0 %34486 }
 0xa31   :  { %34621 = vperm.xlu0 %34219, %v40440_v55  }
 0xa34   :  { %v40527_v55 = vpop.permute.xlu1 %34451  ;;  %v40533_v8 = vpop.permute.xlu0 %34491 }
 0xa35   :  { %34631 = vrot.lane.b32.xlu0 %v34367_v41, %s34775_s21 }
 0xa38   :  { %v40531_v7 = vpop.permute.xlu1 %34461 }
 0xa39   :  { %34641 = vperm.xlu0 %34219, %v40476_v21  }
 0xa3c   :  { %v40535_v56 = vpop.permute.xlu1 %34466 }
 0xa3d   :  { %v34469_v57 = vunpack.i.h.bf16 %v40535_v56  ;;  %v34468_v30 = vunpack.i.l.bf16 %v40535_v56 }
 0xa40   :  { %v40539_v54 = vpop.permute.xlu1 %34471 }
 0xa41   :  { %v34474_v47 = vunpack.i.h.bf16 %v40539_v54 }
 0xa44   :  { %v40541_v2 = vpop.permute.xlu1 %34476 }
 0xa48   :  { %v40543_v62 = vpop.permute.xlu1 %34481 }
 0xa4f   :  { %v40537_v27 = vpop.permute.xlu0 %34496 }
 0xa60   :  { %v34502_v13 = vpop.permute.xlu0 %34501 }
 0xa61   :  { %v34504_v63 = vunpack.i.h.bf16 %v34502_v13  ;;  %v34503_v35 = vunpack.i.l.bf16 %v34502_v13 }
 0xa63   :  { %v30126_v42 = vsel %vm29908_vm4, %v34504_v63, 0.0  ;;  %v30125_v12 = vsel %vm29908_vm4, %v34503_v35, 0.0 }
 0xa64   :  { %v34542_v34 = vpop.permute.xlu0 %34541  ;;  %v34507_v36 = vpop.permute.xlu1 %34506 }
 0xa65   :  { %34651 = vperm.xlu0 %34219, %v34542_v34   ;;  %v34509_v48 = vunpack.i.h.bf16 %v34507_v36  ;;  %v34508_v50 = vunpack.i.l.bf16 %v34507_v36 }
 0xa68   :  { %v34547_v43 = vpop.permute.xlu0 %34546  ;;  %v34512_v51 = vpop.permute.xlu1 %34511 }
 0xa69   :  { %34656 = vperm.xlu0 %34219, %v34547_v43   ;;  %v34514_v41 = vunpack.i.h.bf16 %v34512_v51  ;;  %v34513_v52 = vunpack.i.l.bf16 %v34512_v51  ;;  %v30127_v51 = vsel %vm29908_vm4, %v34508_v50, 0.0 }
 0xa6b   :  { %v30112_v58 = vsel %vm29908_vm4, %v34514_v41, 0.0  ;;  %v30111_v11 = vsel %vm29908_vm4, %v34513_v52, 0.0 }
 0xa6c   :  { %v34552_v31 = vpop.permute.xlu0 %34551  ;;  %v34517_v21 = vpop.permute.xlu1 %34516  ;;  %v30476_v56 = vsel %vm30273_vm6, %v34468_v30, %v30111_v11 }
 0xa6d   :  { %34661 = vperm.xlu0 %34219, %v34552_v31   ;;  %v34519_v33 = vunpack.i.h.bf16 %v34517_v21  ;;  %v34518_v1 = vunpack.i.l.bf16 %v34517_v21 }
 0xa6f   :  { %v30114_v21 = vsel %vm29908_vm4, %v34519_v33, 0.0  ;;  %v30113_v15 = vsel %vm29908_vm4, %v34518_v1, 0.0 }
 0xa70   :  { %v34557_v46 = vpop.permute.xlu0 %34556  ;;  %v40556_v28 = vpop.permute.xlu1 %34521  ;;  %v30479_v49 = vsel %vm30273_vm6, %v34474_v47, %v30114_v21 }
 0xa71   :  { %34666 = vperm.xlu0 %34219, %v34557_v46   ;;  %v30495_v46 = vsel %vm30273_vm6, %v34444_v25, %v30130_v32 }
 0xa74   :  { %v34562_v5 = vpop.permute.xlu0 %34561 }
 0xa75   :  { %34691 = vperm.xlu0 %34219, %v40482_v23   ;;  %v34269_v23 = vunpack.i.h.bf16 %v40473_v4  ;;  %v34443_v4 = vunpack.i.l.bf16 %v40521_v38  ;;  %v34527_v38 = vpop.permute.xlu1 %34526 }
 0xa77   :  { %v30475_v44 = vsel %vm30273_vm6, %v34269_v23, %v30110_v14  ;;  %v30494_v36 = vsel %vm30273_vm6, %v34443_v4, %v30129_v9  ;;  %v34473_v14 = vunpack.i.l.bf16 %v40539_v54  ;;  %v34524_v54 = vunpack.i.h.bf16 %v40556_v28 }
 0xa78   :  { %v34567_v61 = vpop.permute.xlu0 %34566  ;;  %v33152_v24 = vpack.c.bf16 %v30475_v44, %v30474_v19  ;;  %v33158_v52 = vpack.c.bf16 %v30495_v46, %v30494_v36  ;;  %v34523_v19 = vunpack.i.l.bf16 %v40556_v28  ;;  %v34449_v4 = vunpack.i.h.bf16 %v40523_v45 }
 0xa79   :  { %34701 = vperm.xlu0 %34219, %v34562_v5   ;;  %v30128_v5 = vsel %vm29908_vm4, %v34509_v48, 0.0  ;;  %v30478_v23 = vsel %vm30273_vm6, %v34473_v14, %v30113_v15  ;;  %v40608_v41 = vpop.permute.xlu1 %34531  ;;  %v34479_v48 = vunpack.i.h.bf16 %v40541_v2  ;;  %v34478_v28 = vunpack.i.l.bf16 %v40541_v2 }
 0xa7a   :  { %v33160_v9 = vpack.c.bf16 %v30479_v49, %v30478_v23  ;;  %v30132_v11 = vsel %vm29908_vm4, %v34449_v4, 0.0  ;;  %v34459_v14 = vunpack.i.h.bf16 %v40525_v22  ;;  %v34463_v23 = vunpack.i.l.bf16 %v40531_v7 }
 0xa7b   :  { %v34534_v49 = vunpack.i.h.bf16 %v40608_v41 }
 0xa7c   :  { %v30137_v4 = vsel %vm29908_vm4, %v34463_v23, 0.0 }
 0xa7d   :  { %34711 = vperm.xlu0 %34219, %v34567_v61   ;;  %v30477_v61 = vsel %vm30273_vm6, %v34469_v57, %v30112_v58  ;;  %v40612_v44 = vpop.permute.xlu1 %34536 }
 0xa7e   :  { %v33156_v35 = vpack.c.bf16 %v30477_v61, %v30476_v56 }
 0xa83   :  { %v34572_v0 = vpop.permute.xlu0 %34571 }
 0xa84   :  { %v34574_v26 = vunpack.i.h.bf16 %v34572_v0  ;;  %v34573_v20 = vunpack.i.l.bf16 %v34572_v0  ;;  %v34448_v0 = vunpack.i.l.bf16 %v40523_v45 }
 0xa86   :  { %v30490_v37 = vsel %vm30273_vm6, %v34573_v20, %v30125_v12  ;;  %v30491_v53 = vsel %vm30273_vm6, %v34574_v26, %v30126_v42  ;;  %v30116_v42 = vsel %vm29908_vm4, %v34524_v54, 0.0  ;;  %v30115_v12 = vsel %vm29908_vm4, %v34523_v19, 0.0 }
 0xa87   :  { %v34577_v13 = vpop.permute.xlu0 %34576  ;;  %v33150_v34 = vpack.c.bf16 %v30491_v53, %v30490_v37  ;;  %v34529_v26 = vunpack.i.h.bf16 %v34527_v38  ;;  %v34528_v20 = vunpack.i.l.bf16 %v34527_v38  ;;  %v40622_v50 = vpop.permute.xlu1 %34581  ;;  %v30131_v45 = vsel %vm29908_vm4, %v34448_v0, 0.0 }
 0xa88   :  { %v34579_v43 = vunpack.i.h.bf16 %v34577_v13  ;;  %v34578_v31 = vunpack.i.l.bf16 %v34577_v13  ;;  %v34454_v37 = vunpack.i.h.bf16 %v40527_v55  ;;  %v34453_v53 = vunpack.i.l.bf16 %v40527_v55 }
 0xa89   :  { %33151 = vmatprep.subr.bf16.mxu1 %v33150_v34  ;;  %v30481_v2 = vsel %vm30273_vm6, %v34479_v48, %v30116_v42  ;;  %v30118_v57 = vsel %vm29908_vm4, %v34529_v26, 0.0  ;;  %v30117_v30 = vsel %vm29908_vm4, %v34528_v20, 0.0  ;;  %v34484_v55 = vunpack.i.h.bf16 %v40543_v62 }
 0xa8a   :  { %33153 = vmatpush3.bf16.msra.mxu1 %v33152_v24  ;;  %v30492_v10 = vsel %vm30273_vm6, %v34578_v31, %v30127_v51  ;;  %v30493_v3 = vsel %vm30273_vm6, %v34579_v43, %v30128_v5  ;;  %v30480_v24 = vsel %vm30273_vm6, %v34478_v28, %v30115_v12  ;;  %v34483_v34 = vunpack.i.l.bf16 %v40543_v62 }
 0xa8b   :  { %v34587_v6 = vpop.permute.xlu0 %34586  ;;  %v33154_v63 = vpack.c.bf16 %v30493_v3, %v30492_v10  ;;  %v33164_v36 = vpack.c.bf16 %v30481_v2, %v30480_v24  ;;  %v30134_v51 = vsel %vm29908_vm4, %v34454_v37, 0.0  ;;  %v30133_v56 = vsel %vm29908_vm4, %v34453_v53, 0.0  ;;  %v40653_v62 = vpop.permute.xlu1 %34626 }
 0xa8c   :  { %34671 = vperm.xlu1 %34218, %v34587_v6   ;;  %v30482_v61 = vsel %vm30273_vm6, %v34483_v34, %v30117_v30  ;;  %v30483_v21 = vsel %vm30273_vm6, %v34484_v55, %v30118_v57  ;;  %v34458_v6 = vunpack.i.l.bf16 %v40525_v22  ;;  %v34584_v54 = vunpack.i.h.bf16 %v40622_v50 }
 0xa8d   :  { %33155 = vmatprep.subr.bf16.mxu1 %v33154_v63  ;;  %v33168_v3 = vpack.c.bf16 %v30483_v21, %v30482_v61  ;;  %v34464_v63 = vunpack.i.h.bf16 %v40531_v7  ;;  %v34583_v19 = vunpack.i.l.bf16 %v40622_v50  ;;  %v34433_v7 = vunpack.i.l.bf16 %v40519_v39  ;;  %v30585_v50 = vld [vmem:[%s41203_s6 + $0x8] sm:$0xff] }
 0xa8e   :  { %33157 = vmatpush3.bf16.msra.mxu1 %v33156_v35  ;;  %v34434_v35 = vunpack.i.h.bf16 %v40519_v39  ;;  %v30135_v22 = vsel %vm29908_vm4, %v34458_v6, 0.0  ;;  %v30122_v0 = vsel %vm29908_vm4, %v34534_v49, 0.0  ;;  %v34539_v42 = vunpack.i.h.bf16 %v40612_v44  ;;  %v30529_v21 = vld [vmem:[%s41202_s5 + $0x28] sm:$0xff] }
 0xa8f   :  { %v34592_v32 = vpop.permute.xlu0 %34591  ;;  %33159 = vmatprep.subr.bf16.mxu1 %v33158_v52  ;;  %v34637_v47 = vpop.permute.xlu1 %34636  ;;  %v34538_v20 = vunpack.i.l.bf16 %v40612_v44  ;;  %v30533_v49 = vld [vmem:[%s41202_s5 + $0x48] sm:$0xff] }
 0xa90   :  { %34676 = vperm.xlu1 %34218, %v34592_v32   ;;  %v30124_v37 = vsel %vm29908_vm4, %v34539_v42, 0.0  ;;  %v30140_v59 = vsel %vm29908_vm4, %v34434_v35, 0.0  ;;  %v30592_v42 = vld [vmem:[%s41203_s6 + $0x40] sm:$0xff] }
 0xa91   :  { %v30123_v2 = vsel %vm29908_vm4, %v34538_v20, 0.0  ;;  %v30594_v20 = vld [vmem:[%s41203_s6 + $0x50] sm:$0xff] }
 0xa92   :  { %33161 = vmatpush3.bf16.msra.mxu1 %v33160_v9 }
 0xa93   :  { %v34597_v25 = vpop.permute.xlu0 %34596 }
 0xa94   :  { %34681 = vperm.xlu1 %34218, %v34597_v25   ;;  %v30138_v25 = vsel %vm29908_vm4, %v34464_v63, 0.0  ;;  %v30528_v63 = vld [vmem:[%s41202_s5 + $0x20] sm:$0xff] }
 0xa97   :  { %v34602_v58 = vpop.permute.xlu0 %34601 }
 0xa98   :  { %v34604_v33 = vunpack.i.h.bf16 %v34602_v58  ;;  %v34603_v1 = vunpack.i.l.bf16 %v34602_v58  ;;  %34686 = vperm.xlu1 %34218, %v40529_v60  }
 0xa9a   :  { %v30496_v38 = vsel %vm30273_vm6, %v34603_v1, %v30131_v45  ;;  %v30497_v13 = vsel %vm30273_vm6, %v34604_v33, %v30132_v11  ;;  %v30487_v11 = vsel %vm30273_vm6, %v34584_v54, %v30122_v0  ;;  %v34629_v45 = vunpack.i.h.bf16 %v40653_v62  ;;  %v30588_v54 = vld [vmem:[%s41203_s6 + $0x20] sm:$0xff] }
 0xa9b   :  { %v34607_v43 = vpop.permute.xlu0 %34606  ;;  %v33162_v31 = vpack.c.bf16 %v30497_v13, %v30496_v38  ;;  %v34628_v33 = vunpack.i.l.bf16 %v40653_v62  ;;  %v31026_v0 = vld [vmem:[%s41204_s8] sm:$0xff] }
 0xa9c   :  { %v34609_v46 = vunpack.i.h.bf16 %v34607_v43  ;;  %v34608_v5 = vunpack.i.l.bf16 %v34607_v43  ;;  %34696 = vperm.xlu1 %34218, %v40466_v16   ;;  %v30136_v16 = vsel %vm29908_vm4, %v34459_v14, 0.0  ;;  %v30489_v55 = vsel %vm30273_vm6, %v34629_v45, %v30124_v37  ;;  %v30557_v45 = vld [vmem:[%s41202_s5 + $0x108] sm:$0xff] }
 0xa9d   :  { %33163 = vmatprep.subr.bf16.mxu1 %v33162_v31  ;;  %v30488_v13 = vsel %vm30273_vm6, %v34628_v33, %v30123_v2  ;;  %v31032_v33 = vld [vmem:[%s41204_s8 + $0x30] sm:$0xff]  ;;  %v30561_v37 = vld [vmem:[%s41202_s5 + $0x128] sm:$0xff]  ;;  %v30560_v2 = vld [vmem:[%s41202_s5 + $0x120] sm:$0xff] }
 0xa9e   :  { %33165 = vmatpush3.bf16.msra.mxu1 %v33164_v36  ;;  %v30498_v15 = vsel %vm30273_vm6, %v34608_v5, %v30133_v56  ;;  %v30499_v60 = vsel %vm30273_vm6, %v34609_v46, %v30134_v51  ;;  %v33180_v46 = vpack.c.bf16 %v30489_v55, %v30488_v13  ;;  %v30589_v5 = vld [vmem:[%s41203_s6 + $0x28] sm:$0xff]  ;;  %v34647_v51 = vpop.permute.xlu1 %34646  ;;  %v30524_v56 = vld [vmem:[%s41202_s5] sm:$0xff] }
 0xa9f   :  { %v33166_v10 = vpack.c.bf16 %v30499_v60, %v30498_v15  ;;  %v30591_v60 = vld [vmem:[%s41203_s6 + $0x38] sm:$0xff]  ;;  %v31031_v13 = vld [vmem:[%s41204_s8 + $0x28] sm:$0xff]  ;;  %v30568_v55 = vld [vmem:[%s41202_s5 + $0x160] sm:$0xff] }
 0xaa0   :  { %34706 = vperm.xlu1 %34218, %v40533_v8   ;;  %v34533_v8 = vunpack.i.l.bf16 %v40608_v41 }
 0xaa1   :  { %33167 = vmatprep.subr.bf16.mxu1 %v33166_v10  ;;  %v34649_v10 = vunpack.i.h.bf16 %v34647_v51 }
 0xaa2   :  { %33169 = vmatpush3.bf16.msra.mxu1 %v33168_v3  ;;  %v30121_v26 = vsel %vm29908_vm4, %v34533_v8, 0.0  ;;  %v34648_v3 = vunpack.i.l.bf16 %v34647_v51  ;;  %v30586_v8 = vld [vmem:[%s41203_s6 + $0x10] sm:$0xff]  ;;  %v30581_v51 = vld [vmem:[%s41202_s5 + $0x1c8] sm:$0xff] }
 0xaa3   :  { %v30486_v58 = vsel %vm30273_vm6, %v34583_v19, %v30121_v26  ;;  %v30536_v19 = vld [vmem:[%s41202_s5 + $0x60] sm:$0xff]  ;;  %v31028_v26 = vld [vmem:[%s41204_s8 + $0x10] sm:$0xff] }
 0xaa4   :  { %34716 = vperm.xlu1 %34218, %v40537_v27   ;;  %v33176_v57 = vpack.c.bf16 %v30487_v11, %v30486_v58  ;;  %v30596_v58 = vld [vmem:[%s41203_s6 + $0x60] sm:$0xff] }
 0xaa5   :  { %v30552_v11 = vld [vmem:[%s41202_s5 + $0xe0] sm:$0xff] }
 0xaa8   :  { %v34612_v52 = vpop.permute.xlu0 %34611  ;;  %34726 = vperm.xlu1 %34218, %v34637_v47   ;;  %v30584_v47 = vld [vmem:[%s41203_s6] sm:$0xff] }
 0xaa9   :  { %v34614_v32 = vunpack.i.h.bf16 %v34612_v52  ;;  %v34613_v9 = vunpack.i.l.bf16 %v34612_v52 }
 0xaab   :  { %v30500_v27 = vsel %vm30273_vm6, %v34613_v9, %v30135_v22  ;;  %v30501_v41 = vsel %vm30273_vm6, %v34614_v32, %v30136_v16  ;;  %v30593_v16 = vld [vmem:[%s41203_s6 + $0x48] sm:$0xff]  ;;  %v30532_v32 = vld [vmem:[%s41202_s5 + $0x40] sm:$0xff]  ;;  %v30595_v22 = vld [vmem:[%s41203_s6 + $0x58] sm:$0xff] }
 0xaac   :  { %v34617_v12 = vpop.permute.xlu0 %34616  ;;  %v33170_v39 = vpack.c.bf16 %v30501_v41, %v30500_v27  ;;  %30606 = vperm.xlu1 %34218, %v30585_v50   ;;  %v30537_v9 = vld [vmem:[%s41202_s5 + $0x68] sm:$0xff]  ;;  %v30590_v27 = vld [vmem:[%s41203_s6 + $0x30] sm:$0xff]  ;;  %v30540_v41 = vld [vmem:[%s41202_s5 + $0x80] sm:$0xff] }
 0xaad   :  { %v34619_v48 = vunpack.i.h.bf16 %v34617_v12  ;;  %v34618_v28 = vunpack.i.l.bf16 %v34617_v12  ;;  %v30544_v12 = vld [vmem:[%s41202_s5 + $0xa0] sm:$0xff] }
 0xaae   :  { %33171 = vmatprep.subr.bf16.mxu1 %v33170_v39  ;;  %v30549_v39 = vld [vmem:[%s41202_s5 + $0xc8] sm:$0xff]  ;;  %v31030_v50 = vld [vmem:[%s41204_s8 + $0x20] sm:$0xff] }
 0xaaf   :  { %33173 = vmatpush3.bf16.msra.mxu1 %v33172_v29  ;;  %v30502_v44 = vsel %vm30273_vm6, %v34618_v28, %v30137_v4  ;;  %v30503_v1 = vsel %vm30273_vm6, %v34619_v48, %v30138_v25  ;;  %v30139_v29 = vsel %vm29908_vm4, %v34433_v7, 0.0  ;;  %v30541_v7 = vld [vmem:[%s41202_s5 + $0x88] sm:$0xff]  ;;  %v30548_v48 = vld [vmem:[%s41202_s5 + $0xc0] sm:$0xff] }
 0xab0   :  { %v34622_v53 = vpop.permute.xlu0 %34621  ;;  %v33174_v24 = vpack.c.bf16 %v30503_v1, %v30502_v44  ;;  %30616 = vperm.xlu1 %34218, %v30587_v17   ;;  %v30597_v25 = vld [vmem:[%s41203_s6 + $0x68] sm:$0xff]  ;;  %v30598_v44 = vld [vmem:[%s41203_s6 + $0x70] sm:$0xff]  ;;  %v30556_v1 = vld [vmem:[%s41202_s5 + $0x100] sm:$0xff] }
 0xab1   :  { %v34624_v30 = vunpack.i.h.bf16 %v34622_v53  ;;  %v34623_v38 = vunpack.i.l.bf16 %v34622_v53  ;;  %v30545_v4 = vld [vmem:[%s41202_s5 + $0xa8] sm:$0xff]  ;;  %v31034_v53 = vld [vmem:[%s41204_s8 + $0x40] sm:$0xff] }
 0xab2   :  { %33175 = vmatprep.subr.bf16.mxu1 %v33174_v24  ;;  %v30553_v28 = vld [vmem:[%s41202_s5 + $0xe8] sm:$0xff]  ;;  %v30564_v17 = vld [vmem:[%s41202_s5 + $0x140] sm:$0xff] }
 0xab3   :  { %33177 = vmatpush3.bf16.msra.mxu1 %v33176_v57  ;;  %v30504_v34 = vsel %vm30273_vm6, %v34623_v38, %v30139_v29  ;;  %v30505_v43 = vsel %vm30273_vm6, %v34624_v30, %v30140_v59  ;;  %v31027_v24 = vld [vmem:[%s41204_s8 + $0x8] sm:$0xff]  ;;  %v31036_v30 = vld [vmem:[%s41204_s8 + $0x50] sm:$0xf]  ;;  %v31029_v38 = vld [vmem:[%s41204_s8 + $0x18] sm:$0xff] }
 0xab4   :  { %v34632_v31 = vpop.permute.xlu0 %34631  ;;  %v33178_v36 = vpack.c.bf16 %v30505_v43, %v30504_v34  ;;  %30626 = vperm.xlu1 %34218, %v30589_v5   ;;  %v30565_v57 = vld [vmem:[%s41202_s5 + $0x148] sm:$0xff]  ;;  %v31033_v43 = vld [vmem:[%s41204_s8 + $0x38] sm:$0xff]  ;;  %v30576_v5 = vld [vmem:[%s41202_s5 + $0x1a0] sm:$0xff] }
 0xab5   :  { %34721 = vperm.xlu0 %34219, %v34632_v31   ;;  %v30569_v59 = vld [vmem:[%s41202_s5 + $0x168] sm:$0xff]  ;;  %v30572_v31 = vld [vmem:[%s41202_s5 + $0x180] sm:$0xff] }
 0xab6   :  { %33179 = vmatprep.subr.bf16.mxu1 %v33178_v36  ;;  %v31259_v29 = vld [vmem:[%s41205_s10 + $0x8] sm:$0x3] }
 0xab7   :  { %33181 = vmatpush3.bf16.msra.mxu1 %v33180_v46  ;;  %v30573_v34 = vld [vmem:[%s41202_s5 + $0x188] sm:$0xff] }
 0xab8   :  { %v34642_v61 = vpop.permute.xlu0 %34641  ;;  %33182 = vmatprep.subr.bf16.mxu1 %v34824_v18  ;;  %30636 = vperm.xlu1 %34218, %v30591_v60   ;;  %v30577_v36 = vld [vmem:[%s41202_s5 + $0x1a8] sm:$0xff] }
 0xab9   :  { %v34644_v62 = vunpack.i.h.bf16 %v34642_v61  ;;  %v34643_v15 = vunpack.i.l.bf16 %v34642_v61  ;;  %30601 = vperm.xlu0 %34219, %v30584_v47   ;;  %v31035_v46 = vld [vmem:[%s41204_s8 + $0x48] sm:$0xff]  ;;  %v30580_v61 = vld [vmem:[%s41202_s5 + $0x1c0] sm:$0xff] }
 0xaba   :  { %30785 = vmatmul.mubr.f32.vlgmr.msra.gmra.mrb[22].mxu1 %v30524_v56  ;;  %v31258_v56 = vld [vmem:[%s41205_s10] sm:$0xff] }
 0xabb   :  { %v30142_v14 = vsel %vm29908_vm4, %v34644_v62, 0.0  ;;  %v30141_v6 = vsel %vm29908_vm4, %v34643_v15, 0.0  ;;  %30789 = vmatprep.mubr.f32.mxu1 %v30529_v21  ;;  %v30527_v21 = vld [vmem:[%s41202_s5 + $0x18] sm:$0xff] }
 0xabc   :  { %v30506_v35 = vsel %vm30273_vm6, %v34648_v3, %v30141_v6  ;;  %v30507_v23 = vsel %vm30273_vm6, %v34649_v10, %v30142_v14  ;;  %30646 = vperm.xlu1 %34218, %v30593_v16  }
 0xabd   :  { %v33183_v52 = vpack.c.bf16 %v30507_v23, %v30506_v35  ;;  %30611 = vperm.xlu0 %34219, %v30586_v8  }
 0xabe   :  { %30790 = vmatmul.mubr.f32.gmra.mrb[24].mxu1 %v30528_v63 }
 0xabf   :  { %33184 = vmatpush1.bf16.msra.mxu1 %v33183_v52  ;;  %30794 = vmatprep.mubr.f32.mxu1 %v30533_v49 }
 0xac0   :  { %33185 = vmatprep.subr.bf16.mxu1 %v34824_v18  ;;  %30656 = vperm.xlu1 %34218, %v30595_v22  }
 0xac1   :  { %30621 = vperm.xlu0 %34219, %v30588_v54  }
 0xac2   :  { %30795 = vmatmul.mubr.f32.gmra.mrb[26].mxu1 %v30532_v32 }
 0xac3   :  { %30799 = vmatprep.mubr.f32.mxu1 %v30537_v9 }
 0xac4   :  { %30666 = vperm.xlu1 %34218, %v30597_v25  }
 0xac5   :  { %30631 = vperm.xlu0 %34219, %v30590_v27  }
 0xac6   :  { %30800 = vmatmul.mubr.f32.gmra.mrb[28].mxu1 %v30536_v19 }
 0xac7   :  { %30804 = vmatprep.mubr.f32.mxu1 %v30541_v7 }
 0xac8   :  { %31039 = vperm.xlu1 %34218, %v31026_v0  }
 0xac9   :  { %30641 = vperm.xlu0 %34219, %v30592_v42  }
 0xaca   :  { %30805 = vmatmul.mubr.f32.gmra.mrb[30].mxu1 %v30540_v41 }
 0xacb   :  { %30809 = vmatprep.mubr.f32.mxu1 %v30545_v4 }
 0xacc   :  { %31049 = vperm.xlu1 %34218, %v31028_v26  }
 0xacd   :  { %30651 = vperm.xlu0 %34219, %v30594_v20  }
 0xace   :  { %30810 = vmatmul.mubr.f32.gmra.mrb[32].mxu1 %v30544_v12 }
 0xacf   :  { %30814 = vmatprep.mubr.f32.mxu1 %v30549_v39 }
 0xad0   :  { %31059 = vperm.xlu1 %34218, %v31030_v50  }
 0xad1   :  { %30661 = vperm.xlu0 %34219, %v30596_v58  }
 0xad2   :  { %30815 = vmatmul.mubr.f32.gmra.mrb[34].mxu1 %v30548_v48 }
 0xad3   :  { %30819 = vmatprep.mubr.f32.mxu1 %v30553_v28 }
 0xad4   :  { %31069 = vperm.xlu1 %34218, %v31032_v33  }
 0xad5   :  { %30671 = vperm.xlu0 %34219, %v30598_v44  }
 0xad6   :  { %30820 = vmatmul.mubr.f32.gmra.mrb[36].mxu1 %v30552_v11 }
 0xad7   :  { %30824 = vmatprep.mubr.f32.mxu1 %v30557_v45 }
 0xad8   :  { %31079 = vperm.xlu1 %34218, %v31034_v53  }
 0xad9   :  { %31044 = vperm.xlu0 %34219, %v31027_v24  }
 0xada   :  { %30825 = vmatmul.mubr.f32.gmra.mrb[38].mxu1 %v30556_v1 }
 0xadb   :  { %30829 = vmatprep.mubr.f32.mxu1 %v30561_v37 }
 0xadc   :  { %31089 = vperm.xlu1 %34218, %v31036_v30  }
 0xadd   :  { %31054 = vperm.xlu0 %34219, %v31029_v38  }
 0xade   :  { %30830 = vmatmul.mubr.f32.gmra.mrb[40].mxu1 %v30560_v2 }
 0xadf   :  { %30834 = vmatprep.mubr.f32.mxu1 %v30565_v57 }
 0xae0   :  { %31267 = vperm.xlu1 %34218, %v31259_v29  }
 0xae1   :  { %31064 = vperm.xlu0 %34219, %v31031_v13  }
 0xae2   :  { %30835 = vmatmul.mubr.f32.gmra.mrb[42].mxu1 %v30564_v17 }
 0xae3   :  { %30839 = vmatprep.mubr.f32.mxu1 %v30569_v59 }
 0xae4   :  { %v34652_v62 = vpop.permute.xlu0 %34651 }
 0xae5   :  { %31074 = vperm.xlu0 %34219, %v31033_v43   ;;  %v34654_v10 = vunpack.i.h.bf16 %v34652_v62  ;;  %v34653_v3 = vunpack.i.l.bf16 %v34652_v62 }
 0xae6   :  { %30840 = vmatmul.mubr.f32.gmra.mrb[44].mxu1 %v30568_v55 }
 0xae7   :  { %30844 = vmatprep.mubr.f32.mxu1 %v30573_v34  ;;  %v30144_v35 = vsel %vm29908_vm4, %v34654_v10, 0.0  ;;  %v30143_v23 = vsel %vm29908_vm4, %v34653_v3, 0.0 }
 0xae8   :  { %v34657_v15 = vpop.permute.xlu0 %34656 }
 0xae9   :  { %31084 = vperm.xlu0 %34219, %v31035_v46   ;;  %v34659_v49 = vunpack.i.h.bf16 %v34657_v15  ;;  %v34658_v52 = vunpack.i.l.bf16 %v34657_v15 }
 0xaea   :  { %30845 = vmatmul.mubr.f32.gmra.mrb[46].mxu1 %v30572_v31 }
 0xaeb   :  { %30849 = vmatprep.mubr.f32.mxu1 %v30577_v36  ;;  %v30146_v19 = vsel %vm29908_vm4, %v34659_v49, 0.0  ;;  %v30145_v7 = vsel %vm29908_vm4, %v34658_v52, 0.0 }
 0xaec   :  { %v34662_v60 = vpop.permute.xlu0 %34661 }
 0xaed   :  { %31262 = vperm.xlu0 %34219, %v31258_v56   ;;  %v34664_v25 = vunpack.i.h.bf16 %v34662_v60  ;;  %v34663_v27 = vunpack.i.l.bf16 %v34662_v60 }
 0xaee   :  { %30850 = vmatmul.mubr.f32.gmra.mrb[48].mxu1 %v30576_v5 }
 0xaef   :  { %30854 = vmatprep.mubr.f32.mxu1 %v30581_v51  ;;  %v30148_v20 = vsel %vm29908_vm4, %v34664_v25, 0.0  ;;  %v30147_v48 = vsel %vm29908_vm4, %v34663_v27, 0.0 }
 0xaf0   :  { %v34667_v14 = vpop.permute.xlu0 %34666 }
 0xaf1   :  { %v34669_v28 = vunpack.i.h.bf16 %v34667_v14  ;;  %v34668_v50 = vunpack.i.l.bf16 %v34667_v14 }
 0xaf2   :  { %30855 = vmatmul.mubr.f32.gmra.mrb[50].mxu1 %v30580_v61 }
 0xaf3   :  { %32542 = vmatprep.mubr.msk.f32.mxu1 %vm30674_vm12, %v30527_v21  ;;  %v30150_v53 = vsel %vm29908_vm4, %v34669_v28, 0.0  ;;  %v30149_v24 = vsel %vm29908_vm4, %v34668_v50, 0.0  ;;  %v30543_v28 = vld [vmem:[%s41202_s5 + $0x98] sm:$0xff]  ;;  %v30542_v50 = vld [vmem:[%s41202_s5 + $0x90] sm:$0xff] }
 0xaf4   :  { %v34692_v41 = vpop.permute.xlu0 %34691 }
 0xaf5   :  { %v34694_v2 = vunpack.i.h.bf16 %v34692_v41  ;;  %v34693_v57 = vunpack.i.l.bf16 %v34692_v41 }
 0xaf7   :  { %v30152_v55 = vsel %vm29908_vm4, %v34694_v2, 0.0  ;;  %v30151_v34 = vsel %vm29908_vm4, %v34693_v57, 0.0  ;;  %v30562_v2 = vld [vmem:[%s41202_s5 + $0x130] sm:$0xff]  ;;  %v30567_v57 = vld [vmem:[%s41202_s5 + $0x158] sm:$0xff] }
 0xaf8   :  { %v34702_v44 = vpop.permute.xlu0 %34701 }
 0xaf9   :  { %v34704_v43 = vunpack.i.h.bf16 %v34702_v44  ;;  %v34703_v31 = vunpack.i.l.bf16 %v34702_v44  ;;  %v30555_v44 = vld [vmem:[%s41202_s5 + $0xf8] sm:$0xff] }
 0xafb   :  { %v30154_v62 = vsel %vm29908_vm4, %v34704_v43, 0.0  ;;  %v30153_v15 = vsel %vm29908_vm4, %v34703_v31, 0.0  ;;  %v30582_v43 = vld [vmem:[%s41202_s5 + $0x1d0] sm:$0xff] }
 0xafc   :  { %v34712_v36 = vpop.permute.xlu0 %34711 }
 0xafd   :  { %v34714_v60 = vunpack.i.h.bf16 %v34712_v36  ;;  %v34713_v10 = vunpack.i.l.bf16 %v34712_v36 }
 0xaff   :  { %v30155_v49 = vsel %vm29908_vm4, %v34713_v10, 0.0 }
 0xb0b   :  { %v34672_v47 = vpop.permute.xlu1 %34671 }
 0xb0c   :  { %v34674_v6 = vunpack.i.h.bf16 %v34672_v47  ;;  %v34673_v63 = vunpack.i.l.bf16 %v34672_v47 }
 0xb0e   :  { %v30509_v16 = vsel %vm30273_vm6, %v34674_v6, %v30144_v35  ;;  %v30508_v8 = vsel %vm30273_vm6, %v34673_v63, %v30143_v23  ;;  %v30156_v23 = vsel %vm29908_vm4, %v34714_v60, 0.0 }
 0xb0f   :  { %v33186_v32 = vpack.c.bf16 %v30509_v16, %v30508_v8  ;;  %v34677_v9 = vpop.permute.xlu1 %34676 }
 0xb10   :  { %v34679_v22 = vunpack.i.h.bf16 %v34677_v9  ;;  %v34678_v54 = vunpack.i.l.bf16 %v34677_v9 }
 0xb11   :  { %33187 = vmatpush1.bf16.msra.mxu1 %v33186_v32 }
 0xb12   :  { %v30511_v4 = vsel %vm30273_vm6, %v34679_v22, %v30146_v19  ;;  %v30510_v0 = vsel %vm30273_vm6, %v34678_v54, %v30145_v7  ;;  %33188 = vmatprep.subr.bf16.mxu1 %v34824_v18 }
 0xb13   :  { %v33189_v42 = vpack.c.bf16 %v30511_v4, %v30510_v0  ;;  %v34682_v12 = vpop.permute.xlu1 %34681 }
 0xb14   :  { %v34684_v39 = vunpack.i.h.bf16 %v34682_v12  ;;  %v34683_v26 = vunpack.i.l.bf16 %v34682_v12  ;;  %v30531_v12 = vld [vmem:[%s41202_s5 + $0x38] sm:$0xff] }
 0xb15   :  { %33190 = vmatpush1.bf16.msra.mxu1 %v33189_v42  ;;  %v30526_v42 = vld [vmem:[%s41202_s5 + $0x10] sm:$0xff] }
 0xb16   :  { %v30513_v58 = vsel %vm30273_vm6, %v34684_v39, %v30148_v20  ;;  %v30512_v11 = vsel %vm30273_vm6, %v34683_v26, %v30147_v48  ;;  %33191 = vmatprep.subr.bf16.mxu1 %v34824_v18  ;;  %v30530_v39 = vld [vmem:[%s41202_s5 + $0x30] sm:$0xff]  ;;  %v30539_v20 = vld [vmem:[%s41202_s5 + $0x78] sm:$0xff] }
 0xb17   :  { %v33192_v45 = vpack.c.bf16 %v30513_v58, %v30512_v11  ;;  %v34687_v33 = vpop.permute.xlu1 %34686  ;;  %v30534_v26 = vld [vmem:[%s41202_s5 + $0x50] sm:$0xff]  ;;  %v30547_v58 = vld [vmem:[%s41202_s5 + $0xb8] sm:$0xff] }
 0xb18   :  { %v34689_v1 = vunpack.i.h.bf16 %v34687_v33  ;;  %v34688_v37 = vunpack.i.l.bf16 %v34687_v33  ;;  %v30538_v48 = vld [vmem:[%s41202_s5 + $0x70] sm:$0xff] }
 0xb19   :  { %33193 = vmatpush1.bf16.msra.mxu1 %v33192_v45  ;;  %v30546_v11 = vld [vmem:[%s41202_s5 + $0xb0] sm:$0xff]  ;;  %v30551_v45 = vld [vmem:[%s41202_s5 + $0xd8] sm:$0xff] }
 0xb1a   :  { %v30515_v30 = vsel %vm30273_vm6, %v34689_v1, %v30150_v53  ;;  %v30514_v38 = vsel %vm30273_vm6, %v34688_v37, %v30149_v24  ;;  %33194 = vmatprep.subr.bf16.mxu1 %v34824_v18  ;;  %v30550_v33 = vld [vmem:[%s41202_s5 + $0xd0] sm:$0xff]  ;;  %v30559_v37 = vld [vmem:[%s41202_s5 + $0x118] sm:$0xff] }
 0xb1b   :  { %v33195_v17 = vpack.c.bf16 %v30515_v30, %v30514_v38  ;;  %v34697_v59 = vpop.permute.xlu1 %34696  ;;  %v30554_v1 = vld [vmem:[%s41202_s5 + $0xf0] sm:$0xff]  ;;  %v30563_v24 = vld [vmem:[%s41202_s5 + $0x138] sm:$0xff] }
 0xb1c   :  { %v34699_v29 = vunpack.i.h.bf16 %v34697_v59  ;;  %v34698_v13 = vunpack.i.l.bf16 %v34697_v59  ;;  %v30558_v53 = vld [vmem:[%s41202_s5 + $0x110] sm:$0xff]  ;;  %v30571_v38 = vld [vmem:[%s41202_s5 + $0x178] sm:$0xff] }
 0xb1d   :  { %33196 = vmatpush1.bf16.msra.mxu1 %v33195_v17  ;;  %v30566_v30 = vld [vmem:[%s41202_s5 + $0x150] sm:$0xff]  ;;  %v30575_v59 = vld [vmem:[%s41202_s5 + $0x198] sm:$0xff] }
 0xb1e   :  { %v30517_v46 = vsel %vm30273_vm6, %v34699_v29, %v30152_v55  ;;  %v30516_v5 = vsel %vm30273_vm6, %v34698_v13, %v30151_v34  ;;  %33197 = vmatprep.subr.bf16.mxu1 %v34824_v18  ;;  %v30570_v17 = vld [vmem:[%s41202_s5 + $0x170] sm:$0xff]  ;;  %v30579_v13 = vld [vmem:[%s41202_s5 + $0x1b8] sm:$0xff] }
 0xb1f   :  { %v33198_v51 = vpack.c.bf16 %v30517_v46, %v30516_v5  ;;  %v34707_v56 = vpop.permute.xlu1 %34706  ;;  %v30574_v29 = vld [vmem:[%s41202_s5 + $0x190] sm:$0xff]  ;;  %v30583_v34 = vld [vmem:[%s41202_s5 + $0x1d8] sm:$0xff] }
 0xb20   :  { %v34709_v61 = vunpack.i.h.bf16 %v34707_v56  ;;  %v34708_v21 = vunpack.i.l.bf16 %v34707_v56  ;;  %v30578_v55 = vld [vmem:[%s41202_s5 + $0x1b0] sm:$0xff] }
 0xb21   :  { %33199 = vmatpush1.bf16.msra.mxu1 %v33198_v51 }
 0xb22   :  { %v30519_v3 = vsel %vm30273_vm6, %v34709_v61, %v30154_v62  ;;  %v30518_v47 = vsel %vm30273_vm6, %v34708_v21, %v30153_v15  ;;  %33200 = vmatprep.subr.bf16.mxu1 %v34824_v18 }
 0xb23   :  { %v33201_v14 = vpack.c.bf16 %v30519_v3, %v30518_v47  ;;  %v34717_v6 = vpop.permute.xlu1 %34716 }
 0xb24   :  { %v34719_v63 = vunpack.i.h.bf16 %v34717_v6  ;;  %v34718_v35 = vunpack.i.l.bf16 %v34717_v6 }
 0xb25   :  { %33202 = vmatpush1.bf16.msra.mxu1 %v33201_v14 }
 0xb26   :  { %v30521_v52 = vsel %vm30273_vm6, %v34719_v63, %v30156_v23  ;;  %v30520_v16 = vsel %vm30273_vm6, %v34718_v35, %v30155_v49  ;;  %33203 = vmatprep.subr.bf16.mxu1 %v34824_v18 }
 0xb27   :  { %v33204_v8 = vpack.c.bf16 %v30521_v52, %v30520_v16  ;;  %v34727_v32 = vpop.permute.xlu1 %34726 }
 0xb28   :  { %v34729_v19 = vunpack.i.h.bf16 %v34727_v32  ;;  %v34728_v7 = vunpack.i.l.bf16 %v34727_v32 }
 0xb29   :  { %33205 = vmatpush1.bf16.msra.mxu1 %v33204_v8 }
 0xb2a   :  { %33206 = vmatprep.subr.bf16.mxu1 %v34824_v18 }
 0xb34   :  { %v34722_v9 = vpop.permute.xlu0 %34721 }
 0xb35   :  { %v34724_v22 = vunpack.i.h.bf16 %v34722_v9  ;;  %v34723_v54 = vunpack.i.l.bf16 %v34722_v9 }
 0xb37   :  { %v30158_v25 = vsel %vm29908_vm4, %v34724_v22, 0.0  ;;  %v30157_v27 = vsel %vm29908_vm4, %v34723_v54, 0.0 }
 0xb38   :  { %v30522_v41 = vsel %vm30273_vm6, %v34728_v7, %v30157_v27  ;;  %v30523_v4 = vsel %vm30273_vm6, %v34729_v19, %v30158_v25 }
 0xb39   :  { %v33207_v0 = vpack.c.bf16 %v30523_v4, %v30522_v41 }
 0xb3b   :  { %33208 = vmatpush1.bf16.msra.mxu1 %v33207_v0 }
 0xb3e   :  { %30925 = vmatmul.mubr.f32.vlgmr.msra.gmra.mrb[52].mxu1 %v30526_v42 }
 0xb3f   :  { %32543 = vmatprep.mubr.msk.f32.mxu1 %vm30674_vm12, %v30531_v12 }
 0xb42   :  { %30930 = vmatmul.mubr.f32.gmra.mrb[54].mxu1 %v30530_v39 }
 0xb43   :  { %32544 = vmatprep.mubr.msk.f32.mxu1 %vm30674_vm12, %v30535_v40 }
 0xb46   :  { %30935 = vmatmul.mubr.f32.gmra.mrb[56].mxu1 %v30534_v26 }
 0xb47   :  { %32545 = vmatprep.mubr.msk.f32.mxu1 %vm30674_vm12, %v30539_v20 }
 0xb4a   :  { %30940 = vmatmul.mubr.f32.gmra.mrb[58].mxu1 %v30538_v48 }
 0xb4b   :  { %32546 = vmatprep.mubr.msk.f32.mxu1 %vm30674_vm12, %v30543_v28 }
 0xb4e   :  { %30945 = vmatmul.mubr.f32.gmra.mrb[60].mxu1 %v30542_v50 }
 0xb4f   :  { %32547 = vmatprep.mubr.msk.f32.mxu1 %vm30674_vm12, %v30547_v58 }
 0xb52   :  { %30950 = vmatmul.mubr.f32.gmra.mrb[62].mxu1 %v30546_v11 }
 0xb53   :  { %32548 = vmatprep.mubr.msk.f32.mxu1 %vm30674_vm12, %v30551_v45  ;;  %v30602_v45 = vpop.permute.xlu0 %30601 }
 0xb56   :  { %30955 = vmatmul.mubr.f32.gmra.mrb[64].mxu1 %v30550_v33 }
 0xb57   :  { %32549 = vmatprep.mubr.msk.f32.mxu1 %vm30674_vm12, %v30555_v44 }
 0xb5a   :  { %30960 = vmatmul.mubr.f32.gmra.mrb[66].mxu1 %v30554_v1 }
 0xb5b   :  { %32550 = vmatprep.mubr.msk.f32.mxu1 %vm30674_vm12, %v30559_v37 }
 0xb5e   :  { %30965 = vmatmul.mubr.f32.gmra.mrb[68].mxu1 %v30558_v53  ;;  %v30607_v53 = vpop.permute.xlu1 %30606 }
 0xb5f   :  { %32551 = vmatprep.mubr.msk.f32.mxu1 %vm30674_vm12, %v30563_v24 }
 0xb62   :  { %30970 = vmatmul.mubr.f32.gmra.mrb[70].mxu1 %v30562_v2 }
 0xb63   :  { %32552 = vmatprep.mubr.msk.f32.mxu1 %vm30674_vm12, %v30567_v57 }
 0xb66   :  { %30975 = vmatmul.mubr.f32.gmra.mrb[72].mxu1 %v30566_v30 }
 0xb67   :  { %32553 = vmatprep.mubr.msk.f32.mxu1 %vm30674_vm12, %v30571_v38  ;;  %v30612_v38 = vpop.permute.xlu0 %30611 }
 0xb6a   :  { %30980 = vmatmul.mubr.f32.gmra.mrb[74].mxu1 %v30570_v17 }
 0xb6b   :  { %32554 = vmatprep.mubr.msk.f32.mxu1 %vm30674_vm12, %v30575_v59 }
 0xb6e   :  { %30985 = vmatmul.mubr.f32.gmra.mrb[76].mxu1 %v30574_v29 }
 0xb6f   :  { %32555 = vmatprep.mubr.msk.f32.mxu1 %vm30674_vm12, %v30579_v13 }
 0xb72   :  { %30990 = vmatmul.mubr.f32.gmra.mrb[78].mxu1 %v30578_v55 }
 0xb73   :  { %32556 = vmatprep.mubr.msk.f32.mxu1 %vm30674_vm12, %v30583_v34 }
 0xb76   :  { %30995 = vmatmul.mubr.f32.gmra.mrb[80].mxu1 %v30582_v43 }
 0xb8d   :  { %v32728_v31 = vpop.f32.mrb[22].mxu1 }
 0xb8e   :  { %v32729_v36 = vpop.f32.mrb[23].mxu1 }
 0xb8f   :  { %v32730_v46 = vadd.f32 %v32729_v36, %v32728_v31  ;;  %v30617_v31 = vpop.permute.xlu1 %30616 }
 0xb91   :  { %v32731_v5 = vpop.f32.mrb[24].mxu1  ;;  %v30787_v33 = vadd.f32 %v32730_v46, %v30602_v45 }
 0xb92   :  { %v32732_v51 = vpop.f32.mrb[25].mxu1 }
 0xb93   :  { %v32733_v56 = vadd.f32 %v32732_v51, %v32731_v5 }
 0xb95   :  { %v32734_v61 = vpop.f32.mrb[26].mxu1  ;;  %v30792_v24 = vadd.f32 %v32733_v56, %v30607_v53  ;;  %v30622_v56 = vpop.permute.xlu0 %30621 }
 0xb96   :  { %v32735_v21 = vpop.f32.mrb[27].mxu1 }
 0xb97   :  { %v32736_v62 = vadd.f32 %v32735_v21, %v32734_v61 }
 0xb99   :  { %v32737_v15 = vpop.f32.mrb[28].mxu1  ;;  %v30797_v29 = vadd.f32 %v32736_v62, %v30612_v38 }
 0xb9a   :  { %v32738_v60 = vpop.f32.mrb[29].mxu1 }
 0xb9b   :  { %v32739_v10 = vadd.f32 %v32738_v60, %v32737_v15 }
 0xb9d   :  { %v32740_v3 = vpop.f32.mrb[30].mxu1  ;;  %v30802_v36 = vadd.f32 %v32739_v10, %v30617_v31 }
 0xb9e   :  { %v32741_v47 = vpop.f32.mrb[31].mxu1 }
 0xb9f   :  { %v32742_v14 = vadd.f32 %v32741_v47, %v32740_v3 }
 0xba1   :  { %v32743_v6 = vpop.f32.mrb[32].mxu1  ;;  %v30807_v15 = vadd.f32 %v32742_v14, %v30622_v56 }
 0xba2   :  { %v32744_v63 = vpop.f32.mrb[33].mxu1 }
 0xba3   :  { %v41076_v35 = vadd.f32 %v32744_v63, %v32743_v6  ;;  %v30627_v6 = vpop.permute.xlu1 %30626 }
 0xba5   :  { %v32746_v23 = vpop.f32.mrb[34].mxu1  ;;  %v30812_v63 = vadd.f32 %v41076_v35, %v30627_v6 }
 0xba6   :  { %v32747_v49 = vpop.f32.mrb[35].mxu1 }
 0xba7   :  { %v41078_v52 = vadd.f32 %v32747_v49, %v32746_v23 }
 0xba9   :  { %v32749_v16 = vpop.f32.mrb[36].mxu1 }
 0xbaa   :  { %v32750_v8 = vpop.f32.mrb[37].mxu1 }
 0xbab   :  { %v41080_v32 = vadd.f32 %v32750_v8, %v32749_v16  ;;  %v30632_v16 = vpop.permute.xlu0 %30631 }
 0xbad   :  { %v32752_v9 = vpop.f32.mrb[38].mxu1 }
 0xbae   :  { %v32753_v22 = vpop.f32.mrb[39].mxu1 }
 0xbaf   :  { %v41082_v54 = vadd.f32 %v32753_v22, %v32752_v9  ;;  %v30817_v22 = vadd.f32 %v41078_v52, %v30632_v16 }
 0xbb1   :  { %v32755_v19 = vpop.f32.mrb[40].mxu1 }
 0xbb2   :  { %v32756_v7 = vpop.f32.mrb[41].mxu1 }
 0xbb3   :  { %v41084_v25 = vadd.f32 %v32756_v7, %v32755_v19 }
 0xbb5   :  { %v32758_v27 = vpop.f32.mrb[42].mxu1 }
 0xbb6   :  { %v32759_v41 = vpop.f32.mrb[43].mxu1 }
 0xbb7   :  { %v41086_v4 = vadd.f32 %v32759_v41, %v32758_v27  ;;  %v30637_v41 = vpop.permute.xlu1 %30636 }
 0xbb9   :  { %v32761_v0 = vpop.f32.mrb[44].mxu1 }
 0xbba   :  { %v32762_v42 = vpop.f32.mrb[45].mxu1 }
 0xbbb   :  { %v41088_v12 = vadd.f32 %v32762_v42, %v32761_v0  ;;  %v30822_v0 = vadd.f32 %v41080_v32, %v30637_v41  ;;  %v31025_v41 = vld [vmem:[%s41206_s7 + $0x50] sm:$0xf] }
 0xbbd   :  { %v32764_v39 = vpop.f32.mrb[46].mxu1 }
 0xbbe   :  { %v32765_v40 = vpop.f32.mrb[47].mxu1 }
 0xbbf   :  { %v41090_v26 = vadd.f32 %v32765_v40, %v32764_v39  ;;  %v30642_v40 = vpop.permute.xlu0 %30641 }
 0xbc1   :  { %v32767_v20 = vpop.f32.mrb[48].mxu1 }
 0xbc2   :  { %v32768_v48 = vpop.f32.mrb[49].mxu1 }
 0xbc3   :  { %v41092_v28 = vadd.f32 %v32768_v48, %v32767_v20 }
 0xbc5   :  { %v32770_v50 = vpop.f32.mrb[50].mxu1 }
 0xbc6   :  { %v32771_v58 = vpop.f32.mrb[51].mxu1 }
 0xbc7   :  { %v41094_v11 = vadd.f32 %v32771_v58, %v32770_v50  ;;  %v30827_v50 = vadd.f32 %v41082_v54, %v30642_v40 }
 0xc11   :  { %v30926_v44 = vpop.f32.mrb[52].mxu1 }
 0xc12   :  { %v30927_v1 = vadd.f32 %v30926_v44, %v30787_v33  ;;  %v30928_v37 = vpop.f32.mrb[53].mxu1  ;;  %v30647_v44 = vpop.permute.xlu1 %30646 }
 0xc14   :  { %v31000_v17 = vmax.f32 %v30927_v1, 0.0  ;;  %v30832_v1 = vadd.f32 %v41084_v25, %v30647_v44 }
 0xc15   :  { %v30931_v2 = vpop.f32.mrb[54].mxu1 }
 0xc16   :  { %v30932_v57 = vadd.f32 %v30931_v2, %v30792_v24  ;;  %v30933_v30 = vpop.f32.mrb[55].mxu1  ;;  %v30652_v24 = vpop.permute.xlu0 %30651 }
 0xc17   :  { %v30837_v30 = vadd.f32 %v41086_v4, %v30652_v24 }
 0xc18   :  { %v31001_v59 = vmax.f32 %v30932_v57, 0.0 }
 0xc19   :  { %v30936_v13 = vpop.f32.mrb[56].mxu1 }
 0xc1a   :  { %v33210_v55 = vpack.c.bf16 %v31001_v59, %v31000_v17  ;;  %v30937_v34 = vadd.f32 %v30936_v13, %v30797_v29  ;;  %v30938_v43 = vpop.f32.mrb[57].mxu1  ;;  %v30657_v29 = vpop.permute.xlu1 %30656 }
 0xc1b   :  { %v30842_v13 = vadd.f32 %v41088_v12, %v30657_v29  ;;  %v30662_v43 = vpop.permute.xlu0 %30661 }
 0xc1c   :  { %33211 = vmatpush3.bf16.msra.mxu0 %v33210_v55  ;;  %v31002_v61 = vmax.f32 %v30937_v34, 0.0 }
 0xc1d   :  { %v30941_v46 = vpop.f32.mrb[58].mxu1  ;;  %33212 = vmatprep.subr.bf16.mxu0 %v34824_v18 }
 0xc1e   :  { %v30942_v5 = vadd.f32 %v30941_v46, %v30802_v36  ;;  %v30943_v51 = vpop.f32.mrb[59].mxu1  ;;  %v30847_v46 = vadd.f32 %v41090_v26, %v30662_v43 }
 0xc20   :  { %v31003_v21 = vmax.f32 %v30942_v5, 0.0 }
 0xc21   :  { %v30946_v60 = vpop.f32.mrb[60].mxu1 }
 0xc22   :  { %v33213_v3 = vpack.c.bf16 %v31003_v21, %v31002_v61  ;;  %v30947_v47 = vadd.f32 %v30946_v60, %v30807_v15  ;;  %v30948_v62 = vpop.f32.mrb[61].mxu1  ;;  %v30667_v61 = vpop.permute.xlu1 %30666 }
 0xc23   :  { %v30852_v21 = vadd.f32 %v41092_v28, %v30667_v61  ;;  %v31015_v28 = vld [vmem:[%s41206_s7] sm:$0xff] }
 0xc24   :  { %33214 = vmatpush3.bf16.msra.mxu0 %v33213_v3  ;;  %v31004_v8 = vmax.f32 %v30947_v47, 0.0  ;;  %v30672_v3 = vpop.permute.xlu0 %30671 }
 0xc25   :  { %v30951_v23 = vpop.f32.mrb[62].mxu1  ;;  %33215 = vmatprep.subr.bf16.mxu0 %v34824_v18  ;;  %v30857_v6 = vadd.f32 %v41094_v11, %v30672_v3  ;;  %v31017_v11 = vld [vmem:[%s41206_s7 + $0x10] sm:$0xff] }
 0xc26   :  { %v30952_v10 = vadd.f32 %v30951_v23, %v30812_v63  ;;  %v30953_v49 = vpop.f32.mrb[63].mxu1 }
 0xc27   :  { %v41556_v49 = vmov 0.0  }
 0xc28   :  { %v31005_v9 = vmax.f32 %v30952_v10, 0.0 }
 0xc29   :  { %v30956_v19 = vpop.f32.mrb[64].mxu1 }
 0xc2a   :  { %v33216_v14 = vpack.c.bf16 %v31005_v9, %v31004_v8  ;;  %v30957_v7 = vadd.f32 %v30956_v19, %v30817_v22  ;;  %v30958_v27 = vpop.f32.mrb[65].mxu1  ;;  %v31018_v8 = vld [vmem:[%s41206_s7 + $0x18] sm:$0xff]  ;;  %v31019_v9 = vld [vmem:[%s41206_s7 + $0x20] sm:$0xff]  ;;  %v31020_v22 = vld [vmem:[%s41206_s7 + $0x28] sm:$0xff] }
 0xc2b   :  { %v31021_v19 = vld [vmem:[%s41206_s7 + $0x30] sm:$0xff]  ;;  %v31024_v27 = vld [vmem:[%s41206_s7 + $0x48] sm:$0xff] }
 0xc2c   :  { %33217 = vmatpush3.bf16.msra.mxu0 %v33216_v14  ;;  %v31006_v20 = vmax.f32 %v30957_v7, 0.0  ;;  %v31022_v14 = vld [vmem:[%s41206_s7 + $0x38] sm:$0xff]  ;;  %v31023_v7 = vld [vmem:[%s41206_s7 + $0x40] sm:$0xff] }
 0xc2d   :  { %v30961_v42 = vpop.f32.mrb[66].mxu1  ;;  %33218 = vmatprep.subr.bf16.mxu0 %v34824_v18 }
 0xc2e   :  { %v30962_v35 = vadd.f32 %v30961_v42, %v30822_v0  ;;  %v30963_v39 = vpop.f32.mrb[67].mxu1  ;;  %v31256_v0 = vld [vmem:[%s41207_s9] sm:$0xff] }
 0xc2f   :  { %33147 = vmatprep.mubr.msk.f32.mxu1 %vm31270_vm14, %v31256_v0  ;;  %v31040_v39 = vpop.permute.xlu1 %31039 }
 0xc30   :  { %v31007_v48 = vmax.f32 %v30962_v35, 0.0 }
 0xc31   :  { %v30966_v58 = vpop.f32.mrb[68].mxu1 }
 0xc32   :  { %v33219_v52 = vpack.c.bf16 %v31007_v48, %v31006_v20  ;;  %v30967_v45 = vadd.f32 %v30966_v58, %v30827_v50  ;;  %v30968_v33 = vpop.f32.mrb[69].mxu1  ;;  %v31045_v20 = vpop.permute.xlu0 %31044 }
 0xc34   :  { %33220 = vmatpush3.bf16.msra.mxu0 %v33219_v52  ;;  %v31008_v2 = vmax.f32 %v30967_v45, 0.0 }
 0xc35   :  { %v30971_v37 = vpop.f32.mrb[70].mxu1  ;;  %33221 = vmatprep.subr.bf16.mxu0 %v34824_v18 }
 0xc36   :  { %v30972_v32 = vadd.f32 %v30971_v37, %v30832_v1  ;;  %v30973_v53 = vpop.f32.mrb[71].mxu1  ;;  %v31050_v37 = vpop.permute.xlu1 %31049 }
 0xc37   :  { %v31055_v53 = vpop.permute.xlu0 %31054 }
 0xc38   :  { %v31009_v57 = vmax.f32 %v30972_v32, 0.0 }
 0xc39   :  { %v30976_v38 = vpop.f32.mrb[72].mxu1 }
 0xc3a   :  { %v33222_v54 = vpack.c.bf16 %v31009_v57, %v31008_v2  ;;  %v30977_v17 = vadd.f32 %v30976_v38, %v30837_v30  ;;  %v30978_v59 = vpop.f32.mrb[73].mxu1  ;;  %v31060_v29 = vpop.permute.xlu1 %31059 }
 0xc3c   :  { %33223 = vmatpush3.bf16.msra.mxu0 %v33222_v54  ;;  %v31010_v31 = vmax.f32 %v30977_v17, 0.0 }
 0xc3d   :  { %v30981_v55 = vpop.f32.mrb[74].mxu1  ;;  %33224 = vmatprep.subr.bf16.mxu0 %v34824_v18 }
 0xc3e   :  { %v30982_v25 = vadd.f32 %v30981_v55, %v30842_v13  ;;  %v30983_v34 = vpop.f32.mrb[75].mxu1  ;;  %v31065_v55 = vpop.permute.xlu0 %31064 }
 0xc40   :  { %v31011_v36 = vmax.f32 %v30982_v25, 0.0 }
 0xc41   :  { %v30986_v5 = vpop.f32.mrb[76].mxu1 }
 0xc42   :  { %v33225_v4 = vpack.c.bf16 %v31011_v36, %v31010_v31  ;;  %v30987_v51 = vadd.f32 %v30986_v5, %v30847_v46  ;;  %v30988_v56 = vpop.f32.mrb[77].mxu1  ;;  %v31075_v61 = vpop.permute.xlu0 %31074 }
 0xc44   :  { %33226 = vmatpush3.bf16.msra.mxu0 %v33225_v4  ;;  %v31012_v47 = vmax.f32 %v30987_v51, 0.0  ;;  %v31070_v51 = vpop.permute.xlu1 %31069 }
 0xc45   :  { %v30991_v15 = vpop.f32.mrb[78].mxu1  ;;  %33227 = vmatprep.subr.bf16.mxu0 %v34824_v18  ;;  %v31016_v18 = vld [vmem:[%s41206_s7 + $0x8] sm:$0xff] }
 0xc46   :  { %v30992_v12 = vadd.f32 %v30991_v15, %v30852_v21  ;;  %v30993_v60 = vpop.f32.mrb[79].mxu1 }
 0xc48   :  { %v31013_v62 = vmax.f32 %v30992_v12, 0.0 }
 0xc49   :  { %v30996_v63 = vpop.f32.mrb[80].mxu1 }
 0xc4a   :  { %v33228_v26 = vpack.c.bf16 %v31013_v62, %v31012_v47  ;;  %v30997_v23 = vadd.f32 %v30996_v63, %v30857_v6  ;;  %v30998_v10 = vpop.f32.mrb[81].mxu1  ;;  %v31080_v63 = vpop.permute.xlu1 %31079 }
 0xc4c   :  { %33229 = vmatpush3.bf16.msra.mxu0 %v33228_v26  ;;  %v31014_v16 = vmax.f32 %v30997_v23, 0.0  ;;  %v31085_v23 = vpop.permute.xlu0 %31084 }
 0xc4d   :  { %33090 = vmatprep.subr.mxu0 %v41556_v49 }
 0xc50   :  { %33091 = vmatpush3.msra.mxu0 %v31014_v16  ;;  %v31263_v0 = vpop.permute.xlu0 %31262 }
 0xc51   :  { %33093 = vmatmul.mubr.msk.f32.vlgmr.msra.gmra.mrb[20].mxu0 %vm18638_vm11, %v31015_v28 }
 0xc52   :  { %33095 = vmatprep.mubr.msk.f32.mxu0 %vm34779_vm3, %v41556_v49 }
 0xc55   :  { %33096 = vmatmul.mubr.msk.f32.gmra.mrb[22].mxu0 %vm18638_vm11, %v31016_v18 }
 0xc56   :  { %33098 = vmatprep.mubr.msk.f32.mxu0 %vm34779_vm3, %v41556_v49 }
 0xc59   :  { %33099 = vmatmul.mubr.msk.f32.gmra.mrb[24].mxu0 %vm18638_vm11, %v31017_v11  ;;  %v31090_v11 = vpop.permute.xlu1 %31089 }
 0xc5a   :  { %33101 = vmatprep.mubr.msk.f32.mxu0 %vm34779_vm3, %v41556_v49 }
 0xc5d   :  { %33102 = vmatmul.mubr.msk.f32.gmra.mrb[26].mxu0 %vm18638_vm11, %v31018_v8 }
 0xc5e   :  { %33104 = vmatprep.mubr.msk.f32.mxu0 %vm34779_vm3, %v41556_v49 }
 0xc61   :  { %33105 = vmatmul.mubr.msk.f32.gmra.mrb[28].mxu0 %vm18638_vm11, %v31019_v9 }
 0xc62   :  { %33107 = vmatprep.mubr.msk.f32.mxu0 %vm34779_vm3, %v41556_v49 }
 0xc65   :  { %33108 = vmatmul.mubr.msk.f32.gmra.mrb[30].mxu0 %vm18638_vm11, %v31020_v22 }
 0xc66   :  { %33110 = vmatprep.mubr.msk.f32.mxu0 %vm34779_vm3, %v41556_v49 }
 0xc69   :  { %33111 = vmatmul.mubr.msk.f32.gmra.mrb[32].mxu0 %vm18638_vm11, %v31021_v19 }
 0xc6a   :  { %33113 = vmatprep.mubr.msk.f32.mxu0 %vm34779_vm3, %v41556_v49 }
 0xc6d   :  { %33114 = vmatmul.mubr.msk.f32.gmra.mrb[34].mxu0 %vm18638_vm11, %v31022_v14 }
 0xc6e   :  { %33116 = vmatprep.mubr.msk.f32.mxu0 %vm34779_vm3, %v41556_v49 }
 0xc71   :  { %33117 = vmatmul.mubr.msk.f32.gmra.mrb[36].mxu0 %vm18638_vm11, %v31023_v7  ;;  %v31257_v7 = vld [vmem:[%s41207_s9 + $0x8] sm:$0x3] }
 0xc72   :  { %33119 = vmatprep.mubr.msk.f32.mxu0 %vm34779_vm3, %v41556_v49 }
 0xc75   :  { %33120 = vmatmul.mubr.msk.f32.gmra.mrb[38].mxu0 %vm18638_vm11, %v31024_v27  ;;  %v31268_v27 = vpop.permute.xlu1 %31267 }
 0xc76   :  { %33122 = vmatprep.mubr.msk.f32.mxu0 %vm34779_vm3, %v41556_v49  ;;  %vm31277_vm3 = vcmask 1043456  }
 0xc79   :  { %33123 = vmatmul.mubr.msk.f32.gmra.mrb[40].mxu0 %vm18638_vm11, %v31025_v41 }
 0xd24   :  { %v31191_v42 = vpop.f32.mrb[20].mxu0 }
 0xd25   :  { %v33094_v35 = vpop.f32.mrb[21].mxu0  ;;  %v31192_v40 = vadd.f32 %v31191_v42, %v31040_v39 }
 0xd27   :  { %v31245_v52 = vmax.f32 %v31192_v40, 0.0 }
 0xd28   :  { %v31196_v48 = vpop.f32.mrb[22].mxu0 }
 0xd29   :  { %v31197_v50 = vadd.f32 %v31196_v48, %v31045_v20  ;;  %v33097_v58 = vpop.f32.mrb[23].mxu0 }
 0xd2b   :  { %v31246_v45 = vmax.f32 %v31197_v50, 0.0 }
 0xd2c   :  { %v31201_v33 = vpop.f32.mrb[24].mxu0 }
 0xd2d   :  { %v33230_v44 = vpack.c.bf16 %v31246_v45, %v31245_v52  ;;  %v33100_v1 = vpop.f32.mrb[25].mxu0  ;;  %v31202_v32 = vadd.f32 %v31201_v33, %v31050_v37 }
 0xd2f   :  { %33231 = vmatprep.subr.bf16.mxu1 %v33230_v44  ;;  %v31247_v30 = vmax.f32 %v31202_v32, 0.0 }
 0xd30   :  { %v31206_v24 = vpop.f32.mrb[26].mxu0  ;;  %33233 = vmatpush3.bf16.msra.mxu1 %v33230_v44 }
 0xd31   :  { %v31207_v2 = vadd.f32 %v31206_v24, %v31055_v53  ;;  %v33103_v57 = vpop.f32.mrb[27].mxu0 }
 0xd33   :  { %v31248_v38 = vmax.f32 %v31207_v2, 0.0 }
 0xd34   :  { %v31211_v54 = vpop.f32.mrb[28].mxu0 }
 0xd35   :  { %v33234_v17 = vpack.c.bf16 %v31248_v38, %v31247_v30  ;;  %v33106_v59 = vpop.f32.mrb[29].mxu0  ;;  %v31212_v13 = vadd.f32 %v31211_v54, %v31060_v29 }
 0xd37   :  { %33235 = vmatprep.subr.bf16.mxu1 %v33234_v17  ;;  %v31249_v31 = vmax.f32 %v31212_v13, 0.0 }
 0xd38   :  { %v31216_v25 = vpop.f32.mrb[30].mxu0  ;;  %33237 = vmatpush3.bf16.msra.mxu1 %v33234_v17 }
 0xd39   :  { %v31217_v34 = vadd.f32 %v31216_v25, %v31065_v55  ;;  %v33109_v43 = vpop.f32.mrb[31].mxu0 }
 0xd3b   :  { %v31250_v36 = vmax.f32 %v31217_v34, 0.0 }
 0xd3c   :  { %v31221_v46 = vpop.f32.mrb[32].mxu0 }
 0xd3d   :  { %v33238_v5 = vpack.c.bf16 %v31250_v36, %v31249_v31  ;;  %v33112_v4 = vpop.f32.mrb[33].mxu0  ;;  %v31222_v56 = vadd.f32 %v31221_v46, %v31070_v51 }
 0xd3f   :  { %33239 = vmatprep.subr.bf16.mxu1 %v33238_v5  ;;  %v31251_v60 = vmax.f32 %v31222_v56, 0.0 }
 0xd40   :  { %v31226_v21 = vpop.f32.mrb[34].mxu0  ;;  %33241 = vmatpush3.bf16.msra.mxu1 %v33238_v5 }
 0xd41   :  { %v31227_v15 = vadd.f32 %v31226_v21, %v31075_v61  ;;  %v33115_v12 = vpop.f32.mrb[35].mxu0 }
 0xd43   :  { %v31252_v3 = vmax.f32 %v31227_v15, 0.0 }
 0xd44   :  { %v31231_v47 = vpop.f32.mrb[36].mxu0 }
 0xd45   :  { %v33242_v62 = vpack.c.bf16 %v31252_v3, %v31251_v60  ;;  %v33118_v6 = vpop.f32.mrb[37].mxu0  ;;  %v31232_v26 = vadd.f32 %v31231_v47, %v31080_v63 }
 0xd47   :  { %33243 = vmatprep.subr.bf16.mxu1 %v33242_v62  ;;  %v31253_v28 = vmax.f32 %v31232_v26, 0.0 }
 0xd48   :  { %v31236_v10 = vpop.f32.mrb[38].mxu0  ;;  %33245 = vmatpush3.bf16.msra.mxu1 %v33242_v62 }
 0xd49   :  { %v31237_v49 = vadd.f32 %v31236_v10, %v31085_v23  ;;  %v33121_v16 = vpop.f32.mrb[39].mxu0 }
 0xd4b   :  { %v31254_v18 = vmax.f32 %v31237_v49, 0.0 }
 0xd4c   :  { %v31241_v8 = vpop.f32.mrb[40].mxu0 }
 0xd4d   :  { %v33246_v9 = vpack.c.bf16 %v31254_v18, %v31253_v28  ;;  %v31242_v22 = vadd.f32 %v31241_v8, %v31090_v11  ;;  %v33124_v19 = vpop.f32.mrb[41].mxu0 }
 0xd4f   :  { %v31255_v14 = vmax.f32 %v31242_v22, 0.0  ;;  %33247 = vmatprep.subr.bf16.mxu1 %v33246_v9 }
 0xd50   :  { %33249 = vmatpush3.bf16.msra.mxu1 %v33246_v9 }
 0xd51   :  { %33145 = vmatprep.subr.msk.mxu1 %vm31277_vm3, %v31255_v14 }
 0xd54   :  { %33146 = vmatpush3.msk.msra.mxu1 %vm31277_vm3, %v31255_v14 }
 0xd55   :  { %33148 = vmatmul.mubr.msk.f32.vlgmr.msra.gmra.mrb[82].mxu1 %vm31270_vm14, %v31257_v7 }
 0xe28   :  { %v33149_v41 = vpop.f32.mrb[82].mxu1 }
 0xe29   :  { %v31353_v42 = vadd.f32 %v33149_v41, %v31268_v27  ;;  %v31347_v35 = vpop.f32.mrb[83].mxu1 }
 0xe2a   :  { %v31348_v39 = vadd.f32 %v31347_v35, %v31263_v0 }
 0xe2b   :  { %v31358_v40 = vsel %vm31357_vm9, %v31353_v42, -inf }
 0xe2c   :  { %v31356_v20 = vsel %vm27413_vm8, %v31348_v39, -inf }
 0xe2d   :  { %v31359_v48 = vmax.f32 %v31356_v20, %v31358_v40 }
 0xe2f   :  { %v31360_v50 = vrot.slane %v31359_v48, 4 }
 0xe31   :  { %v31361_v58 = vmax.f32 %v31359_v48, %v31360_v50 }
 0xe33   :  { %v31362_v52 = vrot.slane %v31361_v58, 2 }
 0xe35   :  { %v31363_v45 = vmax.f32 %v31361_v58, %v31362_v52 }
 0xe37   :  { %v31364_v33 = vrot.slane %v31363_v45, 1 }
 0xe39   :  { %v31365_v44 = vmax.f32 %v31363_v45, %v31364_v33 }
 0xe3b   :  { %v31366_v1 = vsub.f32 %v31348_v39, %v31365_v44  ;;  %v31367_v37 = vsub.f32 %v31353_v42, %v31365_v44 }
 0xe3d   :  { %v31368_v32 = vmul.f32 1.442695, %v31366_v1  ;;  %v31370_v53 = vmul.f32 1.442695, %v31367_v37 }
 0xe3f   :  { %34738 = vpow2.f32 %v31368_v32 }
 0xe40   :  { %34740 = vpow2.f32 %v31370_v53 }
 0xe49   :  { %v34739_v24 = vpop.eup %34738 }
 0xe4a   :  { %v34741_v2 = vpop.eup %34740  ;;  %v31372_v57 = vsel %vm27413_vm8, %v34739_v24, 0.0 }
 0xe4b   :  { %v31373_v30 = vsel %vm31357_vm9, %v34741_v2, 0.0 }
 0xe4c   :  { %v31374_v38 = vadd.f32 %v31373_v30, %v31372_v57 }
 0xe4e   :  { %v31375_v54 = vrot.slane %v31374_v38, 4 }
 0xe50   :  { %v31376_v17 = vadd.f32 %v31375_v54, %v31374_v38 }
 0xe52   :  { %v31377_v59 = vrot.slane %v31376_v17, 2 }
 0xe54   :  { %v31378_v29 = vadd.f32 %v31377_v59, %v31376_v17 }
 0xe56   :  { %v31379_v13 = vrot.slane %v31378_v29, 1 }
 0xe58   :  { %v31380_v55 = vadd.f32 %v31379_v13, %v31378_v29 }
 0xe5a   :  { %34742 = vlog2.f32 %v31380_v55 }
 0xe64   :  { %v34743_v25 = vpop.eup %34742 }
 0xe65   :  { %v31382_v34 = vmul.f32 0.6931472, %v34743_v25 }
 0xe67   :  { %v31383_v43 = vadd.f32 %v31382_v34, %v31365_v44 }
 0xe69   :  { %v31384_v31 = vsub.f32 %v31348_v39, %v31383_v43  ;;  %v31385_v36 = vsub.f32 %v31353_v42, %v31383_v43 }
 0xe6b   :  { %31386 = vst.msk [vmem:[%s41208_s11] sm:$0xff] %vm27413_vm8, %v31384_v31 }
 0xe6c   :  { %31387 = vst.msk [vmem:[%s41208_s11 + $0x8] sm:$0x3] %vm31357_vm9, %v31385_v36 }

</bundles_post_ra>
